<compile_context>
chip_gen: v5e
topology: v5e:2x2
jax: 0.10.0
libtpu: 0.0.40
codegen_flags: <defaults>
</compile_context>

<pallas_src>
import jax
import jax.numpy as jnp
from jax.experimental import pallas as pl
from jax.experimental.pallas import tpu as pltpu

EPS = 1e-5          # nn.BatchNorm2d default eps
NEG_SLOPE = 0.2     # nn.LeakyReLU(0.2)
VMEM_LIMIT = 48 * 1024 * 1024   # under v7x's 64 MiB physical VMEM, fine on v5e/v6e (128 MiB)


def _round_up(x, m):
    return (x + m - 1) // m * m


def _pick_tile_h(H, W, Cp, elem_bytes=4, budget=2 * 1024 * 1024):
    """Largest even divisor of H whose (TH, W, Cp) f32 tile stays under `budget`."""
    best = 2
    for th in range(2, H + 1, 2):
        if H % th == 0 and th * W * Cp * elem_bytes <= budget:
            best = th
    return best


# ----------------------------- Pallas kernels / calls ------------------------------

def _conv_stats_call(x_pad, w, H, W, Cin, Cp):
    """Pass A: 3x3 conv (9 shifted bf16 matmuls, f32 accum) + per-channel sum / sum-of-squares.

    grid=(N,): one image per step, halo-free full-spatial block (no overlapping BlockSpecs
    needed). The stats output keeps the same block index for every step -> VMEM-resident
    accumulator, so the grid axis is 'arbitrary'. No conv bias: it is mathematically cancelled
    by the BatchNorm mean subtraction that follows.
    """
    N = x_pad.shape[0]

    def kernel(x_ref, w_ref, t_ref, s_ref):
        n = pl.program_id(0)
        x = x_ref[0]                                         # (H+2, W+2, Cin) bf16
        acc = jnp.zeros((H * W, Cp), jnp.float32)
        for kh in range(3):
            for kw in range(3):
                patch = x[kh:kh + H, kw:kw + W, :].reshape(H * W, Cin)
                wk = w_ref[(kh * 3 + kw) * Cin:(kh * 3 + kw + 1) * Cin, :]
                acc = acc + jnp.dot(patch, wk, preferred_element_type=jnp.float32)

        @pl.when(n == 0)
        def _():
            s_ref[...] = jnp.zeros_like(s_ref)

        s1 = jnp.sum(acc, axis=0, keepdims=True)             # (1, Cp)  sum
        s2 = jnp.sum(acc * acc, axis=0, keepdims=True)       # (1, Cp)  sum of squares
        s_ref[...] = s_ref[...] + jnp.concatenate([s1, s2], axis=0)

        t_ref[0] = acc.reshape(H, W, Cp)

    flops = 2 * N * H * W * (9 * Cin) * Cp
    bytes_accessed = (x_pad.size * x_pad.dtype.itemsize + w.size * w.dtype.itemsize
                      + N * H * W * Cp * 4 + 2 * Cp * 4)

    return pl.pallas_call(
        kernel,
        out_shape=(jax.ShapeDtypeStruct((N, H, W, Cp), jnp.float32),
                   jax.ShapeDtypeStruct((2, Cp), jnp.float32)),
        grid=(N,),
        in_specs=[pl.BlockSpec((1, H + 2, W + 2, Cin), lambda n: (n, 0, 0, 0)),
                  pl.BlockSpec((9 * Cin, Cp), lambda n: (0, 0))],
        out_specs=(pl.BlockSpec((1, H, W, Cp), lambda n: (n, 0, 0, 0)),
                   pl.BlockSpec((2, Cp), lambda n: (0, 0))),
        compiler_params=pltpu.CompilerParams(
            dimension_semantics=("arbitrary",), vmem_limit_bytes=VMEM_LIMIT),
        cost_estimate=pl.CostEstimate(flops=flops, transcendentals=0,
                                      bytes_accessed=bytes_accessed),
    )(x_pad, w)


def _bn_act_call(t, stats, gamma, beta, count, out_dtype):
    """Pass B (stage 1): apply global-batch BN + LeakyReLU, tiled over (N, H-blocks)."""
    N, H, W, Cp = t.shape
    TH = _pick_tile_h(H, W, Cp)
    inv = 1.0 / float(count)

    def kernel(t_ref, s_ref, g_ref, b_ref, o_ref):
        mean = s_ref[0:1, :] * inv
        var = jnp.maximum(s_ref[1:2, :] * inv - mean * mean, 0.0)   # E[t^2] - mean^2
        scale = g_ref[...] * jax.lax.rsqrt(var + EPS)               # (1, Cp)
        shift = b_ref[...] - mean * scale                           # (1, Cp)
        y = t_ref[...] * scale + shift
        o_ref[...] = jnp.where(y >= 0, y, NEG_SLOPE * y).astype(o_ref.dtype)

    return pl.pallas_call(
        kernel,
        out_shape=jax.ShapeDtypeStruct((N, H, W, Cp), out_dtype),
        grid=(N, H // TH),
        in_specs=[pl.BlockSpec((1, TH, W, Cp), lambda n, h: (n, h, 0, 0)),
                  pl.BlockSpec((2, Cp), lambda n, h: (0, 0)),
                  pl.BlockSpec((1, Cp), lambda n, h: (0, 0)),
                  pl.BlockSpec((1, Cp), lambda n, h: (0, 0))],
        out_specs=pl.BlockSpec((1, TH, W, Cp), lambda n, h: (n, h, 0, 0)),
        compiler_params=pltpu.CompilerParams(
            dimension_semantics=("parallel", "parallel"), vmem_limit_bytes=VMEM_LIMIT),
    )(t, stats, gamma, beta)


def _bn_pool_act_call(t, stats, gamma, beta, count):
    """Pass B (stage 2): 2x2 average pool (== bilinear x0.5 for even sizes) + BN + LeakyReLU.

    The pool is pure VPU work (3 adds + 1 mul). BN is a per-channel affine, so
    pool(BN(t)) == BN(pool(t)); pooling the raw conv output first means the affine touches
    4x fewer elements. LeakyReLU is applied after the pool, matching the module order.
    """
    N, H, W, Cp = t.shape
    Ho, Wo = H // 2, W // 2
    TH = _pick_tile_h(H, W, Cp)          # even by construction
    inv = 1.0 / float(count)

    def kernel(t_ref, s_ref, g_ref, b_ref, o_ref):
        mean = s_ref[0:1, :] * inv
        var = jnp.maximum(s_ref[1:2, :] * inv - mean * mean, 0.0)
        scale = g_ref[...] * jax.lax.rsqrt(var + EPS)
        shift = b_ref[...] - mean * scale
        tv = t_ref[0]                                        # (TH, W, Cp) f32
        # pool along W: after a contiguous reshape the W-pair sits in the lane dim,
        # so both taps are 128-aligned lane slices.
        tw = tv.reshape(TH, W // 2, 2 * Cp)
        wp = 0.5 * (tw[:, :, :Cp] + tw[:, :, Cp:])           # (TH, Wo, Cp)
        # pool along H: the H-pair sits on a non-minor axis after reshape.
        hp = wp.reshape(TH // 2, 2, W // 2, Cp)
        pooled = 0.5 * (hp[:, 0, :, :] + hp[:, 1, :, :])     # (TH//2, Wo, Cp)
        y = pooled * scale + shift
        o_ref[0] = jnp.where(y >= 0, y, NEG_SLOPE * y).astype(o_ref.dtype)

    return pl.pallas_call(
        kernel,
        out_shape=jax.ShapeDtypeStruct((N, Ho, Wo, Cp), jnp.float32),
        grid=(N, H // TH),
        in_specs=[pl.BlockSpec((1, TH, W, Cp), lambda n, h: (n, h, 0, 0)),
                  pl.BlockSpec((2, Cp), lambda n, h: (0, 0)),
                  pl.BlockSpec((1, Cp), lambda n, h: (0, 0)),
                  pl.BlockSpec((1, Cp), lambda n, h: (0, 0))],
        out_specs=pl.BlockSpec((1, TH // 2, Wo, Cp), lambda n, h: (n, h, 0, 0)),
        compiler_params=pltpu.CompilerParams(
            dimension_semantics=("parallel", "parallel"), vmem_limit_bytes=VMEM_LIMIT),
    )(t, stats, gamma, beta)


# ------------------------------ parameters & forward ---------------------------

def init_params(key, in_channels, out_channels):
    ks = jax.random.split(key, 6)
    # Conv weights in HWIO (3,3,Cin,Cout). Conv biases omitted: with training-mode BatchNorm
    # (batch statistics) a per-channel constant offset is exactly cancelled by mean subtraction.
    w1 = 0.1 * jax.random.normal(ks[0], (3, 3, in_channels, out_channels), jnp.float32)
    g1 = 1.0 + 0.1 * jax.random.normal(ks[1], (1, out_channels), jnp.float32)
    be1 = 0.1 * jax.random.normal(ks[2], (1, out_channels), jnp.float32)
    w2 = 0.1 * jax.random.normal(ks[3], (3, 3, out_channels, out_channels), jnp.float32)
    g2 = 1.0 + 0.1 * jax.random.normal(ks[4], (1, out_channels), jnp.float32)
    be2 = 0.1 * jax.random.normal(ks[5], (1, out_channels), jnp.float32)
    return dict(w1=w1, g1=g1, be1=be1, w2=w2, g2=g2, be2=be2)


def downblock_forward(x_nchw, params):
    """Forward pass of DownBlock. Input NCHW, output NCHW (spatial halved)."""
    N, Cin, H, W = x_nchw.shape
    assert H % 2 == 0 and W % 2 == 0, "bilinear x0.5 requires even spatial dims"
    Cout = params["w1"].shape[-1]
    Cp = _round_up(Cout, 128)            # lane-dense internal channel count
    count = N * H * W                    # BN batch-statistics element count per channel

    # weights -> (9*Cin_layer, Cp) bf16, row order (kh, kw, cin); zero-padded channels stay 0
    w1m = jnp.pad(params["w1"].reshape(9 * Cin, Cout),
                  ((0, 0), (0, Cp - Cout))).astype(jnp.bfloat16)
    w2m = jnp.pad(params["w2"], ((0, 0), (0, 0), (0, Cp - Cout), (0, Cp - Cout))
                  ).reshape(9 * Cp, Cp).astype(jnp.bfloat16)
    g1 = jnp.pad(params["g1"], ((0, 0), (0, Cp - Cout)))
    be1 = jnp.pad(params["be1"], ((0, 0), (0, Cp - Cout)))
    g2 = jnp.pad(params["g2"], ((0, 0), (0, Cp - Cout)))
    be2 = jnp.pad(params["be2"], ((0, 0), (0, Cp - Cout)))

    # NCHW -> NHWC, bf16 matmul operands, zero spatial halo
    x = jnp.transpose(x_nchw, (0, 2, 3, 1)).astype(jnp.bfloat16)
    x_pad = jnp.pad(x, ((0, 0), (1, 1), (1, 1), (0, 0)))

    # --- conv1 + BN1 + LeakyReLU ---
    t1, s1 = _conv_stats_call(x_pad, w1m, H, W, Cin, Cp)
    y1 = _bn_act_call(t1, s1, g1, be1, count, jnp.bfloat16)      # (N,H,W,Cp) bf16
    y1_pad = jnp.pad(y1, ((0, 0), (1, 1), (1, 1), (0, 0)))

    # --- conv2 + BN2 + bilinear(x0.5) pool + LeakyReLU ---
    t2, s2 = _conv_stats_call(y1_pad, w2m, H, W, Cp, Cp)
    out = _bn_pool_act_call(t2, s2, g2, be2, count)              # (N,Ho,Wo,Cp) f32

    out = out[:, :, :, :Cout]                                    # drop channel padding
    return jnp.transpose(out, (0, 3, 1, 2))                      # back to NCHW


# --------------------------------- main -------------------------------------

if __name__ == "__main__":
    key = jax.random.PRNGKey(0)
    k_x, k_p = jax.random.split(key)

    N, Cin, Cout, H, W = 2, 4, 8, 16, 16
    x = jax.random.normal(k_x, (N, Cin, H, W), jnp.float32)      # NCHW like PyTorch
    params = init_params(k_p, Cin, Cout)

    out = jax.jit(downblock_forward)(x, params)
    out = jax.block_until_ready(out)

    assert out.shape == (N, Cout, H // 2, W // 2), out.shape
    assert out.dtype == jnp.float32
    assert bool(jnp.all(jnp.isfinite(out)))
    print("KERNEL_OK")
</pallas_src>

<mosaic_0001>
module attributes {stable_mosaic.version = 11 : i64} {
  func.func @kernel(%arg0: i32, %arg1: i32, %arg2: memref<1x16x16x128xf32, #tpu.memory_space<vmem>>, %arg3: memref<2x128xf32, #tpu.memory_space<vmem>>, %arg4: memref<1x128xf32, #tpu.memory_space<vmem>>, %arg5: memref<1x128xf32, #tpu.memory_space<vmem>>, %arg6: memref<1x16x16x128xbf16, #tpu.memory_space<vmem>>) attributes {dimension_semantics = [#tpu.dimension_semantics<parallel>, #tpu.dimension_semantics<parallel>], iteration_bounds = array<i64: 2, 1>, scalar_prefetch = 0 : i64, scratch_operands = 0 : i64, tpu.core_type = #tpu.core_type<tc>, window_params = [{transform_indices = @transform_0, window_bounds = array<i64: 1, 16, 16, 128>}, {pipeline_mode = #tpu.pipeline_mode<synchronous>, transform_indices = @transform_1, window_bounds = array<i64: 2, 128>}, {pipeline_mode = #tpu.pipeline_mode<synchronous>, transform_indices = @transform_2, window_bounds = array<i64: 1, 128>}, {pipeline_mode = #tpu.pipeline_mode<synchronous>, transform_indices = @transform_3, window_bounds = array<i64: 1, 128>}, {transform_indices = @transform_4, window_bounds = array<i64: 1, 16, 16, 128>}]} {
    %c0 = arith.constant 0 : index
    %c0_0 = arith.constant 0 : index
    %0 = vector.load %arg3[%c0, %c0_0] : memref<2x128xf32, #tpu.memory_space<vmem>>, vector<1x128xf32>
    %cst = arith.constant 0.001953125 : f32
    %1 = vector.broadcast %cst : f32 to vector<1x128xf32>
    %2 = arith.mulf %0, %1 : vector<1x128xf32>
    %c1 = arith.constant 1 : index
    %c0_1 = arith.constant 0 : index
    %3 = vector.load %arg3[%c1, %c0_1] : memref<2x128xf32, #tpu.memory_space<vmem>>, vector<1x128xf32>
    %cst_2 = arith.constant 0.001953125 : f32
    %4 = vector.broadcast %cst_2 : f32 to vector<1x128xf32>
    %5 = arith.mulf %3, %4 : vector<1x128xf32>
    %6 = arith.mulf %2, %2 : vector<1x128xf32>
    %7 = arith.subf %5, %6 : vector<1x128xf32>
    %cst_3 = arith.constant 0.000000e+00 : f32
    %8 = vector.broadcast %cst_3 : f32 to vector<1x128xf32>
    %9 = arith.maximumf %7, %8 : vector<1x128xf32>
    %c0_4 = arith.constant 0 : index
    %c0_5 = arith.constant 0 : index
    %10 = vector.load %arg4[%c0_4, %c0_5] : memref<1x128xf32, #tpu.memory_space<vmem>>, vector<1x128xf32>
    %cst_6 = arith.constant 9.99999974E-6 : f32
    %11 = vector.broadcast %cst_6 : f32 to vector<1x128xf32>
    %12 = arith.addf %9, %11 : vector<1x128xf32>
    %13 = math.rsqrt %12 : vector<1x128xf32>
    %14 = arith.mulf %10, %13 : vector<1x128xf32>
    %c0_7 = arith.constant 0 : index
    %c0_8 = arith.constant 0 : index
    %15 = vector.load %arg5[%c0_7, %c0_8] : memref<1x128xf32, #tpu.memory_space<vmem>>, vector<1x128xf32>
    %16 = arith.mulf %2, %14 : vector<1x128xf32>
    %17 = arith.subf %15, %16 : vector<1x128xf32>
    %c0_9 = arith.constant 0 : index
    %c0_10 = arith.constant 0 : index
    %c0_11 = arith.constant 0 : index
    %c0_12 = arith.constant 0 : index
    %18 = vector.load %arg2[%c0_9, %c0_10, %c0_11, %c0_12] : memref<1x16x16x128xf32, #tpu.memory_space<vmem>>, vector<1x16x16x128xf32>
    %19 = vector.shape_cast %14 : vector<1x128xf32> to vector<1x1x1x128xf32>
    %20 = vector.broadcast %19 : vector<1x1x1x128xf32> to vector<1x16x16x128xf32>
    %21 = arith.mulf %18, %20 : vector<1x16x16x128xf32>
    %22 = vector.shape_cast %17 : vector<1x128xf32> to vector<1x1x1x128xf32>
    %23 = vector.broadcast %22 : vector<1x1x1x128xf32> to vector<1x16x16x128xf32>
    %24 = arith.addf %21, %23 : vector<1x16x16x128xf32>
    %cst_13 = arith.constant 0.000000e+00 : f32
    %25 = vector.broadcast %cst_13 : f32 to vector<1x16x16x128xf32>
    %26 = arith.cmpf oge, %24, %25 : vector<1x16x16x128xf32>
    %cst_14 = arith.constant 2.000000e-01 : f32
    %27 = vector.broadcast %cst_14 : f32 to vector<1x16x16x128xf32>
    %28 = arith.mulf %27, %24 : vector<1x16x16x128xf32>
    %29 = arith.select %26, %24, %28 : vector<1x16x16x128xi1>, vector<1x16x16x128xf32>
    %30 = arith.truncf %29 : vector<1x16x16x128xf32> to vector<1x16x16x128xbf16>
    %c0_15 = arith.constant 0 : index
    %c0_16 = arith.constant 0 : index
    %c0_17 = arith.constant 0 : index
    %c0_18 = arith.constant 0 : index
    %31 = vector.load %arg6[%c0_15, %c0_16, %c0_17, %c0_18] : memref<1x16x16x128xbf16, #tpu.memory_space<vmem>>, vector<1x16x16x128xbf16>
    tpu.vector_store %arg6[%c0_15, %c0_16, %c0_17, %c0_18], %30 {strides = array<i32>} : memref<1x16x16x128xbf16, #tpu.memory_space<vmem>>, vector<1x16x16x128xbf16>,
    return
  }
  func.func @transform_0(%arg0: i32, %arg1: i32) -> (i32, i32, i32, i32) {
    %c0_i32 = arith.constant 0 : i32
    %c0_i32_0 = arith.constant 0 : i32
    %c0_i32_1 = arith.constant 0 : i32
    return %arg0, %arg1, %c0_i32, %c0_i32_0 : i32, i32, i32, i32
  }
  func.func @transform_1(%arg0: i32, %arg1: i32) -> (i32, i32) {
    %c0_i32 = arith.constant 0 : i32
    %c0_i32_0 = arith.constant 0 : i32
    %c0_i32_1 = arith.constant 0 : i32
    return %c0_i32, %c0_i32_0 : i32, i32
  }
  func.func @transform_2(%arg0: i32, %arg1: i32) -> (i32, i32) {
    %c0_i32 = arith.constant 0 : i32
    %c0_i32_0 = arith.constant 0 : i32
    %c0_i32_1 = arith.constant 0 : i32
    return %c0_i32, %c0_i32_0 : i32, i32
  }
  func.func @transform_3(%arg0: i32, %arg1: i32) -> (i32, i32) {
    %c0_i32 = arith.constant 0 : i32
    %c0_i32_0 = arith.constant 0 : i32
    %c0_i32_1 = arith.constant 0 : i32
    return %c0_i32, %c0_i32_0 : i32, i32
  }
  func.func @transform_4(%arg0: i32, %arg1: i32) -> (i32, i32, i32, i32) {
    %c0_i32 = arith.constant 0 : i32
    %c0_i32_0 = arith.constant 0 : i32
    %c0_i32_1 = arith.constant 0 : i32
    return %arg0, %arg1, %c0_i32, %c0_i32_0 : i32, i32, i32, i32
  }
}

module attributes {stable_mosaic.version = 11 : i64} {
  func.func @kernel(%arg0: i32, %arg1: memref<1x18x18x4xbf16, #tpu.memory_space<vmem>>, %arg2: memref<36x128xbf16, #tpu.memory_space<vmem>>, %arg3: memref<1x16x16x128xf32, #tpu.memory_space<vmem>>, %arg4: memref<2x128xf32, #tpu.memory_space<vmem>>) attributes {dimension_semantics = [#tpu.dimension_semantics<arbitrary>], iteration_bounds = array<i64: 2>, scalar_prefetch = 0 : i64, scratch_operands = 0 : i64, tpu.core_type = #tpu.core_type<tc>, window_params = [{transform_indices = @transform_0, window_bounds = array<i64: 1, 18, 18, 4>}, {pipeline_mode = #tpu.pipeline_mode<synchronous>, transform_indices = @transform_1, window_bounds = array<i64: 36, 128>}, {transform_indices = @transform_2, window_bounds = array<i64: 1, 16, 16, 128>}, {pipeline_mode = #tpu.pipeline_mode<synchronous>, transform_indices = @transform_3, window_bounds = array<i64: 2, 128>}]} {
    %c0 = arith.constant 0 : index
    %c0_0 = arith.constant 0 : index
    %c0_1 = arith.constant 0 : index
    %c0_2 = arith.constant 0 : index
    %0 = vector.load %arg1[%c0, %c0_0, %c0_1, %c0_2] : memref<1x18x18x4xbf16, #tpu.memory_space<vmem>>, vector<1x18x18x4xbf16>
    %1 = vector.shape_cast %0 : vector<1x18x18x4xbf16> to vector<18x18x4xbf16>
    %cst = arith.constant 0.000000e+00 : f32
    %2 = vector.broadcast %cst : f32 to vector<256x128xf32>
    %3 = vector.extract_strided_slice %1 {offsets = [0, 0, 0], sizes = [16, 16, 4], strides = [1, 1, 1]} : vector<18x18x4xbf16> to vector<16x16x4xbf16>
    %4 = vector.shape_cast %3 : vector<16x16x4xbf16> to vector<256x4xbf16>
    %c0_3 = arith.constant 0 : index
    %c0_4 = arith.constant 0 : index
    %5 = vector.load %arg2[%c0_3, %c0_4] : memref<36x128xbf16, #tpu.memory_space<vmem>>, vector<4x128xbf16>
    %cst_5 = arith.constant dense<0.000000e+00> : vector<256x128xf32>
    %6 = tpu.matmul %4, %5, %cst_5 {dimension_numbers = #tpu.dot_dimension_numbers<[1], [0], [0], [1], [0, 0, 1, 1], [], []>} : vector<256x4xbf16>, vector<4x128xbf16>, vector<256x128xf32> -> vector<256x128xf32>
    %7 = arith.addf %2, %6 : vector<256x128xf32>
    %8 = vector.extract_strided_slice %1 {offsets = [0, 1, 0], sizes = [16, 16, 4], strides = [1, 1, 1]} : vector<18x18x4xbf16> to vector<16x16x4xbf16>
    %9 = vector.shape_cast %8 : vector<16x16x4xbf16> to vector<256x4xbf16>
    %c4 = arith.constant 4 : index
    %c0_6 = arith.constant 0 : index
    %10 = vector.load %arg2[%c4, %c0_6] : memref<36x128xbf16, #tpu.memory_space<vmem>>, vector<4x128xbf16>
    %cst_7 = arith.constant dense<0.000000e+00> : vector<256x128xf32>
    %11 = tpu.matmul %9, %10, %cst_7 {dimension_numbers = #tpu.dot_dimension_numbers<[1], [0], [0], [1], [0, 0, 1, 1], [], []>} : vector<256x4xbf16>, vector<4x128xbf16>, vector<256x128xf32> -> vector<256x128xf32>
    %12 = arith.addf %7, %11 : vector<256x128xf32>
    %13 = vector.extract_strided_slice %1 {offsets = [0, 2, 0], sizes = [16, 16, 4], strides = [1, 1, 1]} : vector<18x18x4xbf16> to vector<16x16x4xbf16>
    %14 = vector.shape_cast %13 : vector<16x16x4xbf16> to vector<256x4xbf16>
    %c8 = arith.constant 8 : index
    %c0_8 = arith.constant 0 : index
    %15 = vector.load %arg2[%c8, %c0_8] : memref<36x128xbf16, #tpu.memory_space<vmem>>, vector<4x128xbf16>
    %cst_9 = arith.constant dense<0.000000e+00> : vector<256x128xf32>
    %16 = tpu.matmul %14, %15, %cst_9 {dimension_numbers = #tpu.dot_dimension_numbers<[1], [0], [0], [1], [0, 0, 1, 1], [], []>} : vector<256x4xbf16>, vector<4x128xbf16>, vector<256x128xf32> -> vector<256x128xf32>
    %17 = arith.addf %12, %16 : vector<256x128xf32>
    %18 = vector.extract_strided_slice %1 {offsets = [1, 0, 0], sizes = [16, 16, 4], strides = [1, 1, 1]} : vector<18x18x4xbf16> to vector<16x16x4xbf16>
    %19 = vector.shape_cast %18 : vector<16x16x4xbf16> to vector<256x4xbf16>
    %c12 = arith.constant 12 : index
    %c0_10 = arith.constant 0 : index
    %20 = vector.load %arg2[%c12, %c0_10] : memref<36x128xbf16, #tpu.memory_space<vmem>>, vector<4x128xbf16>
    %cst_11 = arith.constant dense<0.000000e+00> : vector<256x128xf32>
    %21 = tpu.matmul %19, %20, %cst_11 {dimension_numbers = #tpu.dot_dimension_numbers<[1], [0], [0], [1], [0, 0, 1, 1], [], []>} : vector<256x4xbf16>, vector<4x128xbf16>, vector<256x128xf32> -> vector<256x128xf32>
    %22 = arith.addf %17, %21 : vector<256x128xf32>
    %23 = vector.extract_strided_slice %1 {offsets = [1, 1, 0], sizes = [16, 16, 4], strides = [1, 1, 1]} : vector<18x18x4xbf16> to vector<16x16x4xbf16>
    %24 = vector.shape_cast %23 : vector<16x16x4xbf16> to vector<256x4xbf16>
    %c16 = arith.constant 16 : index
    %c0_12 = arith.constant 0 : index
    %25 = vector.load %arg2[%c16, %c0_12] : memref<36x128xbf16, #tpu.memory_space<vmem>>, vector<4x128xbf16>
    %cst_13 = arith.constant dense<0.000000e+00> : vector<256x128xf32>
    %26 = tpu.matmul %24, %25, %cst_13 {dimension_numbers = #tpu.dot_dimension_numbers<[1], [0], [0], [1], [0, 0, 1, 1], [], []>} : vector<256x4xbf16>, vector<4x128xbf16>, vector<256x128xf32> -> vector<256x128xf32>
    %27 = arith.addf %22, %26 : vector<256x128xf32>
    %28 = vector.extract_strided_slice %1 {offsets = [1, 2, 0], sizes = [16, 16, 4], strides = [1, 1, 1]} : vector<18x18x4xbf16> to vector<16x16x4xbf16>
    %29 = vector.shape_cast %28 : vector<16x16x4xbf16> to vector<256x4xbf16>
    %c20 = arith.constant 20 : index
    %c0_14 = arith.constant 0 : index
    %30 = vector.load %arg2[%c20, %c0_14] : memref<36x128xbf16, #tpu.memory_space<vmem>>, vector<4x128xbf16>
    %cst_15 = arith.constant dense<0.000000e+00> : vector<256x128xf32>
    %31 = tpu.matmul %29, %30, %cst_15 {dimension_numbers = #tpu.dot_dimension_numbers<[1], [0], [0], [1], [0, 0, 1, 1], [], []>} : vector<256x4xbf16>, vector<4x128xbf16>, vector<256x128xf32> -> vector<256x128xf32>
    %32 = arith.addf %27, %31 : vector<256x128xf32>
    %33 = vector.extract_strided_slice %1 {offsets = [2, 0, 0], sizes = [16, 16, 4], strides = [1, 1, 1]} : vector<18x18x4xbf16> to vector<16x16x4xbf16>
    %34 = vector.shape_cast %33 : vector<16x16x4xbf16> to vector<256x4xbf16>
    %c24 = arith.constant 24 : index
    %c0_16 = arith.constant 0 : index
    %35 = vector.load %arg2[%c24, %c0_16] : memref<36x128xbf16, #tpu.memory_space<vmem>>, vector<4x128xbf16>
    %cst_17 = arith.constant dense<0.000000e+00> : vector<256x128xf32>
    %36 = tpu.matmul %34, %35, %cst_17 {dimension_numbers = #tpu.dot_dimension_numbers<[1], [0], [0], [1], [0, 0, 1, 1], [], []>} : vector<256x4xbf16>, vector<4x128xbf16>, vector<256x128xf32> -> vector<256x128xf32>
    %37 = arith.addf %32, %36 : vector<256x128xf32>
    %38 = vector.extract_strided_slice %1 {offsets = [2, 1, 0], sizes = [16, 16, 4], strides = [1, 1, 1]} : vector<18x18x4xbf16> to vector<16x16x4xbf16>
    %39 = vector.shape_cast %38 : vector<16x16x4xbf16> to vector<256x4xbf16>
    %c28 = arith.constant 28 : index
    %c0_18 = arith.constant 0 : index
    %40 = vector.load %arg2[%c28, %c0_18] : memref<36x128xbf16, #tpu.memory_space<vmem>>, vector<4x128xbf16>
    %cst_19 = arith.constant dense<0.000000e+00> : vector<256x128xf32>
    %41 = tpu.matmul %39, %40, %cst_19 {dimension_numbers = #tpu.dot_dimension_numbers<[1], [0], [0], [1], [0, 0, 1, 1], [], []>} : vector<256x4xbf16>, vector<4x128xbf16>, vector<256x128xf32> -> vector<256x128xf32>
    %42 = arith.addf %37, %41 : vector<256x128xf32>
    %43 = vector.extract_strided_slice %1 {offsets = [2, 2, 0], sizes = [16, 16, 4], strides = [1, 1, 1]} : vector<18x18x4xbf16> to vector<16x16x4xbf16>
    %44 = vector.shape_cast %43 : vector<16x16x4xbf16> to vector<256x4xbf16>
    %c32 = arith.constant 32 : index
    %c0_20 = arith.constant 0 : index
    %45 = vector.load %arg2[%c32, %c0_20] : memref<36x128xbf16, #tpu.memory_space<vmem>>, vector<4x128xbf16>
    %cst_21 = arith.constant dense<0.000000e+00> : vector<256x128xf32>
    %46 = tpu.matmul %44, %45, %cst_21 {dimension_numbers = #tpu.dot_dimension_numbers<[1], [0], [0], [1], [0, 0, 1, 1], [], []>} : vector<256x4xbf16>, vector<4x128xbf16>, vector<256x128xf32> -> vector<256x128xf32>
    %47 = arith.addf %42, %46 : vector<256x128xf32>
    %c0_i32 = arith.constant 0 : i32
    %48 = arith.cmpi eq, %arg0, %c0_i32 : i32
    %49 = arith.extui %48 : i1 to i32
    %c0_i32_22 = arith.constant 0 : i32
    %50 = arith.cmpi ne, %49, %c0_i32_22 : i32
    scf.if %50 {
      %cst_33 = arith.constant 0.000000e+00 : f32
      %64 = vector.broadcast %cst_33 : f32 to vector<2x128xf32>
      %c0_34 = arith.constant 0 : index
      %c0_35 = arith.constant 0 : index
      %65 = vector.load %arg4[%c0_34, %c0_35] : memref<2x128xf32, #tpu.memory_space<vmem>>, vector<2x128xf32>
      tpu.vector_store %arg4[%c0_34, %c0_35], %64 {strides = array<i32>} : memref<2x128xf32, #tpu.memory_space<vmem>>, vector<2x128xf32>,
    } else {
    }
    %cst_23 = arith.constant dense<0.000000e+00> : vector<128xf32>
    %51 = vector.multi_reduction <add>, %47, %cst_23 [0] : vector<256x128xf32> to vector<128xf32>
    %52 = vector.shape_cast %51 : vector<128xf32> to vector<1x128xf32>
    %53 = arith.mulf %47, %47 : vector<256x128xf32>
    %cst_24 = arith.constant dense<0.000000e+00> : vector<128xf32>
    %54 = vector.multi_reduction <add>, %53, %cst_24 [0] : vector<256x128xf32> to vector<128xf32>
    %55 = vector.shape_cast %54 : vector<128xf32> to vector<1x128xf32>
    %c0_25 = arith.constant 0 : index
    %c0_26 = arith.constant 0 : index
    %56 = vector.load %arg4[%c0_25, %c0_26] : memref<2x128xf32, #tpu.memory_space<vmem>>, vector<2x128xf32>
    %57 = tpu.concatenate %52, %55 in 0 : vector<1x128xf32>, vector<1x128xf32> -> vector<2x128xf32>
    %58 = arith.addf %56, %57 : vector<2x128xf32>
    %c0_27 = arith.constant 0 : index
    %c0_28 = arith.constant 0 : index
    %59 = vector.load %arg4[%c0_27, %c0_28] : memref<2x128xf32, #tpu.memory_space<vmem>>, vector<2x128xf32>
    tpu.vector_store %arg4[%c0_27, %c0_28], %58 {strides = array<i32>} : memref<2x128xf32, #tpu.memory_space<vmem>>, vector<2x128xf32>,
    %60 = vector.shape_cast %47 : vector<256x128xf32> to vector<16x16x128xf32>
    %c0_29 = arith.constant 0 : index
    %c0_30 = arith.constant 0 : index
    %c0_31 = arith.constant 0 : index
    %c0_32 = arith.constant 0 : index
    %61 = vector.load %arg3[%c0_29, %c0_30, %c0_31, %c0_32] : memref<1x16x16x128xf32, #tpu.memory_space<vmem>>, vector<1x16x16x128xf32>
    %62 = vector.shape_cast %61 : vector<1x16x16x128xf32> to vector<16x16x128xf32>
    %63 = vector.shape_cast %60 : vector<16x16x128xf32> to vector<1x16x16x128xf32>
    tpu.vector_store %arg3[%c0_29, %c0_30, %c0_31, %c0_32], %63 {strides = array<i32>} : memref<1x16x16x128xf32, #tpu.memory_space<vmem>>, vector<1x16x16x128xf32>,
    return
  }
  func.func @transform_0(%arg0: i32) -> (i32, i32, i32, i32) {
    %c0_i32 = arith.constant 0 : i32
    %c0_i32_0 = arith.constant 0 : i32
    %c0_i32_1 = arith.constant 0 : i32
    %c0_i32_2 = arith.constant 0 : i32
    return %arg0, %c0_i32, %c0_i32_0, %c0_i32_1 : i32, i32, i32, i32
  }
  func.func @transform_1(%arg0: i32) -> (i32, i32) {
    %c0_i32 = arith.constant 0 : i32
    %c0_i32_0 = arith.constant 0 : i32
    %c0_i32_1 = arith.constant 0 : i32
    return %c0_i32, %c0_i32_0 : i32, i32
  }
  func.func @transform_2(%arg0: i32) -> (i32, i32, i32, i32) {
    %c0_i32 = arith.constant 0 : i32
    %c0_i32_0 = arith.constant 0 : i32
    %c0_i32_1 = arith.constant 0 : i32
    %c0_i32_2 = arith.constant 0 : i32
    return %arg0, %c0_i32, %c0_i32_0, %c0_i32_1 : i32, i32, i32, i32
  }
  func.func @transform_3(%arg0: i32) -> (i32, i32) {
    %c0_i32 = arith.constant 0 : i32
    %c0_i32_0 = arith.constant 0 : i32
    %c0_i32_1 = arith.constant 0 : i32
    return %c0_i32, %c0_i32_0 : i32, i32
  }
}

module attributes {stable_mosaic.version = 11 : i64} {
  func.func @kernel(%arg0: i32, %arg1: memref<1x18x18x128xbf16, #tpu.memory_space<vmem>>, %arg2: memref<1152x128xbf16, #tpu.memory_space<vmem>>, %arg3: memref<1x16x16x128xf32, #tpu.memory_space<vmem>>, %arg4: memref<2x128xf32, #tpu.memory_space<vmem>>) attributes {dimension_semantics = [#tpu.dimension_semantics<arbitrary>], iteration_bounds = array<i64: 2>, scalar_prefetch = 0 : i64, scratch_operands = 0 : i64, tpu.core_type = #tpu.core_type<tc>, window_params = [{transform_indices = @transform_0, window_bounds = array<i64: 1, 18, 18, 128>}, {pipeline_mode = #tpu.pipeline_mode<synchronous>, transform_indices = @transform_1, window_bounds = array<i64: 1152, 128>}, {transform_indices = @transform_2, window_bounds = array<i64: 1, 16, 16, 128>}, {pipeline_mode = #tpu.pipeline_mode<synchronous>, transform_indices = @transform_3, window_bounds = array<i64: 2, 128>}]} {
    %c0 = arith.constant 0 : index
    %c0_0 = arith.constant 0 : index
    %c0_1 = arith.constant 0 : index
    %c0_2 = arith.constant 0 : index
    %0 = vector.load %arg1[%c0, %c0_0, %c0_1, %c0_2] : memref<1x18x18x128xbf16, #tpu.memory_space<vmem>>, vector<1x18x18x128xbf16>
    %1 = vector.shape_cast %0 : vector<1x18x18x128xbf16> to vector<18x18x128xbf16>
    %cst = arith.constant 0.000000e+00 : f32
    %2 = vector.broadcast %cst : f32 to vector<256x128xf32>
    %3 = vector.extract_strided_slice %1 {offsets = [0, 0, 0], sizes = [16, 16, 128], strides = [1, 1, 1]} : vector<18x18x128xbf16> to vector<16x16x128xbf16>
    %4 = vector.shape_cast %3 : vector<16x16x128xbf16> to vector<256x128xbf16>
    %c0_3 = arith.constant 0 : index
    %c0_4 = arith.constant 0 : index
    %5 = vector.load %arg2[%c0_3, %c0_4] : memref<1152x128xbf16, #tpu.memory_space<vmem>>, vector<128x128xbf16>
    %cst_5 = arith.constant dense<0.000000e+00> : vector<256x128xf32>
    %6 = tpu.matmul %4, %5, %cst_5 {dimension_numbers = #tpu.dot_dimension_numbers<[1], [0], [0], [1], [0, 0, 1, 1], [], []>} : vector<256x128xbf16>, vector<128x128xbf16>, vector<256x128xf32> -> vector<256x128xf32>
    %7 = arith.addf %2, %6 : vector<256x128xf32>
    %8 = vector.extract_strided_slice %1 {offsets = [0, 1, 0], sizes = [16, 16, 128], strides = [1, 1, 1]} : vector<18x18x128xbf16> to vector<16x16x128xbf16>
    %9 = vector.shape_cast %8 : vector<16x16x128xbf16> to vector<256x128xbf16>
    %c128 = arith.constant 128 : index
    %c0_6 = arith.constant 0 : index
    %10 = vector.load %arg2[%c128, %c0_6] : memref<1152x128xbf16, #tpu.memory_space<vmem>>, vector<128x128xbf16>
    %cst_7 = arith.constant dense<0.000000e+00> : vector<256x128xf32>
    %11 = tpu.matmul %9, %10, %cst_7 {dimension_numbers = #tpu.dot_dimension_numbers<[1], [0], [0], [1], [0, 0, 1, 1], [], []>} : vector<256x128xbf16>, vector<128x128xbf16>, vector<256x128xf32> -> vector<256x128xf32>
    %12 = arith.addf %7, %11 : vector<256x128xf32>
    %13 = vector.extract_strided_slice %1 {offsets = [0, 2, 0], sizes = [16, 16, 128], strides = [1, 1, 1]} : vector<18x18x128xbf16> to vector<16x16x128xbf16>
    %14 = vector.shape_cast %13 : vector<16x16x128xbf16> to vector<256x128xbf16>
    %c256 = arith.constant 256 : index
    %c0_8 = arith.constant 0 : index
    %15 = vector.load %arg2[%c256, %c0_8] : memref<1152x128xbf16, #tpu.memory_space<vmem>>, vector<128x128xbf16>
    %cst_9 = arith.constant dense<0.000000e+00> : vector<256x128xf32>
    %16 = tpu.matmul %14, %15, %cst_9 {dimension_numbers = #tpu.dot_dimension_numbers<[1], [0], [0], [1], [0, 0, 1, 1], [], []>} : vector<256x128xbf16>, vector<128x128xbf16>, vector<256x128xf32> -> vector<256x128xf32>
    %17 = arith.addf %12, %16 : vector<256x128xf32>
    %18 = vector.extract_strided_slice %1 {offsets = [1, 0, 0], sizes = [16, 16, 128], strides = [1, 1, 1]} : vector<18x18x128xbf16> to vector<16x16x128xbf16>
    %19 = vector.shape_cast %18 : vector<16x16x128xbf16> to vector<256x128xbf16>
    %c384 = arith.constant 384 : index
    %c0_10 = arith.constant 0 : index
    %20 = vector.load %arg2[%c384, %c0_10] : memref<1152x128xbf16, #tpu.memory_space<vmem>>, vector<128x128xbf16>
    %cst_11 = arith.constant dense<0.000000e+00> : vector<256x128xf32>
    %21 = tpu.matmul %19, %20, %cst_11 {dimension_numbers = #tpu.dot_dimension_numbers<[1], [0], [0], [1], [0, 0, 1, 1], [], []>} : vector<256x128xbf16>, vector<128x128xbf16>, vector<256x128xf32> -> vector<256x128xf32>
    %22 = arith.addf %17, %21 : vector<256x128xf32>
    %23 = vector.extract_strided_slice %1 {offsets = [1, 1, 0], sizes = [16, 16, 128], strides = [1, 1, 1]} : vector<18x18x128xbf16> to vector<16x16x128xbf16>
    %24 = vector.shape_cast %23 : vector<16x16x128xbf16> to vector<256x128xbf16>
    %c512 = arith.constant 512 : index
    %c0_12 = arith.constant 0 : index
    %25 = vector.load %arg2[%c512, %c0_12] : memref<1152x128xbf16, #tpu.memory_space<vmem>>, vector<128x128xbf16>
    %cst_13 = arith.constant dense<0.000000e+00> : vector<256x128xf32>
    %26 = tpu.matmul %24, %25, %cst_13 {dimension_numbers = #tpu.dot_dimension_numbers<[1], [0], [0], [1], [0, 0, 1, 1], [], []>} : vector<256x128xbf16>, vector<128x128xbf16>, vector<256x128xf32> -> vector<256x128xf32>
    %27 = arith.addf %22, %26 : vector<256x128xf32>
    %28 = vector.extract_strided_slice %1 {offsets = [1, 2, 0], sizes = [16, 16, 128], strides = [1, 1, 1]} : vector<18x18x128xbf16> to vector<16x16x128xbf16>
    %29 = vector.shape_cast %28 : vector<16x16x128xbf16> to vector<256x128xbf16>
    %c640 = arith.constant 640 : index
    %c0_14 = arith.constant 0 : index
    %30 = vector.load %arg2[%c640, %c0_14] : memref<1152x128xbf16, #tpu.memory_space<vmem>>, vector<128x128xbf16>
    %cst_15 = arith.constant dense<0.000000e+00> : vector<256x128xf32>
    %31 = tpu.matmul %29, %30, %cst_15 {dimension_numbers = #tpu.dot_dimension_numbers<[1], [0], [0], [1], [0, 0, 1, 1], [], []>} : vector<256x128xbf16>, vector<128x128xbf16>, vector<256x128xf32> -> vector<256x128xf32>
    %32 = arith.addf %27, %31 : vector<256x128xf32>
    %33 = vector.extract_strided_slice %1 {offsets = [2, 0, 0], sizes = [16, 16, 128], strides = [1, 1, 1]} : vector<18x18x128xbf16> to vector<16x16x128xbf16>
    %34 = vector.shape_cast %33 : vector<16x16x128xbf16> to vector<256x128xbf16>
    %c768 = arith.constant 768 : index
    %c0_16 = arith.constant 0 : index
    %35 = vector.load %arg2[%c768, %c0_16] : memref<1152x128xbf16, #tpu.memory_space<vmem>>, vector<128x128xbf16>
    %cst_17 = arith.constant dense<0.000000e+00> : vector<256x128xf32>
    %36 = tpu.matmul %34, %35, %cst_17 {dimension_numbers = #tpu.dot_dimension_numbers<[1], [0], [0], [1], [0, 0, 1, 1], [], []>} : vector<256x128xbf16>, vector<128x128xbf16>, vector<256x128xf32> -> vector<256x128xf32>
    %37 = arith.addf %32, %36 : vector<256x128xf32>
    %38 = vector.extract_strided_slice %1 {offsets = [2, 1, 0], sizes = [16, 16, 128], strides = [1, 1, 1]} : vector<18x18x128xbf16> to vector<16x16x128xbf16>
    %39 = vector.shape_cast %38 : vector<16x16x128xbf16> to vector<256x128xbf16>
    %c896 = arith.constant 896 : index
    %c0_18 = arith.constant 0 : index
    %40 = vector.load %arg2[%c896, %c0_18] : memref<1152x128xbf16, #tpu.memory_space<vmem>>, vector<128x128xbf16>
    %cst_19 = arith.constant dense<0.000000e+00> : vector<256x128xf32>
    %41 = tpu.matmul %39, %40, %cst_19 {dimension_numbers = #tpu.dot_dimension_numbers<[1], [0], [0], [1], [0, 0, 1, 1], [], []>} : vector<256x128xbf16>, vector<128x128xbf16>, vector<256x128xf32> -> vector<256x128xf32>
    %42 = arith.addf %37, %41 : vector<256x128xf32>
    %43 = vector.extract_strided_slice %1 {offsets = [2, 2, 0], sizes = [16, 16, 128], strides = [1, 1, 1]} : vector<18x18x128xbf16> to vector<16x16x128xbf16>
    %44 = vector.shape_cast %43 : vector<16x16x128xbf16> to vector<256x128xbf16>
    %c1024 = arith.constant 1024 : index
    %c0_20 = arith.constant 0 : index
    %45 = vector.load %arg2[%c1024, %c0_20] : memref<1152x128xbf16, #tpu.memory_space<vmem>>, vector<128x128xbf16>
    %cst_21 = arith.constant dense<0.000000e+00> : vector<256x128xf32>
    %46 = tpu.matmul %44, %45, %cst_21 {dimension_numbers = #tpu.dot_dimension_numbers<[1], [0], [0], [1], [0, 0, 1, 1], [], []>} : vector<256x128xbf16>, vector<128x128xbf16>, vector<256x128xf32> -> vector<256x128xf32>
    %47 = arith.addf %42, %46 : vector<256x128xf32>
    %c0_i32 = arith.constant 0 : i32
    %48 = arith.cmpi eq, %arg0, %c0_i32 : i32
    %49 = arith.extui %48 : i1 to i32
    %c0_i32_22 = arith.constant 0 : i32
    %50 = arith.cmpi ne, %49, %c0_i32_22 : i32
    scf.if %50 {
      %cst_33 = arith.constant 0.000000e+00 : f32
      %64 = vector.broadcast %cst_33 : f32 to vector<2x128xf32>
      %c0_34 = arith.constant 0 : index
      %c0_35 = arith.constant 0 : index
      %65 = vector.load %arg4[%c0_34, %c0_35] : memref<2x128xf32, #tpu.memory_space<vmem>>, vector<2x128xf32>
      tpu.vector_store %arg4[%c0_34, %c0_35], %64 {strides = array<i32>} : memref<2x128xf32, #tpu.memory_space<vmem>>, vector<2x128xf32>,
    } else {
    }
    %cst_23 = arith.constant dense<0.000000e+00> : vector<128xf32>
    %51 = vector.multi_reduction <add>, %47, %cst_23 [0] : vector<256x128xf32> to vector<128xf32>
    %52 = vector.shape_cast %51 : vector<128xf32> to vector<1x128xf32>
    %53 = arith.mulf %47, %47 : vector<256x128xf32>
    %cst_24 = arith.constant dense<0.000000e+00> : vector<128xf32>
    %54 = vector.multi_reduction <add>, %53, %cst_24 [0] : vector<256x128xf32> to vector<128xf32>
    %55 = vector.shape_cast %54 : vector<128xf32> to vector<1x128xf32>
    %c0_25 = arith.constant 0 : index
    %c0_26 = arith.constant 0 : index
    %56 = vector.load %arg4[%c0_25, %c0_26] : memref<2x128xf32, #tpu.memory_space<vmem>>, vector<2x128xf32>
    %57 = tpu.concatenate %52, %55 in 0 : vector<1x128xf32>, vector<1x128xf32> -> vector<2x128xf32>
    %58 = arith.addf %56, %57 : vector<2x128xf32>
    %c0_27 = arith.constant 0 : index
    %c0_28 = arith.constant 0 : index
    %59 = vector.load %arg4[%c0_27, %c0_28] : memref<2x128xf32, #tpu.memory_space<vmem>>, vector<2x128xf32>
    tpu.vector_store %arg4[%c0_27, %c0_28], %58 {strides = array<i32>} : memref<2x128xf32, #tpu.memory_space<vmem>>, vector<2x128xf32>,
    %60 = vector.shape_cast %47 : vector<256x128xf32> to vector<16x16x128xf32>
    %c0_29 = arith.constant 0 : index
    %c0_30 = arith.constant 0 : index
    %c0_31 = arith.constant 0 : index
    %c0_32 = arith.constant 0 : index
    %61 = vector.load %arg3[%c0_29, %c0_30, %c0_31, %c0_32] : memref<1x16x16x128xf32, #tpu.memory_space<vmem>>, vector<1x16x16x128xf32>
    %62 = vector.shape_cast %61 : vector<1x16x16x128xf32> to vector<16x16x128xf32>
    %63 = vector.shape_cast %60 : vector<16x16x128xf32> to vector<1x16x16x128xf32>
    tpu.vector_store %arg3[%c0_29, %c0_30, %c0_31, %c0_32], %63 {strides = array<i32>} : memref<1x16x16x128xf32, #tpu.memory_space<vmem>>, vector<1x16x16x128xf32>,
    return
  }
  func.func @transform_0(%arg0: i32) -> (i32, i32, i32, i32) {
    %c0_i32 = arith.constant 0 : i32
    %c0_i32_0 = arith.constant 0 : i32
    %c0_i32_1 = arith.constant 0 : i32
    %c0_i32_2 = arith.constant 0 : i32
    return %arg0, %c0_i32, %c0_i32_0, %c0_i32_1 : i32, i32, i32, i32
  }
  func.func @transform_1(%arg0: i32) -> (i32, i32) {
    %c0_i32 = arith.constant 0 : i32
    %c0_i32_0 = arith.constant 0 : i32
    %c0_i32_1 = arith.constant 0 : i32
    return %c0_i32, %c0_i32_0 : i32, i32
  }
  func.func @transform_2(%arg0: i32) -> (i32, i32, i32, i32) {
    %c0_i32 = arith.constant 0 : i32
    %c0_i32_0 = arith.constant 0 : i32
    %c0_i32_1 = arith.constant 0 : i32
    %c0_i32_2 = arith.constant 0 : i32
    return %arg0, %c0_i32, %c0_i32_0, %c0_i32_1 : i32, i32, i32, i32
  }
  func.func @transform_3(%arg0: i32) -> (i32, i32) {
    %c0_i32 = arith.constant 0 : i32
    %c0_i32_0 = arith.constant 0 : i32
    %c0_i32_1 = arith.constant 0 : i32
    return %c0_i32, %c0_i32_0 : i32, i32
  }
}

module attributes {stable_mosaic.version = 11 : i64} {
  func.func @kernel(%arg0: i32, %arg1: i32, %arg2: memref<1x16x16x128xf32, #tpu.memory_space<vmem>>, %arg3: memref<2x128xf32, #tpu.memory_space<vmem>>, %arg4: memref<1x128xf32, #tpu.memory_space<vmem>>, %arg5: memref<1x128xf32, #tpu.memory_space<vmem>>, %arg6: memref<1x8x8x128xf32, #tpu.memory_space<vmem>>) attributes {dimension_semantics = [#tpu.dimension_semantics<parallel>, #tpu.dimension_semantics<parallel>], iteration_bounds = array<i64: 2, 1>, scalar_prefetch = 0 : i64, scratch_operands = 0 : i64, tpu.core_type = #tpu.core_type<tc>, window_params = [{transform_indices = @transform_0, window_bounds = array<i64: 1, 16, 16, 128>}, {pipeline_mode = #tpu.pipeline_mode<synchronous>, transform_indices = @transform_1, window_bounds = array<i64: 2, 128>}, {pipeline_mode = #tpu.pipeline_mode<synchronous>, transform_indices = @transform_2, window_bounds = array<i64: 1, 128>}, {pipeline_mode = #tpu.pipeline_mode<synchronous>, transform_indices = @transform_3, window_bounds = array<i64: 1, 128>}, {transform_indices = @transform_4, window_bounds = array<i64: 1, 8, 8, 128>}]} {
    %c0 = arith.constant 0 : index
    %c0_0 = arith.constant 0 : index
    %0 = vector.load %arg3[%c0, %c0_0] : memref<2x128xf32, #tpu.memory_space<vmem>>, vector<1x128xf32>
    %cst = arith.constant 0.001953125 : f32
    %1 = vector.broadcast %cst : f32 to vector<1x128xf32>
    %2 = arith.mulf %0, %1 : vector<1x128xf32>
    %c1 = arith.constant 1 : index
    %c0_1 = arith.constant 0 : index
    %3 = vector.load %arg3[%c1, %c0_1] : memref<2x128xf32, #tpu.memory_space<vmem>>, vector<1x128xf32>
    %cst_2 = arith.constant 0.001953125 : f32
    %4 = vector.broadcast %cst_2 : f32 to vector<1x128xf32>
    %5 = arith.mulf %3, %4 : vector<1x128xf32>
    %6 = arith.mulf %2, %2 : vector<1x128xf32>
    %7 = arith.subf %5, %6 : vector<1x128xf32>
    %cst_3 = arith.constant 0.000000e+00 : f32
    %8 = vector.broadcast %cst_3 : f32 to vector<1x128xf32>
    %9 = arith.maximumf %7, %8 : vector<1x128xf32>
    %c0_4 = arith.constant 0 : index
    %c0_5 = arith.constant 0 : index
    %10 = vector.load %arg4[%c0_4, %c0_5] : memref<1x128xf32, #tpu.memory_space<vmem>>, vector<1x128xf32>
    %cst_6 = arith.constant 9.99999974E-6 : f32
    %11 = vector.broadcast %cst_6 : f32 to vector<1x128xf32>
    %12 = arith.addf %9, %11 : vector<1x128xf32>
    %13 = math.rsqrt %12 : vector<1x128xf32>
    %14 = arith.mulf %10, %13 : vector<1x128xf32>
    %c0_7 = arith.constant 0 : index
    %c0_8 = arith.constant 0 : index
    %15 = vector.load %arg5[%c0_7, %c0_8] : memref<1x128xf32, #tpu.memory_space<vmem>>, vector<1x128xf32>
    %16 = arith.mulf %2, %14 : vector<1x128xf32>
    %17 = arith.subf %15, %16 : vector<1x128xf32>
    %c0_9 = arith.constant 0 : index
    %c0_10 = arith.constant 0 : index
    %c0_11 = arith.constant 0 : index
    %c0_12 = arith.constant 0 : index
    %18 = vector.load %arg2[%c0_9, %c0_10, %c0_11, %c0_12] : memref<1x16x16x128xf32, #tpu.memory_space<vmem>>, vector<1x16x16x128xf32>
    %19 = vector.shape_cast %18 : vector<1x16x16x128xf32> to vector<16x16x128xf32>
    %20 = vector.shape_cast %19 : vector<16x16x128xf32> to vector<16x8x256xf32>
    %21 = vector.extract_strided_slice %20 {offsets = [0, 0, 0], sizes = [16, 8, 128], strides = [1, 1, 1]} : vector<16x8x256xf32> to vector<16x8x128xf32>
    %22 = vector.extract_strided_slice %20 {offsets = [0, 0, 128], sizes = [16, 8, 128], strides = [1, 1, 1]} : vector<16x8x256xf32> to vector<16x8x128xf32>
    %23 = arith.addf %21, %22 : vector<16x8x128xf32>
    %cst_13 = arith.constant 5.000000e-01 : f32
    %24 = vector.broadcast %cst_13 : f32 to vector<16x8x128xf32>
    %25 = arith.mulf %24, %23 : vector<16x8x128xf32>
    %26 = vector.shape_cast %25 : vector<16x8x128xf32> to vector<8x2x8x128xf32>
    %27 = vector.extract_strided_slice %26 {offsets = [0, 0, 0, 0], sizes = [8, 1, 8, 128], strides = [1, 1, 1, 1]} : vector<8x2x8x128xf32> to vector<8x1x8x128xf32>
    %28 = vector.shape_cast %27 : vector<8x1x8x128xf32> to vector<8x8x128xf32>
    %29 = vector.extract_strided_slice %26 {offsets = [0, 1, 0, 0], sizes = [8, 1, 8, 128], strides = [1, 1, 1, 1]} : vector<8x2x8x128xf32> to vector<8x1x8x128xf32>
    %30 = vector.shape_cast %29 : vector<8x1x8x128xf32> to vector<8x8x128xf32>
    %31 = arith.addf %28, %30 : vector<8x8x128xf32>
    %cst_14 = arith.constant 5.000000e-01 : f32
    %32 = vector.broadcast %cst_14 : f32 to vector<8x8x128xf32>
    %33 = arith.mulf %32, %31 : vector<8x8x128xf32>
    %34 = vector.shape_cast %14 : vector<1x128xf32> to vector<1x1x128xf32>
    %35 = vector.broadcast %34 : vector<1x1x128xf32> to vector<8x8x128xf32>
    %36 = arith.mulf %33, %35 : vector<8x8x128xf32>
    %37 = vector.shape_cast %17 : vector<1x128xf32> to vector<1x1x128xf32>
    %38 = vector.broadcast %37 : vector<1x1x128xf32> to vector<8x8x128xf32>
    %39 = arith.addf %36, %38 : vector<8x8x128xf32>
    %cst_15 = arith.constant 0.000000e+00 : f32
    %40 = vector.broadcast %cst_15 : f32 to vector<8x8x128xf32>
    %41 = arith.cmpf oge, %39, %40 : vector<8x8x128xf32>
    %cst_16 = arith.constant 2.000000e-01 : f32
    %42 = vector.broadcast %cst_16 : f32 to vector<8x8x128xf32>
    %43 = arith.mulf %42, %39 : vector<8x8x128xf32>
    %44 = arith.select %41, %39, %43 : vector<8x8x128xi1>, vector<8x8x128xf32>
    %c0_17 = arith.constant 0 : index
    %c0_18 = arith.constant 0 : index
    %c0_19 = arith.constant 0 : index
    %c0_20 = arith.constant 0 : index
    %45 = vector.load %arg6[%c0_17, %c0_18, %c0_19, %c0_20] : memref<1x8x8x128xf32, #tpu.memory_space<vmem>>, vector<1x8x8x128xf32>
    %46 = vector.shape_cast %45 : vector<1x8x8x128xf32> to vector<8x8x128xf32>
    %47 = vector.shape_cast %44 : vector<8x8x128xf32> to vector<1x8x8x128xf32>
    tpu.vector_store %arg6[%c0_17, %c0_18, %c0_19, %c0_20], %47 {strides = array<i32>} : memref<1x8x8x128xf32, #tpu.memory_space<vmem>>, vector<1x8x8x128xf32>,
    return
  }
  func.func @transform_0(%arg0: i32, %arg1: i32) -> (i32, i32, i32, i32) {
    %c0_i32 = arith.constant 0 : i32
    %c0_i32_0 = arith.constant 0 : i32
    %c0_i32_1 = arith.constant 0 : i32
    return %arg0, %arg1, %c0_i32, %c0_i32_0 : i32, i32, i32, i32
  }
  func.func @transform_1(%arg0: i32, %arg1: i32) -> (i32, i32) {
    %c0_i32 = arith.constant 0 : i32
    %c0_i32_0 = arith.constant 0 : i32
    %c0_i32_1 = arith.constant 0 : i32
    return %c0_i32, %c0_i32_0 : i32, i32
  }
  func.func @transform_2(%arg0: i32, %arg1: i32) -> (i32, i32) {
    %c0_i32 = arith.constant 0 : i32
    %c0_i32_0 = arith.constant 0 : i32
    %c0_i32_1 = arith.constant 0 : i32
    return %c0_i32, %c0_i32_0 : i32, i32
  }
  func.func @transform_3(%arg0: i32, %arg1: i32) -> (i32, i32) {
    %c0_i32 = arith.constant 0 : i32
    %c0_i32_0 = arith.constant 0 : i32
    %c0_i32_1 = arith.constant 0 : i32
    return %c0_i32, %c0_i32_0 : i32, i32
  }
  func.func @transform_4(%arg0: i32, %arg1: i32) -> (i32, i32, i32, i32) {
    %c0_i32 = arith.constant 0 : i32
    %c0_i32_0 = arith.constant 0 : i32
    %c0_i32_1 = arith.constant 0 : i32
    return %arg0, %arg1, %c0_i32, %c0_i32_0 : i32, i32, i32, i32
  }
}

</mosaic_0001>

<bundles_post_ra>
// kernel: downblock_forward.5
= control target key start
LH: loop header
LB: loop body
LE: loop exit
PB: predicated region body
PF: predicated region fallthrough
CT: control target
= control target key end

     0   :  { %s806_s15 = smov 0   ;;  %s808_s16 = smov 0   ;;  %s976_s0 = inlined_call_operand.vmem [shape: f32[2,16,16,128], index: 0, kind: input, shape index: {}]   ;;  %s977_s1 = inlined_call_operand.vmem [shape: f32[2,128], index: 1, kind: input, shape index: {}]   ;;  %s978_s2 = inlined_call_operand.vmem [shape: f32[1,128], index: 2, kind: input, shape index: {}]   ;;  %s979_s3 = inlined_call_operand.vmem [shape: f32[1,128], index: 3, kind: input, shape index: {}]   ;;  %s980_s4 = inlined_call_operand.vmem [shape: bf16[2,16,16,128], index: 4, kind: output, shape index: {}]  }
   0x1   :  { %s810_s17 = smov 0  }
   0x2 LB: > { %s26_s18 = sadd.s32 1, %s775_s16  ;;  %p627_p0 = scmp.ge.s32.totalorder %s779_s17, 1  ;;  %s779_s17 = sphi %s810_s17, %s14_s17   ;;  %s775_s16 = sphi %s808_s16, %s982_s16   ;;  %s771_s15 = sphi %s806_s15, %s981_s15  }
   0x3   : > { %p28_p1 = scmp.ge.s32.totalorder %s26_s18, 2  ;;  %p184_p2 = scmp.lt.s32.totalorder %s779_s17, 3 }
   0x5   : > { %s984_s18 = smov (%p28_p1, %s26_s18), 0  ;;  %p185_p3 = pnand %p627_p0, %p184_p2 }
   0x6   : > { %p221_p4 = scmp.lt.s32.totalorder (!%p185_p3), %s771_s15, 1 }
   0x7   : > { %188 = sbr.rel (%p185_p3) target bundleno = 94 (0x5e), region = 36 }
   0xc   : > { %v242_v0 = vld [vmem:[%s977_s1] sm:$0x1]  ;;  %v244_v1 = vld [vmem:[%s977_s1 + $0x1] sm:$0x1]  ;;  %s986_s15 = smov (!%p221_p4, %s771_s15), 1 }
   0xd   : > { %v243_v2 = vmul.f32 0.001953125, %v242_v0  ;;  %v245_v3 = vmul.f32 0.001953125, %v244_v1  ;;  %s634_s23 = sshll.u32 %s986_s15, 8  ;;  %v249_v13 = vld [vmem:[%s978_s2] sm:$0x1]  ;;  %s635_s5 = sshll.u32 %s986_s15, 7 }
   0xe   : > { %s836_s26 = scalar_lea.vmem %s976_s0, %s634_s23  ;;  %v262_v17 = vld [vmem:[%s979_s3] sm:$0x1]  ;;  %s888_s8 = scalar_lea.vmem %s980_s4, %s635_s5 }
   0xf   : > { %v246_v4 = vmul.f32 %v243_v2, %v243_v2  ;;  %v265_v18 = vld [vmem:[%s836_s26] sm:$0xff]  ;;  %v266_v19 = vld [vmem:[%s836_s26 + $0x8] sm:$0xff]  ;;  %v267_v20 = vld [vmem:[%s836_s26 + $0x10] sm:$0xff] }
  0x10   : > { %v268_v21 = vld [vmem:[%s836_s26 + $0x18] sm:$0xff]  ;;  %v269_v22 = vld [vmem:[%s836_s26 + $0x20] sm:$0xff]  ;;  %v270_v25 = vld [vmem:[%s836_s26 + $0x28] sm:$0xff] }
  0x11   : > { %v247_v5 = vsub.f32 %v245_v3, %v246_v4  ;;  %v271_v26 = vld [vmem:[%s836_s26 + $0x30] sm:$0xff]  ;;  %v272_v27 = vld [vmem:[%s836_s26 + $0x38] sm:$0xff]  ;;  %v273_v28 = vld [vmem:[%s836_s26 + $0x40] sm:$0xff] }
  0x12   : > { %v274_v29 = vld [vmem:[%s836_s26 + $0x48] sm:$0xff]  ;;  %v275_v30 = vld [vmem:[%s836_s26 + $0x50] sm:$0xff]  ;;  %v276_v35 = vld [vmem:[%s836_s26 + $0x58] sm:$0xff] }
  0x13   : > { %v248_v6 = vmax.f32 %v247_v5, 0.0  ;;  %v277_v36 = vld [vmem:[%s836_s26 + $0x60] sm:$0xff]  ;;  %v278_v37 = vld [vmem:[%s836_s26 + $0x68] sm:$0xff] }
  0x15   : > { %v250_v7 = vadd.f32 1e-05, %v248_v6 }
  0x17   : > { %755 = vrsqrt.f32 %v250_v7  ;;  %vm257_vm0 = vweird.f32 %v250_v7 }
  0x1d   : > { %v756_v8 = vpop.eup %755 }
  0x1e   : > { %v252_v9 = vmul.f32 %v756_v8, %v250_v7  ;;  %vm258_vm1 = vweird.f32 %v756_v8 }
  0x1f   : > { %vm259_vm2 = vmor %vm257_vm0, %vm258_vm1 }
  0x20   : > { %v253_v10 = vmul.f32 %v756_v8, %v252_v9 }
  0x22   : > { %v254_v11 = vmul.f32 0.5, %v253_v10 }
  0x24   : > { %v255_v12 = vsub.f32 1.5, %v254_v11 }
  0x26   : > { %v256_v14 = vmul.f32 %v756_v8, %v255_v12 }
  0x28   : > { %v260_v15 = vsel %vm259_vm2, %v756_v8, %v256_v14 }
  0x29   : > { %v261_v16 = vmul.f32 %v260_v15, %v249_v13 }
  0x2b   : > { %v263_v23 = vmul.f32 %v261_v16, %v243_v2  ;;  %v849_v24 = vperm.slane %v261_v16, 0 }
  0x2d   : > { %v264_v31 = vsub.f32 %v262_v17, %v263_v23  ;;  %v300_v32 = vmul.f32 %v849_v24, %v265_v18  ;;  %v301_v33 = vmul.f32 %v849_v24, %v266_v19  ;;  %v302_v34 = vmul.f32 %v849_v24, %v267_v20 }
  0x2e   : > { %v303_v38 = vmul.f32 %v849_v24, %v268_v21  ;;  %v304_v39 = vmul.f32 %v849_v24, %v269_v22  ;;  %v305_v40 = vmul.f32 %v849_v24, %v270_v25  ;;  %v306_v41 = vmul.f32 %v849_v24, %v271_v26  ;;  %v279_v22 = vld [vmem:[%s836_s26 + $0x70] sm:$0xff] }
  0x2f   : > { %v867_v42 = vperm.slane %v264_v31, 0  ;;  %v307_v43 = vmul.f32 %v849_v24, %v272_v27  ;;  %v308_v44 = vmul.f32 %v849_v24, %v273_v28  ;;  %v309_v45 = vmul.f32 %v849_v24, %v274_v29  ;;  %v280_v28 = vld [vmem:[%s836_s26 + $0x78] sm:$0xff]  ;;  %v281_v29 = vld [vmem:[%s836_s26 + $0x80] sm:$0xff] }
  0x30   : > { %v310_v46 = vmul.f32 %v849_v24, %v275_v30  ;;  %v311_v47 = vmul.f32 %v849_v24, %v276_v35  ;;  %v312_v48 = vmul.f32 %v849_v24, %v277_v36  ;;  %v313_v49 = vmul.f32 %v849_v24, %v278_v37 }
  0x31   : > { %v335_v50 = vadd.f32 %v867_v42, %v300_v32  ;;  %v336_v51 = vadd.f32 %v867_v42, %v301_v33  ;;  %v337_v52 = vadd.f32 %v867_v42, %v302_v34  ;;  %v338_v53 = vadd.f32 %v867_v42, %v303_v38  ;;  %v282_v33 = vld [vmem:[%s836_s26 + $0x88] sm:$0xff]  ;;  %v283_v34 = vld [vmem:[%s836_s26 + $0x90] sm:$0xff]  ;;  %v284_v38 = vld [vmem:[%s836_s26 + $0x98] sm:$0xff] }
  0x32   : > { %v339_v54 = vadd.f32 %v867_v42, %v304_v39  ;;  %v340_v55 = vadd.f32 %v867_v42, %v305_v40  ;;  %v341_v56 = vadd.f32 %v867_v42, %v306_v41  ;;  %v342_v57 = vadd.f32 %v867_v42, %v307_v43 }
  0x33   : > { %vm367_vm3 = vcmp.ge.f32.partialorder %v335_v50, 0.0  ;;  %vm368_vm4 = vcmp.ge.f32.partialorder %v336_v51, 0.0  ;;  %v399_v58 = vmul.f32 0.2, %v335_v50  ;;  %v400_v59 = vmul.f32 0.2, %v336_v51 }
  0x34   : > { %vm369_vm5 = vcmp.ge.f32.partialorder %v337_v52, 0.0  ;;  %vm370_vm6 = vcmp.ge.f32.partialorder %v338_v53, 0.0  ;;  %v401_v60 = vmul.f32 0.2, %v337_v52  ;;  %v402_v61 = vmul.f32 0.2, %v338_v53 }
  0x35   : > { %v431_v62 = vsel %vm367_vm3, %v335_v50, %v399_v58  ;;  %v432_v63 = vsel %vm368_vm4, %v336_v51, %v400_v59  ;;  %vm371_vm7 = vcmp.ge.f32.partialorder %v339_v54, 0.0  ;;  %vm372_vm8 = vcmp.ge.f32.partialorder %v340_v55, 0.0  ;;  %v286_v58 = vld [vmem:[%s836_s26 + $0xa8] sm:$0xff] }
  0x36   : > { %v639_v0 = vpack.c.bf16 %v432_v63, %v431_v62  ;;  %v433_v1 = vsel %vm369_vm5, %v337_v52, %v401_v60  ;;  %v434_v2 = vsel %vm370_vm6, %v338_v53, %v402_v61  ;;  %v403_v3 = vmul.f32 0.2, %v339_v54  ;;  %v287_v62 = vld [vmem:[%s836_s26 + $0xb0] sm:$0xff] }
  0x37   : > { %v644_v4 = vpack.c.bf16 %v434_v2, %v433_v1  ;;  %v404_v5 = vmul.f32 0.2, %v340_v55  ;;  %vm373_vm9 = vcmp.ge.f32.partialorder %v341_v56, 0.0  ;;  %vm374_vm10 = vcmp.ge.f32.partialorder %v342_v57, 0.0  ;;  %v288_v1 = vld [vmem:[%s836_s26 + $0xb8] sm:$0xff]  ;;  %v289_v2 = vld [vmem:[%s836_s26 + $0xc0] sm:$0xff] }
  0x38   : > { %640 = vst [vmem:[%s888_s8] sm:$0xff] %v639_v0   ;;  %v435_v6 = vsel %vm371_vm7, %v339_v54, %v403_v3  ;;  %v405_v7 = vmul.f32 0.2, %v341_v56  ;;  %v406_v8 = vmul.f32 0.2, %v342_v57  ;;  %v343_v9 = vadd.f32 %v867_v42, %v308_v44 }
  0x39   : > { %716 = vst [vmem:[%s888_s8 + $0x8] sm:$0xff] %v644_v4   ;;  %v436_v10 = vsel %vm372_vm8, %v340_v55, %v404_v5  ;;  %v344_v11 = vadd.f32 %v867_v42, %v309_v45  ;;  %v345_v12 = vadd.f32 %v867_v42, %v310_v46  ;;  %v346_v13 = vadd.f32 %v867_v42, %v311_v47  ;;  %v285_v55 = vld [vmem:[%s836_s26 + $0xa0] sm:$0xff] }
  0x3a   : > { %v649_v14 = vpack.c.bf16 %v436_v10, %v435_v6  ;;  %v437_v15 = vsel %vm373_vm9, %v341_v56, %v405_v7  ;;  %v438_v16 = vsel %vm374_vm10, %v342_v57, %v406_v8  ;;  %vm375_vm11 = vcmp.ge.f32.partialorder %v343_v9, 0.0  ;;  %v290_v7 = vld [vmem:[%s836_s26 + $0xc8] sm:$0xff] }
  0x3b   : > { %v654_v17 = vpack.c.bf16 %v438_v16, %v437_v15  ;;  %vm376_vm12 = vcmp.ge.f32.partialorder %v344_v11, 0.0  ;;  %v407_v18 = vmul.f32 0.2, %v343_v9  ;;  %v408_v19 = vmul.f32 0.2, %v344_v11 }
  0x3c   : > { %717 = vst [vmem:[%s888_s8 + $0x10] sm:$0xff] %v649_v14   ;;  %vm377_vm13 = vcmp.ge.f32.partialorder %v345_v12, 0.0  ;;  %vm378_vm14 = vcmp.ge.f32.partialorder %v346_v13, 0.0  ;;  %v409_v20 = vmul.f32 0.2, %v345_v12  ;;  %v347_v21 = vadd.f32 %v867_v42, %v312_v48 }
  0x3d   : > { %718 = vst [vmem:[%s888_s8 + $0x18] sm:$0xff] %v654_v17   ;;  %v439_v23 = vsel %vm375_vm11, %v343_v9, %v407_v18  ;;  %v440_v25 = vsel %vm376_vm12, %v344_v11, %v408_v19  ;;  %v410_v26 = vmul.f32 0.2, %v346_v13  ;;  %v348_v27 = vadd.f32 %v867_v42, %v313_v49 }
  0x3e   : > { %v659_v30 = vpack.c.bf16 %v440_v25, %v439_v23  ;;  %v441_v31 = vsel %vm377_vm13, %v345_v12, %v409_v20  ;;  %vm379_vm15 = vcmp.ge.f32.partialorder %v347_v21, 0.0  ;;  %v411_v32 = vmul.f32 0.2, %v347_v21  ;;  %v291_v12 = vld [vmem:[%s836_s26 + $0xd0] sm:$0xff] }
  0x3f   : > { %v442_v35 = vsel %vm378_vm14, %v346_v13, %v410_v26  ;;  %vm380_vm0 = vcmp.ge.f32.partialorder %v348_v27, 0.0  ;;  %v412_v36 = vmul.f32 0.2, %v348_v27  ;;  %v314_v37 = vmul.f32 %v849_v24, %v279_v22 }
  0x40   : > { %719 = vst [vmem:[%s888_s8 + $0x20] sm:$0xff] %v659_v30   ;;  %v664_v39 = vpack.c.bf16 %v442_v35, %v441_v31  ;;  %v443_v40 = vsel %vm379_vm15, %v347_v21, %v411_v32  ;;  %v315_v41 = vmul.f32 %v849_v24, %v280_v28  ;;  %v316_v43 = vmul.f32 %v849_v24, %v281_v29  ;;  %v292_v28 = vld [vmem:[%s836_s26 + $0xd8] sm:$0xff] }
  0x41   : > { %v444_v44 = vsel %vm380_vm0, %v348_v27, %v412_v36  ;;  %v349_v45 = vadd.f32 %v867_v42, %v314_v37  ;;  %v317_v46 = vmul.f32 %v849_v24, %v282_v33  ;;  %v318_v47 = vmul.f32 %v849_v24, %v283_v34  ;;  %v293_v33 = vld [vmem:[%s836_s26 + $0xe0] sm:$0xff] }
  0x42   : > { %720 = vst [vmem:[%s888_s8 + $0x28] sm:$0xff] %v664_v39   ;;  %v669_v48 = vpack.c.bf16 %v444_v44, %v443_v40  ;;  %v350_v49 = vadd.f32 %v867_v42, %v315_v41  ;;  %v351_v50 = vadd.f32 %v867_v42, %v316_v43  ;;  %v319_v51 = vmul.f32 %v849_v24, %v284_v38  ;;  %v294_v43 = vld [vmem:[%s836_s26 + $0xe8] sm:$0xff]  ;;  %v295_v44 = vld [vmem:[%s836_s26 + $0xf0] sm:$0xff] }
  0x43   : > { %vm381_vm1 = vcmp.ge.f32.partialorder %v349_v45, 0.0  ;;  %v413_v52 = vmul.f32 0.2, %v349_v45  ;;  %v352_v53 = vadd.f32 %v867_v42, %v317_v46  ;;  %v353_v54 = vadd.f32 %v867_v42, %v318_v47 }
  0x44   : > { %721 = vst [vmem:[%s888_s8 + $0x30] sm:$0xff] %v669_v48   ;;  %vm382_vm2 = vcmp.ge.f32.partialorder %v350_v49, 0.0  ;;  %v414_v56 = vmul.f32 0.2, %v350_v49  ;;  %vm383_vm3 = vcmp.ge.f32.partialorder %v351_v50, 0.0  ;;  %v354_v57 = vadd.f32 %v867_v42, %v319_v51 }
  0x45   : > { %v445_v59 = vsel %vm381_vm1, %v349_v45, %v413_v52  ;;  %vm384_vm4 = vcmp.ge.f32.partialorder %v352_v53, 0.0  ;;  %v415_v60 = vmul.f32 0.2, %v351_v50  ;;  %v416_v61 = vmul.f32 0.2, %v352_v53  ;;  %v296_v45 = vld [vmem:[%s836_s26 + $0xf8] sm:$0xff] }
  0x46   : > { %v446_v63 = vsel %vm382_vm2, %v350_v49, %v414_v56  ;;  %vm385_vm5 = vcmp.ge.f32.partialorder %v353_v54, 0.0  ;;  %vm386_vm6 = vcmp.ge.f32.partialorder %v354_v57, 0.0  ;;  %v417_v0 = vmul.f32 0.2, %v353_v54 }
  0x47   : > { %v674_v3 = vpack.c.bf16 %v446_v63, %v445_v59  ;;  %v447_v4 = vsel %vm383_vm3, %v351_v50, %v415_v60  ;;  %v448_v5 = vsel %vm384_vm4, %v352_v53, %v416_v61  ;;  %v418_v6 = vmul.f32 0.2, %v354_v57 }
  0x48   : > { %v679_v8 = vpack.c.bf16 %v448_v5, %v447_v4  ;;  %v449_v9 = vsel %vm385_vm5, %v353_v54, %v417_v0  ;;  %v320_v10 = vmul.f32 %v849_v24, %v285_v55  ;;  %v321_v11 = vmul.f32 %v849_v24, %v286_v58 }
  0x49   : > { %722 = vst [vmem:[%s888_s8 + $0x38] sm:$0xff] %v674_v3   ;;  %v450_v13 = vsel %vm386_vm6, %v354_v57, %v418_v6  ;;  %v322_v14 = vmul.f32 %v849_v24, %v287_v62  ;;  %v323_v15 = vmul.f32 %v849_v24, %v288_v1  ;;  %v324_v16 = vmul.f32 %v849_v24, %v289_v2 }
  0x4a   : > { %723 = vst [vmem:[%s888_s8 + $0x40] sm:$0xff] %v679_v8   ;;  %v684_v17 = vpack.c.bf16 %v450_v13, %v449_v9  ;;  %v355_v18 = vadd.f32 %v867_v42, %v320_v10  ;;  %v356_v19 = vadd.f32 %v867_v42, %v321_v11  ;;  %v325_v20 = vmul.f32 %v849_v24, %v290_v7 }
  0x4b   : > { %v357_v21 = vadd.f32 %v867_v42, %v322_v14  ;;  %v358_v22 = vadd.f32 %v867_v42, %v323_v15  ;;  %v359_v23 = vadd.f32 %v867_v42, %v324_v16  ;;  %v326_v25 = vmul.f32 %v849_v24, %v291_v12 }
  0x4c   : > { %724 = vst [vmem:[%s888_s8 + $0x48] sm:$0xff] %v684_v17   ;;  %vm387_vm7 = vcmp.ge.f32.partialorder %v355_v18, 0.0  ;;  %vm388_vm8 = vcmp.ge.f32.partialorder %v356_v19, 0.0  ;;  %v419_v26 = vmul.f32 0.2, %v355_v18  ;;  %v360_v27 = vadd.f32 %v867_v42, %v325_v20 }
  0x4d   : > { %v420_v29 = vmul.f32 0.2, %v356_v19  ;;  %vm389_vm9 = vcmp.ge.f32.partialorder %v357_v21, 0.0  ;;  %vm390_vm10 = vcmp.ge.f32.partialorder %v358_v22, 0.0  ;;  %v421_v30 = vmul.f32 0.2, %v357_v21 }
  0x4e   : > { %v451_v31 = vsel %vm387_vm7, %v355_v18, %v419_v26  ;;  %v422_v32 = vmul.f32 0.2, %v358_v22  ;;  %vm391_vm11 = vcmp.ge.f32.partialorder %v359_v23, 0.0  ;;  %vm392_vm12 = vcmp.ge.f32.partialorder %v360_v27, 0.0 }
  0x4f   : > { %v452_v34 = vsel %vm388_vm8, %v356_v19, %v420_v29  ;;  %v453_v35 = vsel %vm389_vm9, %v357_v21, %v421_v30  ;;  %v423_v36 = vmul.f32 0.2, %v359_v23  ;;  %v424_v37 = vmul.f32 0.2, %v360_v27 }
  0x50   : > { %v689_v38 = vpack.c.bf16 %v452_v34, %v451_v31  ;;  %v454_v39 = vsel %vm390_vm10, %v358_v22, %v422_v32  ;;  %v327_v40 = vmul.f32 %v849_v24, %v292_v28  ;;  %v361_v41 = vadd.f32 %v867_v42, %v326_v25 }
  0x51   : > { %v694_v46 = vpack.c.bf16 %v454_v39, %v453_v35  ;;  %v455_v47 = vsel %vm391_vm11, %v359_v23, %v423_v36  ;;  %v456_v48 = vsel %vm392_vm12, %v360_v27, %v424_v37  ;;  %v328_v49 = vmul.f32 %v849_v24, %v293_v33 }
  0x52   : > { %725 = vst [vmem:[%s888_s8 + $0x50] sm:$0xff] %v689_v38   ;;  %v699_v50 = vpack.c.bf16 %v456_v48, %v455_v47  ;;  %v362_v51 = vadd.f32 %v867_v42, %v327_v40  ;;  %vm393_vm13 = vcmp.ge.f32.partialorder %v361_v41, 0.0  ;;  %v425_v52 = vmul.f32 0.2, %v361_v41 }
  0x53   : > { %726 = vst [vmem:[%s888_s8 + $0x58] sm:$0xff] %v694_v46   ;;  %v329_v53 = vmul.f32 %v849_v24, %v294_v43  ;;  %v363_v54 = vadd.f32 %v867_v42, %v328_v49  ;;  %v330_v55 = vmul.f32 %v849_v24, %v295_v44  ;;  %v331_v56 = vmul.f32 %v849_v24, %v296_v45 }
  0x54   : > { %727 = vst [vmem:[%s888_s8 + $0x60] sm:$0xff] %v699_v50   ;;  %vm394_vm14 = vcmp.ge.f32.partialorder %v362_v51, 0.0  ;;  %v426_v57 = vmul.f32 0.2, %v362_v51  ;;  %v457_v58 = vsel %vm393_vm13, %v361_v41, %v425_v52 }
  0x55   : > { %v364_v59 = vadd.f32 %v867_v42, %v329_v53  ;;  %vm395_vm15 = vcmp.ge.f32.partialorder %v363_v54, 0.0  ;;  %v427_v60 = vmul.f32 0.2, %v363_v54  ;;  %v365_v61 = vadd.f32 %v867_v42, %v330_v55 }
  0x56   : > { %v458_v62 = vsel %vm394_vm14, %v362_v51, %v426_v57  ;;  %v366_v63 = vadd.f32 %v867_v42, %v331_v56 }
  0x57   : > { %v704_v0 = vpack.c.bf16 %v458_v62, %v457_v58  ;;  %vm396_vm0 = vcmp.ge.f32.partialorder %v364_v59, 0.0  ;;  %v428_v1 = vmul.f32 0.2, %v364_v59  ;;  %v459_v24 = vsel %vm395_vm15, %v363_v54, %v427_v60 }
  0x58   : > { %vm397_vm1 = vcmp.ge.f32.partialorder %v365_v61, 0.0  ;;  %vm398_vm2 = vcmp.ge.f32.partialorder %v366_v63, 0.0  ;;  %v429_v2 = vmul.f32 0.2, %v365_v61  ;;  %v430_v3 = vmul.f32 0.2, %v366_v63 }
  0x59   : > { %728 = vst [vmem:[%s888_s8 + $0x68] sm:$0xff] %v704_v0   ;;  %v460_v4 = vsel %vm396_vm0, %v364_v59, %v428_v1 }
  0x5a   : > { %v709_v5 = vpack.c.bf16 %v460_v4, %v459_v24  ;;  %v461_v6 = vsel %vm397_vm1, %v365_v61, %v429_v2  ;;  %v462_v7 = vsel %vm398_vm2, %v366_v63, %v430_v3 }
  0x5b   : > { %v714_v8 = vpack.c.bf16 %v462_v7, %v461_v6 }
  0x5c   : > { %729 = vst [vmem:[%s888_s8 + $0x70] sm:$0xff] %v709_v5  }
  0x5d   : > { %730 = vst [vmem:[%s888_s8 + $0x78] sm:$0xff] %v714_v8  }
  0x5e PF: > { %s14_s17 = sadd.s32 1, %s779_s17   ;;  %s981_s15 = smov %s775_s16 }
  0x5f   : > { %p11_p5 = scmp.ge.s32.totalorder %s14_s17, 4   ;;  %s982_s16 = smov %s984_s18 }
  0x61   :  { %13 = sbr.rel (!%p11_p5) target bundleno = 2 (0x2), region = 66 }

// kernel: downblock_forward.7
= control target key start
LH: loop header
LB: loop body
LE: loop exit
PB: predicated region body
PF: predicated region fallthrough
CT: control target
= control target key end

     0   :  { %s978_s15 = smov 0   ;;  %s980_s16 = smov 0   ;;  %s1151_s0 = inlined_call_operand.vmem [shape: f32[2,16,16,128], index: 0, kind: input, shape index: {}]   ;;  %s1152_s1 = inlined_call_operand.vmem [shape: f32[2,128], index: 1, kind: input, shape index: {}]   ;;  %s1153_s2 = inlined_call_operand.vmem [shape: f32[1,128], index: 2, kind: input, shape index: {}]   ;;  %s1154_s3 = inlined_call_operand.vmem [shape: f32[1,128], index: 3, kind: input, shape index: {}]   ;;  %s1155_s4 = inlined_call_operand.vmem [shape: f32[2,8,8,128], index: 4, kind: output, shape index: {}]  }
   0x1   :  { %s982_s17 = smov 0  }
   0x2 LB: > { %s26_s18 = sadd.s32 1, %s947_s16  ;;  %p862_p0 = scmp.ge.s32.totalorder %s951_s17, 1  ;;  %s951_s17 = sphi %s982_s17, %s14_s17   ;;  %s947_s16 = sphi %s980_s16, %s1159_s16   ;;  %s943_s15 = sphi %s978_s15, %s1158_s15  }
   0x3   : > { %p28_p1 = scmp.ge.s32.totalorder %s26_s18, 2  ;;  %p184_p2 = scmp.lt.s32.totalorder %s951_s17, 3 }
   0x5   : > { %s1161_s18 = smov (%p28_p1, %s26_s18), 0  ;;  %p185_p3 = pnand %p862_p0, %p184_p2 }
   0x6   : > { %p220_p4 = scmp.lt.s32.totalorder (!%p185_p3), %s943_s15, 1 }
   0x7   : > { %188 = sbr.rel (%p185_p3) target bundleno = 93 (0x5d), region = 36 }
   0xc   : > { %v240_v0 = vld [vmem:[%s1152_s1] sm:$0x1]  ;;  %v242_v1 = vld [vmem:[%s1152_s1 + $0x1] sm:$0x1]  ;;  %s1163_s15 = smov (!%p220_p4, %s943_s15), 1 }
   0xd   : > { %v1002_v2 = vmul.f32 0.001953125, %v240_v0  ;;  %v243_v3 = vmul.f32 0.001953125, %v242_v1  ;;  %s901_s23 = sshll.u32 %s1163_s15, 8  ;;  %s902_s5 = sshll.u32 %s1163_s15, 6 }
   0xe   : > { %s1012_s26 = scalar_lea.vmem %s1151_s0, %s901_s23  ;;  %s1122_s8 = scalar_lea.vmem %s1155_s4, %s902_s5 }
   0xf   : > { %v244_v4 = vmul.f32 %v1002_v2, %v1002_v2  ;;  %v867_v6 = vld.sshfl [vmem:[%s1012_s26] sm:$0xff pattern:$0x75316420]  ;;  %v869_v7 = vld.sshfl [vmem:[%s1012_s26 + $0x10] sm:$0xff pattern:$0x75316420] }
  0x10   : > { %v455_v9 = vrot.slane %v867_v6, 4  ;;  %v457_v10 = vrot.slane %v869_v7, 4  ;;  %v868_v11 = vld.sshfl [vmem:[%s1012_s26 + $0x8] sm:$0xff pattern:$0x75316420] }
  0x11   : > { %v245_v5 = vsub.f32 %v243_v3, %v244_v4  ;;  %v870_v12 = vld.sshfl [vmem:[%s1012_s26 + $0x18] sm:$0xff pattern:$0x75316420]  ;;  %v456_v13 = vrot.slane %v868_v11, 4 }
  0x12   : > { %v519_v15 = vadd.f32 %v867_v6, %v455_v9  ;;  %v521_v16 = vadd.f32 %v869_v7, %v457_v10  ;;  %v458_v17 = vrot.slane %v870_v12, 4  ;;  %v871_v18 = vld.sshfl [vmem:[%s1012_s26 + $0x20] sm:$0xff pattern:$0x75316420] }
  0x13   : > { %v246_v8 = vmax.f32 %v245_v5, 0.0  ;;  %v520_v19 = vadd.f32 %v868_v11, %v456_v13  ;;  %v873_v20 = vld.sshfl [vmem:[%s1012_s26 + $0x30] sm:$0xff pattern:$0x75316420]  ;;  %v459_v21 = vrot.slane %v871_v18, 4 }
  0x14   : > { %v551_v22 = vmul.f32 0.5, %v519_v15  ;;  %v553_v23 = vmul.f32 0.5, %v521_v16  ;;  %v872_v24 = vld.sshfl [vmem:[%s1012_s26 + $0x28] sm:$0xff pattern:$0x75316420]  ;;  %v522_v25 = vadd.f32 %v870_v12, %v458_v17  ;;  %v461_v27 = vrot.slane %v873_v20, 4 }
  0x15   : > { %v1018_v14 = vadd.f32 1e-05, %v246_v8  ;;  %v552_v26 = vmul.f32 0.5, %v520_v19  ;;  %v523_v28 = vadd.f32 %v871_v18, %v459_v21  ;;  %v874_v29 = vld.sshfl [vmem:[%s1012_s26 + $0x38] sm:$0xff pattern:$0x75316420] }
  0x16   : > { %v583_v30 = vadd.f32 %v553_v23, %v551_v22  ;;  %v460_v31 = vrot.slane %v872_v24, 4  ;;  %v462_v32 = vrot.slane %v874_v29, 4  ;;  %v875_v33 = vld.sshfl [vmem:[%s1012_s26 + $0x40] sm:$0xff pattern:$0x75316420]  ;;  %v554_v34 = vmul.f32 0.5, %v522_v25 }
  0x17   : > { %927 = vrsqrt.f32 %v1018_v14  ;;  %vm255_vm0 = vweird.f32 %v1018_v14  ;;  %v525_v35 = vadd.f32 %v873_v20, %v461_v27  ;;  %v555_v36 = vmul.f32 0.5, %v523_v28  ;;  %v877_v37 = vld.sshfl [vmem:[%s1012_s26 + $0x50] sm:$0xff pattern:$0x75316420] }
  0x18   : > { %v463_v38 = vrot.slane %v875_v33, 4  ;;  %v1028_v39 = vmul.f32 0.5, %v583_v30  ;;  %v524_v40 = vadd.f32 %v872_v24, %v460_v31  ;;  %v526_v41 = vadd.f32 %v874_v29, %v462_v32  ;;  %v876_v43 = vld.sshfl [vmem:[%s1012_s26 + $0x48] sm:$0xff pattern:$0x75316420] }
  0x19   : > { %v465_v42 = vrot.slane %v877_v37, 4  ;;  %v584_v44 = vadd.f32 %v554_v34, %v552_v26  ;;  %v557_v45 = vmul.f32 0.5, %v525_v35  ;;  %v878_v47 = vld.sshfl [vmem:[%s1012_s26 + $0x58] sm:$0xff pattern:$0x75316420]  ;;  %v464_v48 = vrot.slane %v876_v43, 4 }
  0x1a   : > { %v527_v46 = vadd.f32 %v875_v33, %v463_v38  ;;  %v556_v50 = vmul.f32 0.5, %v524_v40  ;;  %v558_v51 = vmul.f32 0.5, %v526_v41  ;;  %v466_v53 = vrot.slane %v878_v47, 4  ;;  %v879_v54 = vld.sshfl [vmem:[%s1012_s26 + $0x60] sm:$0xff pattern:$0x75316420] }
  0x1b   : > { %v529_v52 = vadd.f32 %v877_v37, %v465_v42  ;;  %v1034_v56 = vmul.f32 0.5, %v584_v44  ;;  %v585_v57 = vadd.f32 %v557_v45, %v555_v36  ;;  %v881_v58 = vld.sshfl [vmem:[%s1012_s26 + $0x70] sm:$0xff pattern:$0x75316420]  ;;  %v528_v62 = vadd.f32 %v876_v43, %v464_v48  ;;  %v247_v33 = vld [vmem:[%s1153_s2] sm:$0x1] }
  0x1c   : > { %v586_v59 = vadd.f32 %v558_v51, %v556_v50  ;;  %v559_v60 = vmul.f32 0.5, %v527_v46  ;;  %v880_v63 = vld.sshfl [vmem:[%s1012_s26 + $0x68] sm:$0xff pattern:$0x75316420]  ;;  %v530_v3 = vadd.f32 %v878_v47, %v466_v53  ;;  %v467_v4 = vrot.slane %v879_v54, 4 }
  0x1d   : > { %v928_v49 = vpop.eup %927  ;;  %v561_v61 = vmul.f32 0.5, %v529_v52  ;;  %v1038_v1 = vmul.f32 0.5, %v585_v57  ;;  %v882_v5 = vld.sshfl [vmem:[%s1012_s26 + $0x78] sm:$0xff pattern:$0x75316420]  ;;  %v560_v8 = vmul.f32 0.5, %v528_v62 }
  0x1e   : > { %v250_v55 = vmul.f32 %v928_v49, %v1018_v14  ;;  %vm256_vm1 = vweird.f32 %v928_v49  ;;  %v1041_v6 = vmul.f32 0.5, %v586_v59  ;;  %v469_v9 = vrot.slane %v881_v58, 4  ;;  %v883_v10 = vld.sshfl [vmem:[%s1012_s26 + $0x80] sm:$0xff pattern:$0x75316420] }
  0x1f   : > { %v587_v7 = vadd.f32 %v561_v61, %v559_v60  ;;  %v562_v12 = vmul.f32 0.5, %v530_v3  ;;  %v531_v13 = vadd.f32 %v879_v54, %v467_v4  ;;  %v468_v15 = vrot.slane %v880_v63, 4  ;;  %v885_v16 = vld.sshfl [vmem:[%s1012_s26 + $0x90] sm:$0xff pattern:$0x75316420]  ;;  %vm1050_vm2 = vmor %vm255_vm0, %vm256_vm1 }
  0x20   : > { %v251_v0 = vmul.f32 %v928_v49, %v250_v55  ;;  %v533_v18 = vadd.f32 %v881_v58, %v469_v9  ;;  %v470_v19 = vrot.slane %v882_v5, 4  ;;  %v471_v20 = vrot.slane %v883_v10, 4  ;;  %v884_v21 = vld.sshfl [vmem:[%s1012_s26 + $0x88] sm:$0xff pattern:$0x75316420] }
  0x21   : > { %v603_v17 = vmul.f32 0.5, %v587_v7  ;;  %v588_v23 = vadd.f32 %v562_v12, %v560_v8  ;;  %v563_v24 = vmul.f32 0.5, %v531_v13  ;;  %v532_v25 = vadd.f32 %v880_v63, %v468_v15  ;;  %v886_v26 = vld.sshfl [vmem:[%s1012_s26 + $0x98] sm:$0xff pattern:$0x75316420] }
  0x22   : > { %v252_v11 = vmul.f32 0.5, %v251_v0  ;;  %v565_v28 = vmul.f32 0.5, %v533_v18  ;;  %v534_v29 = vadd.f32 %v882_v5, %v470_v19  ;;  %v473_v30 = vrot.slane %v885_v16, 4  ;;  %v887_v32 = vld.sshfl [vmem:[%s1012_s26 + $0xa0] sm:$0xff pattern:$0x75316420] }
  0x23   : > { %v535_v31 = vadd.f32 %v883_v10, %v471_v20  ;;  %v604_v35 = vmul.f32 0.5, %v588_v23  ;;  %v564_v36 = vmul.f32 0.5, %v532_v25  ;;  %v472_v37 = vrot.slane %v884_v21, 4  ;;  %v889_v42 = vld.sshfl [vmem:[%s1012_s26 + $0xb0] sm:$0xff pattern:$0x75316420] }
  0x24   : > { %v253_v22 = vsub.f32 1.5, %v252_v11  ;;  %v589_v14 = vadd.f32 %v565_v28, %v563_v24  ;;  %v566_v38 = vmul.f32 0.5, %v534_v29  ;;  %v537_v40 = vadd.f32 %v885_v16, %v473_v30  ;;  %v1062_v52 = vld.sshfl [vmem:[%s1012_s26 + $0xa8] sm:$0xff pattern:$0x75316420] }
  0x25   : > { %v567_v41 = vmul.f32 0.5, %v535_v31  ;;  %v474_v44 = vrot.slane %v886_v26, 4  ;;  %v536_v45 = vadd.f32 %v884_v21, %v472_v37  ;;  %v475_v46 = vrot.slane %v887_v32, 4  ;;  %v260_v53 = vld [vmem:[%s1154_s3] sm:$0x1] }
  0x26   : > { %v254_v34 = vmul.f32 %v928_v49, %v253_v22  ;;  %v605_v48 = vmul.f32 0.5, %v589_v14  ;;  %v590_v50 = vadd.f32 %v566_v38, %v564_v36  ;;  %v569_v51 = vmul.f32 0.5, %v537_v40  ;;  %v891_v38 = vld.sshfl [vmem:[%s1012_s26 + $0xc0] sm:$0xff pattern:$0x75316420] }
  0x27   : > { %v538_v54 = vadd.f32 %v886_v26, %v474_v44  ;;  %v568_v55 = vmul.f32 0.5, %v536_v45  ;;  %v477_v57 = vrot.slane %v889_v42, 4  ;;  %v539_v58 = vadd.f32 %v887_v32, %v475_v46  ;;  %v892_v44 = vld.sshfl [vmem:[%s1012_s26 + $0xc8] sm:$0xff pattern:$0x75316420] }
  0x28   : > { %v258_v43 = vsel %vm1050_vm2, %v928_v49, %v254_v34  ;;  %v606_v60 = vmul.f32 0.5, %v590_v50  ;;  %v591_v61 = vadd.f32 %v569_v51, %v567_v41  ;;  %v476_v3 = vrot.slane %v1062_v52, 4  ;;  %v894_v50 = vld.sshfl [vmem:[%s1012_s26 + $0xd8] sm:$0xff pattern:$0x75316420] }
  0x29   : > { %v259_v47 = vmul.f32 %v258_v43, %v247_v33  ;;  %v570_v62 = vmul.f32 0.5, %v538_v54  ;;  %v541_v63 = vadd.f32 %v889_v42, %v477_v57  ;;  %v571_v0 = vmul.f32 0.5, %v539_v58  ;;  %v890_v33 = vld.sshfl [vmem:[%s1012_s26 + $0xb8] sm:$0xff pattern:$0x75316420] }
  0x2a   : > { %v607_v10 = vmul.f32 0.5, %v591_v61  ;;  %v893_v43 = vld.sshfl [vmem:[%s1012_s26 + $0xd0] sm:$0xff pattern:$0x75316420]  ;;  %v478_v54 = vrot.slane %v890_v33, 4 }
  0x2b   : > { %v261_v59 = vmul.f32 %v259_v47, %v1002_v2  ;;  %v1068_v49 = vperm.slane %v259_v47, 0  ;;  %v592_v11 = vadd.f32 %v570_v62, %v568_v55  ;;  %v479_v62 = vrot.slane %v891_v38, 4 }
  0x2c   : > { %v542_v61 = vadd.f32 %v890_v33, %v478_v54 }
  0x2d   : > { %v262_v4 = vsub.f32 %v260_v53, %v261_v59  ;;  %v620_v5 = vmul.f32 %v1068_v49, %v1028_v39  ;;  %v1074_v7 = vrot.slane %v1068_v49, 4  ;;  %v622_v8 = vmul.f32 %v1068_v49, %v1038_v1 }
  0x2e   : > { %v624_v2 = vmul.f32 %v1068_v49, %v603_v17  ;;  %v626_v9 = vmul.f32 %v1068_v49, %v605_v48  ;;  %v628_v1 = vmul.f32 %v1068_v49, %v607_v10  ;;  %v608_v18 = vmul.f32 0.5, %v592_v11 }
  0x2f   : > { %v1080_v12 = vperm.slane %v262_v4, 0  ;;  %v621_v13 = vmul.f32 %v1074_v7, %v1034_v56  ;;  %v623_v39 = vmul.f32 %v1074_v7, %v1041_v6  ;;  %v625_v15 = vmul.f32 %v1074_v7, %v604_v35 }
  0x30   : > { %v627_v16 = vmul.f32 %v1074_v7, %v606_v60  ;;  %v573_v17 = vmul.f32 0.5, %v541_v63  ;;  %v629_v23 = vmul.f32 %v1074_v7, %v608_v18  ;;  %v540_v60 = vadd.f32 %v1062_v52, %v476_v3  ;;  %v895_v63 = vld.sshfl [vmem:[%s1012_s26 + $0xe0] sm:$0xff pattern:$0x75316420] }
  0x31   : > { %v641_v19 = vadd.f32 %v1080_v12, %v620_v5  ;;  %v1091_v20 = vrot.slane %v1080_v12, 4  ;;  %v643_v21 = vadd.f32 %v1080_v12, %v622_v8  ;;  %v645_v56 = vadd.f32 %v1080_v12, %v624_v2 }
  0x32   : > { %v647_v22 = vadd.f32 %v1080_v12, %v626_v9  ;;  %v649_v6 = vadd.f32 %v1080_v12, %v628_v1  ;;  %v593_v24 = vadd.f32 %v573_v17, %v571_v0  ;;  %v481_v5 = vrot.slane %v893_v43, 4  ;;  %v898_v1 = vld.sshfl [vmem:[%s1012_s26 + $0xf8] sm:$0xff pattern:$0x75316420] }
  0x33   : > { %vm657_vm3 = vcmp.ge.f32.partialorder %v641_v19, 0.0  ;;  %v673_v25 = vmul.f32 0.2, %v641_v19  ;;  %v642_v26 = vadd.f32 %v1091_v20, %v621_v13  ;;  %vm659_vm4 = vcmp.ge.f32.partialorder %v643_v21, 0.0 }
  0x34   : > { %v675_v27 = vmul.f32 0.2, %v643_v21  ;;  %v644_v28 = vadd.f32 %v1091_v20, %v623_v39  ;;  %vm661_vm5 = vcmp.ge.f32.partialorder %v645_v56, 0.0  ;;  %v677_v29 = vmul.f32 0.2, %v645_v56 }
  0x35   : > { %v689_v30 = vsel %vm657_vm3, %v641_v19, %v673_v25  ;;  %vm658_vm6 = vcmp.ge.f32.partialorder %v642_v26, 0.0  ;;  %v674_v31 = vmul.f32 0.2, %v642_v26  ;;  %v646_v32 = vadd.f32 %v1091_v20, %v625_v15  ;;  %v897_v13 = vld.sshfl [vmem:[%s1012_s26 + $0xf0] sm:$0xff pattern:$0x75316420] }
  0x36   : > { %721 = vst [vmem:[#allocation1] ss:$2 sm:$0xff] %v689_v30  ;;  %v691_v34 = vsel %vm659_vm4, %v643_v21, %v675_v27  ;;  %vm660_vm7 = vcmp.ge.f32.partialorder %v644_v28, 0.0  ;;  %v676_v35 = vmul.f32 0.2, %v644_v28  ;;  %v693_v36 = vsel %vm661_vm5, %v645_v56, %v677_v29 }
  0x37   : > { %v690_v37 = vsel %vm658_vm6, %v642_v26, %v674_v31  ;;  %726 = vst [vmem:[#allocation1 + $0x10] ss:$2 sm:$0xff] %v691_v34  ;;  %vm662_vm8 = vcmp.ge.f32.partialorder %v646_v32, 0.0  ;;  %v678_v14 = vmul.f32 0.2, %v646_v32  ;;  %vm663_vm9 = vcmp.ge.f32.partialorder %v647_v22, 0.0 }
  0x38   : > { %723 = vst [vmem:[#allocation1 + $0x1] ss:$2 sm:$0xff] %v690_v37  ;;  %v692_v40 = vsel %vm660_vm7, %v644_v28, %v676_v35  ;;  %v679_v41 = vmul.f32 0.2, %v647_v22  ;;  %v648_v42 = vadd.f32 %v1091_v20, %v627_v16  ;;  %vm665_vm10 = vcmp.ge.f32.partialorder %v649_v6, 0.0 }
  0x39   : > { %728 = vst [vmem:[#allocation1 + $0x11] ss:$2 sm:$0xff] %v692_v40  ;;  %v694_v45 = vsel %vm662_vm8, %v646_v32, %v678_v14  ;;  %v681_v46 = vmul.f32 0.2, %v649_v6  ;;  %v650_v47 = vadd.f32 %v1091_v20, %v629_v23  ;;  %v609_v48 = vmul.f32 0.5, %v593_v24 }
  0x3a   : > { %731 = vst [vmem:[#allocation1 + $0x20] ss:$2 sm:$0xff] %v693_v36  ;;  %v695_v51 = vsel %vm663_vm9, %v647_v22, %v679_v41  ;;  %vm664_vm11 = vcmp.ge.f32.partialorder %v648_v42, 0.0  ;;  %v680_v53 = vmul.f32 0.2, %v648_v42  ;;  %v480_v8 = vrot.slane %v892_v44, 4 }
  0x3b   : > { %733 = vst [vmem:[#allocation1 + $0x21] ss:$2 sm:$0xff] %v694_v45  ;;  %v697_v55 = vsel %vm665_vm10, %v649_v6, %v681_v46  ;;  %vm666_vm12 = vcmp.ge.f32.partialorder %v650_v47, 0.0  ;;  %v682_v57 = vmul.f32 0.2, %v650_v47  ;;  %v630_v58 = vmul.f32 %v1068_v49, %v609_v48 }
  0x3c   : > { %736 = vst [vmem:[#allocation1 + $0x30] ss:$2 sm:$0xff] %v695_v51  ;;  %v696_v59 = vsel %vm664_vm11, %v648_v42, %v680_v53  ;;  %v572_v2 = vmul.f32 0.5, %v540_v60  ;;  %v574_v9 = vmul.f32 0.5, %v542_v61  ;;  %v543_v10 = vadd.f32 %v891_v38, %v479_v62 }
  0x3d   : > { %738 = vst [vmem:[#allocation1 + $0x31] ss:$2 sm:$0xff] %v696_v59  ;;  %v698_v0 = vsel %vm666_vm12, %v650_v47, %v682_v57  ;;  %v651_v4 = vadd.f32 %v1080_v12, %v630_v58  ;;  %v482_v11 = vrot.slane %v894_v50, 4  ;;  %v545_v3 = vadd.f32 %v893_v43, %v481_v5  ;;  %v896_v16 = vld.sshfl [vmem:[%s1012_s26 + $0xe8] sm:$0xff pattern:$0x75316420] }
  0x3e   : > { %v544_v15 = vadd.f32 %v892_v44, %v480_v8  ;;  %v594_v17 = vadd.f32 %v574_v9, %v572_v2  ;;  %v575_v19 = vmul.f32 0.5, %v543_v10  ;;  %v483_v23 = vrot.slane %v895_v63, 4 }
  0x3f   : > { %v724_v39 = vld.sshfl [vmem:[#allocation1] sm:$0xff pattern:$0x75316420]  ;;  %vm667_vm13 = vcmp.ge.f32.partialorder %v651_v4, 0.0  ;;  %v683_v52 = vmul.f32 0.2, %v651_v4  ;;  %v546_v21 = vadd.f32 %v894_v50, %v482_v11 }
  0x40   : > { %740 = vst [vmem:[#allocation1] ss:$2 sm:$0xff] %v697_v55  ;;  %v729_v18 = vld.sshfl [vmem:[#allocation1 + $0x10] sm:$0xff pattern:$0x75316420]  ;;  %v577_v22 = vmul.f32 0.5, %v545_v3  ;;  %v547_v29 = vadd.f32 %v895_v63, %v483_v23 }
  0x41   : > { %741 = vst [vmem:[#allocation1 + $0x1] ss:$2 sm:$0xff] %v698_v0  ;;  %v699_v56 = vsel %vm667_vm13, %v651_v4, %v683_v52  ;;  %v576_v6 = vmul.f32 0.5, %v544_v15  ;;  %v610_v24 = vmul.f32 0.5, %v594_v17  ;;  %v578_v27 = vmul.f32 0.5, %v546_v21 }
  0x42   : > { %743 = vst [vmem:[#allocation1 + $0x10] ss:$2 sm:$0xff] %v699_v56  ;;  %v734_v25 = vld.sshfl [vmem:[#allocation1 + $0x20] sm:$0xff pattern:$0x75316420]  ;;  %v595_v26 = vadd.f32 %v577_v22, %v575_v19  ;;  %v485_v28 = vrot.slane %v897_v13, 4 }
  0x43   : > { %760 = vst [vmem:[%s1122_s8] sm:$0xff] %v724_v39  ;;  %v631_v30 = vmul.f32 %v1074_v7, %v610_v24  ;;  %v484_v32 = vrot.slane %v896_v16, 4  ;;  %v486_v33 = vrot.slane %v898_v1, 4  ;;  %v596_v35 = vadd.f32 %v578_v27, %v576_v6 }
  0x44   : > { %v739_v31 = vld.sshfl [vmem:[#allocation1 + $0x30] sm:$0xff pattern:$0x75316420]  ;;  %761 = vst [vmem:[%s1122_s8 + $0x8] sm:$0xff] %v729_v18  ;;  %v611_v34 = vmul.f32 0.5, %v595_v26  ;;  %v549_v36 = vadd.f32 %v897_v13, %v485_v28  ;;  %v579_v37 = vmul.f32 0.5, %v547_v29 }
  0x45   : > { %762 = vst [vmem:[%s1122_s8 + $0x10] sm:$0xff] %v734_v25  ;;  %v652_v14 = vadd.f32 %v1091_v20, %v631_v30  ;;  %v548_v38 = vadd.f32 %v896_v16, %v484_v32  ;;  %v550_v40 = vadd.f32 %v898_v1, %v486_v33  ;;  %v612_v42 = vmul.f32 0.5, %v596_v35 }
  0x46   : > { %763 = vst [vmem:[%s1122_s8 + $0x18] sm:$0xff] %v739_v31  ;;  %v632_v41 = vmul.f32 %v1068_v49, %v611_v34  ;;  %v581_v43 = vmul.f32 0.5, %v549_v36 }
  0x47   : > { %vm668_vm14 = vcmp.ge.f32.partialorder %v652_v14, 0.0  ;;  %v684_v44 = vmul.f32 0.2, %v652_v14  ;;  %v580_v45 = vmul.f32 0.5, %v548_v38  ;;  %v582_v46 = vmul.f32 0.5, %v550_v40 }
  0x48   : > { %v653_v47 = vadd.f32 %v1080_v12, %v632_v41  ;;  %v633_v48 = vmul.f32 %v1074_v7, %v612_v42  ;;  %v597_v50 = vadd.f32 %v581_v43, %v579_v37  ;;  %v742_v51 = vld.sshfl [vmem:[#allocation1] sm:$0xff pattern:$0x75316420] }
  0x49   : > { %v700_v53 = vsel %vm668_vm14, %v652_v14, %v684_v44  ;;  %v598_v54 = vadd.f32 %v582_v46, %v580_v45  ;;  %764 = vst [vmem:[%s1122_s8 + $0x20] sm:$0xff] %v742_v51 }
  0x4a   : > { %744 = vst [vmem:[#allocation1 + $0x11] ss:$2 sm:$0xff] %v700_v53  ;;  %vm669_vm15 = vcmp.ge.f32.partialorder %v653_v47, 0.0  ;;  %v685_v55 = vmul.f32 0.2, %v653_v47  ;;  %v654_v57 = vadd.f32 %v1091_v20, %v633_v48  ;;  %v613_v58 = vmul.f32 0.5, %v597_v50 }
  0x4b   : > { %v614_v59 = vmul.f32 0.5, %v598_v54 }
  0x4c   : > { %v701_v60 = vsel %vm669_vm15, %v653_v47, %v685_v55  ;;  %vm670_vm0 = vcmp.ge.f32.partialorder %v654_v57, 0.0  ;;  %v686_v61 = vmul.f32 0.2, %v654_v57  ;;  %v634_v62 = vmul.f32 %v1068_v49, %v613_v58 }
  0x4d   : > { %746 = vst [vmem:[#allocation1 + $0x20] ss:$2 sm:$0xff] %v701_v60  ;;  %v635_v63 = vmul.f32 %v1074_v7, %v614_v59 }
  0x4e   : > { %v702_v0 = vsel %vm670_vm0, %v654_v57, %v686_v61  ;;  %v655_v4 = vadd.f32 %v1080_v12, %v634_v62 }
  0x4f   : > { %747 = vst [vmem:[#allocation1 + $0x21] ss:$2 sm:$0xff] %v702_v0  ;;  %v656_v5 = vadd.f32 %v1091_v20, %v635_v63 }
  0x50   : > { %vm671_vm1 = vcmp.ge.f32.partialorder %v655_v4, 0.0  ;;  %v687_v8 = vmul.f32 0.2, %v655_v4 }
  0x51   : > { %vm672_vm2 = vcmp.ge.f32.partialorder %v656_v5, 0.0  ;;  %v688_v2 = vmul.f32 0.2, %v656_v5  ;;  %v745_v9 = vld.sshfl [vmem:[#allocation1 + $0x10] sm:$0xff pattern:$0x75316420] }
  0x52   : > { %v703_v10 = vsel %vm671_vm1, %v655_v4, %v687_v8  ;;  %765 = vst [vmem:[%s1122_s8 + $0x28] sm:$0xff] %v745_v9 }
  0x53   : > { %749 = vst [vmem:[#allocation1 + $0x30] ss:$2 sm:$0xff] %v703_v10  ;;  %v704_v49 = vsel %vm672_vm2, %v656_v5, %v688_v2 }
  0x54   : > { %750 = vst [vmem:[#allocation1 + $0x31] ss:$2 sm:$0xff] %v704_v49 }
  0x56   : > { %v748_v11 = vld.sshfl [vmem:[#allocation1 + $0x20] sm:$0xff pattern:$0x75316420] }
  0x57   : > { %766 = vst [vmem:[%s1122_s8 + $0x30] sm:$0xff] %v748_v11 }
  0x5b   : > { %v751_v7 = vld.sshfl [vmem:[#allocation1 + $0x30] sm:$0xff pattern:$0x75316420] }
  0x5c   : > { %767 = vst [vmem:[%s1122_s8 + $0x38] sm:$0xff] %v751_v7 }
  0x5d PF: > { %s14_s17 = sadd.s32 1, %s951_s17   ;;  %s1158_s15 = smov %s947_s16 }
  0x5e   : > { %p11_p5 = scmp.ge.s32.totalorder %s14_s17, 4   ;;  %s1159_s16 = smov %s1161_s18 }
  0x60   :  { %13 = sbr.rel (!%p11_p5) target bundleno = 2 (0x2), region = 73 }

// kernel: downblock_forward.4
= control target key start
LH: loop header
LB: loop body
LE: loop exit
PB: predicated region body
PF: predicated region fallthrough
CT: control target
= control target key end

     0   :  { %s2769_s12 = smov 0   ;;  %s4067_s0 = inlined_call_operand.vmem [shape: bf16[2,18,18,4], index: 0, kind: input, shape index: {}]   ;;  %s4068_s1 = inlined_call_operand.vmem [shape: bf16[36,128], index: 1, kind: input, shape index: {}]   ;;  %s4069_s2 = inlined_call_operand.vmem [shape: f32[2,16,16,128], index: 2, kind: output, shape index: {0}]   ;;  %s4070_s3 = inlined_call_operand.vmem [shape: f32[2,128], index: 3, kind: output, shape index: {1}]  }
   0x1 LB: > { %s2775_s13 = sadd.s32 4294967295, %s2746_s12   ;;  %p2458_p0 = scmp.ge.s32.totalorder %s2746_s12, 1  ;;  %s2746_s12 = sphi %s2769_s12, %s14_s12  }
   0x2   : > { %p135_p1 = scmp.lt.s32.totalorder %s2746_s12, 3 }
   0x4   : > { %p136_p2 = pnand %p2458_p0, %p135_p1 }
   0x6   : > { %139 = sbr.rel (%p136_p2) target bundleno = 835 (0x343), region = 28 }
   0xb   : > { %v612_v0 = vld [vmem:[%s4068_s1] sm:$0xc]  ;;  %p159_p3 = scmp.lt.s32.totalorder %s2775_s13, 1  ;;  %v1158_v3 = vld [vmem:[%s4068_s1 + $0x4] sm:$0x3]  ;;  %vm714_vm0 = vcmask 1041408  }
   0xc   : > { %v662_v1 = vunpack.c.l.b16 %v612_v0  ;;  %v224_v4 = vld [vmem:[%s4068_s1] sm:$0x3]  ;;  %v1540_v5 = vld [vmem:[%s4068_s1 + $0x8] sm:$0x3]  ;;  %vm225_vm1 = vsmask.f32 3328 }
   0xd   : > { %s160_s16 = scalar_select %p159_p3, %s2775_s13, 1  ;;  %vm226_vm2 = vsmask.f32 7440  ;;  %v1256_v7 = vsel %vm714_vm0, %v1158_v3, 0  ;;  %v1379_v8 = vld [vmem:[%s4068_s1 + $0x4] sm:$0xc] }
   0xe   : > { %v663_v2 = vpack.c.b16 %v662_v1, %v662_v1  ;;  %v936_v9 = vsel %vm714_vm0, %v224_v4, 0  ;;  %v1548_v13 = vsel %vm714_vm0, %v1540_v5, 0  ;;  %v1386_v22 = vunpack.c.l.b16 %v1379_v8  ;;  %vm2831_vm4 = vmor %vm225_vm1, %vm226_vm2  ;;  %p2696_p4 = scmp.ne.s32.totalorder %s2775_s13, 0 }
   0xf   : > { %s2721_s21 = smul.u32 216, %s160_s16  ;;  %s2699_s22 = sshll.u32 %s160_s16, 8  ;;  %vm665_vm3 = vcmask 31744   ;;  %vm1043_vm5 = vcmask 1042432   ;;  %vm1044_vm6 = vcmask 1046532  }
  0x10   : > { %v664_v6 = vrot.slane %v663_v2, 2  ;;  %s2796_s27 = scalar_lea.vmem %s4069_s2, %s2699_s22  ;;  %v1387_v42 = vpack.c.b16 %v1386_v22, %v1386_v22  ;;  %vm3134_vm7 = vmor %vm1043_vm5, %vm1044_vm6 }
  0x11   : > { %s2801_s30 = scalar_lea.vmem %s4067_s0, %s2721_s21 }
  0x12   : > { %v716_v10 = vsel %vm714_vm0, %v664_v6, 0  ;;  %v2810_v11 = vld [vmem:[%s2801_s30 + $0x30] sm:$0xf]  ;;  %v2813_v12 = vld [vmem:[%s2801_s30 + $0x34] sm:$0xf]  ;;  %v1388_v5 = vrot.slane %v1387_v42, 2 }
  0x13   : > { %2718 = vmatpush.bf16.msra.mxu1 %v716_v10  ;;  %2719 = vmatpush.bf16.msra.mxu2 %v716_v10  ;;  %v2817_v14 = vld [vmem:[%s2801_s30 + $0x38] sm:$0x1]  ;;  %v325_v15 = vshrl.u32 %v2810_v11, 16  ;;  %v328_v16 = vshll.u32 %v2810_v11, 16  ;;  %v334_v17 = vshll.u32 %v2813_v12, 16  ;;  %v338_v18 = vshrl.u32 %v2813_v12, 16 }
  0x14   : > { %2720 = vmatpush.bf16.msra.mxu3 %v716_v10  ;;  %725 = vmatpush.bf16.msra.mxu0 %v716_v10  ;;  %v344_v19 = vshll.u32 %v2817_v14, 16  ;;  %v194_v20 = vld [vmem:[%s2801_s30 + $0x60] sm:$0xf]  ;;  %v195_v21 = vld [vmem:[%s2801_s30 + $0x64] sm:$0xf] }
  0x15   : > { %v327_v23 = vrot.slane %v325_v15, 4  ;;  %v330_v24 = vrot.slane %v328_v16, 5  ;;  %v336_v25 = vrot.slane %v334_v17, 5  ;;  %v340_v26 = vrot.slane %v338_v18, 4  ;;  %v196_v27 = vld [vmem:[%s2801_s30 + $0x68] sm:$0x1] }
  0x16   : > { %v346_v28 = vrot.slane %v344_v19, 5  ;;  %v421_v29 = vshrl.u32 %v194_v20, 16  ;;  %v424_v30 = vshll.u32 %v194_v20, 16  ;;  %v430_v31 = vshll.u32 %v195_v21, 16  ;;  %v206_v36 = vld [vmem:[%s2801_s30 + $0x90] sm:$0xf] }
  0x17   : > { %1265 = vmatpush.bf16.msrb.mxu2 %v1256_v7  ;;  %945 = vmatpush.bf16.msrb.mxu1 %v936_v9  ;;  %v331_v32 = vor.u32 %v330_v24, %v327_v23  ;;  %v341_v33 = vor.u32 %v340_v26, %v336_v25  ;;  %v434_v34 = vshrl.u32 %v195_v21, 16  ;;  %v440_v35 = vshll.u32 %v196_v27, 16  ;;  %v207_v37 = vld [vmem:[%s2801_s30 + $0x94] sm:$0xf]  ;;  %v208_v54 = vld [vmem:[%s2801_s30 + $0x98] sm:$0x1] }
  0x18   : > { %1557 = vmatpush.bf16.msrb.mxu0 %v1548_v13  ;;  %v423_v39 = vrot.slane %v421_v29, 4  ;;  %v426_v40 = vrot.slane %v424_v30, 5  ;;  %v432_v41 = vrot.slane %v430_v31, 5  ;;  %v517_v48 = vshrl.u32 %v206_v36, 16  ;;  %v2841_v0 = vld [vmem:[%s2801_s30] sm:$0xf] }
  0x19   : > { %v332_v43 = vrot.slane %v331_v32, 4  ;;  %v342_v44 = vrot.slane %v341_v33, 4  ;;  %v436_v45 = vrot.slane %v434_v34, 4  ;;  %v442_v46 = vrot.slane %v440_v35, 5  ;;  %v2848_v4 = vld [vmem:[%s2801_s30 + $0x4] sm:$0xf] }
  0x1a   : > { %v427_v47 = vor.u32 %v426_v40, %v423_v39  ;;  %v520_v49 = vshll.u32 %v206_v36, 16  ;;  %v526_v50 = vshll.u32 %v207_v37, 16  ;;  %v530_v55 = vshrl.u32 %v207_v37, 16  ;;  %v2853_v10 = vld [vmem:[%s2801_s30 + $0x8] sm:$0x1] }
  0x1b   : > { %v337_v51 = vsel %vm2831_vm4, %v332_v43, %v336_v25  ;;  %v347_v52 = vsel %vm2831_vm4, %v342_v44, %v346_v28  ;;  %v437_v53 = vor.u32 %v436_v45, %v432_v41  ;;  %v519_v59 = vrot.slane %v517_v48, 4  ;;  %v2865_v26 = vld [vmem:[%s2801_s30 + $0x3c] sm:$0xf]  ;;  %v2872_v31 = vld [vmem:[%s2801_s30 + $0x40] sm:$0xf] }
  0x1c   : > { %v621_v56 = vunpack.c.l.b16 %v337_v51  ;;  %v622_v57 = vunpack.c.l.b16 %v347_v52  ;;  %v428_v58 = vrot.slane %v427_v47, 4  ;;  %v522_v61 = vrot.slane %v520_v49, 5  ;;  %v2877_v35 = vld [vmem:[%s2801_s30 + $0x44] sm:$0x1] }
  0x1d   : > { %v438_v60 = vrot.slane %v437_v53, 4  ;;  %v528_v62 = vrot.slane %v526_v50, 5  ;;  %v532_v63 = vrot.slane %v530_v55, 4  ;;  %v536_v3 = vshll.u32 %v208_v54, 16  ;;  %v2891_v50 = vld [vmem:[%s2801_s30 + $0x70] sm:$0xf] }
  0x1e   : > { %v2843_v1 = vpack.c.b16 %v622_v57, %v621_v56  ;;  %v433_v2 = vsel %vm2831_vm4, %v428_v58, %v432_v41  ;;  %v523_v8 = vor.u32 %v522_v61, %v519_v59  ;;  %v229_v16 = vshrl.u32 %v2841_v0, 16  ;;  %v2882_v41 = vld [vmem:[%s2801_s30 + $0x6c] sm:$0xf]  ;;  %v2898_v54 = vld [vmem:[%s2801_s30 + $0x74] sm:$0x1] }
  0x1f   : > { %v443_v6 = vsel %vm2831_vm4, %v438_v60, %v442_v46  ;;  %v629_v7 = vunpack.c.l.b16 %v433_v2  ;;  %v533_v9 = vor.u32 %v532_v63, %v528_v62  ;;  %v538_v15 = vrot.slane %v536_v3, 5 }
  0x20   : > { %2466 = vmatmul.msk.bf16.vlgmr.msra.gmra.mxu1 %vm665_vm3, %v2843_v1  ;;  %v630_v13 = vunpack.c.l.b16 %v443_v6  ;;  %v232_v17 = vshll.u32 %v2841_v0, 16  ;;  %v524_v18 = vrot.slane %v523_v8, 4  ;;  %v238_v20 = vshll.u32 %v2848_v4, 16 }
  0x21   : > { %v534_v19 = vrot.slane %v533_v9, 4  ;;  %v242_v21 = vshrl.u32 %v2848_v4, 16  ;;  %v231_v23 = vrot.slane %v229_v16, 4  ;;  %v248_v25 = vshll.u32 %v2853_v10, 16 }
  0x22   : > { %v2861_v22 = vpack.c.b16 %v630_v13, %v629_v7  ;;  %v234_v24 = vrot.slane %v232_v17, 5  ;;  %v529_v27 = vsel %vm2831_vm4, %v524_v18, %v528_v62  ;;  %v240_v29 = vrot.slane %v238_v20, 5  ;;  %v209_v7 = vld [vmem:[%s2801_s30 + $0x9c] sm:$0xf] }
  0x23   : > { %v539_v28 = vsel %vm2831_vm4, %v534_v19, %v538_v15  ;;  %v244_v30 = vrot.slane %v242_v21, 4  ;;  %v637_v32 = vunpack.c.l.b16 %v529_v27  ;;  %v250_v37 = vrot.slane %v248_v25, 5  ;;  %v210_v15 = vld [vmem:[%s2801_s30 + $0xa0] sm:$0xf] }
  0x24   : > { %4113 = vst [vmem:[#allocation2_spill] sm:$0xff] %v2861_v22  ;;  %2470 = vmatmul.msk.bf16.vlgmr.msra.gmra.mxu2 %vm665_vm3, %v2861_v22  ;;  %v638_v33 = vunpack.c.l.b16 %v539_v28  ;;  %v235_v34 = vor.u32 %v234_v24, %v231_v23  ;;  %v1393_v39 = vsel %vm714_vm0, %v1388_v5, 0  ;;  %v349_v40 = vshrl.u32 %v2865_v26, 16  ;;  %v211_v23 = vld [vmem:[%s2801_s30 + $0xa4] sm:$0x1] }
  0x25   : > { %v245_v36 = vor.u32 %v244_v30, %v240_v29  ;;  %1402 = vmatpush.bf16.msrb.mxu3 %v1393_v39  ;;  %v352_v44 = vshll.u32 %v2865_v26, 16  ;;  %v358_v45 = vshll.u32 %v2872_v31, 16  ;;  %v362_v48 = vshrl.u32 %v2872_v31, 16 }
  0x26   : > { %v2884_v42 = vpack.c.b16 %v638_v33, %v637_v32  ;;  %v236_v43 = vrot.slane %v235_v34, 4  ;;  %v351_v47 = vrot.slane %v349_v40, 4  ;;  %v368_v49 = vshll.u32 %v2877_v35, 16 }
  0x27   : > { %v246_v46 = vrot.slane %v245_v36, 4  ;;  %v354_v52 = vrot.slane %v352_v44, 5  ;;  %v360_v53 = vrot.slane %v358_v45, 5  ;;  %v445_v55 = vshrl.u32 %v2882_v41, 16  ;;  %v2916_v44 = vld [vmem:[%s2801_s30 + $0xc] sm:$0xf] }
  0x28   : > { %4114 = vst [vmem:[#allocation3_spill] sm:$0xff] %v2884_v42  ;;  %2474 = vmatmul.msk.bf16.vlgmr.msra.gmra.mxu3 %vm665_vm3, %v2884_v42  ;;  %v241_v51 = vsel %vm2831_vm4, %v236_v43, %v240_v29  ;;  %v364_v58 = vrot.slane %v362_v48, 4  ;;  %v370_v59 = vrot.slane %v368_v49, 5  ;;  %v448_v63 = vshll.u32 %v2882_v41, 16  ;;  %v2923_v48 = vld [vmem:[%s2801_s30 + $0x10] sm:$0xf] }
  0x29   : > { %v251_v56 = vsel %vm2831_vm4, %v246_v46, %v250_v37  ;;  %v613_v57 = vunpack.c.l.b16 %v241_v51  ;;  %v355_v61 = vor.u32 %v354_v52, %v351_v47  ;;  %v447_v62 = vrot.slane %v445_v55, 4  ;;  %v2926_v49 = vld [vmem:[%s2801_s30 + $0x14] sm:$0x1] }
  0x2a   : > { %v614_v60 = vunpack.c.l.b16 %v251_v56  ;;  %v365_v2 = vor.u32 %v364_v58, %v360_v53  ;;  %v454_v3 = vshll.u32 %v2891_v50, 16  ;;  %v458_v5 = vshrl.u32 %v2891_v50, 16 }
  0x2b   : > { %v464_v6 = vshll.u32 %v2898_v54, 16  ;;  %v356_v9 = vrot.slane %v355_v61, 4  ;;  %v450_v13 = vrot.slane %v448_v63, 5  ;;  %v541_v24 = vshrl.u32 %v209_v7, 16 }
  0x2c   : > { %v645_v8 = vpack.c.b16 %v614_v60, %v613_v57  ;;  %v366_v16 = vrot.slane %v365_v2, 4  ;;  %v456_v17 = vrot.slane %v454_v3, 5  ;;  %v460_v18 = vrot.slane %v458_v5, 4  ;;  %v2938_v2 = vld [vmem:[%s2801_s30 + $0x48] sm:$0xf] }
  0x2d   : > { %v466_v19 = vrot.slane %v464_v6, 5  ;;  %v361_v20 = vsel %vm2831_vm4, %v356_v9, %v360_v53  ;;  %v451_v21 = vor.u32 %v450_v13, %v447_v62  ;;  %v544_v25 = vshll.u32 %v209_v7, 16 }
  0x2e   : > { %2462 = vmatmul.msk.bf16.vlgmr.msra.gmra.mxu0 %vm665_vm3, %v645_v8  ;;  %v371_v27 = vsel %vm2831_vm4, %v366_v16, %v370_v59  ;;  %v623_v28 = vunpack.c.l.b16 %v361_v20  ;;  %v461_v29 = vor.u32 %v460_v18, %v456_v17  ;;  %v550_v30 = vshll.u32 %v210_v15, 16  ;;  %v2945_v8 = vld [vmem:[%s2801_s30 + $0x4c] sm:$0xf] }
  0x2f   : > { %v624_v32 = vunpack.c.l.b16 %v371_v27  ;;  %v452_v33 = vrot.slane %v451_v21, 4  ;;  %v543_v34 = vrot.slane %v541_v24, 4  ;;  %v546_v36 = vrot.slane %v544_v25, 5 }
  0x30   : > { %v462_v37 = vrot.slane %v461_v29, 4  ;;  %v552_v39 = vrot.slane %v550_v30, 5  ;;  %v554_v40 = vshrl.u32 %v210_v15, 16  ;;  %v560_v43 = vshll.u32 %v211_v23, 16 }
  0x31   : > { %v2918_v45 = vpack.c.b16 %v624_v32, %v623_v28  ;;  %v457_v46 = vsel %vm2831_vm4, %v452_v33, %v456_v17  ;;  %v547_v47 = vor.u32 %v546_v36, %v543_v34  ;;  %v253_v58 = vshrl.u32 %v2916_v44, 16  ;;  %v2959_v28 = vld [vmem:[%s2801_s30 + $0x78] sm:$0xf] }
  0x32   : > { %v467_v51 = vsel %vm2831_vm4, %v462_v37, %v466_v19  ;;  %v631_v52 = vunpack.c.l.b16 %v457_v46  ;;  %v556_v53 = vrot.slane %v554_v40, 4  ;;  %v562_v55 = vrot.slane %v560_v43, 5  ;;  %v2950_v19 = vld [vmem:[%s2801_s30 + $0x50] sm:$0x1] }
  0x33   : > { %2467 = vmatmul.msk.bf16.gmra.mxu1 %vm665_vm3, %v2918_v45  ;;  %v632_v56 = vunpack.c.l.b16 %v467_v51  ;;  %v548_v57 = vrot.slane %v547_v47, 4  ;;  %v256_v59 = vshll.u32 %v2916_v44, 16  ;;  %v262_v61 = vshll.u32 %v2923_v48, 16  ;;  %v2967_v47 = vld [vmem:[%s2801_s30 + $0x7c] sm:$0xf] }
  0x34   : > { %v557_v60 = vor.u32 %v556_v53, %v552_v39  ;;  %v266_v62 = vshrl.u32 %v2923_v48, 16  ;;  %v272_v63 = vshll.u32 %v2926_v49, 16  ;;  %v255_v6 = vrot.slane %v253_v58, 4  ;;  %v2970_v51 = vld [vmem:[%s2801_s30 + $0x80] sm:$0x1] }
  0x35   : > { %v2940_v3 = vpack.c.b16 %v632_v56, %v631_v52  ;;  %v553_v5 = vsel %vm2831_vm4, %v548_v57, %v552_v39  ;;  %v258_v7 = vrot.slane %v256_v59, 5  ;;  %v264_v15 = vrot.slane %v262_v61, 5 }
  0x36   : > { %v558_v9 = vrot.slane %v557_v60, 4  ;;  %v639_v13 = vunpack.c.l.b16 %v553_v5  ;;  %v268_v16 = vrot.slane %v266_v62, 4  ;;  %v274_v18 = vrot.slane %v272_v63, 5 }
  0x37   : > { %2471 = vmatmul.msk.bf16.gmra.mxu2 %vm665_vm3, %v2940_v3  ;;  %v259_v17 = vor.u32 %v258_v7, %v255_v6  ;;  %v373_v20 = vshrl.u32 %v2938_v2, 16  ;;  %v376_v21 = vshll.u32 %v2938_v2, 16  ;;  %v382_v25 = vshll.u32 %v2945_v8, 16  ;;  %v2982_v7 = vld [vmem:[%s2801_s30 + $0xa8] sm:$0xf] }
  0x38   : > { %v563_v23 = vsel %vm2831_vm4, %v558_v9, %v562_v55  ;;  %v269_v24 = vor.u32 %v268_v16, %v264_v15  ;;  %v386_v27 = vshrl.u32 %v2945_v8, 16  ;;  %v392_v39 = vshll.u32 %v2950_v19, 16  ;;  %4116 = vst [vmem:[#allocation5_spill] sm:$0xff] %v2982_v7  ;;  %v2989_v16 = vld [vmem:[%s2801_s30 + $0xac] sm:$0xf] }
  0x39   : > { %v640_v29 = vunpack.c.l.b16 %v563_v23  ;;  %v260_v30 = vrot.slane %v259_v17, 4  ;;  %v375_v32 = vrot.slane %v373_v20, 4  ;;  %v378_v33 = vrot.slane %v376_v21, 5  ;;  %4117 = vst [vmem:[#allocation6_spill] sm:$0xff] %v2989_v16  ;;  %v2994_v23 = vld [vmem:[%s2801_s30 + $0xb0] sm:$0x1] }
  0x3a   : > { %v270_v34 = vrot.slane %v269_v24, 4  ;;  %v384_v36 = vrot.slane %v382_v25, 5  ;;  %v388_v37 = vrot.slane %v386_v27, 4  ;;  %v469_v52 = vshrl.u32 %v2959_v28, 16  ;;  %4118 = vst [vmem:[#allocation7_spill] sm:$0xff] %v2994_v23 }
  0x3b   : > { %v2962_v40 = vpack.c.b16 %v640_v29, %v639_v13  ;;  %v265_v43 = vsel %vm2831_vm4, %v260_v30, %v264_v15  ;;  %v379_v46 = vor.u32 %v378_v33, %v375_v32  ;;  %v394_v57 = vrot.slane %v392_v39, 5 }
  0x3c   : > { %v275_v53 = vsel %vm2831_vm4, %v270_v34, %v274_v18  ;;  %v615_v55 = vunpack.c.l.b16 %v265_v43  ;;  %v389_v56 = vor.u32 %v388_v37, %v384_v36  ;;  %v471_v60 = vrot.slane %v469_v52, 4 }
  0x3d   : > { %4115 = vst [vmem:[#allocation4_spill] sm:$0xff] %v2962_v40  ;;  %2475 = vmatmul.msk.bf16.gmra.mxu3 %vm665_vm3, %v2962_v40  ;;  %v616_v58 = vunpack.c.l.b16 %v275_v53  ;;  %v380_v59 = vrot.slane %v379_v46, 4  ;;  %v472_v61 = vshll.u32 %v2959_v28, 16  ;;  %v478_v63 = vshll.u32 %v2967_v47, 16 }
  0x3e   : > { %v390_v62 = vrot.slane %v389_v56, 4  ;;  %v482_v5 = vshrl.u32 %v2967_v47, 16  ;;  %v488_v6 = vshll.u32 %v2970_v51, 16  ;;  %v565_v29 = vshrl.u32 %v2982_v7, 16 }
  0x3f   : > { %v2984_v9 = vpack.c.b16 %v616_v58, %v615_v55  ;;  %v385_v13 = vsel %vm2831_vm4, %v380_v59, %v384_v36  ;;  %v474_v15 = vrot.slane %v472_v61, 5  ;;  %v480_v20 = vrot.slane %v478_v63, 5  ;;  %v3003_v36 = vld [vmem:[%s2801_s30 + $0x18] sm:$0xf] }
  0x40   : > { %v395_v17 = vsel %vm2831_vm4, %v390_v62, %v394_v57  ;;  %v625_v18 = vunpack.c.l.b16 %v385_v13  ;;  %v484_v21 = vrot.slane %v482_v5, 4  ;;  %v490_v27 = vrot.slane %v488_v6, 5  ;;  %v3009_v57 = vld [vmem:[%s2801_s30 + $0x1c] sm:$0xf]  ;;  %v3022_v13 = vld [vmem:[%s2801_s30 + $0x54] sm:$0xf] }
  0x41   : > { %2463 = vmatmul.msk.bf16.gmra.mxu0 %vm665_vm3, %v2984_v9  ;;  %v626_v24 = vunpack.c.l.b16 %v395_v17  ;;  %v475_v25 = vor.u32 %v474_v15, %v471_v60  ;;  %v568_v32 = vshll.u32 %v2982_v7, 16  ;;  %v574_v33 = vshll.u32 %v2989_v16, 16  ;;  %v3016_v60 = vld [vmem:[%s2801_s30 + $0x20] sm:$0x1] }
  0x42   : > { %v485_v30 = vor.u32 %v484_v21, %v480_v20  ;;  %v578_v34 = vshrl.u32 %v2989_v16, 16  ;;  %v567_v43 = vrot.slane %v565_v29, 4  ;;  %v584_v46 = vshll.u32 %v2994_v23, 16  ;;  %v3102_v16 = vld [vmem:[%s2801_s30 + $0x2c] sm:$0x1] }
  0x43   : > { %v3005_v37 = vpack.c.b16 %v626_v24, %v625_v18  ;;  %v476_v39 = vrot.slane %v475_v25, 4  ;;  %v570_v53 = vrot.slane %v568_v32, 5  ;;  %v576_v55 = vrot.slane %v574_v33, 5  ;;  %v3031_v33 = vld [vmem:[%s2801_s30 + $0x58] sm:$0xf] }
  0x44   : > { %v486_v52 = vrot.slane %v485_v30, 4  ;;  %v580_v56 = vrot.slane %v578_v34, 4  ;;  %v586_v59 = vrot.slane %v584_v46, 5  ;;  %v277_v61 = vshrl.u32 %v3003_v36, 16 }
  0x45   : > { %4119 = vst [vmem:[#allocation8_spill] sm:$0xff] %v3005_v37  ;;  %2468 = vmatmul.msk.bf16.gmra.mxu1 %vm665_vm3, %v3005_v37  ;;  %v481_v58 = vsel %vm2831_vm4, %v476_v39, %v480_v20  ;;  %v571_v5 = vor.u32 %v570_v53, %v567_v43  ;;  %v280_v18 = vshll.u32 %v3003_v36, 16  ;;  %v286_v20 = vshll.u32 %v3009_v57, 16  ;;  %v3039_v53 = vld [vmem:[%s2801_s30 + $0x5c] sm:$0x1] }
  0x46   : > { %v491_v62 = vsel %vm2831_vm4, %v486_v52, %v490_v27  ;;  %v633_v63 = vunpack.c.l.b16 %v481_v58  ;;  %v581_v6 = vor.u32 %v580_v56, %v576_v55  ;;  %v279_v17 = vrot.slane %v277_v61, 4  ;;  %v3042_v56 = vld [vmem:[%s2801_s30 + $0x84] sm:$0xf] }
  0x47   : > { %v634_v15 = vunpack.c.l.b16 %v491_v62  ;;  %v572_v21 = vrot.slane %v571_v5, 4  ;;  %v290_v25 = vshrl.u32 %v3009_v57, 16  ;;  %v296_v27 = vshll.u32 %v3016_v60, 16  ;;  %4120 = vst [vmem:[#allocation9_spill] sm:$0xff] %v3042_v56 }
  0x48   : > { %v582_v24 = vrot.slane %v581_v6, 4  ;;  %v282_v30 = vrot.slane %v280_v18, 5  ;;  %v288_v32 = vrot.slane %v286_v20, 5  ;;  %v397_v34 = vshrl.u32 %v3022_v13, 16 }
  0x49   : > { %v3028_v29 = vpack.c.b16 %v634_v15, %v633_v63  ;;  %v577_v39 = vsel %vm2831_vm4, %v572_v21, %v576_v55  ;;  %v292_v46 = vrot.slane %v290_v25, 4  ;;  %v298_v52 = vrot.slane %v296_v27, 5 }
  0x4a   : > { %v587_v43 = vsel %vm2831_vm4, %v582_v24, %v586_v59  ;;  %v641_v58 = vunpack.c.l.b16 %v577_v39  ;;  %v283_v62 = vor.u32 %v282_v30, %v279_v17  ;;  %v399_v63 = vrot.slane %v397_v34, 4  ;;  %v3054_v30 = vld [vmem:[%s2801_s30 + $0x88] sm:$0xf] }
  0x4b   : > { %2472 = vmatmul.msk.bf16.gmra.mxu2 %vm665_vm3, %v3028_v29  ;;  %v642_v61 = vunpack.c.l.b16 %v587_v43  ;;  %v293_v5 = vor.u32 %v292_v46, %v288_v32  ;;  %v400_v55 = vshll.u32 %v3022_v13, 16  ;;  %v406_v59 = vshll.u32 %v3031_v33, 16  ;;  %v3061_v43 = vld [vmem:[%s2801_s30 + $0x8c] sm:$0x1] }
  0x4c   : > { %v410_v6 = vshrl.u32 %v3031_v33, 16  ;;  %v284_v18 = vrot.slane %v283_v62, 4  ;;  %v416_v20 = vshll.u32 %v3039_v53, 16  ;;  %v493_v21 = vshrl.u32 %v3042_v56, 16 }
  0x4d   : > { %v3049_v15 = vpack.c.b16 %v642_v61, %v641_v58  ;;  %v294_v24 = vrot.slane %v293_v5, 4  ;;  %v402_v25 = vrot.slane %v400_v55, 5  ;;  %v408_v27 = vrot.slane %v406_v59, 5 }
  0x4e   : > { %v412_v17 = vrot.slane %v410_v6, 4  ;;  %v289_v34 = vsel %vm2831_vm4, %v284_v18, %v288_v32  ;;  %v418_v39 = vrot.slane %v416_v20, 5  ;;  %v495_v46 = vrot.slane %v493_v21, 4  ;;  %v3069_v18 = vld [vmem:[%s2801_s30 + $0xb4] sm:$0xf] }
  0x4f   : > { %4121 = vst [vmem:[#allocation10_spill] sm:$0xff] %v3049_v15  ;;  %2476 = vmatmul.msk.bf16.gmra.mxu3 %vm665_vm3, %v3049_v15  ;;  %v496_v58 = vshll.u32 %v3042_v56, 16  ;;  %v299_v61 = vsel %vm2831_vm4, %v294_v24, %v298_v52  ;;  %v617_v62 = vunpack.c.l.b16 %v289_v34  ;;  %v403_v5 = vor.u32 %v402_v25, %v399_v63  ;;  %v3075_v63 = vld [vmem:[%s2801_s30 + $0xb8] sm:$0xf] }
  0x50   : > { %v413_v55 = vor.u32 %v412_v17, %v408_v27  ;;  %v618_v59 = vunpack.c.l.b16 %v299_v61  ;;  %v502_v15 = vshll.u32 %v3054_v30, 16  ;;  %v506_v32 = vshrl.u32 %v3054_v30, 16  ;;  %4122 = vst [vmem:[#allocation11_spill] sm:$0xff] %v3069_v18  ;;  %v3082_v61 = vld [vmem:[%s2801_s30 + $0xbc] sm:$0x1] }
  0x51   : > { %v498_v6 = vrot.slane %v496_v58, 5  ;;  %v404_v20 = vrot.slane %v403_v5, 4  ;;  %v512_v7 = vshll.u32 %v3061_v43, 16  ;;  %4123 = vst [vmem:[#allocation12_spill] sm:$0xff] %v3075_v63  ;;  %v589_v5 = vshrl.u32 %v3069_v18, 16 }
  0x52   : > { %v414_v21 = vrot.slane %v413_v55, 4  ;;  %v3072_v23 = vpack.c.b16 %v618_v59, %v617_v62  ;;  %v504_v24 = vrot.slane %v502_v15, 5  ;;  %v508_v34 = vrot.slane %v506_v32, 4  ;;  %4124 = vst [vmem:[#allocation13_spill] sm:$0xff] %v3082_v61 }
  0x53   : > { %v499_v52 = vor.u32 %v498_v6, %v495_v46  ;;  %v409_v25 = vsel %vm2831_vm4, %v404_v20, %v408_v27  ;;  %v514_v58 = vrot.slane %v512_v7, 5  ;;  %v591_v59 = vrot.slane %v589_v5, 4 }
  0x54   : > { %v419_v17 = vsel %vm2831_vm4, %v414_v21, %v418_v39  ;;  %2464 = vmatmul.msk.bf16.gmra.mxu0 %vm665_vm3, %v3072_v23  ;;  %v627_v15 = vunpack.c.l.b16 %v409_v25  ;;  %v509_v55 = vor.u32 %v508_v34, %v504_v24  ;;  %v592_v27 = vshll.u32 %v3069_v18, 16  ;;  %v3091_v39 = vld [vmem:[%s2801_s30 + $0x24] sm:$0xf] }
  0x55   : > { %v628_v46 = vunpack.c.l.b16 %v419_v17  ;;  %v500_v62 = vrot.slane %v499_v52, 4  ;;  %v598_v6 = vshll.u32 %v3075_v63, 16  ;;  %v602_v7 = vshrl.u32 %v3075_v63, 16  ;;  %v3099_v52 = vld [vmem:[%s2801_s30 + $0x28] sm:$0xf] }
  0x56   : > { %v510_v21 = vrot.slane %v509_v55, 4  ;;  %v608_v25 = vshll.u32 %v3082_v61, 16  ;;  %v594_v17 = vrot.slane %v592_v27, 5  ;;  %v1051_v63 = vrot.slane %v2853_v10, 5 }
  0x57   : > { %v3093_v32 = vpack.c.b16 %v628_v46, %v627_v15  ;;  %v505_v20 = vsel %vm2831_vm4, %v500_v62, %v504_v24  ;;  %v600_v5 = vrot.slane %v598_v6, 5  ;;  %v604_v18 = vrot.slane %v602_v7, 4 }
  0x58   : > { %v635_v34 = vunpack.c.l.b16 %v505_v20  ;;  %v515_v15 = vsel %vm2831_vm4, %v510_v21, %v514_v58  ;;  %v610_v24 = vrot.slane %v608_v25, 5  ;;  %v301_v46 = vshrl.u32 %v3091_v39, 16  ;;  %v1814_v21 = vld [vmem:[%s4068_s1 + $0xc] sm:$0x3] }
  0x59   : > { %4125 = vst [vmem:[#allocation14_spill] sm:$0xff] %v3093_v32  ;;  %2469 = vmatmul.msk.bf16.gmra.mxu1 %vm665_vm3, %v3093_v32  ;;  %v636_v62 = vunpack.c.l.b16 %v515_v15  ;;  %v595_v55 = vor.u32 %v594_v17, %v591_v59  ;;  %v605_v61 = vor.u32 %v604_v18, %v600_v5  ;;  %v304_v27 = vshll.u32 %v3091_v39, 16  ;;  %v1971_v17 = vld [vmem:[%s4068_s1 + $0xc] sm:$0xc] }
  0x5a   : > { %v303_v6 = vrot.slane %v301_v46, 4  ;;  %v310_v7 = vshll.u32 %v3099_v52, 16  ;;  %v314_v20 = vshrl.u32 %v3099_v52, 16  ;;  %v320_v10 = vshll.u32 %v3102_v16, 16  ;;  %v1679_v46 = vld [vmem:[%s4068_s1 + $0x8] sm:$0xc] }
  0x5b   : > { %v3114_v40 = vpack.c.b16 %v636_v62, %v635_v34  ;;  %v596_v42 = vrot.slane %v595_v55, 4  ;;  %v606_v56 = vrot.slane %v605_v61, 4  ;;  %v306_v58 = vrot.slane %v304_v27, 5  ;;  %v2114_v62 = vld [vmem:[%s4068_s1 + $0x10] sm:$0x3] }
  0x5c   : > { %v312_v59 = vrot.slane %v310_v7, 5  ;;  %v316_v18 = vrot.slane %v314_v20, 4  ;;  %v322_v25 = vrot.slane %v320_v10, 5 }
  0x5d   : > { %4126 = vst [vmem:[#allocation15_spill] sm:$0xff] %v3114_v40  ;;  %2473 = vmatmul.msk.bf16.gmra.mxu2 %vm665_vm3, %v3114_v40  ;;  %v601_v34 = vsel %vm2831_vm4, %v596_v42, %v600_v5  ;;  %v611_v61 = vsel %vm2831_vm4, %v606_v56, %v610_v24  ;;  %v307_v15 = vor.u32 %v306_v58, %v303_v6  ;;  %v2558_v42 = vrot.slane %v2841_v0, 9 }
  0x5e   : > { %v643_v55 = vunpack.c.l.b16 %v601_v34  ;;  %v644_v27 = vunpack.c.l.b16 %v611_v61  ;;  %v317_v7 = vor.u32 %v316_v18, %v312_v59  ;;  %v1048_v5 = vrot.slane %v2848_v4, 5 }
  0x5f   : > { %v308_v56 = vrot.slane %v307_v15, 4  ;;  %v1824_v24 = vsel %vm714_vm0, %v1814_v21, 0  ;;  %v1976_v6 = vunpack.c.l.b16 %v1971_v17  ;;  %v1684_v40 = vunpack.c.l.b16 %v1679_v46 }
  0x60   : > { %v3141_v10 = vpack.c.b16 %v644_v27, %v643_v55  ;;  %v318_v58 = vrot.slane %v317_v7, 4  ;;  %1833 = vmatpush.bf16.msra.mxu2 %v1824_v24  ;;  %v2122_v18 = vsel %vm714_vm0, %v2114_v62, 0  ;;  %v1049_v0 = vsel %vm3134_vm7, %v2558_v42, %v1048_v5  ;;  %v2700_v7 = vld [vmem:[%s2801_s30] sm:$0xff] }
  0x61   : > { %v313_v34 = vsel %vm2831_vm4, %v308_v56, %v312_v59  ;;  %v1050_v61 = vrot.slane %v1048_v5, 4  ;;  %v1977_v15 = vpack.c.b16 %v1976_v6, %v1976_v6  ;;  %2131 = vmatpush.bf16.msra.mxu0 %v2122_v18  ;;  %v1159_v17 = vunpack.c.l.b16 %v1049_v0  ;;  %v2701_v0 = vld [vmem:[%s2801_s30 + $0xc] sm:$0xff] }
  0x62   : > { %2477 = vmatmul.msk.bf16.gmra.mxu3 %vm665_vm3, %v3141_v10  ;;  %v323_v4 = vsel %vm2831_vm4, %v318_v58, %v322_v25  ;;  %v619_v21 = vunpack.c.l.b16 %v313_v34  ;;  %v1685_v46 = vpack.c.b16 %v1684_v40, %v1684_v40  ;;  %v2559_v27 = vrot.slane %v2916_v44, 9 }
  0x63   : > { %v620_v55 = vunpack.c.l.b16 %v323_v4  ;;  %v1052_v62 = vsel %vm3134_vm7, %v1050_v61, %v1051_v63  ;;  %v1978_v59 = vrot.slane %v1977_v15, 2  ;;  %v1055_v5 = vrot.slane %v2923_v48, 5  ;;  %v3181_v15 = vld [vmem:[%s2801_s30 + $0x18] sm:$0xff] }
  0x64   : > { %v1160_v42 = vunpack.c.l.b16 %v1052_v62  ;;  %v1686_v56 = vrot.slane %v1685_v46, 2  ;;  %v1058_v24 = vrot.slane %v2926_v49, 5  ;;  %v1062_v61 = vrot.slane %v3009_v57, 5  ;;  %v3201_v62 = vld [vmem:[%s2801_s30 + $0x24] sm:$0xff] }
  0x65   : > { %v3158_v6 = vpack.c.b16 %v620_v55, %v619_v21  ;;  %v1983_v25 = vsel %vm714_vm0, %v1978_v59, 0  ;;  %v1056_v63 = vsel %vm3134_vm7, %v2559_v27, %v1055_v5  ;;  %v1057_v44 = vrot.slane %v1055_v5, 4 }
  0x66   : > { %v1191_v40 = vpack.c.b16 %v1160_v42, %v1159_v17  ;;  %1992 = vmatpush.bf16.msra.mxu3 %v1983_v25  ;;  %v1691_v58 = vsel %vm714_vm0, %v1686_v56, 0  ;;  %v1161_v48 = vunpack.c.l.b16 %v1056_v63  ;;  %v2560_v4 = vrot.slane %v3003_v36, 9  ;;  %v3223_v25 = vld [vmem:[%s2801_s30 + $0x30] sm:$0xff] }
  0x67   : > { %2465 = vmatmul.msk.bf16.gmra.mxu0 %vm665_vm3, %v3158_v6  ;;  %1700 = vmatpush.bf16.msra.mxu1 %v1691_v58  ;;  %v1059_v49 = vsel %vm3134_vm7, %v1057_v44, %v1058_v24  ;;  %v1064_v21 = vrot.slane %v1062_v61, 4  ;;  %v1065_v17 = vrot.slane %v3016_v60, 5  ;;  %v1069_v60 = vrot.slane %v3099_v52, 5 }
  0x68   : > { %v1162_v18 = vunpack.c.l.b16 %v1059_v49  ;;  %v2561_v59 = vrot.slane %v3091_v39, 9  ;;  %v1079_v63 = vrot.slane %v2817_v14, 5 }
  0x69   : > { %2542 = vmatmul.msk.bf16.vlgmr.msrb.gmra.mxu1 %vm665_vm3, %v2700_v7  ;;  %v1066_v57 = vsel %vm3134_vm7, %v1064_v21, %v1065_v17  ;;  %v1071_v27 = vrot.slane %v1069_v60, 4  ;;  %v1072_v7 = vrot.slane %v3102_v16, 5  ;;  %v1076_v16 = vrot.slane %v2813_v12, 5  ;;  %v3251_v21 = vld [vmem:[%s2801_s30 + $0x3c] sm:$0xff] }
  0x6a   : > { %v3169_v34 = vpack.c.b16 %v1162_v18, %v1161_v48  ;;  %v1164_v55 = vunpack.c.l.b16 %v1066_v57  ;;  %v1070_v42 = vsel %vm3134_vm7, %v2561_v59, %v1069_v60  ;;  %v2563_v17 = vrot.slane %v2865_v26, 9 }
  0x6b   : > { %v1073_v52 = vsel %vm3134_vm7, %v1071_v27, %v1072_v7  ;;  %v1165_v56 = vunpack.c.l.b16 %v1070_v42  ;;  %v1078_v58 = vrot.slane %v1076_v16, 4  ;;  %v1086_v57 = vrot.slane %v2877_v35, 5 }
  0x6c   : > { %v1166_v5 = vunpack.c.l.b16 %v1073_v52 }
  0x6d   : > { %2574 = vmatmul.msk.bf16.vlgmr.msrb.gmra.mxu2 %vm665_vm3, %v1191_v40  ;;  %v2562_v40 = vrot.slane %v2810_v11, 9  ;;  %v1080_v12 = vsel %vm3134_vm7, %v1078_v58, %v1079_v63  ;;  %v1093_v63 = vrot.slane %v2950_v19, 5 }
  0x6e   : > { %v3215_v39 = vpack.c.b16 %v1166_v5, %v1165_v56  ;;  %v1168_v49 = vunpack.c.l.b16 %v1080_v12  ;;  %v1090_v56 = vrot.slane %v2945_v8, 5 }
  0x6f   : > { %v1077_v44 = vsel %vm3134_vm7, %v2562_v40, %v1076_v16  ;;  %v3285_v16 = vld [vmem:[%s2801_s30 + $0x48] sm:$0xff]  ;;  %v2564_v40 = vrot.slane %v2938_v2, 9 }
  0x70   : > { %v1167_v48 = vunpack.c.l.b16 %v1077_v44  ;;  %4131 = vst [vmem:[#allocation18_spill] sm:$0xff] %v3285_v16  ;;  %v1092_v58 = vrot.slane %v1090_v56, 4 }
  0x71   : > { %v1091_v8 = vsel %vm3134_vm7, %v2564_v40, %v1090_v56  ;;  %v1100_v40 = vrot.slane %v3039_v53, 5 }
  0x72   : > { %2594 = vmatmul.msk.bf16.vlgmr.msrb.gmra.mxu3 %vm665_vm3, %v2701_v0  ;;  %v3243_v14 = vpack.c.b16 %v1168_v49, %v1167_v48  ;;  %v1094_v48 = vsel %vm3134_vm7, %v1092_v58, %v1093_v63  ;;  %v1171_v2 = vunpack.c.l.b16 %v1091_v8 }
  0x77   : > { %2610 = vmatmul.msk.bf16.vlgmr.msrb.gmra.mxu0 %vm665_vm3, %v2984_v9  ;;  %v1063_v9 = vsel %vm3134_vm7, %v2560_v4, %v1062_v61  ;;  %v1083_v61 = vrot.slane %v2872_v31, 5 }
  0x78   : > { %v1163_v46 = vunpack.c.l.b16 %v1063_v9 }
  0x79   : > { %2543 = vmatmul.msk.bf16.gmra.mxu1 %vm665_vm3, %v2701_v0  ;;  %v1085_v9 = vrot.slane %v1083_v61, 4  ;;  %v1084_v31 = vsel %vm3134_vm7, %v2563_v17, %v1083_v61  ;;  %v1172_v61 = vunpack.c.l.b16 %v1094_v48 }
  0x7a   : > { %v3195_v36 = vpack.c.b16 %v1164_v55, %v1163_v46  ;;  %v1169_v27 = vunpack.c.l.b16 %v1084_v31 }
  0x7b   : > { %v1087_v60 = vsel %vm3134_vm7, %v1085_v9, %v1086_v57  ;;  %v3309_v9 = vpack.c.b16 %v1172_v61, %v1171_v2  ;;  %v1097_v57 = vrot.slane %v3031_v33, 5 }
  0x7c   : > { %v1170_v35 = vunpack.c.l.b16 %v1087_v60 }
  0x7d   : > { %2575 = vmatmul.msk.bf16.gmra.mxu2 %vm665_vm3, %v3169_v34  ;;  %4134 = vst [vmem:[#allocation21_spill] sm:$0xff] %v3309_v9  ;;  %v1099_v56 = vrot.slane %v1097_v57, 4 }
  0x7e   : > { %v3275_v42 = vpack.c.b16 %v1170_v35, %v1169_v27  ;;  %v3319_v27 = vld [vmem:[%s2801_s30 + $0x54] sm:$0xff]  ;;  %v2565_v35 = vrot.slane %v3022_v13, 9 }
  0x7f   : > { %4135 = vst [vmem:[#allocation22_spill] sm:$0xff] %v3319_v27  ;;  %v1101_v8 = vsel %vm3134_vm7, %v1099_v56, %v1100_v40 }
  0x80   : > { %v1098_v33 = vsel %vm3134_vm7, %v2565_v35, %v1097_v57  ;;  %v1174_v53 = vunpack.c.l.b16 %v1101_v8  ;;  %v2731_v35 = vld [vmem:[%s2801_s30 + $0x64] sm:$0xf]  ;;  %v2732_v8 = vld [vmem:[%s2801_s30 + $0x68] sm:$0x1] }
  0x81   : > { %v1173_v48 = vunpack.c.l.b16 %v1098_v33  ;;  %v1104_v56 = vrot.slane %v2731_v35, 5 }
  0x82   : > { %2595 = vmatmul.msk.bf16.gmra.mxu3 %vm665_vm3, %v3181_v15 }
  0x83   : > { %v3341_v61 = vpack.c.b16 %v1174_v53, %v1173_v48 }
  0x85   : > { %4137 = vst [vmem:[#allocation24_spill] sm:$0xff] %v3341_v61 }
  0x87   : > { %2611 = vmatmul.msk.bf16.gmra.mxu0 %vm665_vm3, %v3072_v23 }
  0x89   : > { %2544 = vmatmul.msk.bf16.gmra.mxu1 %vm665_vm3, %v3181_v15 }
  0x8d   : > { %2576 = vmatmul.msk.bf16.gmra.mxu2 %vm665_vm3, %v3195_v36 }
  0x92   : > { %2596 = vmatmul.msk.bf16.gmra.mxu3 %vm665_vm3, %v3201_v62 }
  0x97   : > { %2612 = vmatmul.msk.bf16.gmra.mxu0 %vm665_vm3, %v3158_v6 }
  0x99   : > { %2545 = vmatmul.msk.bf16.gmra.mxu1 %vm665_vm3, %v3201_v62 }
  0x9d   : > { %v3218_v24 = vpop.f32.mrf.mxu1  ;;  %2577 = vmatmul.msk.bf16.gmra.mxu2 %vm665_vm3, %v3215_v39 }
  0xa2   : > { %2597 = vmatmul.msk.bf16.gmra.mxu3 %vm665_vm3, %v3223_v25 }
  0xa5   : > { %v3235_v0 = vpop.f32.mrf.mxu1 }
  0xa7   : > { %v3233_v18 = vpop.f32.mrf.mxu2  ;;  %2613 = vmatmul.msk.bf16.gmra.mxu0 %vm665_vm3, %v2843_v1 }
  0xa9   : > { %2546 = vmatmul.msk.bf16.gmra.mxu1 %vm665_vm3, %v3223_v25 }
  0xab   : > { %v3241_v11 = vpop.f32.mrf.mxu0  ;;  %v3246_v4 = vpop.f32.mrf.mxu3 }
  0xac   : > { %4129 = vst [vmem:[#allocation16_spill] sm:$0xff] %v3246_v4 }
  0xad   : > { %2578 = vmatmul.msk.bf16.gmra.mxu2 %vm665_vm3, %v3243_v14 }
  0xaf   : > { %v3255_v46 = vpop.f32.mrf.mxu2 }
  0xb0   : > { %v3257_v55 = vpop.f32.mrf.mxu1 }
  0xb2   : > { %2598 = vmatmul.msk.bf16.gmra.mxu3 %vm665_vm3, %v3251_v21 }
  0xb3   : > { %v3265_v59 = vpop.f32.mrf.mxu0  ;;  %v3267_v26 = vpop.f32.mrf.mxu3 }
  0xb4   : > { %4130 = vst [vmem:[#allocation17_spill] sm:$0xff] %v3267_v26 }
  0xb7   : > { %2614 = vmatmul.msk.bf16.gmra.mxu0 %vm665_vm3, %v2918_v45 }
  0xb8   : > { %v3271_v7 = vpop.f32.mrf.mxu1 }
  0xb9   : > { %2547 = vmatmul.msk.bf16.gmra.mxu1 %vm665_vm3, %v3251_v21 }
  0xba   : > { %v3277_v52 = vpop.f32.mrf.mxu2 }
  0xbd   : > { %2579 = vmatmul.msk.bf16.gmra.mxu2 %vm665_vm3, %v3275_v42 }
  0xbe   : > { %v3280_v5 = vpop.f32.mrf.mxu0 }
  0xc0   : > { %v3289_v44 = vpop.f32.mrf.mxu3 }
  0xc1   : > { %4132 = vst [vmem:[#allocation19_spill] sm:$0xff] %v3289_v44 }
  0xc2   : > { %v3291_v12 = vpop.f32.mrf.mxu1  ;;  %2599 = vmatmul.msk.bf16.gmra.mxu3 %vm665_vm3, %v3285_v16  ;;  %v3299_v49 = vpop.f32.mrf.mxu2 }
  0xc6   : > { %v3303_v19 = vpop.f32.mrf.mxu0 }
  0xc7   : > { %2615 = vmatmul.msk.bf16.gmra.mxu0 %vm665_vm3, %v3005_v37 }
  0xc8   : > { %v3305_v17 = vpop.f32.mrf.mxu3 }
  0xc9   : > { %4133 = vst [vmem:[#allocation20_spill] sm:$0xff] %v3305_v17  ;;  %2548 = vmatmul.msk.bf16.gmra.mxu1 %vm665_vm3, %v3285_v16  ;;  %v3354_v17 = vld [vmem:[%s2801_s30 + $0x60] sm:$0xff] }
  0xca   : > { %v3312_v31 = vpop.f32.mrf.mxu1  ;;  %4139 = vst [vmem:[#allocation26_spill] sm:$0xff] %v3354_v17 }
  0xcd   : > { %2580 = vmatmul.msk.bf16.gmra.mxu2 %vm665_vm3, %v3309_v9 }
  0xce   : > { %v3316_v60 = vpop.f32.mrf.mxu2 }
  0xd1   : > { %v3323_v58 = vpop.f32.mrf.mxu0 }
  0xd2   : > { %v3325_v63 = vpop.f32.mrf.mxu3  ;;  %2600 = vmatmul.msk.bf16.gmra.mxu3 %vm665_vm3, %v3319_v27 }
  0xd3   : > { %4136 = vst [vmem:[#allocation23_spill] sm:$0xff] %v3325_v63  ;;  %v1107_v63 = vrot.slane %v2732_v8, 5 }
  0xd6   : > { %v3333_v13 = vpop.f32.mrf.mxu1  ;;  %v3335_v2 = vpop.f32.mrf.mxu2 }
  0xd7   : > { %2616 = vmatmul.msk.bf16.gmra.mxu0 %vm665_vm3, %v3093_v32  ;;  %v2733_v32 = vld [vmem:[%s2801_s30 + $0x60] sm:$0xf] }
  0xd8   : > { %v2566_v44 = vrot.slane %v2733_v32, 9 }
  0xd9   : > { %2549 = vmatmul.msk.bf16.gmra.mxu1 %vm665_vm3, %v3319_v27  ;;  %v3343_v57 = vpop.f32.mrf.mxu0  ;;  %v1106_v27 = vrot.slane %v1104_v56, 4 }
  0xda   : > { %v3346_v40 = vpop.f32.mrf.mxu3  ;;  %v1105_v53 = vsel %vm3134_vm7, %v2566_v44, %v1104_v56 }
  0xdb   : > { %4138 = vst [vmem:[#allocation25_spill] sm:$0xff] %v3346_v40  ;;  %v1108_v35 = vsel %vm3134_vm7, %v1106_v27, %v1107_v63  ;;  %v1175_v26 = vunpack.c.l.b16 %v1105_v53  ;;  %v1111_v27 = vrot.slane %v2891_v50, 5  ;;  %v3387_v53 = vld [vmem:[%s2801_s30 + $0x6c] sm:$0xff] }
  0xdc   : > { %v1176_v32 = vunpack.c.l.b16 %v1108_v35 }
  0xdd   : > { %2581 = vmatmul.msk.bf16.gmra.mxu2 %vm665_vm3, %v3341_v61 }
  0xde   : > { %v3350_v33 = vpop.f32.mrf.mxu1  ;;  %v3376_v44 = vpack.c.b16 %v1176_v32, %v1175_v26  ;;  %v1113_v26 = vrot.slane %v1111_v27, 4 }
  0xe0   : > { %v3357_v48 = vpop.f32.mrf.mxu2  ;;  %4141 = vst [vmem:[#allocation28_spill] sm:$0xff] %v3376_v44 }
  0xe2   : > { %2601 = vmatmul.msk.bf16.gmra.mxu3 %vm665_vm3, %v3354_v17 }
  0xe4   : > { %v3365_v40 = vpop.f32.mrf.mxu0 }
  0xe5   : > { %v3367_v8 = vpop.f32.mrf.mxu3 }
  0xe6   : > { %4140 = vst [vmem:[#allocation27_spill] sm:$0xff] %v3367_v8  ;;  %v947_v61 = vpop.f32.mrf.mxu1  ;;  %v2567_v8 = vrot.slane %v2882_v41, 9 }
  0xe7   : > { %v948_v9 = vadd.f32 %v947_v61, %v3241_v11  ;;  %2617 = vmatmul.msk.bf16.gmra.mxu0 %vm665_vm3, %v2861_v22  ;;  %v1114_v61 = vrot.slane %v2898_v54, 5 }
  0xe8   : > { %v3372_v37 = vpop.f32.mrf.mxu2  ;;  %v1112_v50 = vsel %vm3134_vm7, %v2567_v8, %v1111_v27 }
  0xe9   : > { %2550 = vmatmul.msk.bf16.gmra.mxu1 %vm665_vm3, %v3354_v17  ;;  %v1177_v4 = vunpack.c.l.b16 %v1112_v50 }
  0xec   : > { %v3379_v63 = vpop.f32.mrf.mxu0 }
  0xed   : > { %v3381_v56 = vpop.f32.mrf.mxu3  ;;  %2582 = vmatmul.msk.bf16.gmra.mxu2 %vm665_vm3, %v3376_v44 }
  0xee   : > { %4142 = vst [vmem:[#allocation29_spill] sm:$0xff] %v3381_v56  ;;  %v949_v11 = vpop.f32.mrf.mxu1  ;;  %v1115_v56 = vsel %vm3134_vm7, %v1113_v26, %v1114_v61  ;;  %v1118_v61 = vrot.slane %v2967_v47, 5 }
  0xef   : > { %v950_v35 = vadd.f32 %v949_v11, %v3265_v59  ;;  %v1178_v16 = vunpack.c.l.b16 %v1115_v56  ;;  %v1121_v56 = vrot.slane %v2970_v51, 5 }
  0xf0   : > { %v1267_v32 = vpop.f32.mrf.mxu2 }
  0xf1   : > { %v1347_v22 = vadd.f32 %v1267_v32, %v948_v9  ;;  %v3404_v11 = vpack.c.b16 %v1178_v16, %v1177_v4  ;;  %v3411_v32 = vld [vmem:[%s2801_s30 + $0x78] sm:$0xff] }
  0xf2   : > { %2602 = vmatmul.msk.bf16.gmra.mxu3 %vm665_vm3, %v3387_v53 }
  0xf4   : > { %v1559_v44 = vpop.f32.mrf.mxu0 }
  0xf5   : > { %v1404_v54 = vpop.f32.mrf.mxu3 }
  0xf6   : > { %v952_v17 = vpop.f32.mrf.mxu1  ;;  %v1484_v59 = vadd.f32 %v1404_v54, %v1347_v22 }
  0xf7   : > { %v953_v41 = vadd.f32 %v952_v17, %v3280_v5  ;;  %2618 = vmatmul.msk.bf16.gmra.mxu0 %vm665_vm3, %v2940_v3 }
  0xf8   : > { %v1269_v9 = vpop.f32.mrf.mxu2  ;;  %v3402_v8 = vadd.f32 %v1559_v44, %v1484_v59  ;;  %v2568_v44 = vrot.slane %v2959_v28, 9 }
  0xf9   : > { %2551 = vmatmul.msk.bf16.gmra.mxu1 %vm665_vm3, %v3387_v53  ;;  %v1348_v27 = vadd.f32 %v1269_v9, %v950_v35  ;;  %v1120_v35 = vrot.slane %v1118_v61, 4 }
  0xfa   : > { %v1119_v51 = vsel %vm3134_vm7, %v2568_v44, %v1118_v61 }
  0xfb   : > { %v1122_v54 = vsel %vm3134_vm7, %v1120_v35, %v1121_v56  ;;  %v1128_v35 = vrot.slane %v3061_v43, 5 }
  0xfc   : > { %v1561_v26 = vpop.f32.mrf.mxu0 }
  0xfd   : > { %v1406_v22 = vpop.f32.mrf.mxu3  ;;  %2583 = vmatmul.msk.bf16.gmra.mxu2 %vm665_vm3, %v3404_v11 }
  0xfe   : > { %v954_v5 = vpop.f32.mrf.mxu1  ;;  %v1485_v17 = vadd.f32 %v1406_v22, %v1348_v27  ;;  %v1180_v22 = vunpack.c.l.b16 %v1122_v54 }
  0xff   : > { %v955_v50 = vadd.f32 %v954_v5, %v3303_v19  ;;  %v1179_v19 = vunpack.c.l.b16 %v1119_v51  ;;  %v3437_v51 = vld [vmem:[%s2801_s30 + $0x84] sm:$0xff] }
 0x100   : > { %v1272_v4 = vpop.f32.mrf.mxu2  ;;  %v3415_v16 = vadd.f32 %v1561_v26, %v1485_v17  ;;  %v1125_v17 = vrot.slane %v3054_v30, 5 }
 0x101   : > { %v1349_v47 = vadd.f32 %v1272_v4, %v953_v41  ;;  %v3430_v56 = vpack.c.b16 %v1180_v22, %v1179_v19 }
 0x102   : > { %2603 = vmatmul.msk.bf16.gmra.mxu3 %vm665_vm3, %v3411_v32 }
 0x104   : > { %v1564_v59 = vpop.f32.mrf.mxu0 }
 0x105   : > { %v1409_v9 = vpop.f32.mrf.mxu3 }
 0x106   : > { %v957_v27 = vpop.f32.mrf.mxu1  ;;  %v1486_v28 = vadd.f32 %v1409_v9, %v1349_v47 }
 0x107   : > { %v958_v26 = vadd.f32 %v957_v27, %v3323_v58  ;;  %2619 = vmatmul.msk.bf16.gmra.mxu0 %vm665_vm3, %v3028_v29 }
 0x108   : > { %v1274_v41 = vpop.f32.mrf.mxu2  ;;  %v3428_v61 = vadd.f32 %v1564_v59, %v1486_v28  ;;  %v4143_v59 = vld [vmem:[#allocation9_spill] sm:$0xff] }
 0x109   : > { %2552 = vmatmul.msk.bf16.gmra.mxu1 %vm665_vm3, %v3411_v32  ;;  %v1350_v5 = vadd.f32 %v1274_v41, %v955_v50  ;;  %v2569_v9 = vrot.slane %v4143_v59, 9  ;;  %v1127_v50 = vrot.slane %v1125_v17, 4 }
 0x10b   : > { %v1126_v43 = vsel %vm3134_vm7, %v2569_v9, %v1125_v17  ;;  %v1129_v22 = vsel %vm3134_vm7, %v1127_v50, %v1128_v35  ;;  %v2734_v9 = vld [vmem:[%s2801_s30 + $0x94] sm:$0xf] }
 0x10c   : > { %v1566_v44 = vpop.f32.mrf.mxu0  ;;  %v1132_v50 = vrot.slane %v2734_v9, 5 }
 0x10d   : > { %v1411_v4 = vpop.f32.mrf.mxu3  ;;  %2584 = vmatmul.msk.bf16.gmra.mxu2 %vm665_vm3, %v3430_v56 }
 0x10e   : > { %v959_v58 = vpop.f32.mrf.mxu1  ;;  %v1487_v47 = vadd.f32 %v1411_v4, %v1350_v5  ;;  %v1181_v5 = vunpack.c.l.b16 %v1126_v43  ;;  %v1182_v4 = vunpack.c.l.b16 %v1129_v22 }
 0x10f   : > { %v960_v54 = vadd.f32 %v959_v58, %v3343_v57 }
 0x110   : > { %v1277_v27 = vpop.f32.mrf.mxu2  ;;  %v3441_v19 = vadd.f32 %v1566_v44, %v1487_v47  ;;  %v3456_v59 = vpack.c.b16 %v1182_v4, %v1181_v5 }
 0x111   : > { %v1351_v30 = vadd.f32 %v1277_v27, %v958_v26  ;;  %v4145_v26 = vld [vmem:[#allocation15_spill] sm:$0xff] }
 0x112   : > { %4144 = vst [vmem:[#allocation9_spill] sm:$0xff] %v3441_v19  ;;  %2604 = vmatmul.msk.bf16.gmra.mxu3 %vm665_vm3, %v3437_v51 }
 0x113   : > { %4147 = vst [vmem:[#allocation31_spill] sm:$0xff] %v3456_v59 }
 0x114   : > { %v1569_v28 = vpop.f32.mrf.mxu0 }
 0x115   : > { %v1414_v57 = vpop.f32.mrf.mxu3 }
 0x116   : > { %v962_v41 = vpop.f32.mrf.mxu1  ;;  %v1488_v58 = vadd.f32 %v1414_v57, %v1351_v30  ;;  %v2735_v30 = vld [vmem:[%s2801_s30 + $0x98] sm:$0x1] }
 0x117   : > { %v963_v44 = vadd.f32 %v962_v41, %v3365_v40  ;;  %2620 = vmatmul.msk.bf16.gmra.mxu0 %vm665_vm3, %v4145_v26  ;;  %v1135_v43 = vrot.slane %v2735_v30, 5  ;;  %v3463_v41 = vld [vmem:[%s2801_s30 + $0x90] sm:$0xff] }
 0x118   : > { %v1279_v47 = vpop.f32.mrf.mxu2  ;;  %v3454_v17 = vadd.f32 %v1569_v28, %v1488_v58  ;;  %4148 = vst [vmem:[#allocation32_spill] sm:$0xff] %v3463_v41  ;;  %v2736_v28 = vld [vmem:[%s2801_s30 + $0x90] sm:$0xf] }
 0x119   : > { %2553 = vmatmul.msk.bf16.gmra.mxu1 %vm665_vm3, %v3437_v51  ;;  %v1352_v35 = vadd.f32 %v1279_v47, %v960_v54  ;;  %v2570_v58 = vrot.slane %v2736_v28, 9  ;;  %v1134_v54 = vrot.slane %v1132_v50, 4 }
 0x11a   : > { %4146 = vst [vmem:[#allocation30_spill] sm:$0xff] %v3454_v17  ;;  %v2739_v17 = vld [vmem:[%s2801_s30 + $0x9c] sm:$0xf] }
 0x11b   : > { %v1133_v9 = vsel %vm3134_vm7, %v2570_v58, %v1132_v50  ;;  %v2737_v58 = vld [vmem:[%s2801_s30 + $0xa0] sm:$0xf] }
 0x11c   : > { %v1571_v27 = vpop.f32.mrf.mxu0 }
 0x11d   : > { %v1416_v40 = vpop.f32.mrf.mxu3  ;;  %2585 = vmatmul.msk.bf16.gmra.mxu2 %vm665_vm3, %v3456_v59 }
 0x11e   : > { %v964_v22 = vpop.f32.mrf.mxu1  ;;  %v1489_v57 = vadd.f32 %v1416_v40, %v1352_v35  ;;  %v1136_v35 = vsel %vm3134_vm7, %v1134_v54, %v1135_v43  ;;  %v1139_v54 = vrot.slane %v2737_v58, 5 }
 0x11f   : > { %v965_v26 = vadd.f32 %v964_v22, %v3379_v63  ;;  %v1183_v22 = vunpack.c.l.b16 %v1133_v9  ;;  %v1184_v28 = vunpack.c.l.b16 %v1136_v35  ;;  %v2738_v35 = vld [vmem:[%s2801_s30 + $0xa4] sm:$0x1] }
 0x120   : > { %v1282_v5 = vpop.f32.mrf.mxu2  ;;  %v3467_v4 = vadd.f32 %v1571_v27, %v1489_v57  ;;  %v4150_v27 = vld [vmem:[#allocation3_spill] sm:$0xff] }
 0x121   : > { %v1353_v47 = vadd.f32 %v1282_v5, %v963_v44  ;;  %v3481_v43 = vpack.c.b16 %v1184_v28, %v1183_v22 }
 0x122   : > { %4149 = vst [vmem:[#allocation33_spill] sm:$0xff] %v3467_v4  ;;  %2605 = vmatmul.msk.bf16.gmra.mxu3 %vm665_vm3, %v3463_v41  ;;  %v3488_v4 = vld [vmem:[%s2801_s30 + $0x9c] sm:$0xff] }
 0x123   : > { %4152 = vst [vmem:[#allocation35_spill] sm:$0xff] %v3481_v43 }
 0x124   : > { %v1574_v30 = vpop.f32.mrf.mxu0  ;;  %4153 = vst [vmem:[#allocation36_spill] sm:$0xff] %v3488_v4 }
 0x125   : > { %v1419_v40 = vpop.f32.mrf.mxu3 }
 0x126   : > { %v967_v63 = vpop.f32.mrf.mxu1  ;;  %v1490_v59 = vadd.f32 %v1419_v40, %v1353_v47  ;;  %v1142_v40 = vrot.slane %v2738_v35, 5 }
 0x127   : > { %2621 = vmatmul.msk.bf16.gmra.mxu0 %vm665_vm3, %v4150_v27 }
 0x128   : > { %v1284_v44 = vpop.f32.mrf.mxu2  ;;  %v3479_v50 = vadd.f32 %v1574_v30, %v1490_v59  ;;  %v1141_v59 = vrot.slane %v1139_v54, 4 }
 0x129   : > { %2554 = vmatmul.msk.bf16.gmra.mxu1 %vm665_vm3, %v3463_v41  ;;  %v1354_v57 = vadd.f32 %v1284_v44, %v965_v26  ;;  %v2571_v41 = vrot.slane %v2739_v17, 9  ;;  %v968_v26 = vadd.f32 %v967_v63, %v3218_v24  ;;  %v4155_v63 = vld [vmem:[#allocation4_spill] sm:$0xff] }
 0x12a   : > { %4151 = vst [vmem:[#allocation34_spill] sm:$0xff] %v3479_v50 }
 0x12b   : > { %v1140_v44 = vsel %vm3134_vm7, %v2571_v41, %v1139_v54 }
 0x12c   : > { %v1576_v5 = vpop.f32.mrf.mxu0  ;;  %v1185_v17 = vunpack.c.l.b16 %v1140_v44 }
 0x12d   : > { %v1421_v9 = vpop.f32.mrf.mxu3  ;;  %2586 = vmatmul.msk.bf16.gmra.mxu2 %vm665_vm3, %v3481_v43 }
 0x12e   : > { %v969_v47 = vpop.f32.mrf.mxu1  ;;  %v1491_v27 = vadd.f32 %v1421_v9, %v1354_v57  ;;  %v1143_v57 = vsel %vm3134_vm7, %v1141_v59, %v1142_v40  ;;  %v4158_v59 = vld [vmem:[#allocation6_spill] sm:$0xff] }
 0x12f   : > { %v1186_v43 = vunpack.c.l.b16 %v1143_v57  ;;  %v4159_v57 = vld [vmem:[#allocation7_spill] sm:$0xff] }
 0x130   : > { %v1287_v30 = vpop.f32.mrf.mxu2  ;;  %v3492_v22 = vadd.f32 %v1576_v5, %v1491_v27  ;;  %v970_v27 = vadd.f32 %v969_v47, %v3235_v0  ;;  %v3514_v47 = vld [vmem:[%s2801_s30 + $0xa8] sm:$0xff] }
 0x131   : > { %v1355_v28 = vadd.f32 %v1287_v30, %v968_v26  ;;  %v3507_v40 = vpack.c.b16 %v1186_v43, %v1185_v17  ;;  %v1146_v26 = vrot.slane %v4158_v59, 5  ;;  %4160 = vst [vmem:[#allocation6_spill] sm:$0xff] %v3514_v47 }
 0x132   : > { %4154 = vst [vmem:[#allocation37_spill] sm:$0xff] %v3492_v22  ;;  %2606 = vmatmul.msk.bf16.gmra.mxu3 %vm665_vm3, %v3488_v4 }
 0x133   : > { %4157 = vst [vmem:[#allocation39_spill] sm:$0xff] %v3507_v40 }
 0x134   : > { %v1579_v58 = vpop.f32.mrf.mxu0 }
 0x135   : > { %v1424_v9 = vpop.f32.mrf.mxu3 }
 0x136   : > { %v972_v35 = vpop.f32.mrf.mxu1  ;;  %v1492_v24 = vadd.f32 %v1424_v9, %v1355_v28  ;;  %v1149_v9 = vrot.slane %v4159_v57, 5 }
 0x137   : > { %2622 = vmatmul.msk.bf16.gmra.mxu0 %vm665_vm3, %v4155_v63  ;;  %v4161_v63 = vld [vmem:[#allocation5_spill] sm:$0xff] }
 0x138   : > { %v1289_v5 = vpop.f32.mrf.mxu2  ;;  %v3505_v41 = vadd.f32 %v1579_v58, %v1492_v24  ;;  %v2572_v22 = vrot.slane %v4161_v63, 9  ;;  %v1148_v58 = vrot.slane %v1146_v26, 4  ;;  %v973_v24 = vadd.f32 %v972_v35, %v3257_v55 }
 0x139   : > { %2555 = vmatmul.msk.bf16.gmra.mxu1 %vm665_vm3, %v3488_v4  ;;  %v1356_v54 = vadd.f32 %v1289_v5, %v970_v27 }
 0x13a   : > { %4156 = vst [vmem:[#allocation38_spill] sm:$0xff] %v3505_v41  ;;  %v1147_v5 = vsel %vm3134_vm7, %v2572_v22, %v1146_v26  ;;  %v3532_v22 = vld [vmem:[%s2801_s30 + $0xc0] sm:$0xf] }
 0x13b   : > { %v1187_v57 = vunpack.c.l.b16 %v1147_v5  ;;  %4164 = vst [vmem:[#allocation5_spill] sm:$0xff] %v3532_v22  ;;  %v1517_v5 = vshrl.u32 %v3532_v22, 16 }
 0x13c   : > { %v1581_v30 = vpop.f32.mrf.mxu0 }
 0x13d   : > { %v1426_v44 = vpop.f32.mrf.mxu3  ;;  %2587 = vmatmul.msk.bf16.gmra.mxu2 %vm665_vm3, %v3507_v40  ;;  %v4163_v40 = vld [vmem:[#allocation10_spill] sm:$0xff] }
 0x13e   : > { %v974_v28 = vpop.f32.mrf.mxu1  ;;  %v1493_v0 = vadd.f32 %v1426_v44, %v1356_v54  ;;  %v1150_v54 = vsel %vm3134_vm7, %v1148_v58, %v1149_v9 }
 0x13f   : > { %v1188_v55 = vunpack.c.l.b16 %v1150_v54 }
 0x140   : > { %v1292_v43 = vpop.f32.mrf.mxu2  ;;  %v3518_v17 = vadd.f32 %v1581_v30, %v1493_v0  ;;  %v975_v30 = vadd.f32 %v974_v28, %v3271_v7  ;;  %v1520_v7 = vshll.u32 %v3532_v22, 16 }
 0x141   : > { %v1357_v27 = vadd.f32 %v1292_v43, %v973_v24  ;;  %v3536_v58 = vpack.c.b16 %v1188_v55, %v1187_v57  ;;  %v3539_v24 = vld [vmem:[%s2801_s30 + $0xc4] sm:$0xf]  ;;  %v4168_v43 = vld [vmem:[#allocation12_spill] sm:$0xff]  ;;  %v4169_v57 = vld [vmem:[#allocation13_spill] sm:$0xff] }
 0x142   : > { %4162 = vst [vmem:[#allocation7_spill] sm:$0xff] %v3518_v17  ;;  %2607 = vmatmul.msk.bf16.gmra.mxu3 %vm665_vm3, %v3514_v47  ;;  %v1526_v28 = vshll.u32 %v3539_v24, 16  ;;  %v1156_v55 = vrot.slane %v4169_v57, 5  ;;  %v1519_v17 = vrot.slane %v1517_v5, 4  ;;  %v1522_v41 = vrot.slane %v1520_v7, 5 }
 0x143   : > { %4166 = vst [vmem:[#allocation41_spill] sm:$0xff] %v3536_v58 }
 0x144   : > { %v1584_v59 = vpop.f32.mrf.mxu0  ;;  %4167 = vst [vmem:[#allocation42_spill] sm:$0xff] %v3539_v24 }
 0x145   : > { %v1429_v63 = vpop.f32.mrf.mxu3 }
 0x146   : > { %v977_v44 = vpop.f32.mrf.mxu1  ;;  %v1494_v35 = vadd.f32 %v1429_v63, %v1357_v27  ;;  %v1153_v27 = vrot.slane %v4168_v43, 5  ;;  %v1530_v63 = vshrl.u32 %v3539_v24, 16  ;;  %v1528_v24 = vrot.slane %v1526_v28, 5 }
 0x147   : > { %2623 = vmatmul.msk.bf16.gmra.mxu0 %vm665_vm3, %v4163_v40  ;;  %v978_v22 = vadd.f32 %v977_v44, %v3291_v12  ;;  %v1523_v44 = vor.u32 %v1522_v41, %v1519_v17 }
 0x148   : > { %v1294_v0 = vpop.f32.mrf.mxu2  ;;  %v3534_v26 = vadd.f32 %v1584_v59, %v1494_v35  ;;  %v1532_v4 = vrot.slane %v1530_v63, 4 }
 0x149   : > { %2556 = vmatmul.msk.bf16.gmra.mxu1 %vm665_vm3, %v3514_v47  ;;  %v1358_v9 = vadd.f32 %v1294_v0, %v975_v30  ;;  %v3550_v30 = vld [vmem:[%s2801_s30 + $0xb4] sm:$0xff]  ;;  %v4170_v0 = vld [vmem:[#allocation11_spill] sm:$0xff] }
 0x14a   : > { %4165 = vst [vmem:[#allocation40_spill] sm:$0xff] %v3534_v26  ;;  %v2573_v43 = vrot.slane %v4170_v0, 9  ;;  %v1155_v26 = vrot.slane %v1153_v27, 4  ;;  %v1533_v5 = vor.u32 %v1532_v4, %v1528_v24 }
 0x14c   : > { %v1586_v54 = vpop.f32.mrf.mxu0  ;;  %v1534_v41 = vrot.slane %v1533_v5, 4 }
 0x14d   : > { %v1431_v40 = vpop.f32.mrf.mxu3  ;;  %2588 = vmatmul.msk.bf16.gmra.mxu2 %vm665_vm3, %v3536_v58  ;;  %v3557_v58 = vld [vmem:[%s2801_s30 + $0xc8] sm:$0x1] }
 0x14e   : > { %v979_v59 = vpop.f32.mrf.mxu1  ;;  %v1495_v35 = vadd.f32 %v1431_v40, %v1358_v9  ;;  %v1154_v40 = vsel %vm3134_vm7, %v2573_v43, %v1153_v27  ;;  %v1157_v9 = vsel %vm3134_vm7, %v1155_v26, %v1156_v55  ;;  %v1536_v7 = vshll.u32 %v3557_v58, 16 }
 0x14f   : > { %v1189_v63 = vunpack.c.l.b16 %v1154_v40  ;;  %v980_v57 = vadd.f32 %v979_v59, %v3312_v31  ;;  %v1524_v26 = vrot.slane %v1523_v44, 4 }
 0x150   : > { %v1297_v47 = vpop.f32.mrf.mxu2  ;;  %v3554_v50 = vadd.f32 %v1586_v54, %v1495_v35  ;;  %v1538_v4 = vrot.slane %v1536_v7, 5 }
 0x151   : > { %v1359_v19 = vadd.f32 %v1297_v47, %v978_v22  ;;  %v1190_v47 = vunpack.c.l.b16 %v1157_v9  ;;  %v3582_v9 = vld [vmem:[%s2801_s30 + $0xc0] sm:$0xff] }
 0x152   : > { %2608 = vmatmul.msk.bf16.gmra.mxu3 %vm665_vm3, %v3550_v30  ;;  %v1539_v31 = vsel %vm2831_vm4, %v1534_v41, %v1538_v4 }
 0x153   : > { %v3573_v35 = vpack.c.b16 %v1190_v47, %v1189_v63  ;;  %v1542_v5 = vunpack.c.l.b16 %v1539_v31 }
 0x154   : > { %v1589_v12 = vpop.f32.mrf.mxu0 }
 0x155   : > { %v1434_v28 = vpop.f32.mrf.mxu3 }
 0x156   : > { %v982_v54 = vpop.f32.mrf.mxu1  ;;  %v1496_v22 = vadd.f32 %v1434_v28, %v1359_v19  ;;  %v1529_v19 = vsel %vm2831_vm4, %v1524_v26, %v1528_v24 }
 0x157   : > { %2624 = vmatmul.msk.bf16.gmra.mxu0 %vm665_vm3, %v3141_v10  ;;  %v1541_v44 = vunpack.c.l.b16 %v1529_v19 }
 0x158   : > { %v1299_v27 = vpop.f32.mrf.mxu2  ;;  %v3571_v17 = vadd.f32 %v1589_v12, %v1496_v22  ;;  %v983_v12 = vadd.f32 %v982_v54, %v3333_v13 }
 0x159   : > { %2557 = vmatmul.msk.bf16.gmra.mxu1 %vm665_vm3, %v3550_v30  ;;  %v1360_v55 = vadd.f32 %v1299_v27, %v980_v57  ;;  %v3589_v24 = vpack.c.b16 %v1542_v5, %v1541_v44 }
 0x15c   : > { %v1591_v0 = vpop.f32.mrf.mxu0 }
 0x15d   : > { %v1436_v59 = vpop.f32.mrf.mxu3  ;;  %2589 = vmatmul.msk.bf16.gmra.mxu2 %vm665_vm3, %v3573_v35 }
 0x15e   : > { %v984_v43 = vpop.f32.mrf.mxu1  ;;  %v1497_v40 = vadd.f32 %v1436_v59, %v1360_v55 }
 0x15f   : > { %v985_v13 = vadd.f32 %v984_v43, %v3350_v33 }
 0x160   : > { %v1302_v7 = vpop.f32.mrf.mxu2  ;;  %v3585_v28 = vadd.f32 %v1591_v0, %v1497_v40 }
 0x161   : > { %v1361_v63 = vadd.f32 %v1302_v7, %v983_v12 }
 0x162   : > { %2609 = vmatmul.msk.bf16.gmra.mxu3 %vm665_vm3, %v3582_v9 }
 0x164   : > { %v1594_v47 = vpop.f32.mrf.mxu0 }
 0x165   : > { %v1439_v22 = vpop.f32.mrf.mxu3 }
 0x166   : > { %v987_v57 = vpop.f32.mrf.mxu1  ;;  %v1498_v27 = vadd.f32 %v1439_v22, %v1361_v63 }
 0x167   : > { %2625 = vmatmul.msk.bf16.gmra.mxu0 %vm665_vm3, %v3589_v24  ;;  %v988_v31 = vadd.f32 %v987_v57, %v3233_v18 }
 0x168   : > { %v1304_v54 = vpop.f32.mrf.mxu2  ;;  %v3596_v26 = vadd.f32 %v1594_v47, %v1498_v27 }
 0x169   : > { %2627 = vmatmul.msk.bf16.vlgmr.msra.gmra.mxu1 %vm665_vm3, %v3169_v34  ;;  %v1362_v41 = vadd.f32 %v1304_v54, %v985_v13 }
 0x16c   : > { %v1596_v4 = vpop.f32.mrf.mxu0 }
 0x16d   : > { %v1441_v55 = vpop.f32.mrf.mxu3  ;;  %2647 = vmatmul.msk.bf16.vlgmr.msra.gmra.mxu2 %vm665_vm3, %v3181_v15 }
 0x16e   : > { %v989_v0 = vpop.f32.mrf.mxu1  ;;  %v1499_v19 = vadd.f32 %v1441_v55, %v1362_v41 }
 0x16f   : > { %v990_v15 = vadd.f32 %v989_v0, %v3255_v46 }
 0x170   : > { %v1307_v59 = vpop.f32.mrf.mxu2  ;;  %v3601_v40 = vadd.f32 %v1596_v4, %v1499_v19 }
 0x171   : > { %v1363_v33 = vadd.f32 %v1307_v59, %v988_v31 }
 0x172   : > { %2663 = vmatmul.msk.bf16.vlgmr.msra.gmra.mxu3 %vm665_vm3, %v3072_v23 }
 0x174   : > { %v1599_v34 = vpop.f32.mrf.mxu0 }
 0x175   : > { %v1444_v43 = vpop.f32.mrf.mxu3 }
 0x176   : > { %v992_v12 = vpop.f32.mrf.mxu1  ;;  %v1500_v44 = vadd.f32 %v1444_v43, %v1363_v33 }
 0x177   : > { %2680 = vmatmul.msk.bf16.vlgmr.msra.gmra.mxu0 %vm665_vm3, %v3195_v36  ;;  %v993_v57 = vadd.f32 %v992_v12, %v3277_v52 }
 0x178   : > { %v1309_v5 = vpop.f32.mrf.mxu2  ;;  %v3610_v18 = vadd.f32 %v1599_v34, %v1500_v44 }
 0x179   : > { %2628 = vmatmul.msk.bf16.gmra.mxu1 %vm665_vm3, %v3195_v36  ;;  %v1364_v7 = vadd.f32 %v1309_v5, %v990_v15 }
 0x17c   : > { %v1601_v63 = vpop.f32.mrf.mxu0 }
 0x17d   : > { %v1446_v47 = vpop.f32.mrf.mxu3  ;;  %2648 = vmatmul.msk.bf16.gmra.mxu2 %vm665_vm3, %v3201_v62 }
 0x17e   : > { %v994_v23 = vpop.f32.mrf.mxu1  ;;  %v1501_v22 = vadd.f32 %v1446_v47, %v1364_v7 }
 0x17f   : > { %v995_v62 = vadd.f32 %v994_v23, %v3299_v49 }
 0x180   : > { %v1312_v27 = vpop.f32.mrf.mxu2  ;;  %v3615_v13 = vadd.f32 %v1601_v63, %v1501_v22 }
 0x181   : > { %v1365_v46 = vadd.f32 %v1312_v27, %v993_v57 }
 0x182   : > { %2664 = vmatmul.msk.bf16.gmra.mxu3 %vm665_vm3, %v3158_v6 }
 0x184   : > { %v1604_v36 = vpop.f32.mrf.mxu0 }
 0x185   : > { %v1449_v54 = vpop.f32.mrf.mxu3 }
 0x186   : > { %v997_v41 = vpop.f32.mrf.mxu1  ;;  %v1502_v4 = vadd.f32 %v1449_v54, %v1365_v46 }
 0x187   : > { %2681 = vmatmul.msk.bf16.gmra.mxu0 %vm665_vm3, %v3215_v39  ;;  %v998_v33 = vadd.f32 %v997_v41, %v3316_v60 }
 0x188   : > { %v1314_v55 = vpop.f32.mrf.mxu2  ;;  %v3624_v52 = vadd.f32 %v1604_v36, %v1502_v4 }
 0x189   : > { %2629 = vmatmul.msk.bf16.gmra.mxu1 %vm665_vm3, %v3215_v39  ;;  %v1366_v0 = vadd.f32 %v1314_v55, %v995_v62 }
 0x18c   : > { %v1606_v19 = vpop.f32.mrf.mxu0 }
 0x18d   : > { %v1451_v31 = vpop.f32.mrf.mxu3  ;;  %2649 = vmatmul.msk.bf16.gmra.mxu2 %vm665_vm3, %v3223_v25 }
 0x18e   : > { %v999_v6 = vpop.f32.mrf.mxu1  ;;  %v1503_v59 = vadd.f32 %v1451_v31, %v1366_v0  ;;  %v4171_v0 = vld [vmem:[#allocation18_spill] sm:$0xff]  ;;  %v4172_v31 = vld [vmem:[#allocation16_spill] sm:$0xff] }
 0x18f   : > { %v1000_v25 = vadd.f32 %v999_v6, %v3335_v2 }
 0x190   : > { %v1317_v34 = vpop.f32.mrf.mxu2  ;;  %v3629_v43 = vadd.f32 %v1606_v19, %v1503_v59 }
 0x191   : > { %v1367_v49 = vadd.f32 %v1317_v34, %v998_v33  ;;  %v4173_v34 = vld [vmem:[#allocation8_spill] sm:$0xff] }
 0x192   : > { %2665 = vmatmul.msk.bf16.gmra.mxu3 %vm665_vm3, %v2843_v1 }
 0x194   : > { %v1609_v39 = vpop.f32.mrf.mxu0 }
 0x195   : > { %v1454_v12 = vpop.f32.mrf.mxu3 }
 0x196   : > { %v1002_v44 = vpop.f32.mrf.mxu1  ;;  %v1504_v15 = vadd.f32 %v1454_v12, %v1367_v49 }
 0x197   : > { %2682 = vmatmul.msk.bf16.gmra.mxu0 %vm665_vm3, %v3243_v14  ;;  %v1003_v22 = vadd.f32 %v1002_v44, %v3357_v48  ;;  %v4174_v44 = vld [vmem:[#allocation21_spill] sm:$0xff] }
 0x198   : > { %v1319_v5 = vpop.f32.mrf.mxu2  ;;  %v3638_v60 = vadd.f32 %v1609_v39, %v1504_v15  ;;  %v4175_v15 = vld [vmem:[#allocation17_spill] sm:$0xff] }
 0x199   : > { %2630 = vmatmul.msk.bf16.gmra.mxu1 %vm665_vm3, %v3243_v14  ;;  %v1368_v7 = vadd.f32 %v1319_v5, %v1000_v25 }
 0x19c   : > { %v1611_v63 = vpop.f32.mrf.mxu0 }
 0x19d   : > { %v1456_v47 = vpop.f32.mrf.mxu3  ;;  %2650 = vmatmul.msk.bf16.gmra.mxu2 %vm665_vm3, %v3251_v21 }
 0x19e   : > { %v1004_v1 = vpop.f32.mrf.mxu1  ;;  %v1505_v23 = vadd.f32 %v1456_v47, %v1368_v7 }
 0x19f   : > { %v1005_v21 = vadd.f32 %v1004_v1, %v3372_v37 }
 0x1a0   : > { %v1322_v57 = vpop.f32.mrf.mxu2  ;;  %v3643_v27 = vadd.f32 %v1611_v63, %v1505_v23  ;;  %v4176_v23 = vld [vmem:[#allocation22_spill] sm:$0xff] }
 0x1a1   : > { %v1369_v2 = vadd.f32 %v1322_v57, %v1003_v22 }
 0x1a2   : > { %2666 = vmatmul.msk.bf16.gmra.mxu3 %vm665_vm3, %v2918_v45 }
 0x1a4   : > { %v1614_v14 = vpop.f32.mrf.mxu0 }
 0x1a5   : > { %v1459_v46 = vpop.f32.mrf.mxu3 }
 0x1a6   : > { %v1007_v36 = vpop.f32.mrf.mxu1  ;;  %v1506_v54 = vadd.f32 %v1459_v46, %v1369_v2  ;;  %v4177_v2 = vld [vmem:[#allocation19_spill] sm:$0xff] }
 0x1a7   : > { %2683 = vmatmul.msk.bf16.gmra.mxu0 %vm665_vm3, %v3275_v42  ;;  %v1008_v6 = vadd.f32 %v1007_v36, %v4172_v31 }
 0x1a8   : > { %v1324_v41 = vpop.f32.mrf.mxu2  ;;  %v3652_v48 = vadd.f32 %v1614_v14, %v1506_v54 }
 0x1a9   : > { %2631 = vmatmul.msk.bf16.gmra.mxu1 %vm665_vm3, %v3275_v42  ;;  %v1370_v4 = vadd.f32 %v1324_v41, %v1005_v21  ;;  %v4178_v21 = vld [vmem:[#allocation14_spill] sm:$0xff] }
 0x1ac   : > { %v1616_v62 = vpop.f32.mrf.mxu0 }
 0x1ad   : > { %v1461_v55 = vpop.f32.mrf.mxu3  ;;  %2651 = vmatmul.msk.bf16.gmra.mxu2 %vm665_vm3, %v4171_v0  ;;  %v4179_v0 = vld [vmem:[#allocation24_spill] sm:$0xff] }
 0x1ae   : > { %v1009_v45 = vpop.f32.mrf.mxu1  ;;  %v1507_v19 = vadd.f32 %v1461_v55, %v1370_v4 }
 0x1af   : > { %v1010_v25 = vadd.f32 %v1009_v45, %v4175_v15  ;;  %v4180_v45 = vld [vmem:[#allocation20_spill] sm:$0xff] }
 0x1b0   : > { %v1327_v59 = vpop.f32.mrf.mxu2  ;;  %v3657_v33 = vadd.f32 %v1616_v62, %v1507_v19 }
 0x1b1   : > { %v1371_v37 = vadd.f32 %v1327_v59, %v1008_v6 }
 0x1b2   : > { %2667 = vmatmul.msk.bf16.gmra.mxu3 %vm665_vm3, %v4173_v34 }
 0x1b4   : > { %v1619_v42 = vpop.f32.mrf.mxu0 }
 0x1b5   : > { %v1464_v49 = vpop.f32.mrf.mxu3 }
 0x1b6   : > { %v1012_v39 = vpop.f32.mrf.mxu1  ;;  %v1508_v12 = vadd.f32 %v1464_v49, %v1371_v37 }
 0x1b7   : > { %2684 = vmatmul.msk.bf16.gmra.mxu0 %vm665_vm3, %v4174_v44  ;;  %v1013_v14 = vadd.f32 %v1012_v39, %v4177_v2  ;;  %v4185_v2 = vld [vmem:[#allocation25_spill] sm:$0xff] }
 0x1b8   : > { %v1329_v5 = vpop.f32.mrf.mxu2  ;;  %v3666_v7 = vadd.f32 %v1619_v42, %v1508_v12  ;;  %v4181_v42 = vld [vmem:[#allocation26_spill] sm:$0xff]  ;;  %v4182_v12 = vld [vmem:[#allocation23_spill] sm:$0xff] }
 0x1b9   : > { %2632 = vmatmul.msk.bf16.gmra.mxu1 %vm665_vm3, %v4174_v44  ;;  %v1372_v63 = vadd.f32 %v1329_v5, %v1010_v25 }
 0x1bc   : > { %v1621_v47 = vpop.f32.mrf.mxu0 }
 0x1bd   : > { %v1466_v1 = vpop.f32.mrf.mxu3  ;;  %2652 = vmatmul.msk.bf16.gmra.mxu2 %vm665_vm3, %v4176_v23 }
 0x1be   : > { %v1014_v22 = vpop.f32.mrf.mxu1  ;;  %v1509_v57 = vadd.f32 %v1466_v1, %v1372_v63  ;;  %v4183_v63 = vld [vmem:[#allocation2_spill] sm:$0xff] }
 0x1bf   : > { %v1015_v19 = vadd.f32 %v1014_v22, %v4180_v45 }
 0x1c0   : > { %v1332_v46 = vpop.f32.mrf.mxu2  ;;  %v3671_v36 = vadd.f32 %v1621_v47, %v1509_v57  ;;  %v4184_v57 = vld [vmem:[#allocation28_spill] sm:$0xff] }
 0x1c1   : > { %v1373_v54 = vadd.f32 %v1332_v46, %v1013_v14 }
 0x1c2   : > { %2668 = vmatmul.msk.bf16.gmra.mxu3 %vm665_vm3, %v4178_v21 }
 0x1c4   : > { %v1624_v41 = vpop.f32.mrf.mxu0 }
 0x1c5   : > { %v1469_v4 = vpop.f32.mrf.mxu3 }
 0x1c6   : > { %v1017_v62 = vpop.f32.mrf.mxu1  ;;  %v1510_v55 = vadd.f32 %v1469_v4, %v1373_v54 }
 0x1c7   : > { %2685 = vmatmul.msk.bf16.gmra.mxu0 %vm665_vm3, %v4179_v0  ;;  %v1018_v44 = vadd.f32 %v1017_v62, %v4182_v12 }
 0x1c8   : > { %v1334_v31 = vpop.f32.mrf.mxu2  ;;  %v3680_v6 = vadd.f32 %v1624_v41, %v1510_v55 }
 0x1c9   : > { %2633 = vmatmul.msk.bf16.gmra.mxu1 %vm665_vm3, %v4179_v0  ;;  %v1374_v59 = vadd.f32 %v1334_v31, %v1015_v19  ;;  %v4186_v0 = vld [vmem:[#allocation27_spill] sm:$0xff] }
 0x1cc   : > { %v1626_v37 = vpop.f32.mrf.mxu0 }
 0x1cd   : > { %v1471_v34 = vpop.f32.mrf.mxu3  ;;  %2653 = vmatmul.msk.bf16.gmra.mxu2 %vm665_vm3, %v4181_v42 }
 0x1ce   : > { %v1019_v49 = vpop.f32.mrf.mxu1  ;;  %v1511_v39 = vadd.f32 %v1471_v34, %v1374_v59 }
 0x1cf   : > { %v1020_v14 = vadd.f32 %v1019_v49, %v4185_v2 }
 0x1d0   : > { %v1337_v15 = vpop.f32.mrf.mxu2  ;;  %v3685_v25 = vadd.f32 %v1626_v37, %v1511_v39 }
 0x1d1   : > { %v1375_v5 = vadd.f32 %v1337_v15, %v1018_v44 }
 0x1d2   : > { %2669 = vmatmul.msk.bf16.gmra.mxu3 %vm665_vm3, %v4183_v63 }
 0x1d4   : > { %v1629_v47 = vpop.f32.mrf.mxu0 }
 0x1d5   : > { %v1474_v1 = vpop.f32.mrf.mxu3 }
 0x1d6   : > { %v1022_v23 = vpop.f32.mrf.mxu1  ;;  %v1512_v22 = vadd.f32 %v1474_v1, %v1375_v5 }
 0x1d7   : > { %2686 = vmatmul.msk.bf16.gmra.mxu0 %vm665_vm3, %v4184_v57  ;;  %v1023_v45 = vadd.f32 %v1022_v23, %v4186_v0  ;;  %v4188_v0 = vld [vmem:[#allocation9_spill] sm:$0xff] }
 0x1d8   : > { %v1339_v46 = vpop.f32.mrf.mxu2  ;;  %v3694_v54 = vadd.f32 %v1629_v47, %v1512_v22 }
 0x1d9   : > { %2634 = vmatmul.msk.bf16.gmra.mxu1 %vm665_vm3, %v4184_v57  ;;  %v1376_v21 = vadd.f32 %v1339_v46, %v1020_v14 }
 0x1dc   : > { %v1631_v41 = vpop.f32.mrf.mxu0 }
 0x1dd   : > { %v1476_v4 = vpop.f32.mrf.mxu3  ;;  %2654 = vmatmul.msk.bf16.gmra.mxu2 %vm665_vm3, %v3387_v53  ;;  %v4187_v53 = vld [vmem:[#allocation29_spill] sm:$0xff] }
 0x1de   : > { %v1024_v62 = vpop.f32.mrf.mxu1  ;;  %v1513_v55 = vadd.f32 %v1476_v4, %v1376_v21 }
 0x1df   : > { %v1025_v12 = vadd.f32 %v1024_v62, %v4187_v53 }
 0x1e0   : > { %v1342_v19 = vpop.f32.mrf.mxu2  ;;  %v3699_v31 = vadd.f32 %v1631_v41, %v1513_v55 }
 0x1e1   : > { %v1377_v59 = vadd.f32 %v1342_v19, %v1023_v45 }
 0x1e2   : > { %2670 = vmatmul.msk.bf16.gmra.mxu3 %vm665_vm3, %v2940_v3 }
 0x1e4   : > { %v1634_v37 = vpop.f32.mrf.mxu0 }
 0x1e5   : > { %v1479_v34 = vpop.f32.mrf.mxu3 }
 0x1e6   : > { %v1702_v42 = vpop.f32.mrf.mxu1  ;;  %v1514_v49 = vadd.f32 %v1479_v34, %v1377_v59 }
 0x1e7   : > { %v1782_v39 = vadd.f32 %v1702_v42, %v3402_v8  ;;  %2687 = vmatmul.msk.bf16.gmra.mxu0 %vm665_vm3, %v3404_v11 }
 0x1e8   : > { %v1344_v44 = vpop.f32.mrf.mxu2  ;;  %v3709_v15 = vadd.f32 %v1634_v37, %v1514_v49  ;;  %v4189_v37 = vld [vmem:[#allocation15_spill] sm:$0xff] }
 0x1e9   : > { %2635 = vmatmul.msk.bf16.gmra.mxu1 %vm665_vm3, %v3404_v11  ;;  %v1378_v5 = vadd.f32 %v1344_v44, %v1025_v12  ;;  %v4191_v12 = vld [vmem:[#allocation31_spill] sm:$0xff] }
 0x1ec   : > { %v1636_v63 = vpop.f32.mrf.mxu0 }
 0x1ed   : > { %v1481_v3 = vpop.f32.mrf.mxu3  ;;  %2655 = vmatmul.msk.bf16.gmra.mxu2 %vm665_vm3, %v3411_v32 }
 0x1ee   : > { %v1704_v47 = vpop.f32.mrf.mxu1  ;;  %v1515_v1 = vadd.f32 %v1481_v3, %v1378_v5 }
 0x1ef   : > { %v1783_v8 = vadd.f32 %v1704_v47, %v3415_v16  ;;  %v4192_v47 = vld [vmem:[#allocation32_spill] sm:$0xff] }
 0x1f0   : > { %v1835_v23 = vpop.f32.mrf.mxu2  ;;  %v3714_v22 = vadd.f32 %v1636_v63, %v1515_v1 }
 0x1f1   : > { %v1915_v57 = vadd.f32 %v1835_v23, %v1782_v39  ;;  %v4190_v39 = vld [vmem:[#allocation30_spill] sm:$0xff]  ;;  %v4193_v23 = vld [vmem:[#allocation33_spill] sm:$0xff] }
 0x1f2   : > { %2671 = vmatmul.msk.bf16.gmra.mxu3 %vm665_vm3, %v3028_v29 }
 0x1f4   : > { %v2133_v11 = vpop.f32.mrf.mxu0 }
 0x1f5   : > { %v1994_v2 = vpop.f32.mrf.mxu3 }
 0x1f6   : > { %v1707_v14 = vpop.f32.mrf.mxu1  ;;  %v2074_v46 = vadd.f32 %v1994_v2, %v1915_v57 }
 0x1f7   : > { %v1784_v21 = vadd.f32 %v1707_v14, %v3428_v61  ;;  %2688 = vmatmul.msk.bf16.gmra.mxu0 %vm665_vm3, %v3430_v56 }
 0x1f8   : > { %v3721_v32 = vadd.f32 %v2133_v11, %v2074_v46  ;;  %v1837_v41 = vpop.f32.mrf.mxu2  ;;  %v4194_v46 = vld [vmem:[#allocation3_spill] sm:$0xff] }
 0x1f9   : > { %2636 = vmatmul.msk.bf16.gmra.mxu1 %vm665_vm3, %v3430_v56  ;;  %v1916_v16 = vadd.f32 %v1837_v41, %v1783_v8 }
 0x1fc   : > { %v2135_v4 = vpop.f32.mrf.mxu0 }
 0x1fd   : > { %v1996_v62 = vpop.f32.mrf.mxu3  ;;  %2656 = vmatmul.msk.bf16.gmra.mxu2 %vm665_vm3, %v3437_v51 }
 0x1fe   : > { %v1709_v29 = vpop.f32.mrf.mxu1  ;;  %v2075_v55 = vadd.f32 %v1996_v62, %v1916_v16  ;;  %v4195_v62 = vld [vmem:[#allocation34_spill] sm:$0xff] }
 0x1ff   : > { %v1785_v45 = vadd.f32 %v1709_v29, %v4188_v0 }
 0x200   : > { %v3728_v61 = vadd.f32 %v2135_v4, %v2075_v55  ;;  %v1840_v19 = vpop.f32.mrf.mxu2  ;;  %v4196_v55 = vld [vmem:[#allocation35_spill] sm:$0xff] }
 0x201   : > { %v1917_v59 = vadd.f32 %v1840_v19, %v1784_v21 }
 0x202   : > { %2672 = vmatmul.msk.bf16.gmra.mxu3 %vm665_vm3, %v4189_v37 }
 0x204   : > { %v2138_v34 = vpop.f32.mrf.mxu0 }
 0x205   : > { %v1999_v42 = vpop.f32.mrf.mxu3 }
 0x206   : > { %v1712_v56 = vpop.f32.mrf.mxu1  ;;  %v2076_v49 = vadd.f32 %v1999_v42, %v1917_v59 }
 0x207   : > { %v1786_v53 = vadd.f32 %v1712_v56, %v4190_v39  ;;  %2689 = vmatmul.msk.bf16.gmra.mxu0 %vm665_vm3, %v4191_v12 }
 0x208   : > { %v3735_v51 = vadd.f32 %v2138_v34, %v2076_v49  ;;  %v1842_v44 = vpop.f32.mrf.mxu2  ;;  %v4197_v34 = vld [vmem:[#allocation36_spill] sm:$0xff]  ;;  %v4198_v49 = vld [vmem:[#allocation37_spill] sm:$0xff] }
 0x209   : > { %2637 = vmatmul.msk.bf16.gmra.mxu1 %vm665_vm3, %v4191_v12  ;;  %v1918_v5 = vadd.f32 %v1842_v44, %v1785_v45 }
 0x20c   : > { %v2140_v63 = vpop.f32.mrf.mxu0 }
 0x20d   : > { %v2001_v3 = vpop.f32.mrf.mxu3  ;;  %2657 = vmatmul.msk.bf16.gmra.mxu2 %vm665_vm3, %v4192_v47 }
 0x20e   : > { %v1714_v1 = vpop.f32.mrf.mxu1  ;;  %v2077_v8 = vadd.f32 %v2001_v3, %v1918_v5  ;;  %v4199_v5 = vld [vmem:[#allocation4_spill] sm:$0xff] }
 0x20f   : > { %v1787_v57 = vadd.f32 %v1714_v1, %v4193_v23 }
 0x210   : > { %v3742_v11 = vadd.f32 %v2140_v63, %v2077_v8  ;;  %v1845_v2 = vpop.f32.mrf.mxu2  ;;  %v4200_v8 = vld [vmem:[#allocation38_spill] sm:$0xff] }
 0x211   : > { %v1919_v14 = vadd.f32 %v1845_v2, %v1786_v53 }
 0x212   : > { %2673 = vmatmul.msk.bf16.gmra.mxu3 %vm665_vm3, %v4194_v46 }
 0x214   : > { %v2143_v21 = vpop.f32.mrf.mxu0 }
 0x215   : > { %v2004_v41 = vpop.f32.mrf.mxu3 }
 0x216   : > { %v1717_v16 = vpop.f32.mrf.mxu1  ;;  %v2078_v4 = vadd.f32 %v2004_v41, %v1919_v14 }
 0x217   : > { %v1788_v29 = vadd.f32 %v1717_v16, %v4195_v62  ;;  %2690 = vmatmul.msk.bf16.gmra.mxu0 %vm665_vm3, %v4196_v55  ;;  %v4202_v16 = vld [vmem:[#allocation6_spill] sm:$0xff] }
 0x218   : > { %v3749_v0 = vadd.f32 %v2143_v21, %v2078_v4  ;;  %v1847_v45 = vpop.f32.mrf.mxu2 }
 0x219   : > { %2638 = vmatmul.msk.bf16.gmra.mxu1 %vm665_vm3, %v4196_v55  ;;  %v1920_v19 = vadd.f32 %v1847_v45, %v1787_v57  ;;  %v4201_v57 = vld [vmem:[#allocation39_spill] sm:$0xff] }
 0x21c   : > { %v2145_v59 = vpop.f32.mrf.mxu0 }
 0x21d   : > { %v2006_v37 = vpop.f32.mrf.mxu3  ;;  %2658 = vmatmul.msk.bf16.gmra.mxu2 %vm665_vm3, %v4197_v34 }
 0x21e   : > { %v1719_v42 = vpop.f32.mrf.mxu1  ;;  %v2079_v56 = vadd.f32 %v2006_v37, %v1920_v19  ;;  %v4204_v37 = vld [vmem:[#allocation10_spill] sm:$0xff] }
 0x21f   : > { %v1789_v39 = vadd.f32 %v1719_v42, %v4198_v49 }
 0x220   : > { %v3756_v53 = vadd.f32 %v2145_v59, %v2079_v56  ;;  %v1850_v12 = vpop.f32.mrf.mxu2 }
 0x221   : > { %v1921_v44 = vadd.f32 %v1850_v12, %v1788_v29  ;;  %v4203_v29 = vld [vmem:[#allocation7_spill] sm:$0xff] }
 0x222   : > { %2674 = vmatmul.msk.bf16.gmra.mxu3 %vm665_vm3, %v4199_v5 }
 0x224   : > { %v2148_v63 = vpop.f32.mrf.mxu0 }
 0x225   : > { %v2009_v3 = vpop.f32.mrf.mxu3 }
 0x226   : > { %v1722_v47 = vpop.f32.mrf.mxu1  ;;  %v2080_v1 = vadd.f32 %v2009_v3, %v1921_v44  ;;  %v4206_v44 = vld [vmem:[#allocation41_spill] sm:$0xff] }
 0x227   : > { %v1790_v23 = vadd.f32 %v1722_v47, %v4200_v8  ;;  %2691 = vmatmul.msk.bf16.gmra.mxu0 %vm665_vm3, %v4201_v57 }
 0x228   : > { %v3763_v2 = vadd.f32 %v2148_v63, %v2080_v1  ;;  %v1852_v14 = vpop.f32.mrf.mxu2 }
 0x229   : > { %2639 = vmatmul.msk.bf16.gmra.mxu1 %vm665_vm3, %v4201_v57  ;;  %v1922_v46 = vadd.f32 %v1852_v14, %v1789_v39  ;;  %v4205_v39 = vld [vmem:[#allocation40_spill] sm:$0xff] }
 0x22c   : > { %v2150_v21 = vpop.f32.mrf.mxu0 }
 0x22d   : > { %v2011_v41 = vpop.f32.mrf.mxu3  ;;  %2659 = vmatmul.msk.bf16.gmra.mxu2 %vm665_vm3, %v4202_v16  ;;  %v4207_v16 = vld [vmem:[#allocation42_spill] sm:$0xff] }
 0x22e   : > { %v1724_v4 = vpop.f32.mrf.mxu1  ;;  %v2081_v62 = vadd.f32 %v2011_v41, %v1922_v46 }
 0x22f   : > { %v1791_v55 = vadd.f32 %v1724_v4, %v4203_v29  ;;  %v1674_v4 = vrot.slane %v4207_v16, 5  ;;  %v3793_v29 = vld [vmem:[%s2801_s30 + $0xd0] sm:$0xf] }
 0x230   : > { %v3770_v45 = vadd.f32 %v2150_v21, %v2081_v62  ;;  %v1855_v19 = vpop.f32.mrf.mxu2  ;;  %v3790_v62 = vld [vmem:[%s2801_s30 + $0xcc] sm:$0xf] }
 0x231   : > { %v1923_v59 = vadd.f32 %v1855_v19, %v1790_v23 }
 0x232   : > { %2675 = vmatmul.msk.bf16.gmra.mxu3 %vm665_vm3, %v4204_v37 }
 0x234   : > { %v2153_v34 = vpop.f32.mrf.mxu0 }
 0x235   : > { %v2014_v42 = vpop.f32.mrf.mxu3 }
 0x236   : > { %v1727_v56 = vpop.f32.mrf.mxu1  ;;  %v2082_v49 = vadd.f32 %v2014_v42, %v1923_v59  ;;  %v1957_v42 = vshll.u32 %v3793_v29, 16 }
 0x237   : > { %v1792_v12 = vadd.f32 %v1727_v56, %v4205_v39  ;;  %2692 = vmatmul.msk.bf16.gmra.mxu0 %vm665_vm3, %v4206_v44  ;;  %v1961_v56 = vshrl.u32 %v3793_v29, 16 }
 0x238   : > { %v3777_v5 = vadd.f32 %v2153_v34, %v2082_v49  ;;  %v1857_v63 = vpop.f32.mrf.mxu2  ;;  %v1948_v34 = vshrl.u32 %v3790_v62, 16 }
 0x239   : > { %2640 = vmatmul.msk.bf16.gmra.mxu1 %vm665_vm3, %v4206_v44  ;;  %v1924_v3 = vadd.f32 %v1857_v63, %v1791_v55 }
 0x23c   : > { %v2155_v47 = vpop.f32.mrf.mxu0 }
 0x23d   : > { %v2016_v1 = vpop.f32.mrf.mxu3  ;;  %2660 = vmatmul.msk.bf16.gmra.mxu2 %vm665_vm3, %v3550_v30 }
 0x23e   : > { %v1729_v8 = vpop.f32.mrf.mxu1  ;;  %v2083_v23 = vadd.f32 %v2016_v1, %v1924_v3  ;;  %v1950_v3 = vrot.slane %v1948_v34, 4  ;;  %v1959_v1 = vrot.slane %v1957_v42, 5 }
 0x23f   : > { %v1793_v57 = vadd.f32 %v1729_v8, %v3554_v50  ;;  %v4208_v50 = vld [vmem:[#allocation5_spill] sm:$0xff]  ;;  %v1963_v8 = vrot.slane %v1961_v56, 4 }
 0x240   : > { %v3784_v14 = vadd.f32 %v2155_v47, %v2083_v23  ;;  %v1860_v46 = vpop.f32.mrf.mxu2  ;;  %v2626_v37 = vrot.slane %v4208_v50, 9 }
 0x241   : > { %v1925_v21 = vadd.f32 %v1860_v46, %v1792_v12  ;;  %v1677_v12 = vrot.slane %v3557_v58, 5 }
 0x242   : > { %2676 = vmatmul.msk.bf16.gmra.mxu3 %vm665_vm3, %v3141_v10  ;;  %v1951_v10 = vshll.u32 %v3790_v62, 16  ;;  %v1675_v63 = vsel %vm3134_vm7, %v2626_v37, %v1674_v4 }
 0x243   : > { %v1680_v58 = vunpack.c.l.b16 %v1675_v63 }
 0x244   : > { %v2158_v41 = vpop.f32.mrf.mxu0  ;;  %v1953_v47 = vrot.slane %v1951_v10, 5 }
 0x245   : > { %v2019_v55 = vpop.f32.mrf.mxu3 }
 0x246   : > { %v1732_v30 = vpop.f32.mrf.mxu1  ;;  %v2084_v19 = vadd.f32 %v2019_v55, %v1925_v21  ;;  %v223_v21 = vld [vmem:[%s2801_s30 + $0xd4] sm:$0x1] }
 0x247   : > { %v1794_v59 = vadd.f32 %v1732_v30, %v3571_v17  ;;  %2693 = vmatmul.msk.bf16.gmra.mxu0 %vm665_vm3, %v3573_v35  ;;  %v1676_v17 = vrot.slane %v1674_v4, 4  ;;  %v1954_v4 = vor.u32 %v1953_v47, %v1950_v3  ;;  %v1964_v30 = vor.u32 %v1963_v8, %v1959_v1 }
 0x248   : > { %v3803_v49 = vadd.f32 %v2158_v41, %v2084_v19  ;;  %v1862_v39 = vpop.f32.mrf.mxu2  ;;  %v1967_v19 = vshll.u32 %v223_v21, 16 }
 0x249   : > { %2641 = vmatmul.msk.bf16.gmra.mxu1 %vm665_vm3, %v3573_v35  ;;  %v1926_v44 = vadd.f32 %v1862_v39, %v1793_v57  ;;  %v1678_v46 = vsel %vm3134_vm7, %v1676_v17, %v1677_v12  ;;  %v1955_v42 = vrot.slane %v1954_v4, 4  ;;  %v1965_v56 = vrot.slane %v1964_v30, 4 }
 0x24a   : > { %v1681_v55 = vunpack.c.l.b16 %v1678_v46  ;;  %v2109_v17 = vrot.slane %v3793_v29, 5  ;;  %v2679_v29 = vrot.slane %v3790_v62, 9 }
 0x24c   : > { %v2160_v23 = vpop.f32.mrf.mxu0  ;;  %v1682_v10 = vpack.c.b16 %v1681_v55, %v1680_v58  ;;  %v2111_v8 = vrot.slane %v2109_v17, 4 }
 0x24d   : > { %v2021_v41 = vpop.f32.mrf.mxu3  ;;  %2661 = vmatmul.msk.bf16.gmra.mxu2 %vm665_vm3, %v3582_v9  ;;  %v1969_v9 = vrot.slane %v1967_v19, 5 }
 0x24e   : > { %v1734_v35 = vpop.f32.mrf.mxu1  ;;  %v2085_v16 = vadd.f32 %v2021_v41, %v1926_v44  ;;  %v2717_v41 = vld [vmem:[%s2801_s30 + $0xcc] sm:$0xff] }
 0x24f   : > { %v1795_v57 = vadd.f32 %v1734_v35, %v3585_v28 }
 0x250   : > { %v3816_v50 = vadd.f32 %v2160_v23, %v2085_v16  ;;  %v1865_v37 = vpop.f32.mrf.mxu2  ;;  %v2112_v23 = vrot.slane %v223_v21, 5 }
 0x251   : > { %v1927_v34 = vadd.f32 %v1865_v37, %v1794_v59  ;;  %v1960_v59 = vsel %vm2831_vm4, %v1955_v42, %v1959_v1  ;;  %v2110_v1 = vsel %vm3134_vm7, %v2679_v29, %v2109_v17 }
 0x252   : > { %2677 = vmatmul.msk.bf16.gmra.mxu3 %vm665_vm3, %v3589_v24  ;;  %v1970_v24 = vsel %vm2831_vm4, %v1965_v56, %v1969_v9  ;;  %v2113_v38 = vsel %vm3134_vm7, %v2111_v8, %v2112_v23  ;;  %v2115_v21 = vunpack.c.l.b16 %v2110_v1 }
 0x253   : > { %v1973_v35 = vunpack.c.l.b16 %v1970_v24 }
 0x254   : > { %v2163_v39 = vpop.f32.mrf.mxu0 }
 0x255   : > { %v2024_v28 = vpop.f32.mrf.mxu3 }
 0x256   : > { %v1737_v12 = vpop.f32.mrf.mxu1  ;;  %v2086_v44 = vadd.f32 %v2024_v28, %v1927_v34 }
 0x257   : > { %v1796_v63 = vadd.f32 %v1737_v12, %v3596_v26  ;;  %2694 = vmatmul.msk.bf16.gmra.mxu0 %vm665_vm3, %v1682_v10  ;;  %v1972_v26 = vunpack.c.l.b16 %v1960_v59 }
 0x258   : > { %v3827_v3 = vadd.f32 %v2163_v39, %v2086_v44  ;;  %v1867_v47 = vpop.f32.mrf.mxu2 }
 0x259   : > { %2642 = vmatmul.msk.bf16.gmra.mxu1 %vm665_vm3, %v1682_v10  ;;  %v1928_v46 = vadd.f32 %v1867_v47, %v1795_v57  ;;  %v1974_v30 = vpack.c.b16 %v1973_v35, %v1972_v26  ;;  %v2116_v57 = vunpack.c.l.b16 %v2113_v38 }
 0x25b   : > { %v2117_v10 = vpack.c.b16 %v2116_v57, %v2115_v21 }
 0x25c   : > { %v2165_v16 = vpop.f32.mrf.mxu0 }
 0x25d   : > { %v2026_v58 = vpop.f32.mrf.mxu3  ;;  %2662 = vmatmul.msk.bf16.gmra.mxu2 %vm665_vm3, %v2717_v41 }
 0x25e   : > { %v1739_v55 = vpop.f32.mrf.mxu1  ;;  %v2087_v4 = vadd.f32 %v2026_v58, %v1928_v46 }
 0x25f   : > { %v1797_v62 = vadd.f32 %v1739_v55, %v3601_v40 }
 0x260   : > { %v3838_v19 = vadd.f32 %v2165_v16, %v2087_v4  ;;  %v1870_v37 = vpop.f32.mrf.mxu2 }
 0x261   : > { %v1929_v34 = vadd.f32 %v1870_v37, %v1796_v63 }
 0x262   : > { %2678 = vmatmul.msk.bf16.gmra.mxu3 %vm665_vm3, %v1974_v30 }
 0x264   : > { %v2168_v42 = vpop.f32.mrf.mxu0 }
 0x265   : > { %v2029_v20 = vpop.f32.mrf.mxu3 }
 0x266   : > { %v1742_v56 = vpop.f32.mrf.mxu1  ;;  %v2088_v9 = vadd.f32 %v2029_v20, %v1929_v34 }
 0x267   : > { %v1798_v39 = vadd.f32 %v1742_v56, %v3610_v18  ;;  %2695 = vmatmul.msk.bf16.gmra.mxu0 %vm665_vm3, %v2117_v10 }
 0x268   : > { %v3843_v17 = vadd.f32 %v2168_v42, %v2088_v9  ;;  %v1872_v40 = vpop.f32.mrf.mxu2 }
 0x269   : > { %v1930_v28 = vadd.f32 %v1872_v40, %v1797_v62 }
 0x26c   : > { %v2170_v12 = vpop.f32.mrf.mxu0 }
 0x26d   : > { %v2031_v44 = vpop.f32.mrf.mxu3 }
 0x26e   : > { %v1744_v59 = vpop.f32.mrf.mxu1  ;;  %v2089_v24 = vadd.f32 %v2031_v44, %v1930_v28 }
 0x26f   : > { %v1799_v63 = vadd.f32 %v1744_v59, %v3615_v13 }
 0x270   : > { %v3846_v47 = vadd.f32 %v2170_v12, %v2089_v24  ;;  %v1875_v29 = vpop.f32.mrf.mxu2 }
 0x271   : > { %v1931_v8 = vadd.f32 %v1875_v29, %v1798_v39 }
 0x274   : > { %v2173_v23 = vpop.f32.mrf.mxu0 }
 0x275   : > { %v2034_v46 = vpop.f32.mrf.mxu3 }
 0x276   : > { %v1747_v41 = vpop.f32.mrf.mxu1  ;;  %v2090_v18 = vadd.f32 %v2034_v46, %v1931_v8 }
 0x277   : > { %v1800_v26 = vadd.f32 %v1747_v41, %v3624_v52 }
 0x278   : > { %v3849_v35 = vadd.f32 %v2173_v23, %v2090_v18  ;;  %v1877_v16 = vpop.f32.mrf.mxu2 }
 0x279   : > { %v1932_v1 = vadd.f32 %v1877_v16, %v1799_v63 }
 0x27c   : > { %v2175_v38 = vpop.f32.mrf.mxu0 }
 0x27d   : > { %v2036_v58 = vpop.f32.mrf.mxu3 }
 0x27e   : > { %v1749_v55 = vpop.f32.mrf.mxu1  ;;  %v2091_v4 = vadd.f32 %v2036_v58, %v1932_v1 }
 0x27f   : > { %v1801_v13 = vadd.f32 %v1749_v55, %v3629_v43 }
 0x280   : > { %v3852_v30 = vadd.f32 %v2175_v38, %v2091_v4  ;;  %v1880_v62 = vpop.f32.mrf.mxu2 }
 0x281   : > { %v1933_v21 = vadd.f32 %v1880_v62, %v1800_v26 }
 0x284   : > { %v2178_v57 = vpop.f32.mrf.mxu0 }
 0x285   : > { %v2039_v37 = vpop.f32.mrf.mxu3 }
 0x286   : > { %v1752_v34 = vpop.f32.mrf.mxu1  ;;  %v2092_v10 = vadd.f32 %v2039_v37, %v1933_v21 }
 0x287   : > { %v1802_v52 = vadd.f32 %v1752_v34, %v3638_v60 }
 0x288   : > { %v3855_v42 = vadd.f32 %v2178_v57, %v2092_v10  ;;  %v1882_v20 = vpop.f32.mrf.mxu2 }
 0x289   : > { %v1934_v56 = vadd.f32 %v1882_v20, %v1801_v13 }
 0x28c   : > { %v2180_v9 = vpop.f32.mrf.mxu0 }
 0x28d   : > { %v2041_v39 = vpop.f32.mrf.mxu3 }
 0x28e   : > { %v1754_v40 = vpop.f32.mrf.mxu1  ;;  %v2093_v28 = vadd.f32 %v2041_v39, %v1934_v56 }
 0x28f   : > { %v1803_v43 = vadd.f32 %v1754_v40, %v3643_v27 }
 0x290   : > { %v3858_v12 = vadd.f32 %v2180_v9, %v2093_v28  ;;  %v1885_v44 = vpop.f32.mrf.mxu2 }
 0x291   : > { %v1935_v59 = vadd.f32 %v1885_v44, %v1802_v52 }
 0x294   : > { %v2183_v24 = vpop.f32.mrf.mxu0 }
 0x295   : > { %v2044_v63 = vpop.f32.mrf.mxu3 }
 0x296   : > { %v1757_v29 = vpop.f32.mrf.mxu1  ;;  %v2094_v8 = vadd.f32 %v2044_v63, %v1935_v59 }
 0x297   : > { %v1804_v60 = vadd.f32 %v1757_v29, %v3652_v48 }
 0x298   : > { %v3861_v23 = vadd.f32 %v2183_v24, %v2094_v8  ;;  %v1887_v46 = vpop.f32.mrf.mxu2 }
 0x299   : > { %v1936_v41 = vadd.f32 %v1887_v46, %v1803_v43 }
 0x29c   : > { %v2185_v18 = vpop.f32.mrf.mxu0 }
 0x29d   : > { %v2046_v26 = vpop.f32.mrf.mxu3 }
 0x29e   : > { %v1759_v16 = vpop.f32.mrf.mxu1  ;;  %v2095_v1 = vadd.f32 %v2046_v26, %v1936_v41 }
 0x29f   : > { %v1805_v27 = vadd.f32 %v1759_v16, %v3657_v33 }
 0x2a0   : > { %v3864_v38 = vadd.f32 %v2185_v18, %v2095_v1  ;;  %v1890_v58 = vpop.f32.mrf.mxu2 }
 0x2a1   : > { %v1937_v55 = vadd.f32 %v1890_v58, %v1804_v60 }
 0x2a4   : > { %v2188_v4 = vpop.f32.mrf.mxu0 }
 0x2a5   : > { %v2049_v13 = vpop.f32.mrf.mxu3 }
 0x2a6   : > { %v1762_v62 = vpop.f32.mrf.mxu1  ;;  %v2096_v21 = vadd.f32 %v2049_v13, %v1937_v55 }
 0x2a7   : > { %v1806_v33 = vadd.f32 %v1762_v62, %v3666_v7 }
 0x2a8   : > { %v3866_v57 = vadd.f32 %v2188_v4, %v2096_v21  ;;  %v1892_v48 = vpop.f32.mrf.mxu2 }
 0x2a9   : > { %v1938_v37 = vadd.f32 %v1892_v48, %v1805_v27 }
 0x2ac   : > { %v2190_v34 = vpop.f32.mrf.mxu0 }
 0x2ad   : > { %v2051_v10 = vpop.f32.mrf.mxu3 }
 0x2ae   : > { %v1764_v52 = vpop.f32.mrf.mxu1  ;;  %v2097_v20 = vadd.f32 %v2051_v10, %v1938_v37 }
 0x2af   : > { %v1807_v24 = vadd.f32 %v1764_v52, %v3671_v36 }
 0x2b0   : > { %v3868_v56 = vadd.f32 %v2190_v34, %v2097_v20  ;;  %v1895_v9 = vpop.f32.mrf.mxu2 }
 0x2b1   : > { %v1939_v39 = vadd.f32 %v1895_v9, %v1806_v33 }
 0x2b4   : > { %v2193_v40 = vpop.f32.mrf.mxu0 }
 0x2b5   : > { %v2054_v28 = vpop.f32.mrf.mxu3 }
 0x2b6   : > { %v1767_v43 = vpop.f32.mrf.mxu1  ;;  %v2098_v44 = vadd.f32 %v2054_v28, %v1939_v39 }
 0x2b7   : > { %v1808_v7 = vadd.f32 %v1767_v43, %v3680_v6 }
 0x2b8   : > { %v3871_v59 = vadd.f32 %v2193_v40, %v2098_v44  ;;  %v1897_v63 = vpop.f32.mrf.mxu2 }
 0x2b9   : > { %v1940_v29 = vadd.f32 %v1897_v63, %v1807_v24 }
 0x2bc   : > { %v2195_v8 = vpop.f32.mrf.mxu0 }
 0x2bd   : > { %v2056_v60 = vpop.f32.mrf.mxu3 }
 0x2be   : > { %v1769_v46 = vpop.f32.mrf.mxu1  ;;  %v2099_v41 = vadd.f32 %v2056_v60, %v1940_v29 }
 0x2bf   : > { %v1809_v36 = vadd.f32 %v1769_v46, %v3685_v25 }
 0x2c0   : > { %v3874_v18 = vadd.f32 %v2195_v8, %v2099_v41  ;;  %v1900_v26 = vpop.f32.mrf.mxu2 }
 0x2c1   : > { %v1941_v16 = vadd.f32 %v1900_v26, %v1808_v7 }
 0x2c4   : > { %v2198_v1 = vpop.f32.mrf.mxu0 }
 0x2c5   : > { %v2059_v27 = vpop.f32.mrf.mxu3 }
 0x2c6   : > { %v2100_v58 = vadd.f32 %v2059_v27, %v1941_v16  ;;  %v1772_v55 = vpop.f32.mrf.mxu1 }
 0x2c7   : > { %v1810_v10 = vadd.f32 %v1772_v55, %v3694_v54 }
 0x2c8   : > { %v3877_v4 = vadd.f32 %v2198_v1, %v2100_v58  ;;  %v1902_v13 = vpop.f32.mrf.mxu2 }
 0x2c9   : > { %v1942_v62 = vadd.f32 %v1902_v13, %v1809_v36 }
 0x2cc   : > { %v2200_v21 = vpop.f32.mrf.mxu0 }
 0x2cd   : > { %v2061_v48 = vpop.f32.mrf.mxu3 }
 0x2ce   : > { %v2101_v37 = vadd.f32 %v2061_v48, %v1942_v62  ;;  %v1774_v52 = vpop.f32.mrf.mxu1 }
 0x2cf   : > { %v1811_v28 = vadd.f32 %v1774_v52, %v3699_v31 }
 0x2d0   : > { %v3880_v34 = vadd.f32 %v2200_v21, %v2101_v37  ;;  %v1905_v6 = vpop.f32.mrf.mxu2 }
 0x2d1   : > { %v1943_v20 = vadd.f32 %v1905_v6, %v1810_v10 }
 0x2d4   : > { %v2203_v33 = vpop.f32.mrf.mxu0 }
 0x2d5   : > { %v2064_v9 = vpop.f32.mrf.mxu3 }
 0x2d6   : > { %v2102_v39 = vadd.f32 %v2064_v9, %v1943_v20  ;;  %v1777_v44 = vpop.f32.mrf.mxu1 }
 0x2d7   : > { %v1812_v54 = vadd.f32 %v1777_v44, %v3709_v15 }
 0x2d8   : > { %v3883_v40 = vadd.f32 %v2203_v33, %v2102_v39  ;;  %v1907_v25 = vpop.f32.mrf.mxu2 }
 0x2d9   : > { %v1944_v43 = vadd.f32 %v1907_v25, %v1811_v28 }
 0x2dc   : > { %v2205_v24 = vpop.f32.mrf.mxu0 }
 0x2dd   : > { %v2066_v63 = vpop.f32.mrf.mxu3 }
 0x2de   : > { %v2103_v29 = vadd.f32 %v2066_v63, %v1944_v43  ;;  %v1779_v41 = vpop.f32.mrf.mxu1 }
 0x2df   : > { %v1813_v31 = vadd.f32 %v1779_v41, %v3714_v22 }
 0x2e0   : > { %v3886_v8 = vadd.f32 %v2205_v24, %v2103_v29  ;;  %v1910_v60 = vpop.f32.mrf.mxu2 }
 0x2e1   : > { %v1945_v46 = vadd.f32 %v1910_v60, %v1812_v54 }
 0x2e4   : > { %v2208_v7 = vpop.f32.mrf.mxu0 }
 0x2e5   : > { %v2069_v26 = vpop.f32.mrf.mxu3 }
 0x2e6   : > { %v2104_v16 = vadd.f32 %v2069_v26, %v1945_v46 }
 0x2e8   : > { %v3889_v1 = vadd.f32 %v2208_v7, %v2104_v16  ;;  %v1912_v27 = vpop.f32.mrf.mxu2 }
 0x2e9   : > { %v1946_v58 = vadd.f32 %v1912_v27, %v1813_v31 }
 0x2ec   : > { %v2210_v13 = vpop.f32.mrf.mxu0  ;;  %2248 = sbr.rel (%p2696_p4) target bundleno = 755 (0x2f3), region = 32 }
 0x2ed   : > { %v2071_v55 = vpop.f32.mrf.mxu3 }
 0x2ee   : > { %v2105_v36 = vadd.f32 %v2071_v55, %v1946_v58 }
 0x2f0   : > { %v3892_v62 = vadd.f32 %v2210_v13, %v2105_v36 }
 0x2f1   : > { %v2748_v15 = vmov 0.0  }
 0x2f2   : > { %2249 = vst [vmem:[%s4070_s3] sm:$0x3] %v2748_v15 }
 0x2f3 PF: > { %v2250_v22 = vadd.f32 %v3728_v61, %v3721_v32  ;;  %2361 = vst [vmem:[%s2796_s27] sm:$0xff] %v3721_v32  ;;  %v2287_v21 = vmul.f32 %v3721_v32, %v3721_v32  ;;  %v2288_v48 = vmul.f32 %v3728_v61, %v3728_v61  ;;  %v2289_v10 = vmul.f32 %v3735_v51, %v3735_v51 }
 0x2f4   : > { %2362 = vst [vmem:[%s2796_s27 + $0x8] sm:$0xff] %v3728_v61  ;;  %v2290_v32 = vmul.f32 %v3742_v11, %v3742_v11  ;;  %vm2357_vm8 = vcmask 1040384  }
 0x2f5   : > { %v2251_v37 = vadd.f32 %v2250_v22, %v3735_v51  ;;  %2363 = vst [vmem:[%s2796_s27 + $0x10] sm:$0xff] %v3735_v51  ;;  %v2319_v61 = vadd.f32 %v2288_v48, %v2287_v21  ;;  %v2291_v51 = vmul.f32 %v3749_v0, %v3749_v0  ;;  %v2304_v21 = vmul.f32 %v3852_v30, %v3852_v30 }
 0x2f6   : > { %2364 = vst [vmem:[%s2796_s27 + $0x18] sm:$0xff] %v3742_v11 }
 0x2f7   : > { %v2252_v6 = vadd.f32 %v2251_v37, %v3742_v11  ;;  %2365 = vst [vmem:[%s2796_s27 + $0x20] sm:$0xff] %v3749_v0  ;;  %v2320_v20 = vadd.f32 %v2319_v61, %v2289_v10  ;;  %v2292_v11 = vmul.f32 %v3756_v53, %v3756_v53  ;;  %v2305_v37 = vmul.f32 %v3855_v42, %v3855_v42 }
 0x2f8   : > { %2366 = vst [vmem:[%s2796_s27 + $0x28] sm:$0xff] %v3756_v53 }
 0x2f9   : > { %v2253_v52 = vadd.f32 %v2252_v6, %v3749_v0  ;;  %2367 = vst [vmem:[%s2796_s27 + $0x30] sm:$0xff] %v3763_v2  ;;  %v2321_v9 = vadd.f32 %v2320_v20, %v2290_v32  ;;  %v2293_v0 = vmul.f32 %v3763_v2, %v3763_v2  ;;  %v2308_v20 = vmul.f32 %v3864_v38, %v3864_v38 }
 0x2fa   : > { %2368 = vst [vmem:[%s2796_s27 + $0x38] sm:$0xff] %v3770_v45 }
 0x2fb   : > { %v2254_v33 = vadd.f32 %v2253_v52, %v3756_v53  ;;  %2369 = vst [vmem:[%s2796_s27 + $0x40] sm:$0xff] %v3777_v5  ;;  %v2322_v28 = vadd.f32 %v2321_v9, %v2291_v51  ;;  %v2294_v53 = vmul.f32 %v3770_v45, %v3770_v45  ;;  %v2307_v52 = vmul.f32 %v3861_v23, %v3861_v23 }
 0x2fc   : > { %2370 = vst [vmem:[%s2796_s27 + $0x48] sm:$0xff] %v3784_v14 }
 0x2fd   : > { %v2255_v39 = vadd.f32 %v2254_v33, %v3763_v2  ;;  %2371 = vst [vmem:[%s2796_s27 + $0x50] sm:$0xff] %v3803_v49  ;;  %v2323_v43 = vadd.f32 %v2322_v28, %v2292_v11  ;;  %v2295_v2 = vmul.f32 %v3777_v5, %v3777_v5  ;;  %v2309_v11 = vmul.f32 %v3866_v57, %v3866_v57 }
 0x2fe   : > { %2372 = vst [vmem:[%s2796_s27 + $0x58] sm:$0xff] %v3816_v50  ;;  %v2311_v28 = vmul.f32 %v3871_v59, %v3871_v59 }
 0x2ff   : > { %v2256_v25 = vadd.f32 %v2255_v39, %v3770_v45  ;;  %2373 = vst [vmem:[%s2796_s27 + $0x60] sm:$0xff] %v3827_v3  ;;  %v2324_v24 = vadd.f32 %v2323_v43, %v2293_v0  ;;  %v2296_v45 = vmul.f32 %v3784_v14, %v3784_v14  ;;  %v2310_v39 = vmul.f32 %v3868_v56, %v3868_v56 }
 0x300   : > { %2374 = vst [vmem:[%s2796_s27 + $0x68] sm:$0xff] %v3838_v19 }
 0x301   : > { %v2257_v44 = vadd.f32 %v2256_v25, %v3777_v5  ;;  %2375 = vst [vmem:[%s2796_s27 + $0x70] sm:$0xff] %v3843_v17  ;;  %v2325_v29 = vadd.f32 %v2324_v24, %v2294_v53  ;;  %v2297_v5 = vmul.f32 %v3803_v49, %v3803_v49  ;;  %v2312_v53 = vmul.f32 %v3874_v18, %v3874_v18 }
 0x302   : > { %2376 = vst [vmem:[%s2796_s27 + $0x78] sm:$0xff] %v3846_v47  ;;  %v2314_v24 = vmul.f32 %v3880_v34, %v3880_v34 }
 0x303   : > { %v2258_v63 = vadd.f32 %v2257_v44, %v3784_v14  ;;  %2377 = vst [vmem:[%s2796_s27 + $0x80] sm:$0xff] %v3849_v35  ;;  %v2326_v60 = vadd.f32 %v2325_v29, %v2295_v2  ;;  %v2298_v14 = vmul.f32 %v3816_v50, %v3816_v50  ;;  %v2313_v44 = vmul.f32 %v3877_v4, %v3877_v4 }
 0x304   : > { %2378 = vst [vmem:[%s2796_s27 + $0x88] sm:$0xff] %v3852_v30 }
 0x305   : > { %v2259_v54 = vadd.f32 %v2258_v63, %v3803_v49  ;;  %2379 = vst [vmem:[%s2796_s27 + $0x90] sm:$0xff] %v3855_v42  ;;  %v2327_v41 = vadd.f32 %v2326_v60, %v2296_v45  ;;  %v2299_v49 = vmul.f32 %v3827_v3, %v3827_v3  ;;  %v2315_v45 = vmul.f32 %v3883_v40, %v3883_v40 }
 0x306   : > { %2380 = vst [vmem:[%s2796_s27 + $0x98] sm:$0xff] %v3858_v12  ;;  %v2317_v60 = vmul.f32 %v3889_v1, %v3889_v1 }
 0x307   : > { %v2260_v46 = vadd.f32 %v2259_v54, %v3816_v50  ;;  %2381 = vst [vmem:[%s2796_s27 + $0xa0] sm:$0xff] %v3861_v23  ;;  %v2328_v26 = vadd.f32 %v2327_v41, %v2297_v5  ;;  %v2300_v50 = vmul.f32 %v3838_v19, %v3838_v19  ;;  %v2316_v54 = vmul.f32 %v3886_v8, %v3886_v8 }
 0x308   : > { %2382 = vst [vmem:[%s2796_s27 + $0xa8] sm:$0xff] %v3864_v38 }
 0x309   : > { %v2261_v7 = vadd.f32 %v2260_v46, %v3827_v3  ;;  %2383 = vst [vmem:[%s2796_s27 + $0xb0] sm:$0xff] %v3866_v57  ;;  %v2329_v31 = vadd.f32 %v2328_v26, %v2298_v14  ;;  %v2301_v3 = vmul.f32 %v3843_v17, %v3843_v17  ;;  %v2318_v14 = vmul.f32 %v3892_v62, %v3892_v62 }
 0x30a   : > { %2384 = vst [vmem:[%s2796_s27 + $0xb8] sm:$0xff] %v3868_v56 }
 0x30b   : > { %v2262_v16 = vadd.f32 %v2261_v7, %v3838_v19  ;;  %2385 = vst [vmem:[%s2796_s27 + $0xc0] sm:$0xff] %v3871_v59  ;;  %v2330_v58 = vadd.f32 %v2329_v31, %v2299_v49  ;;  %v2302_v19 = vmul.f32 %v3846_v47, %v3846_v47 }
 0x30c   : > { %2386 = vst [vmem:[%s2796_s27 + $0xc8] sm:$0xff] %v3874_v18 }
 0x30d   : > { %v2263_v27 = vadd.f32 %v2262_v16, %v3843_v17  ;;  %2387 = vst [vmem:[%s2796_s27 + $0xd0] sm:$0xff] %v3877_v4  ;;  %v2331_v36 = vadd.f32 %v2330_v58, %v2300_v50  ;;  %v2303_v17 = vmul.f32 %v3849_v35, %v3849_v35 }
 0x30e   : > { %2388 = vst [vmem:[%s2796_s27 + $0xd8] sm:$0xff] %v3880_v34 }
 0x30f   : > { %v2264_v55 = vadd.f32 %v2263_v27, %v3846_v47  ;;  %2389 = vst [vmem:[%s2796_s27 + $0xe0] sm:$0xff] %v3883_v40  ;;  %v2332_v15 = vadd.f32 %v2331_v36, %v2301_v3 }
 0x310   : > { %2390 = vst [vmem:[%s2796_s27 + $0xe8] sm:$0xff] %v3886_v8 }
 0x311   : > { %v2265_v13 = vadd.f32 %v2264_v55, %v3849_v35  ;;  %2391 = vst [vmem:[%s2796_s27 + $0xf0] sm:$0xff] %v3889_v1  ;;  %v2333_v48 = vadd.f32 %v2332_v15, %v2302_v19  ;;  %v2306_v35 = vmul.f32 %v3858_v12, %v3858_v12 }
 0x312   : > { %2392 = vst [vmem:[%s2796_s27 + $0xf8] sm:$0xff] %v3892_v62 }
 0x313   : > { %v2266_v22 = vadd.f32 %v2265_v13, %v3852_v30  ;;  %v2334_v10 = vadd.f32 %v2333_v48, %v2303_v17 }
 0x315   : > { %v2267_v47 = vadd.f32 %v2266_v22, %v3855_v42  ;;  %v2335_v32 = vadd.f32 %v2334_v10, %v2304_v21 }
 0x317   : > { %v2268_v6 = vadd.f32 %v2267_v47, %v3858_v12  ;;  %v2336_v51 = vadd.f32 %v2335_v32, %v2305_v37 }
 0x319   : > { %v2269_v61 = vadd.f32 %v2268_v6, %v3861_v23  ;;  %v2337_v33 = vadd.f32 %v2336_v51, %v2306_v35 }
 0x31b   : > { %v2270_v30 = vadd.f32 %v2269_v61, %v3864_v38  ;;  %v2338_v9 = vadd.f32 %v2337_v33, %v2307_v52 }
 0x31d   : > { %v2271_v42 = vadd.f32 %v2270_v30, %v3866_v57  ;;  %v2339_v0 = vadd.f32 %v2338_v9, %v2308_v20 }
 0x31f   : > { %v2272_v12 = vadd.f32 %v2271_v42, %v3868_v56  ;;  %v2340_v25 = vadd.f32 %v2339_v0, %v2309_v11 }
 0x321   : > { %v2273_v23 = vadd.f32 %v2272_v12, %v3871_v59  ;;  %v2341_v43 = vadd.f32 %v2340_v25, %v2310_v39 }
 0x323   : > { %v2274_v38 = vadd.f32 %v2273_v23, %v3874_v18  ;;  %v2342_v2 = vadd.f32 %v2341_v43, %v2311_v28 }
 0x325   : > { %v2275_v57 = vadd.f32 %v2274_v38, %v3877_v4  ;;  %v2343_v63 = vadd.f32 %v2342_v2, %v2312_v53 }
 0x327   : > { %v2276_v56 = vadd.f32 %v2275_v57, %v3880_v34  ;;  %v2344_v29 = vadd.f32 %v2343_v63, %v2313_v44 }
 0x329   : > { %v2277_v59 = vadd.f32 %v2276_v56, %v3883_v40  ;;  %v2345_v5 = vadd.f32 %v2344_v29, %v2314_v24 }
 0x32b   : > { %v2278_v18 = vadd.f32 %v2277_v59, %v3886_v8  ;;  %v2346_v46 = vadd.f32 %v2345_v5, %v2315_v45 }
 0x32d   : > { %v2279_v4 = vadd.f32 %v2278_v18, %v3889_v1  ;;  %v2347_v41 = vadd.f32 %v2346_v46, %v2316_v54 }
 0x32f   : > { %v2280_v34 = vadd.f32 %v2279_v4, %v3892_v62  ;;  %v2348_v7 = vadd.f32 %v2347_v41, %v2317_v60  ;;  %v2356_v62 = vld [vmem:[%s4070_s3] sm:$0x3] }
 0x331   : > { %v2281_v40 = vrot.slane %v2280_v34, 4  ;;  %v2349_v26 = vadd.f32 %v2348_v7, %v2318_v14 }
 0x333   : > { %v2282_v49 = vadd.f32 %v2281_v40, %v2280_v34  ;;  %v2350_v50 = vrot.slane %v2349_v26, 4 }
 0x335   : > { %v2283_v16 = vrot.slane %v2282_v49, 2  ;;  %v2351_v31 = vadd.f32 %v2350_v50, %v2349_v26 }
 0x337   : > { %v2284_v8 = vadd.f32 %v2283_v16, %v2282_v49  ;;  %v2352_v3 = vrot.slane %v2351_v31, 2 }
 0x339   : > { %v2285_v27 = vrot.slane %v2284_v8, 1  ;;  %v2353_v58 = vadd.f32 %v2352_v3, %v2351_v31 }
 0x33b   : > { %v2286_v55 = vadd.f32 %v2285_v27, %v2284_v8  ;;  %v2354_v1 = vrot.slane %v2353_v58, 1 }
 0x33d   : > { %v2355_v19 = vadd.f32 %v2354_v1, %v2353_v58 }
 0x33f   : > { %v2358_v36 = vsel %vm2357_vm8, %v2286_v55, %v2355_v19 }
 0x340   : > { %v2359_v13 = vadd.f32 %v2358_v36, %v2356_v62 }
 0x342   : > { %2360 = vst [vmem:[%s4070_s3] sm:$0x3] %v2359_v13 }
 0x343 PF: > { %s14_s12 = sadd.s32 1, %s2746_s12  }
 0x344   : > { %p11_p5 = scmp.ge.s32.totalorder %s14_s12, 4  }
 0x346   :  { %13 = sbr.rel (!%p11_p5) target bundleno = 1 (0x1), region = 70 }

// kernel: downblock_forward.6
= control target key start
LH: loop header
LB: loop body
LE: loop exit
PB: predicated region body
PF: predicated region fallthrough
CT: control target
= control target key end

     0   :  { %s3428_s12 = smov 0   ;;  %s4729_s0 = inlined_call_operand.vmem [shape: bf16[2,18,18,128], index: 0, kind: input, shape index: {}]   ;;  %s4730_s1 = inlined_call_operand.vmem [shape: bf16[1152,128], index: 1, kind: input, shape index: {}]   ;;  %s4731_s2 = inlined_call_operand.vmem [shape: f32[2,16,16,128], index: 2, kind: output, shape index: {0}]   ;;  %s4732_s3 = inlined_call_operand.vmem [shape: f32[2,128], index: 3, kind: output, shape index: {1}]  }
   0x1 LB: > { %s3434_s13 = sadd.s32 4294967295, %s3405_s12   ;;  %p2871_p0 = scmp.ge.s32.totalorder %s3405_s12, 1  ;;  %s3405_s12 = sphi %s3428_s12, %s14_s12  }
   0x2   : > { %p135_p1 = scmp.lt.s32.totalorder %s3405_s12, 3 }
   0x4   : > { %p136_p2 = pnand %p2871_p0, %p135_p1 }
   0x6   : > { %139 = sbr.rel (%p136_p2) target bundleno = 835 (0x343), region = 28 }
   0xb   : > { %v3290_v0 = vld [vmem:[%s4730_s1 + $0x78] sm:$0xff]  ;;  %p159_p3 = scmp.lt.s32.totalorder %s3434_s13, 1  ;;  %v3289_v1 = vld [vmem:[%s4730_s1 + $0x70] sm:$0xff]  ;;  %v3288_v2 = vld [vmem:[%s4730_s1 + $0x68] sm:$0xff]  ;;  %vm239_vm0 = vsmask.f32 3328 }
   0xc   : > { %3347 = vmatpush.bf16.msra.mxu1 %v3290_v0  ;;  %3348 = vmatpush.bf16.msra.mxu2 %v3290_v0  ;;  %vm240_vm1 = vsmask.f32 7440  ;;  %v3287_v6 = vld [vmem:[%s4730_s1 + $0x60] sm:$0xff]  ;;  %v3286_v35 = vld [vmem:[%s4730_s1 + $0x58] sm:$0xff]  ;;  %v3285_v54 = vld [vmem:[%s4730_s1 + $0x50] sm:$0xff]  ;;  %vm1092_vm3 = vcmask 1042432  }
   0xd   : > { %s160_s18 = scalar_select %p159_p3, %s3434_s13, 1  ;;  %3349 = vmatpush.bf16.msra.mxu3 %v3290_v0  ;;  %754 = vmatpush.bf16.msra.mxu0 %v3290_v0  ;;  %vm3472_vm2 = vmor %vm239_vm0, %vm240_vm1  ;;  %vm1093_vm4 = vcmask 1046532  }
   0xe   : > { %vm3845_vm5 = vmor %vm1092_vm3, %vm1093_vm4  ;;  %p3253_p4 = scmp.ne.s32.totalorder %s3434_s13, 0 }
   0xf   : > { %s3371_s19 = smul.u32 216, %s160_s18  ;;  %s3256_s20 = sshll.u32 %s160_s18, 8 }
  0x10   : > { %s3449_s23 = scalar_lea.vmem %s4731_s2, %s3256_s20  ;;  %3350 = vmatpush.bf16.msra.mxu1 %v3289_v1  ;;  %3351 = vmatpush.bf16.msra.mxu2 %v3289_v1 }
  0x11   : > { %s3457_s28 = scalar_lea.vmem %s4729_s0, %s3371_s19  ;;  %3352 = vmatpush.bf16.msra.mxu3 %v3289_v1  ;;  %755 = vmatpush.bf16.msra.mxu0 %v3289_v1 }
  0x12   : > { %v181_v3 = vld [vmem:[%s3457_s28 + $0x30] sm:$0xf]  ;;  %v182_v4 = vld [vmem:[%s3457_s28 + $0x34] sm:$0xf]  ;;  %v183_v5 = vld [vmem:[%s3457_s28 + $0x38] sm:$0x1] }
  0x13   : > { %v339_v7 = vshrl.u32 %v181_v3, 16  ;;  %v342_v8 = vshll.u32 %v181_v3, 16  ;;  %v348_v9 = vshll.u32 %v182_v4, 16  ;;  %v352_v10 = vshrl.u32 %v182_v4, 16  ;;  %v193_v11 = vld [vmem:[%s3457_s28 + $0x60] sm:$0xf] }
  0x14   : > { %v358_v12 = vshll.u32 %v183_v5, 16  ;;  %v194_v13 = vld [vmem:[%s3457_s28 + $0x64] sm:$0xf]  ;;  %v195_v14 = vld [vmem:[%s3457_s28 + $0x68] sm:$0x1]  ;;  %v435_v15 = vshrl.u32 %v193_v11, 16  ;;  %3353 = vmatpush.bf16.msra.mxu1 %v3288_v2  ;;  %3354 = vmatpush.bf16.msra.mxu2 %v3288_v2 }
  0x15   : > { %v341_v16 = vrot.slane %v339_v7, 4  ;;  %v344_v17 = vrot.slane %v342_v8, 5  ;;  %v350_v18 = vrot.slane %v348_v9, 5  ;;  %v354_v19 = vrot.slane %v352_v10, 4  ;;  %v205_v20 = vld [vmem:[%s3457_s28 + $0x90] sm:$0xf]  ;;  %3355 = vmatpush.bf16.msra.mxu3 %v3288_v2  ;;  %756 = vmatpush.bf16.msra.mxu0 %v3288_v2 }
  0x16   : > { %v360_v21 = vrot.slane %v358_v12, 5  ;;  %v437_v22 = vrot.slane %v435_v15, 4  ;;  %v438_v23 = vshll.u32 %v193_v11, 16  ;;  %v444_v24 = vshll.u32 %v194_v13, 16  ;;  %v206_v29 = vld [vmem:[%s3457_s28 + $0x94] sm:$0xf] }
  0x17   : > { %v345_v25 = vor.u32 %v344_v17, %v341_v16  ;;  %v355_v26 = vor.u32 %v354_v19, %v350_v18  ;;  %v448_v27 = vshrl.u32 %v194_v13, 16  ;;  %v454_v28 = vshll.u32 %v195_v14, 16  ;;  %v207_v41 = vld [vmem:[%s3457_s28 + $0x98] sm:$0x1]  ;;  %v3485_v49 = vld [vmem:[%s3457_s28] sm:$0xf] }
  0x18   : > { %v440_v31 = vrot.slane %v438_v23, 5  ;;  %v446_v32 = vrot.slane %v444_v24, 5  ;;  %v531_v33 = vshrl.u32 %v205_v20, 16  ;;  %v534_v34 = vshll.u32 %v205_v20, 16  ;;  %3356 = vmatpush.bf16.msra.mxu1 %v3287_v6  ;;  %3357 = vmatpush.bf16.msra.mxu2 %v3287_v6  ;;  %v3495_v62 = vld [vmem:[%s3457_s28 + $0x4] sm:$0xf] }
  0x19   : > { %v346_v36 = vrot.slane %v345_v25, 4  ;;  %v356_v37 = vrot.slane %v355_v26, 4  ;;  %v450_v38 = vrot.slane %v448_v27, 4  ;;  %v456_v39 = vrot.slane %v454_v28, 5  ;;  %3358 = vmatpush.bf16.msra.mxu3 %v3287_v6  ;;  %757 = vmatpush.bf16.msra.mxu0 %v3287_v6  ;;  %v3501_v4 = vld [vmem:[%s3457_s28 + $0x8] sm:$0x1] }
  0x1a   : > { %v441_v40 = vor.u32 %v440_v31, %v437_v22  ;;  %v533_v42 = vrot.slane %v531_v33, 4  ;;  %v536_v43 = vrot.slane %v534_v34, 5  ;;  %v540_v44 = vshll.u32 %v206_v29, 16  ;;  %v3504_v5 = vld [vmem:[%s3457_s28 + $0x3c] sm:$0xf]  ;;  %v3284_v10 = vld [vmem:[%s4730_s1 + $0x48] sm:$0xff] }
  0x1b   : > { %v351_v45 = vsel %vm3472_vm2, %v346_v36, %v350_v18  ;;  %v361_v46 = vsel %vm3472_vm2, %v356_v37, %v360_v21  ;;  %v451_v47 = vor.u32 %v450_v38, %v446_v32  ;;  %v544_v48 = vshrl.u32 %v206_v29, 16  ;;  %v3515_v15 = vld [vmem:[%s3457_s28 + $0x40] sm:$0xf]  ;;  %v3521_v19 = vld [vmem:[%s3457_s28 + $0x44] sm:$0x1]  ;;  %v3298_v37 = vld [vmem:[%s4730_s1 + $0xb8] sm:$0xff] }
  0x1c   : > { %v650_v50 = vunpack.c.l.b16 %v351_v45  ;;  %v651_v51 = vunpack.c.l.b16 %v361_v46  ;;  %v442_v52 = vrot.slane %v441_v40, 4  ;;  %v537_v53 = vor.u32 %v536_v43, %v533_v42  ;;  %3359 = vmatpush.bf16.msra.mxu1 %v3286_v35  ;;  %3360 = vmatpush.bf16.msra.mxu2 %v3286_v35  ;;  %v196_v25 = vld [vmem:[%s3457_s28 + $0x6c] sm:$0xf]  ;;  %v3283_v31 = vld [vmem:[%s4730_s1 + $0x40] sm:$0xff]  ;;  %v197_v40 = vld [vmem:[%s3457_s28 + $0x70] sm:$0xf] }
  0x1d   : > { %v452_v55 = vrot.slane %v451_v47, 4  ;;  %v542_v56 = vrot.slane %v540_v44, 5  ;;  %v546_v57 = vrot.slane %v544_v48, 4  ;;  %v550_v58 = vshll.u32 %v207_v41, 16  ;;  %3361 = vmatpush.bf16.msra.mxu3 %v3286_v35  ;;  %758 = vmatpush.bf16.msra.mxu0 %v3286_v35  ;;  %v3306_v43 = vld [vmem:[%s4730_s1 + $0xf8] sm:$0xff] }
  0x1e   : > { %v3490_v59 = vpack.c.b16 %v651_v51, %v650_v50  ;;  %v447_v60 = vsel %vm3472_vm2, %v442_v52, %v446_v32  ;;  %v538_v61 = vrot.slane %v537_v53, 4  ;;  %v243_v63 = vshrl.u32 %v3485_v49, 16  ;;  %v198_v47 = vld [vmem:[%s3457_s28 + $0x74] sm:$0x1]  ;;  %v208_v53 = vld [vmem:[%s3457_s28 + $0x9c] sm:$0xf] }
  0x1f   : > { %v457_v0 = vsel %vm3472_vm2, %v452_v55, %v456_v39  ;;  %v658_v1 = vunpack.c.l.b16 %v447_v60  ;;  %v547_v2 = vor.u32 %v546_v57, %v542_v56  ;;  %v552_v3 = vrot.slane %v550_v58, 5 }
  0x20   : > { %v659_v6 = vunpack.c.l.b16 %v457_v0  ;;  %v543_v7 = vsel %vm3472_vm2, %v538_v61, %v542_v56  ;;  %v245_v8 = vrot.slane %v243_v63, 4  ;;  %v246_v9 = vshll.u32 %v3485_v49, 16  ;;  %3362 = vmatpush.bf16.msra.mxu1 %v3285_v54  ;;  %3363 = vmatpush.bf16.msra.mxu2 %v3285_v54  ;;  %v3282_v56 = vld [vmem:[%s4730_s1 + $0x38] sm:$0xff]  ;;  %v3297_v61 = vld [vmem:[%s4730_s1 + $0xb0] sm:$0xff] }
  0x21   : > { %v548_v11 = vrot.slane %v547_v2, 4  ;;  %v666_v12 = vunpack.c.l.b16 %v543_v7  ;;  %v252_v13 = vshll.u32 %v3495_v62, 16  ;;  %v256_v14 = vshrl.u32 %v3495_v62, 16  ;;  %3364 = vmatpush.bf16.msra.mxu3 %v3285_v54  ;;  %759 = vmatpush.bf16.msra.mxu0 %v3285_v54  ;;  %v3305_v2 = vld [vmem:[%s4730_s1 + $0xf0] sm:$0xff] }
  0x22   : > { %v3517_v16 = vpack.c.b16 %v659_v6, %v658_v1  ;;  %v248_v17 = vrot.slane %v246_v9, 5  ;;  %v262_v18 = vshll.u32 %v3501_v4, 16  ;;  %v363_v20 = vshrl.u32 %v3504_v5, 16 }
  0x23   : > { %v553_v21 = vsel %vm3472_vm2, %v548_v11, %v552_v3  ;;  %v254_v22 = vrot.slane %v252_v13, 5  ;;  %v258_v23 = vrot.slane %v256_v14, 4  ;;  %v366_v24 = vshll.u32 %v3504_v5, 16  ;;  %v3314_v11 = vld [vmem:[%s4730_s1 + $0x138] sm:$0xff] }
  0x24   : > { %4767 = vst [vmem:[#allocation2_spill] sm:$0xff] %v3517_v16  ;;  %v667_v26 = vunpack.c.l.b16 %v553_v21  ;;  %v249_v27 = vor.u32 %v248_v17, %v245_v8  ;;  %v264_v28 = vrot.slane %v262_v18, 5  ;;  %v365_v29 = vrot.slane %v363_v20, 4  ;;  %3365 = vmatpush.bf16.msra.mxu1 %v3284_v10  ;;  %3366 = vmatpush.bf16.msra.mxu2 %v3284_v10  ;;  %v209_v8 = vld [vmem:[%s3457_s28 + $0xa0] sm:$0xf]  ;;  %v3281_v20 = vld [vmem:[%s4730_s1 + $0x30] sm:$0xff] }
  0x25   : > { %v259_v32 = vor.u32 %v258_v23, %v254_v22  ;;  %v368_v33 = vrot.slane %v366_v24, 5  ;;  %v372_v34 = vshll.u32 %v3515_v15, 16  ;;  %v376_v35 = vshrl.u32 %v3515_v15, 16  ;;  %3367 = vmatpush.bf16.msra.mxu3 %v3284_v10  ;;  %760 = vmatpush.bf16.msra.mxu0 %v3284_v10  ;;  %v210_v17 = vld [vmem:[%s3457_s28 + $0xa4] sm:$0x1] }
  0x26   : > { %v3533_v36 = vpack.c.b16 %v667_v26, %v666_v12  ;;  %v250_v38 = vrot.slane %v249_v27, 4  ;;  %v382_v39 = vshll.u32 %v3521_v19, 16  ;;  %v459_v41 = vshrl.u32 %v196_v25, 16  ;;  %v3568_v18 = vld [vmem:[%s3457_s28 + $0xc] sm:$0xf] }
  0x27   : > { %v260_v42 = vrot.slane %v259_v32, 4  ;;  %v369_v44 = vor.u32 %v368_v33, %v365_v29  ;;  %v374_v45 = vrot.slane %v372_v34, 5  ;;  %v378_v46 = vrot.slane %v376_v35, 4  ;;  %v3296_v29 = vld [vmem:[%s4730_s1 + $0xa8] sm:$0xff]  ;;  %v3580_v34 = vld [vmem:[%s3457_s28 + $0x10] sm:$0xf] }
  0x28   : > { %v255_v48 = vsel %vm3472_vm2, %v250_v38, %v254_v22  ;;  %v384_v50 = vrot.slane %v382_v39, 5  ;;  %v461_v51 = vrot.slane %v459_v41, 4  ;;  %v462_v52 = vshll.u32 %v196_v25, 16  ;;  %3368 = vmatpush.bf16.msra.mxu1 %v3283_v31  ;;  %3369 = vmatpush.bf16.msra.mxu2 %v3283_v31 }
  0x29   : > { %v265_v54 = vsel %vm3472_vm2, %v260_v42, %v264_v28  ;;  %v642_v55 = vunpack.c.l.b16 %v255_v48  ;;  %v370_v57 = vrot.slane %v369_v44, 4  ;;  %v379_v58 = vor.u32 %v378_v46, %v374_v45  ;;  %3370 = vmatpush.bf16.msra.mxu3 %v3283_v31  ;;  %761 = vmatpush.bf16.msra.mxu0 %v3283_v31  ;;  %v3591_v42 = vld [vmem:[%s3457_s28 + $0x14] sm:$0x1]  ;;  %v3280_v48 = vld [vmem:[%s4730_s1 + $0x28] sm:$0xff] }
  0x2a   : > { %v643_v60 = vunpack.c.l.b16 %v265_v54  ;;  %v464_v63 = vrot.slane %v462_v52, 5  ;;  %v468_v0 = vshll.u32 %v197_v40, 16  ;;  %v472_v1 = vshrl.u32 %v197_v40, 16  ;;  %v3602_v54 = vld [vmem:[%s3457_s28 + $0x48] sm:$0xf] }
  0x2b   : > { %v375_v3 = vsel %vm3472_vm2, %v370_v57, %v374_v45  ;;  %v380_v6 = vrot.slane %v379_v58, 4  ;;  %v478_v7 = vshll.u32 %v198_v47, 16  ;;  %v555_v9 = vshrl.u32 %v208_v53, 16  ;;  %782 = vmatmul.bf16.vlgmr.msra.gmra.mxu1 %v3490_v59  ;;  %802 = vmatmul.bf16.vlgmr.msra.gmra.mxu2 %v3517_v16 }
  0x2c   : > { %1335 = vmatpush.bf16.msrb.mxu2 %v3298_v37  ;;  %v674_v10 = vpack.c.b16 %v643_v60, %v642_v55  ;;  %v652_v12 = vunpack.c.l.b16 %v375_v3  ;;  %v465_v13 = vor.u32 %v464_v63, %v461_v51  ;;  %v470_v14 = vrot.slane %v468_v0, 5  ;;  %822 = vmatmul.bf16.vlgmr.msra.gmra.mxu3 %v3533_v36  ;;  %v3304_v37 = vld [vmem:[%s4730_s1 + $0xe8] sm:$0xff]  ;;  %v3295_v60 = vld [vmem:[%s4730_s1 + $0xa0] sm:$0xff] }
  0x2d   : > { %1526 = vmatpush.bf16.msrb.mxu3 %v3306_v43  ;;  %987 = vmatpush.bf16.msrb.mxu1 %v3282_v56  ;;  %v385_v21 = vsel %vm3472_vm2, %v380_v6, %v384_v50  ;;  %v474_v22 = vrot.slane %v472_v1, 4  ;;  %v480_v23 = vrot.slane %v478_v7, 5  ;;  %v557_v24 = vrot.slane %v555_v9, 4  ;;  %v3313_v43 = vld [vmem:[%s4730_s1 + $0x130] sm:$0xff]  ;;  %v3312_v3 = vld [vmem:[%s4730_s1 + $0x128] sm:$0xff]  ;;  %v3279_v6 = vld [vmem:[%s4730_s1 + $0x20] sm:$0xff] }
  0x2e   : > { %762 = vmatmul.bf16.vlgmr.msra.gmra.mxu0 %v674_v10  ;;  %v653_v25 = vunpack.c.l.b16 %v385_v21  ;;  %v466_v26 = vrot.slane %v465_v13, 4  ;;  %v558_v27 = vshll.u32 %v208_v53, 16  ;;  %v564_v28 = vshll.u32 %v209_v8, 16  ;;  %v3621_v10 = vld [vmem:[%s3457_s28 + $0x4c] sm:$0xf] }
  0x2f   : > { %v475_v31 = vor.u32 %v474_v22, %v470_v14  ;;  %v568_v32 = vshrl.u32 %v209_v8, 16  ;;  %v574_v33 = vshll.u32 %v210_v17, 16  ;;  %v267_v35 = vshrl.u32 %v3568_v18, 16  ;;  %1739 = vmatpush.bf16.msrb.mxu0 %v3314_v11  ;;  %v3629_v17 = vld [vmem:[%s3457_s28 + $0x50] sm:$0x1] }
  0x30   : > { %1336 = vmatpush.bf16.msrb.mxu2 %v3297_v61  ;;  %v3586_v38 = vpack.c.b16 %v653_v25, %v652_v12  ;;  %v471_v39 = vsel %vm3472_vm2, %v466_v26, %v470_v14  ;;  %v560_v40 = vrot.slane %v558_v27, 5  ;;  %v566_v41 = vrot.slane %v564_v28, 5  ;;  %v3303_v61 = vld [vmem:[%s4730_s1 + $0xe0] sm:$0xff]  ;;  %v3633_v21 = vld [vmem:[%s3457_s28 + $0x78] sm:$0xf] }
  0x31   : > { %1527 = vmatpush.bf16.msrb.mxu3 %v3305_v2  ;;  %988 = vmatpush.bf16.msrb.mxu1 %v3281_v20  ;;  %v476_v44 = vrot.slane %v475_v31, 4  ;;  %v660_v45 = vunpack.c.l.b16 %v471_v39  ;;  %v570_v46 = vrot.slane %v568_v32, 4  ;;  %v576_v47 = vrot.slane %v574_v33, 5  ;;  %v3294_v26 = vld [vmem:[%s4730_s1 + $0x98] sm:$0xff] }
  0x32   : > { %4768 = vst [vmem:[#allocation3_spill] sm:$0xff] %v3586_v38  ;;  %v561_v50 = vor.u32 %v560_v40, %v557_v24  ;;  %v269_v51 = vrot.slane %v267_v35, 4  ;;  %v270_v52 = vshll.u32 %v3568_v18, 16  ;;  %v276_v53 = vshll.u32 %v3580_v34, 16  ;;  %v3302_v27 = vld [vmem:[%s4730_s1 + $0xd8] sm:$0xff]  ;;  %v3311_v40 = vld [vmem:[%s4730_s1 + $0x120] sm:$0xff] }
  0x33   : > { %v481_v55 = vsel %vm3472_vm2, %v476_v44, %v480_v23  ;;  %v571_v56 = vor.u32 %v570_v46, %v566_v41  ;;  %v280_v57 = vshrl.u32 %v3580_v34, 16  ;;  %v286_v58 = vshll.u32 %v3591_v42, 16  ;;  %1740 = vmatpush.bf16.msrb.mxu0 %v3313_v43  ;;  %v3655_v46 = vld [vmem:[%s3457_s28 + $0x7c] sm:$0xf] }
  0x34   : > { %1337 = vmatpush.bf16.msrb.mxu2 %v3296_v29  ;;  %v661_v63 = vunpack.c.l.b16 %v481_v55  ;;  %v562_v0 = vrot.slane %v561_v50, 4  ;;  %v272_v1 = vrot.slane %v270_v52, 5  ;;  %v278_v2 = vrot.slane %v276_v53, 5  ;;  %v211_v55 = vld [vmem:[%s3457_s28 + $0xa8] sm:$0xf] }
  0x35   : > { %1528 = vmatpush.bf16.msrb.mxu3 %v3304_v37  ;;  %v572_v7 = vrot.slane %v571_v56, 4  ;;  %v282_v8 = vrot.slane %v280_v57, 4  ;;  %v288_v9 = vrot.slane %v286_v58, 5  ;;  %989 = vmatpush.bf16.msrb.mxu1 %v3280_v48  ;;  %v387_v11 = vshrl.u32 %v3602_v54, 16  ;;  %v3278_v48 = vld [vmem:[%s4730_s1 + $0x18] sm:$0xff]  ;;  %v3293_v56 = vld [vmem:[%s4730_s1 + $0x90] sm:$0xff] }
  0x36   : > { %v3624_v12 = vpack.c.b16 %v661_v63, %v660_v45  ;;  %v567_v13 = vsel %vm3472_vm2, %v562_v0, %v566_v41  ;;  %v273_v14 = vor.u32 %v272_v1, %v269_v51  ;;  %v390_v20 = vshll.u32 %v3602_v54, 16  ;;  %v3301_v57 = vld [vmem:[%s4730_s1 + $0xd0] sm:$0xff] }
  0x37   : > { %v577_v22 = vsel %vm3472_vm2, %v572_v7, %v576_v47  ;;  %v668_v23 = vunpack.c.l.b16 %v567_v13  ;;  %v283_v24 = vor.u32 %v282_v8, %v278_v2  ;;  %v389_v25 = vrot.slane %v387_v11, 4  ;;  %1741 = vmatpush.bf16.msrb.mxu0 %v3312_v3  ;;  %v3658_v47 = vld [vmem:[%s3457_s28 + $0x80] sm:$0x1]  ;;  %v212_v11 = vld [vmem:[%s3457_s28 + $0xac] sm:$0xf] }
  0x38   : > { %1338 = vmatpush.bf16.msrb.mxu2 %v3295_v60  ;;  %v669_v28 = vunpack.c.l.b16 %v577_v22  ;;  %v274_v29 = vrot.slane %v273_v14, 4  ;;  %v392_v31 = vrot.slane %v390_v20, 5  ;;  %v396_v32 = vshll.u32 %v3621_v10, 16  ;;  %v3277_v14 = vld [vmem:[%s4730_s1 + $0x10] sm:$0xff] }
  0x39   : > { %1529 = vmatpush.bf16.msrb.mxu3 %v3303_v61  ;;  %v284_v33 = vrot.slane %v283_v24, 4  ;;  %990 = vmatpush.bf16.msrb.mxu1 %v3279_v6  ;;  %v400_v35 = vshrl.u32 %v3621_v10, 16  ;;  %v406_v37 = vshll.u32 %v3629_v17, 16  ;;  %v483_v39 = vshrl.u32 %v3633_v21, 16  ;;  %v3310_v6 = vld [vmem:[%s4730_s1 + $0x118] sm:$0xff] }
  0x3a   : > { %v3650_v41 = vpack.c.b16 %v669_v28, %v668_v23  ;;  %v279_v43 = vsel %vm3472_vm2, %v274_v29, %v278_v2  ;;  %v393_v44 = vor.u32 %v392_v31, %v389_v25  ;;  %v398_v45 = vrot.slane %v396_v32, 5  ;;  %v213_v25 = vld [vmem:[%s3457_s28 + $0xb0] sm:$0x1]  ;;  %v3693_v31 = vld [vmem:[%s3457_s28 + $0x18] sm:$0xf] }
  0x3b   : > { %v289_v50 = vsel %vm3472_vm2, %v284_v33, %v288_v9  ;;  %v644_v51 = vunpack.c.l.b16 %v279_v43  ;;  %v402_v52 = vrot.slane %v400_v35, 4  ;;  %v408_v53 = vrot.slane %v406_v37, 5  ;;  %787 = vmatmul.bf16.gmra.mxu1 %v3586_v38  ;;  %807 = vmatmul.bf16.gmra.mxu2 %v3624_v12 }
  0x3c   : > { %4769 = vst [vmem:[#allocation4_spill] sm:$0xff] %v3650_v41  ;;  %1339 = vmatpush.bf16.msrb.mxu2 %v3294_v26  ;;  %v645_v58 = vunpack.c.l.b16 %v289_v50  ;;  %v394_v60 = vrot.slane %v393_v44, 4  ;;  %v485_v61 = vrot.slane %v483_v39, 4  ;;  %v486_v63 = vshll.u32 %v3633_v21, 16  ;;  %827 = vmatmul.bf16.gmra.mxu3 %v3650_v41 }
  0x3d   : > { %1530 = vmatpush.bf16.msrb.mxu3 %v3302_v27  ;;  %v403_v0 = vor.u32 %v402_v52, %v398_v45  ;;  %v492_v1 = vshll.u32 %v3655_v46, 16  ;;  %v496_v2 = vshrl.u32 %v3655_v46, 16  ;;  %v502_v3 = vshll.u32 %v3658_v47, 16  ;;  %1742 = vmatpush.bf16.msrb.mxu0 %v3311_v40  ;;  %v3701_v52 = vld [vmem:[%s3457_s28 + $0x1c] sm:$0xf] }
  0x3e   : > { %v3682_v7 = vpack.c.b16 %v645_v58, %v644_v51  ;;  %v399_v8 = vsel %vm3472_vm2, %v394_v60, %v398_v45  ;;  %v488_v9 = vrot.slane %v486_v63, 5  ;;  %v579_v13 = vshrl.u32 %v211_v55, 16  ;;  %991 = vmatpush.bf16.msrb.mxu1 %v3278_v48  ;;  %v3292_v45 = vld [vmem:[%s4730_s1 + $0x88] sm:$0xff]  ;;  %v3709_v60 = vld [vmem:[%s3457_s28 + $0x20] sm:$0x1] }
  0x3f   : > { %v404_v20 = vrot.slane %v403_v0, 4  ;;  %v654_v22 = vunpack.c.l.b16 %v399_v8  ;;  %v494_v23 = vrot.slane %v492_v1, 5  ;;  %v498_v24 = vrot.slane %v496_v2, 4 }
  0x40   : > { %1340 = vmatpush.bf16.msrb.mxu2 %v3293_v56  ;;  %767 = vmatmul.bf16.gmra.mxu0 %v3682_v7  ;;  %v489_v26 = vor.u32 %v488_v9, %v485_v61  ;;  %v504_v27 = vrot.slane %v502_v3, 5  ;;  %v581_v28 = vrot.slane %v579_v13, 4  ;;  %v582_v29 = vshll.u32 %v211_v55, 16  ;;  %v3712_v61 = vld [vmem:[%s3457_s28 + $0x54] sm:$0xf] }
  0x41   : > { %1531 = vmatpush.bf16.msrb.mxu3 %v3301_v57  ;;  %v409_v32 = vsel %vm3472_vm2, %v404_v20, %v408_v53  ;;  %v499_v33 = vor.u32 %v498_v24, %v494_v23  ;;  %v588_v35 = vshll.u32 %v212_v11, 16  ;;  %v592_v37 = vshrl.u32 %v212_v11, 16  ;;  %1743 = vmatpush.bf16.msrb.mxu0 %v3310_v6  ;;  %v3300_v11 = vld [vmem:[%s4730_s1 + $0xc8] sm:$0xff]  ;;  %v3309_v13 = vld [vmem:[%s4730_s1 + $0x110] sm:$0xff] }
  0x42   : > { %v655_v39 = vunpack.c.l.b16 %v409_v32  ;;  %v490_v40 = vrot.slane %v489_v26, 4  ;;  %v584_v43 = vrot.slane %v582_v29, 5  ;;  %v598_v44 = vshll.u32 %v213_v25, 16  ;;  %992 = vmatpush.bf16.msrb.mxu1 %v3277_v14  ;;  %v3276_v14 = vld [vmem:[%s4730_s1 + $0x8] sm:$0xff]  ;;  %v3291_v25 = vld [vmem:[%s4730_s1 + $0x80] sm:$0xff] }
  0x43   : > { %v500_v48 = vrot.slane %v499_v33, 4  ;;  %v590_v50 = vrot.slane %v588_v35, 5  ;;  %v594_v51 = vrot.slane %v592_v37, 4  ;;  %v291_v53 = vshrl.u32 %v3693_v31, 16  ;;  %v3738_v32 = vld [vmem:[%s3457_s28 + $0x58] sm:$0xf] }
  0x44   : > { %v3704_v55 = vpack.c.b16 %v655_v39, %v654_v22  ;;  %v495_v56 = vsel %vm3472_vm2, %v490_v40, %v494_v23  ;;  %v585_v57 = vor.u32 %v584_v43, %v581_v28  ;;  %v600_v58 = vrot.slane %v598_v44, 5  ;;  %1341 = vmatpush.bf16.msrb.mxu2 %v3292_v45  ;;  %v3741_v33 = vld [vmem:[%s3457_s28 + $0x5c] sm:$0x1]  ;;  %v3746_v43 = vld [vmem:[%s3457_s28 + $0x84] sm:$0xf]  ;;  %v3308_v45 = vld [vmem:[%s4730_s1 + $0x108] sm:$0xff] }
  0x45   : > { %v505_v63 = vsel %vm3472_vm2, %v500_v48, %v504_v27  ;;  %v662_v0 = vunpack.c.l.b16 %v495_v56  ;;  %v595_v1 = vor.u32 %v594_v51, %v590_v50  ;;  %v293_v2 = vrot.slane %v291_v53, 4  ;;  %1532 = vmatpush.bf16.msrb.mxu3 %v3300_v11  ;;  %1744 = vmatpush.bf16.msrb.mxu0 %v3309_v13  ;;  %v3299_v44 = vld [vmem:[%s4730_s1 + $0xc0] sm:$0xff] }
  0x46   : > { %4770 = vst [vmem:[#allocation5_spill] sm:$0xff] %v3704_v55  ;;  %v663_v3 = vunpack.c.l.b16 %v505_v63  ;;  %v586_v6 = vrot.slane %v585_v57, 4  ;;  %v294_v8 = vshll.u32 %v3693_v31, 16  ;;  %v300_v9 = vshll.u32 %v3701_v52, 16  ;;  %993 = vmatpush.bf16.msrb.mxu1 %v3276_v14  ;;  %v3275_v56 = vld [vmem:[%s4730_s1] sm:$0xff] }
  0x47   : > { %v596_v20 = vrot.slane %v595_v1, 4  ;;  %v304_v22 = vshrl.u32 %v3701_v52, 16  ;;  %v310_v23 = vshll.u32 %v3709_v60, 16  ;;  %v411_v24 = vshrl.u32 %v3712_v61, 16 }
  0x48   : > { %v3733_v26 = vpack.c.b16 %v663_v3, %v662_v0  ;;  %v591_v27 = vsel %vm3472_vm2, %v586_v6, %v590_v50  ;;  %v296_v28 = vrot.slane %v294_v8, 5  ;;  %v302_v29 = vrot.slane %v300_v9, 5  ;;  %1342 = vmatpush.bf16.msrb.mxu2 %v3291_v25  ;;  %v3766_v6 = vld [vmem:[%s3457_s28 + $0x88] sm:$0xf] }
  0x49   : > { %v601_v35 = vsel %vm3472_vm2, %v596_v20, %v600_v58  ;;  %v670_v37 = vunpack.c.l.b16 %v591_v27  ;;  %v306_v39 = vrot.slane %v304_v22, 4  ;;  %v312_v40 = vrot.slane %v310_v23, 5  ;;  %1533 = vmatpush.bf16.msrb.mxu3 %v3299_v44  ;;  %1745 = vmatpush.bf16.msrb.mxu0 %v3308_v45  ;;  %v3307_v20 = vld [vmem:[%s4730_s1 + $0x100] sm:$0xff] }
  0x4a   : > { %v671_v48 = vunpack.c.l.b16 %v601_v35  ;;  %v297_v50 = vor.u32 %v296_v28, %v293_v2  ;;  %v413_v51 = vrot.slane %v411_v24, 4  ;;  %v414_v53 = vshll.u32 %v3712_v61, 16  ;;  %v3776_v24 = vld [vmem:[%s3457_s28 + $0x8c] sm:$0x1]  ;;  %v3780_v28 = vld [vmem:[%s3457_s28 + $0xb4] sm:$0xf]  ;;  %994 = vmatpush.bf16.msrb.mxu1 %v3275_v56 }
  0x4b   : > { %v307_v57 = vor.u32 %v306_v39, %v302_v29  ;;  %v420_v58 = vshll.u32 %v3738_v32, 16  ;;  %v424_v63 = vshrl.u32 %v3738_v32, 16  ;;  %v430_v0 = vshll.u32 %v3741_v33, 16  ;;  %792 = vmatmul.bf16.gmra.mxu1 %v3704_v55  ;;  %812 = vmatmul.bf16.gmra.mxu2 %v3733_v26  ;;  %4772 = vst [vmem:[#allocation7_spill] sm:$0xff] %v3780_v28 }
  0x4c   : > { %v3763_v1 = vpack.c.b16 %v671_v48, %v670_v37  ;;  %v298_v2 = vrot.slane %v297_v50, 4  ;;  %v416_v3 = vrot.slane %v414_v53, 5  ;;  %v507_v8 = vshrl.u32 %v3746_v43, 16 }
  0x4d   : > { %v308_v9 = vrot.slane %v307_v57, 4  ;;  %v422_v11 = vrot.slane %v420_v58, 5  ;;  %v426_v13 = vrot.slane %v424_v63, 4  ;;  %v432_v14 = vrot.slane %v430_v0, 5  ;;  %v3788_v58 = vld [vmem:[%s3457_s28 + $0xb8] sm:$0xf]  ;;  %1746 = vmatpush.bf16.msrb.mxu0 %v3307_v20 }
  0x4e   : > { %4771 = vst [vmem:[#allocation6_spill] sm:$0xff] %v3763_v1  ;;  %832 = vmatmul.bf16.gmra.mxu3 %v3763_v1  ;;  %v303_v22 = vsel %vm3472_vm2, %v298_v2, %v302_v29  ;;  %v417_v23 = vor.u32 %v416_v3, %v413_v51  ;;  %v509_v25 = vrot.slane %v507_v8, 4  ;;  %v510_v27 = vshll.u32 %v3746_v43, 16  ;;  %v3796_v3 = vld [vmem:[%s3457_s28 + $0xbc] sm:$0x1] }
  0x4f   : > { %v313_v35 = vsel %vm3472_vm2, %v308_v9, %v312_v40  ;;  %v646_v37 = vunpack.c.l.b16 %v303_v22  ;;  %v427_v39 = vor.u32 %v426_v13, %v422_v11  ;;  %v516_v44 = vshll.u32 %v3766_v6, 16  ;;  %4773 = vst [vmem:[#allocation8_spill] sm:$0xff] %v3788_v58  ;;  %v3799_v8 = vld [vmem:[%s3457_s28 + $0x24] sm:$0xf]  ;;  %v3330_v9 = vld [vmem:[%s4730_s1 + $0x1b8] sm:$0xff] }
  0x50   : > { %v647_v29 = vunpack.c.l.b16 %v313_v35  ;;  %v418_v45 = vrot.slane %v417_v23, 4  ;;  %v512_v48 = vrot.slane %v510_v27, 5  ;;  %v520_v50 = vshrl.u32 %v3766_v6, 16  ;;  %4774 = vst [vmem:[#allocation9_spill] sm:$0xff] %v3796_v3  ;;  %2127 = vmatpush.bf16.msra.mxu2 %v3330_v9 }
  0x51   : > { %v428_v51 = vrot.slane %v427_v39, 4  ;;  %v518_v53 = vrot.slane %v516_v44, 5  ;;  %v526_v57 = vshll.u32 %v3776_v24, 16  ;;  %v603_v56 = vshrl.u32 %v3780_v28, 16 }
  0x52   : > { %v3791_v40 = vpack.c.b16 %v647_v29, %v646_v37  ;;  %v423_v63 = vsel %vm3472_vm2, %v418_v45, %v422_v11  ;;  %v513_v0 = vor.u32 %v512_v48, %v509_v25  ;;  %v522_v2 = vrot.slane %v520_v50, 4  ;;  %v3812_v29 = vld [vmem:[%s3457_s28 + $0x28] sm:$0xf] }
  0x53   : > { %v433_v13 = vsel %vm3472_vm2, %v428_v51, %v432_v14  ;;  %v656_v20 = vunpack.c.l.b16 %v423_v63  ;;  %v528_v22 = vrot.slane %v526_v57, 5  ;;  %v605_v23 = vrot.slane %v603_v56, 4  ;;  %v3338_v57 = vld [vmem:[%s4730_s1 + $0x1f8] sm:$0xff] }
  0x54   : > { %772 = vmatmul.bf16.gmra.mxu0 %v3791_v40  ;;  %v657_v11 = vunpack.c.l.b16 %v433_v13  ;;  %v514_v25 = vrot.slane %v513_v0, 4  ;;  %v523_v27 = vor.u32 %v522_v2, %v518_v53  ;;  %v606_v35 = vshll.u32 %v3780_v28, 16  ;;  %v3322_v56 = vld [vmem:[%s4730_s1 + $0x178] sm:$0xff]  ;;  %2340 = vmatpush.bf16.msra.mxu3 %v3338_v57 }
  0x55   : > { %v612_v37 = vshll.u32 %v3788_v58, 16  ;;  %v616_v39 = vshrl.u32 %v3788_v58, 16  ;;  %v622_v44 = vshll.u32 %v3796_v3, 16  ;;  %v315_v14 = vshrl.u32 %v3799_v8, 16  ;;  %v3346_v63 = vld [vmem:[%s4730_s1 + $0x238] sm:$0xff]  ;;  %1936 = vmatpush.bf16.msra.mxu1 %v3322_v56 }
  0x56   : > { %v3815_v45 = vpack.c.b16 %v657_v11, %v656_v20  ;;  %v519_v48 = vsel %vm3472_vm2, %v514_v25, %v518_v53  ;;  %v524_v50 = vrot.slane %v523_v27, 4  ;;  %v608_v51 = vrot.slane %v606_v35, 5  ;;  %v3829_v20 = vld [vmem:[%s3457_s28 + $0x2c] sm:$0x1]  ;;  %2537 = vmatpush.bf16.msra.mxu0 %v3346_v63 }
  0x57   : > { %v664_v0 = vunpack.c.l.b16 %v519_v48  ;;  %v614_v2 = vrot.slane %v612_v37, 5  ;;  %v618_v9 = vrot.slane %v616_v39, 4  ;;  %v624_v13 = vrot.slane %v622_v44, 5 }
  0x58   : > { %4775 = vst [vmem:[#allocation10_spill] sm:$0xff] %v3815_v45  ;;  %v529_v53 = vsel %vm3472_vm2, %v524_v50, %v528_v22  ;;  %v609_v11 = vor.u32 %v608_v51, %v605_v23  ;;  %v317_v25 = vrot.slane %v315_v14, 4  ;;  %v318_v27 = vshll.u32 %v3799_v8, 16 }
  0x59   : > { %v665_v35 = vunpack.c.l.b16 %v529_v53  ;;  %v619_v3 = vor.u32 %v618_v9, %v614_v2  ;;  %v324_v28 = vshll.u32 %v3812_v29, 16  ;;  %v328_v48 = vshrl.u32 %v3812_v29, 16 }
  0x5a   : > { %v610_v37 = vrot.slane %v609_v11, 4  ;;  %v320_v39 = vrot.slane %v318_v27, 5  ;;  %v334_v44 = vshll.u32 %v3829_v20, 16  ;;  %v1100_v11 = vrot.slane %v3501_v4, 5 }
  0x5b   : > { %v3837_v58 = vpack.c.b16 %v665_v35, %v664_v0  ;;  %v620_v22 = vrot.slane %v619_v3, 4  ;;  %v326_v23 = vrot.slane %v324_v28, 5  ;;  %v330_v14 = vrot.slane %v328_v48, 4  ;;  %797 = vmatmul.bf16.gmra.mxu1 %v3815_v45 }
  0x5c   : > { %v615_v50 = vsel %vm3472_vm2, %v610_v37, %v614_v2  ;;  %v321_v51 = vor.u32 %v320_v39, %v317_v25  ;;  %v336_v57 = vrot.slane %v334_v44, 5  ;;  %v4776_v0 = vmov 0 }
  0x5d   : > { %817 = vmatmul.bf16.gmra.mxu2 %v3837_v58  ;;  %v625_v56 = vsel %vm3472_vm2, %v620_v22, %v624_v13  ;;  %v672_v63 = vunpack.c.l.b16 %v615_v50  ;;  %v331_v9 = vor.u32 %v330_v14, %v326_v23  ;;  %v4777_v0 = vsel %vm3845_vm5, 4294967295, %v4776_v0 }
  0x5e   : > { %4778 = vst [vmem:[#allocation11_spill] sm:$0xff] %v4777_v0  ;;  %v3003_v28 = vrot.slane %v3485_v49, 9  ;;  %v673_v3 = vunpack.c.l.b16 %v625_v56  ;;  %v322_v53 = vrot.slane %v321_v51, 4  ;;  %v1097_v2 = vrot.slane %v3495_v62, 5 }
  0x5f   : > { %v332_v25 = vrot.slane %v331_v9, 4  ;;  %v3004_v27 = vrot.slane %v3568_v18, 9  ;;  %v1104_v35 = vrot.slane %v3580_v34, 5  ;;  %v1107_v13 = vrot.slane %v3591_v42, 5  ;;  %v3257_v9 = vld [vmem:[%s3457_s28] sm:$0xff] }
  0x60   : > { %v3855_v48 = vpack.c.b16 %v673_v3, %v672_v63  ;;  %v327_v37 = vsel %vm3472_vm2, %v322_v53, %v326_v23  ;;  %v1098_v49 = vsel %vm3845_vm5, %v3003_v28, %v1097_v2  ;;  %v1099_v39 = vrot.slane %v1097_v2, 4  ;;  %v3258_v28 = vld [vmem:[%s3457_s28 + $0xc] sm:$0xff] }
  0x61   : > { %v337_v62 = vsel %vm3472_vm2, %v332_v25, %v336_v57  ;;  %v648_v4 = vunpack.c.l.b16 %v327_v37  ;;  %v1223_v44 = vunpack.c.l.b16 %v1098_v49  ;;  %v1105_v18 = vsel %vm3845_vm5, %v3004_v27, %v1104_v35  ;;  %v3329_v3 = vld [vmem:[%s4730_s1 + $0x1b0] sm:$0xff] }
  0x62   : > { %837 = vmatmul.bf16.gmra.mxu3 %v3855_v48  ;;  %v649_v34 = vunpack.c.l.b16 %v337_v62  ;;  %v1101_v42 = vsel %vm3845_vm5, %v1099_v39, %v1100_v11  ;;  %v1106_v22 = vrot.slane %v1104_v35, 4  ;;  %v1225_v14 = vunpack.c.l.b16 %v1105_v18  ;;  %2128 = vmatpush.bf16.msra.mxu2 %v3329_v3  ;;  %v3337_v53 = vld [vmem:[%s4730_s1 + $0x1f0] sm:$0xff] }
  0x63   : > { %v1224_v23 = vunpack.c.l.b16 %v1101_v42  ;;  %v3321_v2 = vld [vmem:[%s4730_s1 + $0x170] sm:$0xff]  ;;  %2341 = vmatpush.bf16.msra.mxu3 %v3337_v53  ;;  %v1111_v25 = vrot.slane %v3701_v52, 5  ;;  %v3005_v27 = vrot.slane %v3693_v31, 9  ;;  %v3909_v31 = vld [vmem:[%s3457_s28 + $0x24] sm:$0xff]  ;;  %v1121_v18 = vrot.slane %v3829_v20, 5 }
  0x64   : > { %v3868_v50 = vpack.c.b16 %v649_v34, %v648_v4  ;;  %v1108_v51 = vsel %vm3845_vm5, %v1106_v22, %v1107_v13  ;;  %v3345_v11 = vld [vmem:[%s4730_s1 + $0x230] sm:$0xff]  ;;  %1937 = vmatpush.bf16.msra.mxu1 %v3321_v2  ;;  %v1114_v13 = vrot.slane %v3709_v60, 5  ;;  %v1118_v4 = vrot.slane %v3812_v29, 5  ;;  %v3328_v42 = vld [vmem:[%s4730_s1 + $0x1a8] sm:$0xff]  ;;  %v3383_v2 = vld [vmem:[%s3457_s28 + $0x38] sm:$0x1] }
  0x65   : > { %v1255_v57 = vpack.c.b16 %v1224_v23, %v1223_v44  ;;  %v1226_v56 = vunpack.c.l.b16 %v1108_v51  ;;  %2538 = vmatpush.bf16.msra.mxu0 %v3345_v11  ;;  %v1113_v35 = vrot.slane %v1111_v25, 4  ;;  %v1112_v37 = vsel %vm3845_vm5, %v3005_v27, %v1111_v25  ;;  %v3336_v20 = vld [vmem:[%s4730_s1 + $0x1e8] sm:$0xff] }
  0x66   : > { %777 = vmatmul.bf16.gmra.mxu0 %v3868_v50  ;;  %v1227_v52 = vunpack.c.l.b16 %v1112_v37  ;;  %v3006_v60 = vrot.slane %v3799_v8, 9  ;;  %v1120_v44 = vrot.slane %v1118_v4, 4  ;;  %2129 = vmatpush.bf16.msra.mxu2 %v3328_v42  ;;  %v3320_v23 = vld [vmem:[%s4730_s1 + $0x168] sm:$0xff]  ;;  %v1128_v11 = vrot.slane %v3383_v2, 5 }
  0x67   : > { %v3873_v63 = vpack.c.b16 %v1226_v56, %v1225_v14  ;;  %v1115_v49 = vsel %vm3845_vm5, %v1113_v35, %v1114_v13  ;;  %v3344_v14 = vld [vmem:[%s4730_s1 + $0x228] sm:$0xff]  ;;  %2342 = vmatpush.bf16.msra.mxu3 %v3336_v20  ;;  %v1139_v2 = vrot.slane %v3621_v10, 5 }
  0x68   : > { %v1228_v39 = vunpack.c.l.b16 %v1115_v49  ;;  %v1119_v34 = vsel %vm3845_vm5, %v3006_v60, %v1118_v4  ;;  %v1122_v29 = vsel %vm3845_vm5, %v1120_v44, %v1121_v18  ;;  %1938 = vmatpush.bf16.msra.mxu1 %v3320_v23  ;;  %v3957_v4 = vld [vmem:[%s3457_s28 + $0x3c] sm:$0xff]  ;;  %v3008_v60 = vrot.slane %v3504_v5, 9 }
  0x69   : > { %v1229_v8 = vunpack.c.l.b16 %v1119_v34  ;;  %v1230_v22 = vunpack.c.l.b16 %v1122_v29  ;;  %2539 = vmatpush.bf16.msra.mxu0 %v3344_v14  ;;  %v1135_v18 = vrot.slane %v3521_v19, 5  ;;  %v3327_v5 = vld [vmem:[%s4730_s1 + $0x1a0] sm:$0xff] }
  0x6a   : > { %v3903_v62 = vpack.c.b16 %v1228_v39, %v1227_v52  ;;  %v1132_v52 = vrot.slane %v3515_v15, 5  ;;  %2130 = vmatpush.bf16.msra.mxu2 %v3327_v5  ;;  %v3335_v23 = vld [vmem:[%s4730_s1 + $0x1e0] sm:$0xff] }
  0x6b   : > { %995 = vmatmul.bf16.vlgmr.msrb.gmra.mxu1 %v3257_v9  ;;  %v3931_v51 = vpack.c.b16 %v1230_v22, %v1229_v8  ;;  %v3937_v9 = vld [vmem:[%s3457_s28 + $0x30] sm:$0xff]  ;;  %v3319_v14 = vld [vmem:[%s4730_s1 + $0x160] sm:$0xff]  ;;  %2343 = vmatpush.bf16.msra.mxu3 %v3335_v23  ;;  %v1146_v23 = vrot.slane %v3738_v32, 5 }
  0x6c   : > { %v1134_v44 = vrot.slane %v1132_v52, 4  ;;  %v1133_v15 = vsel %vm3845_vm5, %v3008_v60, %v1132_v52  ;;  %1939 = vmatpush.bf16.msra.mxu1 %v3319_v14  ;;  %v4031_v14 = vld [vmem:[%s3457_s28 + $0x54] sm:$0xff] }
  0x6d   : > { %1343 = vmatmul.bf16.vlgmr.msrb.gmra.mxu2 %v1255_v57  ;;  %v3381_v57 = vld [vmem:[%s3457_s28 + $0x34] sm:$0xf]  ;;  %v1233_v19 = vunpack.c.l.b16 %v1133_v15  ;;  %4786 = vst [vmem:[#allocation19_spill] sm:$0xff] %v4031_v14 }
  0x6e   : > { %v1125_v56 = vrot.slane %v3381_v57, 5  ;;  %v1136_v8 = vsel %vm3845_vm5, %v1134_v44, %v1135_v18 }
  0x6f   : > { %v1234_v20 = vunpack.c.l.b16 %v1136_v8 }
  0x70   : > { %v1127_v53 = vrot.slane %v1125_v56, 4 }
  0x72   : > { %1534 = vmatmul.bf16.vlgmr.msrb.gmra.mxu3 %v3258_v28  ;;  %v1129_v27 = vsel %vm3845_vm5, %v1127_v53, %v1128_v11  ;;  %v3343_v53 = vld [vmem:[%s4730_s1 + $0x220] sm:$0xff] }
  0x73   : > { %v1232_v13 = vunpack.c.l.b16 %v1129_v27  ;;  %2540 = vmatpush.bf16.msra.mxu0 %v3343_v53  ;;  %v3009_v27 = vrot.slane %v3602_v54, 9  ;;  %v3010_v53 = vrot.slane %v3712_v61, 9 }
  0x75   : > { %v1140_v44 = vsel %vm3845_vm5, %v3009_v27, %v1139_v2  ;;  %v1149_v27 = vrot.slane %v3741_v33, 5  ;;  %v3326_v33 = vld [vmem:[%s4730_s1 + $0x198] sm:$0xff] }
  0x76   : > { %1747 = vmatmul.bf16.vlgmr.msrb.gmra.mxu0 %v3682_v7  ;;  %v3893_v7 = vld [vmem:[%s3457_s28 + $0x18] sm:$0xff]  ;;  %v1235_v15 = vunpack.c.l.b16 %v1140_v44  ;;  %2131 = vmatpush.bf16.msra.mxu2 %v3326_v33 }
  0x7b   : > { %1000 = vmatmul.bf16.gmra.mxu1 %v3258_v28  ;;  %v3382_v28 = vld [vmem:[%s3457_s28 + $0x30] sm:$0xf] }
  0x7c   : > { %v3007_v3 = vrot.slane %v3382_v28, 9 }
  0x7d   : > { %1348 = vmatmul.bf16.gmra.mxu2 %v3873_v63 }
  0x7e   : > { %v1126_v25 = vsel %vm3845_vm5, %v3007_v3, %v1125_v56  ;;  %v3990_v3 = vpack.c.b16 %v1234_v20, %v1233_v19 }
  0x7f   : > { %v1231_v35 = vunpack.c.l.b16 %v1126_v25  ;;  %v4001_v25 = vld [vmem:[%s3457_s28 + $0x48] sm:$0xff] }
  0x80   : > { %4781 = vst [vmem:[#allocation14_spill] sm:$0xff] %v3990_v3 }
  0x81   : > { %v3949_v49 = vpack.c.b16 %v1232_v13, %v1231_v35  ;;  %4782 = vst [vmem:[#allocation15_spill] sm:$0xff] %v4001_v25  ;;  %v1141_v35 = vrot.slane %v1139_v2, 4  ;;  %v1142_v13 = vrot.slane %v3629_v17, 5  ;;  %v1148_v2 = vrot.slane %v1146_v23, 4 }
  0x82   : > { %1539 = vmatmul.bf16.gmra.mxu3 %v3893_v7 }
  0x83   : > { %v1143_v18 = vsel %vm3845_vm5, %v1141_v35, %v1142_v13  ;;  %v1150_v61 = vsel %vm3845_vm5, %v1148_v2, %v1149_v27 }
  0x84   : > { %v1236_v54 = vunpack.c.l.b16 %v1143_v18  ;;  %v1147_v18 = vsel %vm3845_vm5, %v3010_v53, %v1146_v23  ;;  %v3318_v23 = vld [vmem:[%s4730_s1 + $0x158] sm:$0xff] }
  0x85   : > { %1940 = vmatpush.bf16.msra.mxu1 %v3318_v23  ;;  %v3385_v23 = vld [vmem:[%s3457_s28 + $0x60] sm:$0xf] }
  0x86   : > { %1752 = vmatmul.bf16.gmra.mxu0 %v3791_v40  ;;  %v4025_v20 = vpack.c.b16 %v1236_v54, %v1235_v15  ;;  %v1237_v15 = vunpack.c.l.b16 %v1147_v18  ;;  %v1238_v54 = vunpack.c.l.b16 %v1150_v61  ;;  %v3384_v61 = vld [vmem:[%s3457_s28 + $0x64] sm:$0xf] }
  0x87   : > { %v1153_v33 = vrot.slane %v3384_v61, 5 }
  0x88   : > { %4785 = vst [vmem:[#allocation18_spill] sm:$0xff] %v4025_v20  ;;  %v4062_v27 = vpack.c.b16 %v1238_v54, %v1237_v15  ;;  %v3011_v15 = vrot.slane %v3385_v23, 9 }
  0x89   : > { %v1155_v54 = vrot.slane %v1153_v33, 4 }
  0x8a   : > { %4788 = vst [vmem:[#allocation21_spill] sm:$0xff] %v4062_v27 }
  0x8b   : > { %1005 = vmatmul.bf16.gmra.mxu1 %v3893_v7 }
  0x8d   : > { %1353 = vmatmul.bf16.gmra.mxu2 %v3903_v62 }
  0x92   : > { %1544 = vmatmul.bf16.gmra.mxu3 %v3909_v31 }
  0x96   : > { %1757 = vmatmul.bf16.gmra.mxu0 %v3868_v50 }
  0x9b   : > { %1010 = vmatmul.bf16.gmra.mxu1 %v3909_v31 }
  0x9d   : > { %1358 = vmatmul.bf16.gmra.mxu2 %v3931_v51 }
  0xa2   : > { %1549 = vmatmul.bf16.gmra.mxu3 %v3937_v9 }
  0xa6   : > { %1762 = vmatmul.bf16.gmra.mxu0 %v3490_v59 }
  0xa8   : > { %v3947_v37 = vpop.f32.mrf.mxu1 }
  0xab   : > { %v3952_v39 = vpop.f32.mrf.mxu0  ;;  %1015 = vmatmul.bf16.gmra.mxu1 %v3937_v9 }
  0xad   : > { %1363 = vmatmul.bf16.gmra.mxu2 %v3949_v49 }
  0xae   : > { %v3961_v34 = vpop.f32.mrf.mxu2 }
  0xaf   : > { %v3963_v29 = vpop.f32.mrf.mxu3 }
  0xb0   : > { %4779 = vst [vmem:[#allocation12_spill] sm:$0xff] %v3963_v29  ;;  %v3965_v42 = vpop.f32.mrf.mxu1 }
  0xb2   : > { %1554 = vmatmul.bf16.gmra.mxu3 %v3957_v4 }
  0xb3   : > { %v3975_v22 = vpop.f32.mrf.mxu0 }
  0xb6   : > { %1767 = vmatmul.bf16.gmra.mxu0 %v3586_v38  ;;  %v3984_v57 = vpop.f32.mrf.mxu2 }
  0xb7   : > { %v3986_v56 = vpop.f32.mrf.mxu3 }
  0xb8   : > { %4780 = vst [vmem:[#allocation13_spill] sm:$0xff] %v3986_v56  ;;  %v3988_v28 = vpop.f32.mrf.mxu1 }
  0xbb   : > { %1020 = vmatmul.bf16.gmra.mxu1 %v3957_v4 }
  0xbd   : > { %v3997_v11 = vpop.f32.mrf.mxu0  ;;  %1368 = vmatmul.bf16.gmra.mxu2 %v3990_v3 }
  0xbe   : > { %v4005_v52 = vpop.f32.mrf.mxu2 }
  0xbf   : > { %v4007_v60 = vpop.f32.mrf.mxu3 }
  0xc0   : > { %4783 = vst [vmem:[#allocation16_spill] sm:$0xff] %v4007_v60  ;;  %v4009_v10 = vpop.f32.mrf.mxu1  ;;  %v3386_v60 = vld [vmem:[%s3457_s28 + $0x68] sm:$0x1] }
  0xc1   : > { %v1156_v56 = vrot.slane %v3386_v60, 5 }
  0xc2   : > { %1559 = vmatmul.bf16.gmra.mxu3 %v4001_v25 }
  0xc5   : > { %v4017_v17 = vpop.f32.mrf.mxu0 }
  0xc6   : > { %1772 = vmatmul.bf16.gmra.mxu0 %v3704_v55  ;;  %v4019_v8 = vpop.f32.mrf.mxu2 }
  0xc7   : > { %v4021_v5 = vpop.f32.mrf.mxu3 }
  0xc8   : > { %4784 = vst [vmem:[#allocation17_spill] sm:$0xff] %v4021_v5  ;;  %v4023_v19 = vpop.f32.mrf.mxu1 }
  0xcb   : > { %1025 = vmatmul.bf16.gmra.mxu1 %v4001_v25 }
  0xcd   : > { %1373 = vmatmul.bf16.gmra.mxu2 %v4025_v20 }
  0xce   : > { %v4035_v35 = vpop.f32.mrf.mxu2 }
  0xd0   : > { %v4042_v32 = vpop.f32.mrf.mxu1 }
  0xd1   : > { %v4037_v13 = vpop.f32.mrf.mxu0  ;;  %v4039_v44 = vpop.f32.mrf.mxu3 }
  0xd2   : > { %4787 = vst [vmem:[#allocation20_spill] sm:$0xff] %v4039_v44  ;;  %1564 = vmatmul.bf16.gmra.mxu3 %v4031_v14  ;;  %v3334_v44 = vld [vmem:[%s4730_s1 + $0x1d8] sm:$0xff] }
  0xd3   : > { %2344 = vmatpush.bf16.msra.mxu3 %v3334_v44  ;;  %v4075_v44 = vld [vmem:[%s3457_s28 + $0x60] sm:$0xff] }
  0xd4   : > { %4790 = vst [vmem:[#allocation23_spill] sm:$0xff] %v4075_v44 }
  0xd6   : > { %1777 = vmatmul.bf16.gmra.mxu0 %v3815_v45  ;;  %v4058_v53 = vpop.f32.mrf.mxu2  ;;  %v3342_v45 = vld [vmem:[%s4730_s1 + $0x218] sm:$0xff] }
  0xd7   : > { %2541 = vmatpush.bf16.msra.mxu0 %v3342_v45  ;;  %v1157_v45 = vsel %vm3845_vm5, %v1155_v54, %v1156_v56 }
  0xd8   : > { %v4064_v18 = vpop.f32.mrf.mxu1  ;;  %v1240_v60 = vunpack.c.l.b16 %v1157_v45  ;;  %v3388_v45 = vld [vmem:[%s3457_s28 + $0x6c] sm:$0xf] }
  0xd9   : > { %v4060_v2 = vpop.f32.mrf.mxu0  ;;  %v4067_v5 = vpop.f32.mrf.mxu3 }
  0xda   : > { %4789 = vst [vmem:[#allocation22_spill] sm:$0xff] %v4067_v5 }
  0xdb   : > { %1030 = vmatmul.bf16.gmra.mxu1 %v4031_v14  ;;  %v1154_v14 = vsel %vm3845_vm5, %v3011_v15, %v1153_v33  ;;  %v3387_v33 = vld [vmem:[%s3457_s28 + $0x70] sm:$0xf] }
  0xdc   : > { %v1239_v20 = vunpack.c.l.b16 %v1154_v14  ;;  %v1160_v15 = vrot.slane %v3387_v33, 5  ;;  %v4106_v14 = vld [vmem:[%s3457_s28 + $0x6c] sm:$0xff] }
  0xdd   : > { %1378 = vmatmul.bf16.gmra.mxu2 %v4062_v27 }
  0xde   : > { %v4095_v29 = vpack.c.b16 %v1240_v60, %v1239_v20  ;;  %v3389_v20 = vld [vmem:[%s3457_s28 + $0x74] sm:$0x1] }
  0xdf   : > { %v1163_v60 = vrot.slane %v3389_v20, 5 }
  0xe0   : > { %v4079_v61 = vpop.f32.mrf.mxu2  ;;  %v4082_v5 = vpop.f32.mrf.mxu1  ;;  %4794 = vst [vmem:[#allocation27_spill] sm:$0xff] %v4095_v29 }
  0xe1   : > { %4791 = vst [vmem:[#allocation24_spill] sm:$0xff] %v4079_v61 }
  0xe2   : > { %1569 = vmatmul.bf16.gmra.mxu3 %v4075_v44 }
  0xe3   : > { %v4088_v27 = vpop.f32.mrf.mxu0 }
  0xe5   : > { %v4090_v23 = vpop.f32.mrf.mxu3 }
  0xe6   : > { %4792 = vst [vmem:[#allocation25_spill] sm:$0xff] %v4090_v23  ;;  %1782 = vmatmul.bf16.gmra.mxu0 %v3517_v16  ;;  %v3012_v23 = vrot.slane %v3388_v45, 9  ;;  %v1162_v16 = vrot.slane %v1160_v15, 4  ;;  %v3325_v45 = vld [vmem:[%s4730_s1 + $0x190] sm:$0xff] }
  0xe7   : > { %2132 = vmatpush.bf16.msra.mxu2 %v3325_v45 }
  0xe8   : > { %v4093_v55 = vpop.f32.mrf.mxu2  ;;  %v996_v25 = vpop.f32.mrf.mxu1 }
  0xe9   : > { %4793 = vst [vmem:[#allocation26_spill] sm:$0xff] %v4093_v55  ;;  %v997_v56 = vadd.f32 %v996_v25, %v3952_v39  ;;  %v1161_v39 = vsel %vm3845_vm5, %v3012_v23, %v1160_v15  ;;  %v1164_v25 = vsel %vm3845_vm5, %v1162_v16, %v1163_v60  ;;  %v3333_v23 = vld [vmem:[%s4730_s1 + $0x1d0] sm:$0xff] }
  0xea   : > { %v1241_v20 = vunpack.c.l.b16 %v1161_v39  ;;  %v1242_v61 = vunpack.c.l.b16 %v1164_v25  ;;  %v3317_v16 = vld [vmem:[%s4730_s1 + $0x150] sm:$0xff]  ;;  %2345 = vmatpush.bf16.msra.mxu3 %v3333_v23 }
  0xeb   : > { %v4098_v3 = vpop.f32.mrf.mxu0  ;;  %1035 = vmatmul.bf16.gmra.mxu1 %v4075_v44  ;;  %v3341_v25 = vld [vmem:[%s4730_s1 + $0x210] sm:$0xff] }
  0xec   : > { %1941 = vmatpush.bf16.msra.mxu1 %v3317_v16  ;;  %v4128_v60 = vpack.c.b16 %v1242_v61, %v1241_v20  ;;  %2542 = vmatpush.bf16.msra.mxu0 %v3341_v25  ;;  %v3013_v61 = vrot.slane %v3633_v21, 9 }
  0xed   : > { %v4102_v54 = vpop.f32.mrf.mxu3  ;;  %1383 = vmatmul.bf16.gmra.mxu2 %v4095_v29 }
  0xee   : > { %4795 = vst [vmem:[#allocation28_spill] sm:$0xff] %v4102_v54 }
  0xf0   : > { %v1344_v55 = vpop.f32.mrf.mxu2  ;;  %v998_v33 = vpop.f32.mrf.mxu1 }
  0xf1   : > { %v1424_v38 = vadd.f32 %v1344_v55, %v997_v56  ;;  %v999_v29 = vadd.f32 %v998_v33, %v3975_v22 }
  0xf2   : > { %1574 = vmatmul.bf16.gmra.mxu3 %v4106_v14 }
  0xf3   : > { %v1748_v54 = vpop.f32.mrf.mxu0 }
  0xf5   : > { %v1535_v44 = vpop.f32.mrf.mxu3 }
  0xf6   : > { %1787 = vmatmul.bf16.gmra.mxu0 %v3624_v12  ;;  %v1615_v55 = vadd.f32 %v1535_v44, %v1424_v38  ;;  %v1167_v38 = vrot.slane %v3655_v46, 5  ;;  %v1170_v46 = vrot.slane %v3658_v47, 5 }
  0xf8   : > { %v1346_v22 = vpop.f32.mrf.mxu2  ;;  %v4126_v15 = vadd.f32 %v1748_v54, %v1615_v55  ;;  %v1001_v33 = vpop.f32.mrf.mxu1  ;;  %v1169_v20 = vrot.slane %v1167_v38, 4 }
  0xf9   : > { %v1425_v56 = vadd.f32 %v1346_v22, %v999_v29  ;;  %v1002_v39 = vadd.f32 %v1001_v33, %v3997_v11  ;;  %v4138_v29 = vld [vmem:[%s3457_s28 + $0x78] sm:$0xff]  ;;  %v1168_v22 = vsel %vm3845_vm5, %v3013_v61, %v1167_v38  ;;  %v1174_v61 = vrot.slane %v3766_v6, 5 }
  0xfb   : > { %v1750_v44 = vpop.f32.mrf.mxu0  ;;  %1040 = vmatmul.bf16.gmra.mxu1 %v4106_v14 }
  0xfd   : > { %v1537_v45 = vpop.f32.mrf.mxu3  ;;  %1388 = vmatmul.bf16.gmra.mxu2 %v4128_v60 }
  0xfe   : > { %v1616_v54 = vadd.f32 %v1537_v45, %v1425_v56  ;;  %v1171_v56 = vsel %vm3845_vm5, %v1169_v20, %v1170_v46  ;;  %v1243_v45 = vunpack.c.l.b16 %v1168_v22  ;;  %v4160_v22 = vld [vmem:[%s3457_s28 + $0x84] sm:$0xff] }
  0xff   : > { %v1244_v47 = vunpack.c.l.b16 %v1171_v56  ;;  %v1176_v56 = vrot.slane %v1174_v61, 4 }
 0x100   : > { %v1349_v55 = vpop.f32.mrf.mxu2  ;;  %v4142_v11 = vadd.f32 %v1750_v44, %v1616_v54  ;;  %v1003_v16 = vpop.f32.mrf.mxu1 }
 0x101   : > { %v1426_v23 = vadd.f32 %v1349_v55, %v1002_v39  ;;  %v1004_v25 = vadd.f32 %v1003_v16, %v4017_v17 }
 0x102   : > { %4796 = vst [vmem:[#allocation29_spill] sm:$0xff] %v4142_v11  ;;  %1579 = vmatmul.bf16.gmra.mxu3 %v4138_v29  ;;  %v4153_v11 = vpack.c.b16 %v1244_v47, %v1243_v45 }
 0x103   : > { %v1753_v33 = vpop.f32.mrf.mxu0 }
 0x105   : > { %v1540_v21 = vpop.f32.mrf.mxu3 }
 0x106   : > { %1792 = vmatmul.bf16.gmra.mxu0 %v3733_v26  ;;  %v1617_v44 = vadd.f32 %v1540_v21, %v1426_v23  ;;  %v3014_v23 = vrot.slane %v3746_v43, 9  ;;  %v3324_v43 = vld [vmem:[%s4730_s1 + $0x188] sm:$0xff] }
 0x107   : > { %2133 = vmatpush.bf16.msra.mxu2 %v3324_v43  ;;  %v3391_v43 = vld [vmem:[%s3457_s28 + $0x90] sm:$0xf] }
 0x108   : > { %v1351_v39 = vpop.f32.mrf.mxu2  ;;  %v4151_v54 = vadd.f32 %v1753_v33, %v1617_v44  ;;  %v1006_v38 = vpop.f32.mrf.mxu1  ;;  %v1177_v33 = vrot.slane %v3776_v24, 5  ;;  %v1175_v45 = vsel %vm3845_vm5, %v3014_v23, %v1174_v61  ;;  %v3332_v61 = vld [vmem:[%s4730_s1 + $0x1c8] sm:$0xff] }
 0x109   : > { %v1427_v55 = vadd.f32 %v1351_v39, %v1004_v25  ;;  %v1007_v46 = vadd.f32 %v1006_v38, %v4037_v13  ;;  %2346 = vmatpush.bf16.msra.mxu3 %v3332_v61 }
 0x10a   : > { %v1178_v47 = vsel %vm3845_vm5, %v1176_v56, %v1177_v33  ;;  %v3390_v33 = vld [vmem:[%s3457_s28 + $0x94] sm:$0xf] }
 0x10b   : > { %v1755_v20 = vpop.f32.mrf.mxu0  ;;  %1045 = vmatmul.bf16.gmra.mxu1 %v4138_v29  ;;  %v1246_v38 = vunpack.c.l.b16 %v1178_v47 }
 0x10d   : > { %v1542_v17 = vpop.f32.mrf.mxu3  ;;  %1393 = vmatmul.bf16.gmra.mxu2 %v4153_v11 }
 0x10e   : > { %v1618_v16 = vadd.f32 %v1542_v17, %v1427_v55  ;;  %v1245_v55 = vunpack.c.l.b16 %v1175_v45  ;;  %v3340_v45 = vld [vmem:[%s4730_s1 + $0x208] sm:$0xff] }
 0x10f   : > { %2543 = vmatpush.bf16.msra.mxu0 %v3340_v45 }
 0x110   : > { %v1354_v25 = vpop.f32.mrf.mxu2  ;;  %v4164_v21 = vadd.f32 %v1755_v20, %v1618_v16  ;;  %v1008_v13 = vpop.f32.mrf.mxu1  ;;  %v4184_v23 = vpack.c.b16 %v1246_v38, %v1245_v55  ;;  %v3392_v38 = vld [vmem:[%s3457_s28 + $0x98] sm:$0x1] }
 0x111   : > { %v1428_v6 = vadd.f32 %v1354_v25, %v1007_v46  ;;  %v1009_v39 = vadd.f32 %v1008_v13, %v4060_v2  ;;  %v3316_v2 = vld [vmem:[%s4730_s1 + $0x148] sm:$0xff]  ;;  %v1181_v25 = vrot.slane %v3390_v33, 5 }
 0x112   : > { %1584 = vmatmul.bf16.gmra.mxu3 %v4160_v22  ;;  %1942 = vmatpush.bf16.msra.mxu1 %v3316_v2 }
 0x113   : > { %v1758_v44 = vpop.f32.mrf.mxu0  ;;  %v1183_v55 = vrot.slane %v1181_v25, 4 }
 0x115   : > { %v1545_v24 = vpop.f32.mrf.mxu3 }
 0x116   : > { %1797 = vmatmul.bf16.gmra.mxu0 %v3837_v58  ;;  %v1619_v20 = vadd.f32 %v1545_v24, %v1428_v6  ;;  %v3015_v24 = vrot.slane %v3391_v43, 9 }
 0x118   : > { %v1356_v46 = vpop.f32.mrf.mxu2  ;;  %v4182_v17 = vadd.f32 %v1758_v44, %v1619_v20  ;;  %v1011_v56 = vpop.f32.mrf.mxu1  ;;  %v1184_v20 = vrot.slane %v3392_v38, 5 }
 0x119   : > { %v1429_v16 = vadd.f32 %v1356_v46, %v1009_v39  ;;  %v1012_v13 = vadd.f32 %v1011_v56, %v4088_v27  ;;  %v4194_v39 = vld [vmem:[%s3457_s28 + $0x90] sm:$0xff]  ;;  %v1182_v56 = vsel %vm3845_vm5, %v3015_v24, %v1181_v25 }
 0x11a   : > { %v1247_v43 = vunpack.c.l.b16 %v1182_v56  ;;  %v4215_v56 = vld [vmem:[%s3457_s28 + $0x9c] sm:$0xff] }
 0x11b   : > { %v1760_v6 = vpop.f32.mrf.mxu0  ;;  %1050 = vmatmul.bf16.gmra.mxu1 %v4160_v22  ;;  %4800 = vst [vmem:[#allocation33_spill] sm:$0xff] %v4215_v56 }
 0x11d   : > { %v1547_v47 = vpop.f32.mrf.mxu3  ;;  %1398 = vmatmul.bf16.gmra.mxu2 %v4184_v23 }
 0x11e   : > { %v1620_v44 = vadd.f32 %v1547_v47, %v1429_v16  ;;  %v1185_v16 = vsel %vm3845_vm5, %v1183_v55, %v1184_v20  ;;  %v3393_v55 = vld [vmem:[%s3457_s28 + $0xa0] sm:$0xf] }
 0x11f   : > { %v1248_v38 = vunpack.c.l.b16 %v1185_v16  ;;  %v1188_v20 = vrot.slane %v3393_v55, 5 }
 0x120   : > { %v1359_v61 = vpop.f32.mrf.mxu2  ;;  %v4198_v27 = vadd.f32 %v1760_v6, %v1620_v44  ;;  %v1013_v46 = vpop.f32.mrf.mxu1 }
 0x121   : > { %v1430_v2 = vadd.f32 %v1359_v61, %v1012_v13  ;;  %v1014_v45 = vadd.f32 %v1013_v46, %v4098_v3  ;;  %v4209_v25 = vpack.c.b16 %v1248_v38, %v1247_v43 }
 0x122   : > { %4797 = vst [vmem:[#allocation30_spill] sm:$0xff] %v4198_v27  ;;  %1589 = vmatmul.bf16.gmra.mxu3 %v4194_v39 }
 0x123   : > { %v1763_v33 = vpop.f32.mrf.mxu0  ;;  %4799 = vst [vmem:[#allocation32_spill] sm:$0xff] %v4209_v25 }
 0x125   : > { %v1550_v47 = vpop.f32.mrf.mxu3 }
 0x126   : > { %1802 = vmatmul.bf16.gmra.mxu0 %v3533_v36  ;;  %v1621_v6 = vadd.f32 %v1550_v47, %v1430_v2  ;;  %v3394_v2 = vld [vmem:[%s3457_s28 + $0x9c] sm:$0xf]  ;;  %v1190_v47 = vrot.slane %v1188_v20, 4 }
 0x127   : > { %v3016_v16 = vrot.slane %v3394_v2, 9  ;;  %v3323_v2 = vld [vmem:[%s4730_s1 + $0x180] sm:$0xff] }
 0x128   : > { %v1361_v13 = vpop.f32.mrf.mxu2  ;;  %v4207_v44 = vadd.f32 %v1763_v33, %v1621_v6  ;;  %v1016_v24 = vpop.f32.mrf.mxu1  ;;  %v3395_v33 = vld [vmem:[%s3457_s28 + $0xa4] sm:$0x1]  ;;  %2134 = vmatpush.bf16.msra.mxu2 %v3323_v2 }
 0x129   : > { %v1431_v61 = vadd.f32 %v1361_v13, %v1014_v45  ;;  %v1191_v6 = vrot.slane %v3395_v33, 5  ;;  %v1017_v45 = vadd.f32 %v1016_v24, %v3947_v37 }
 0x12a   : > { %4798 = vst [vmem:[#allocation31_spill] sm:$0xff] %v4207_v44  ;;  %v1189_v44 = vsel %vm3845_vm5, %v3016_v16, %v1188_v20  ;;  %v3331_v20 = vld [vmem:[%s4730_s1 + $0x1c0] sm:$0xff] }
 0x12b   : > { %v1765_v27 = vpop.f32.mrf.mxu0  ;;  %1055 = vmatmul.bf16.gmra.mxu1 %v4194_v39  ;;  %v1249_v37 = vunpack.c.l.b16 %v1189_v44  ;;  %2347 = vmatpush.bf16.msra.mxu3 %v3331_v20  ;;  %v3398_v20 = vld [vmem:[%s3457_s28 + $0xb0] sm:$0x1] }
 0x12d   : > { %v1552_v3 = vpop.f32.mrf.mxu3  ;;  %1403 = vmatmul.bf16.gmra.mxu2 %v4209_v25  ;;  %v4287_v25 = vld [vmem:[%s3457_s28 + $0xc8] sm:$0x1] }
 0x12e   : > { %v1622_v46 = vadd.f32 %v1552_v3, %v1431_v61  ;;  %v1192_v61 = vsel %vm3845_vm5, %v1190_v47, %v1191_v6 }
 0x130   : > { %v1364_v43 = vpop.f32.mrf.mxu2  ;;  %v4220_v38 = vadd.f32 %v1765_v27, %v1622_v46  ;;  %v1018_v55 = vpop.f32.mrf.mxu1  ;;  %v1250_v27 = vunpack.c.l.b16 %v1192_v61  ;;  %v3315_v46 = vld [vmem:[%s4730_s1 + $0x140] sm:$0xff] }
 0x131   : > { %v1432_v13 = vadd.f32 %v1364_v43, %v1017_v45  ;;  %v1019_v16 = vadd.f32 %v1018_v55, %v3965_v42  ;;  %1943 = vmatpush.bf16.msra.mxu1 %v3315_v46  ;;  %v1198_v46 = vrot.slane %v3398_v20, 5 }
 0x132   : > { %4801 = vst [vmem:[#allocation34_spill] sm:$0xff] %v4220_v38  ;;  %1594 = vmatmul.bf16.gmra.mxu3 %v4215_v56  ;;  %v4240_v45 = vpack.c.b16 %v1250_v27, %v1249_v37 }
 0x133   : > { %v1768_v3 = vpop.f32.mrf.mxu0 }
 0x134   : > { %4803 = vst [vmem:[#allocation36_spill] sm:$0xff] %v4240_v45 }
 0x135   : > { %v1555_v33 = vpop.f32.mrf.mxu3 }
 0x136   : > { %1807 = vmatmul.bf16.gmra.mxu0 %v3650_v41  ;;  %v1623_v24 = vadd.f32 %v1555_v33, %v1432_v13  ;;  %v3396_v13 = vld [vmem:[%s3457_s28 + $0xac] sm:$0xf]  ;;  %v3339_v33 = vld [vmem:[%s4730_s1 + $0x200] sm:$0xff] }
 0x137   : > { %v1195_v61 = vrot.slane %v3396_v13, 5  ;;  %2544 = vmatpush.bf16.msra.mxu0 %v3339_v33 }
 0x138   : > { %v1366_v47 = vpop.f32.mrf.mxu2  ;;  %v4238_v44 = vadd.f32 %v1768_v3, %v1623_v24  ;;  %v1021_v43 = vpop.f32.mrf.mxu1  ;;  %v4249_v3 = vld [vmem:[%s3457_s28 + $0xa8] sm:$0xff] }
 0x139   : > { %v1433_v6 = vadd.f32 %v1366_v47, %v1019_v16  ;;  %4804 = vst [vmem:[#allocation37_spill] sm:$0xff] %v4249_v3  ;;  %v3397_v24 = vld [vmem:[%s3457_s28 + $0xa8] sm:$0xf]  ;;  %v1197_v27 = vrot.slane %v1195_v61, 4  ;;  %v1022_v16 = vadd.f32 %v1021_v43, %v3988_v28  ;;  %v4263_v43 = vld [vmem:[%s3457_s28 + $0xc0] sm:$0xf] }
 0x13a   : > { %4802 = vst [vmem:[#allocation35_spill] sm:$0xff] %v4238_v44  ;;  %v3017_v37 = vrot.slane %v3397_v24, 9 }
 0x13b   : > { %v1770_v2 = vpop.f32.mrf.mxu0  ;;  %1060 = vmatmul.bf16.gmra.mxu1 %v4215_v56  ;;  %v1199_v33 = vsel %vm3845_vm5, %v1197_v27, %v1198_v46  ;;  %4806 = vst [vmem:[#allocation39_spill] sm:$0xff] %v4263_v43  ;;  %v1648_v27 = vshrl.u32 %v4263_v43, 16 }
 0x13c   : > { %v1252_v20 = vunpack.c.l.b16 %v1199_v33 }
 0x13d   : > { %v1557_v42 = vpop.f32.mrf.mxu3  ;;  %1408 = vmatmul.bf16.gmra.mxu2 %v4240_v45 }
 0x13e   : > { %v1624_v55 = vadd.f32 %v1557_v42, %v1433_v6  ;;  %v1196_v6 = vsel %vm3845_vm5, %v3017_v37, %v1195_v61 }
 0x13f   : > { %v1251_v38 = vunpack.c.l.b16 %v1196_v6  ;;  %v4810_v6 = vld [vmem:[#allocation8_spill] sm:$0xff] }
 0x140   : > { %v1369_v47 = vpop.f32.mrf.mxu2  ;;  %v4254_v44 = vadd.f32 %v1770_v2, %v1624_v55  ;;  %v1023_v45 = vpop.f32.mrf.mxu1  ;;  %v1202_v33 = vrot.slane %v4810_v6, 5  ;;  %v4812_v6 = vld [vmem:[#allocation9_spill] sm:$0xff] }
 0x141   : > { %v1434_v13 = vadd.f32 %v1369_v47, %v1022_v16  ;;  %v1024_v2 = vadd.f32 %v1023_v45, %v4009_v10  ;;  %v4267_v16 = vld [vmem:[%s3457_s28 + $0xc4] sm:$0xf]  ;;  %v4271_v37 = vpack.c.b16 %v1252_v20, %v1251_v38  ;;  %v1650_v38 = vrot.slane %v1648_v27, 4  ;;  %v4281_v20 = vld [vmem:[%s3457_s28 + $0xb4] sm:$0xff] }
 0x142   : > { %4805 = vst [vmem:[#allocation38_spill] sm:$0xff] %v4254_v44  ;;  %1599 = vmatmul.bf16.gmra.mxu3 %v4249_v3  ;;  %v1661_v10 = vshrl.u32 %v4267_v16, 16 }
 0x143   : > { %v1773_v42 = vpop.f32.mrf.mxu0  ;;  %4807 = vst [vmem:[#allocation40_spill] sm:$0xff] %v4267_v16 }
 0x144   : > { %4809 = vst [vmem:[#allocation42_spill] sm:$0xff] %v4271_v37  ;;  %v1663_v56 = vrot.slane %v1661_v10, 4 }
 0x145   : > { %v1560_v24 = vpop.f32.mrf.mxu3 }
 0x146   : > { %1812 = vmatmul.bf16.gmra.mxu0 %v3763_v1  ;;  %v1625_v28 = vadd.f32 %v1560_v24, %v1434_v13  ;;  %v1651_v13 = vshll.u32 %v4263_v43, 16  ;;  %v1657_v24 = vshll.u32 %v4267_v16, 16 }
 0x148   : > { %v1371_v55 = vpop.f32.mrf.mxu2  ;;  %v4269_v47 = vadd.f32 %v1773_v42, %v1625_v28  ;;  %v1026_v46 = vpop.f32.mrf.mxu1  ;;  %v4811_v28 = vld [vmem:[#allocation7_spill] sm:$0xff]  ;;  %v1653_v1 = vrot.slane %v1651_v13, 5  ;;  %v1659_v41 = vrot.slane %v1657_v24, 5  ;;  %v1667_v13 = vshll.u32 %v4287_v25, 16 }
 0x149   : > { %v1435_v61 = vadd.f32 %v1371_v55, %v1024_v2  ;;  %v3018_v2 = vrot.slane %v4811_v28, 9  ;;  %v1204_v55 = vrot.slane %v1202_v33, 4  ;;  %v1027_v43 = vadd.f32 %v1026_v46, %v4023_v19 }
 0x14a   : > { %4808 = vst [vmem:[#allocation41_spill] sm:$0xff] %v4269_v47  ;;  %v1205_v47 = vrot.slane %v4812_v6, 5  ;;  %v1654_v19 = vor.u32 %v1653_v1, %v1650_v38  ;;  %v1664_v46 = vor.u32 %v1663_v56, %v1659_v41 }
 0x14b   : > { %v1775_v44 = vpop.f32.mrf.mxu0  ;;  %1065 = vmatmul.bf16.gmra.mxu1 %v4249_v3  ;;  %v1203_v27 = vsel %vm3845_vm5, %v3018_v2, %v1202_v33  ;;  %v1669_v33 = vrot.slane %v1667_v13, 5 }
 0x14c   : > { %v1253_v10 = vunpack.c.l.b16 %v1203_v27  ;;  %v4310_v27 = vld [vmem:[%s3457_s28 + $0xc0] sm:$0xff] }
 0x14d   : > { %v1562_v45 = vpop.f32.mrf.mxu3  ;;  %1413 = vmatmul.bf16.gmra.mxu2 %v4271_v37 }
 0x14e   : > { %v1626_v42 = vadd.f32 %v1562_v45, %v1435_v61  ;;  %v1206_v45 = vsel %vm3845_vm5, %v1204_v55, %v1205_v47 }
 0x14f   : > { %v1254_v6 = vunpack.c.l.b16 %v1206_v45 }
 0x150   : > { %v1374_v16 = vpop.f32.mrf.mxu2  ;;  %v4289_v3 = vadd.f32 %v1775_v44, %v1626_v42  ;;  %v1028_v61 = vpop.f32.mrf.mxu1  ;;  %v1665_v42 = vrot.slane %v1664_v46, 4 }
 0x151   : > { %v1436_v37 = vadd.f32 %v1374_v16, %v1027_v43  ;;  %v1029_v43 = vadd.f32 %v1028_v61, %v4042_v32  ;;  %v1655_v16 = vrot.slane %v1654_v19, 4  ;;  %v4301_v1 = vpack.c.b16 %v1254_v6, %v1253_v10 }
 0x152   : > { %1604 = vmatmul.bf16.gmra.mxu3 %v4281_v20 }
 0x153   : > { %v1778_v28 = vpop.f32.mrf.mxu0  ;;  %v1660_v55 = vsel %vm3472_vm2, %v1655_v16, %v1659_v41 }
 0x154   : > { %v1687_v45 = vunpack.c.l.b16 %v1660_v55 }
 0x155   : > { %v1565_v24 = vpop.f32.mrf.mxu3 }
 0x156   : > { %1817 = vmatmul.bf16.gmra.mxu0 %v3855_v48  ;;  %v1627_v44 = vadd.f32 %v1565_v24, %v1436_v37  ;;  %v1670_v37 = vsel %vm3472_vm2, %v1665_v42, %v1669_v33 }
 0x158   : > { %v1376_v2 = vpop.f32.mrf.mxu2  ;;  %v4299_v0 = vadd.f32 %v1778_v28, %v1627_v44  ;;  %v1031_v56 = vpop.f32.mrf.mxu1  ;;  %v1688_v28 = vunpack.c.l.b16 %v1670_v37 }
 0x159   : > { %v1437_v47 = vadd.f32 %v1376_v2, %v1029_v43  ;;  %v1032_v19 = vadd.f32 %v1031_v56, %v4064_v18 }
 0x15a   : > { %v4316_v41 = vpack.c.b16 %v1688_v28, %v1687_v45 }
 0x15b   : > { %v1780_v38 = vpop.f32.mrf.mxu0  ;;  %1070 = vmatmul.bf16.gmra.mxu1 %v4281_v20 }
 0x15d   : > { %v1567_v32 = vpop.f32.mrf.mxu3  ;;  %1418 = vmatmul.bf16.gmra.mxu2 %v4301_v1 }
 0x15e   : > { %v1628_v61 = vadd.f32 %v1567_v32, %v1437_v47 }
 0x160   : > { %v1379_v46 = vpop.f32.mrf.mxu2  ;;  %v4313_v13 = vadd.f32 %v1780_v38, %v1628_v61  ;;  %v1033_v10 = vpop.f32.mrf.mxu1 }
 0x161   : > { %v1438_v24 = vadd.f32 %v1379_v46, %v1032_v19  ;;  %v1034_v16 = vadd.f32 %v1033_v10, %v4082_v5 }
 0x162   : > { %1609 = vmatmul.bf16.gmra.mxu3 %v4310_v27 }
 0x163   : > { %v1783_v6 = vpop.f32.mrf.mxu0 }
 0x165   : > { %v1570_v44 = vpop.f32.mrf.mxu3 }
 0x166   : > { %1822 = vmatmul.bf16.gmra.mxu0 %v4316_v41  ;;  %v1629_v43 = vadd.f32 %v1570_v44, %v1438_v24 }
 0x168   : > { %v1381_v42 = vpop.f32.mrf.mxu2  ;;  %v4320_v33 = vadd.f32 %v1783_v6, %v1629_v43  ;;  %v1036_v2 = vpop.f32.mrf.mxu1 }
 0x169   : > { %v1439_v18 = vadd.f32 %v1381_v42, %v1034_v16  ;;  %v1037_v55 = vadd.f32 %v1036_v2, %v3961_v34 }
 0x16b   : > { %v1785_v47 = vpop.f32.mrf.mxu0  ;;  %1944 = vmatmul.bf16.vlgmr.msra.gmra.mxu1 %v3873_v63 }
 0x16d   : > { %v1572_v56 = vpop.f32.mrf.mxu3  ;;  %2135 = vmatmul.bf16.vlgmr.msra.gmra.mxu2 %v3893_v7 }
 0x16e   : > { %v1630_v38 = vadd.f32 %v1572_v56, %v1439_v18 }
 0x170   : > { %v1384_v37 = vpop.f32.mrf.mxu2  ;;  %v4325_v32 = vadd.f32 %v1785_v47, %v1630_v38  ;;  %v1038_v5 = vpop.f32.mrf.mxu1 }
 0x171   : > { %v1440_v61 = vadd.f32 %v1384_v37, %v1037_v55  ;;  %v1039_v63 = vadd.f32 %v1038_v5, %v3984_v57 }
 0x172   : > { %2348 = vmatmul.bf16.vlgmr.msra.gmra.mxu3 %v3791_v40 }
 0x173   : > { %v1788_v45 = vpop.f32.mrf.mxu0 }
 0x175   : > { %v1575_v28 = vpop.f32.mrf.mxu3 }
 0x176   : > { %2545 = vmatmul.bf16.vlgmr.msra.gmra.mxu0 %v3903_v62  ;;  %v1631_v19 = vadd.f32 %v1575_v28, %v1440_v61 }
 0x178   : > { %v1386_v46 = vpop.f32.mrf.mxu2  ;;  %v4330_v24 = vadd.f32 %v1788_v45, %v1631_v19  ;;  %v1041_v10 = vpop.f32.mrf.mxu1 }
 0x179   : > { %v1441_v7 = vadd.f32 %v1386_v46, %v1039_v63  ;;  %v1042_v44 = vadd.f32 %v1041_v10, %v4005_v52 }
 0x17b   : > { %v1790_v34 = vpop.f32.mrf.mxu0  ;;  %1949 = vmatmul.bf16.gmra.mxu1 %v3903_v62 }
 0x17d   : > { %v1577_v6 = vpop.f32.mrf.mxu3  ;;  %2140 = vmatmul.bf16.gmra.mxu2 %v3909_v31 }
 0x17e   : > { %v1632_v40 = vadd.f32 %v1577_v6, %v1441_v7 }
 0x180   : > { %v1389_v43 = vpop.f32.mrf.mxu2  ;;  %v4335_v16 = vadd.f32 %v1790_v34, %v1632_v40  ;;  %v1043_v57 = vpop.f32.mrf.mxu1  ;;  %v4813_v40 = vld [vmem:[#allocation24_spill] sm:$0xff] }
 0x181   : > { %v1442_v42 = vadd.f32 %v1389_v43, %v1042_v44  ;;  %v1044_v62 = vadd.f32 %v1043_v57, %v4019_v8 }
 0x182   : > { %2353 = vmatmul.bf16.gmra.mxu3 %v3868_v50 }
 0x183   : > { %v1793_v18 = vpop.f32.mrf.mxu0 }
 0x185   : > { %v1580_v2 = vpop.f32.mrf.mxu3 }
 0x186   : > { %2550 = vmatmul.bf16.gmra.mxu0 %v3931_v51  ;;  %v1633_v47 = vadd.f32 %v1580_v2, %v1442_v42 }
 0x188   : > { %v1391_v56 = vpop.f32.mrf.mxu2  ;;  %v4340_v38 = vadd.f32 %v1793_v18, %v1633_v47  ;;  %v1046_v55 = vpop.f32.mrf.mxu1  ;;  %v4814_v18 = vld [vmem:[#allocation3_spill] sm:$0xff] }
 0x189   : > { %v1443_v31 = vadd.f32 %v1391_v56, %v1044_v62  ;;  %v1047_v61 = vadd.f32 %v1046_v55, %v4035_v35  ;;  %v4815_v62 = vld [vmem:[#allocation14_spill] sm:$0xff] }
 0x18b   : > { %v1795_v52 = vpop.f32.mrf.mxu0  ;;  %1954 = vmatmul.bf16.gmra.mxu1 %v3931_v51 }
 0x18d   : > { %v1582_v37 = vpop.f32.mrf.mxu3  ;;  %2145 = vmatmul.bf16.gmra.mxu2 %v3937_v9 }
 0x18e   : > { %v1634_v50 = vadd.f32 %v1582_v37, %v1443_v31  ;;  %v4816_v31 = vld [vmem:[#allocation26_spill] sm:$0xff] }
 0x190   : > { %v1394_v5 = vpop.f32.mrf.mxu2  ;;  %v4345_v45 = vadd.f32 %v1795_v52, %v1634_v50  ;;  %v1048_v8 = vpop.f32.mrf.mxu1 }
 0x191   : > { %v1444_v28 = vadd.f32 %v1394_v5, %v1047_v61  ;;  %v1049_v51 = vadd.f32 %v1048_v8, %v4058_v53  ;;  %v4817_v5 = vld [vmem:[#allocation15_spill] sm:$0xff]  ;;  %v4818_v8 = vld [vmem:[#allocation12_spill] sm:$0xff] }
 0x192   : > { %2358 = vmatmul.bf16.gmra.mxu3 %v3490_v59 }
 0x193   : > { %v1798_v19 = vpop.f32.mrf.mxu0 }
 0x195   : > { %v1585_v63 = vpop.f32.mrf.mxu3 }
 0x196   : > { %2555 = vmatmul.bf16.gmra.mxu0 %v3949_v49  ;;  %v1635_v46 = vadd.f32 %v1585_v63, %v1444_v28 }
 0x198   : > { %v1396_v7 = vpop.f32.mrf.mxu2  ;;  %v4350_v10 = vadd.f32 %v1798_v19, %v1635_v46  ;;  %v1051_v34 = vpop.f32.mrf.mxu1 }
 0x199   : > { %v1445_v9 = vadd.f32 %v1396_v7, %v1049_v51  ;;  %v1052_v44 = vadd.f32 %v1051_v34, %v4813_v40  ;;  %v4819_v7 = vld [vmem:[#allocation5_spill] sm:$0xff] }
 0x19a   : > { %v4821_v40 = vld [vmem:[#allocation13_spill] sm:$0xff] }
 0x19b   : > { %v1800_v35 = vpop.f32.mrf.mxu0  ;;  %1959 = vmatmul.bf16.gmra.mxu1 %v3949_v49 }
 0x19d   : > { %v1587_v6 = vpop.f32.mrf.mxu3  ;;  %2150 = vmatmul.bf16.gmra.mxu2 %v3957_v4 }
 0x19e   : > { %v1636_v59 = vadd.f32 %v1587_v6, %v1445_v9  ;;  %v4820_v6 = vld [vmem:[#allocation18_spill] sm:$0xff] }
 0x1a0   : > { %v1399_v43 = vpop.f32.mrf.mxu2  ;;  %v4355_v42 = vadd.f32 %v1800_v35, %v1636_v59  ;;  %v1053_v53 = vpop.f32.mrf.mxu1 }
 0x1a1   : > { %v1446_v57 = vadd.f32 %v1399_v43, %v1052_v44  ;;  %v1054_v49 = vadd.f32 %v1053_v53, %v4816_v31  ;;  %v4823_v31 = vld [vmem:[#allocation16_spill] sm:$0xff] }
 0x1a2   : > { %2363 = vmatmul.bf16.gmra.mxu3 %v4814_v18 }
 0x1a3   : > { %v1803_v2 = vpop.f32.mrf.mxu0 }
 0x1a5   : > { %v1590_v47 = vpop.f32.mrf.mxu3 }
 0x1a6   : > { %2560 = vmatmul.bf16.gmra.mxu0 %v4815_v62  ;;  %v1637_v56 = vadd.f32 %v1590_v47, %v1446_v57 }
 0x1a8   : > { %v1401_v55 = vpop.f32.mrf.mxu2  ;;  %v4360_v52 = vadd.f32 %v1803_v2, %v1637_v56  ;;  %v1056_v37 = vpop.f32.mrf.mxu1 }
 0x1a9   : > { %v1447_v4 = vadd.f32 %v1401_v55, %v1054_v49  ;;  %v1057_v19 = vadd.f32 %v1056_v37, %v4818_v8  ;;  %v4825_v8 = vld [vmem:[#allocation21_spill] sm:$0xff] }
 0x1ab   : > { %v1805_v50 = vpop.f32.mrf.mxu0  ;;  %1964 = vmatmul.bf16.gmra.mxu1 %v4815_v62  ;;  %v4822_v62 = vld [vmem:[#allocation19_spill] sm:$0xff] }
 0x1ad   : > { %v1592_v61 = vpop.f32.mrf.mxu3  ;;  %2155 = vmatmul.bf16.gmra.mxu2 %v4817_v5 }
 0x1ae   : > { %v1638_v28 = vadd.f32 %v1592_v61, %v1447_v4 }
 0x1b0   : > { %v1404_v63 = vpop.f32.mrf.mxu2  ;;  %v4365_v46 = vadd.f32 %v1805_v50, %v1638_v28  ;;  %v1058_v9 = vpop.f32.mrf.mxu1  ;;  %v4824_v50 = vld [vmem:[#allocation10_spill] sm:$0xff] }
 0x1b1   : > { %v1448_v51 = vadd.f32 %v1404_v63, %v1057_v19  ;;  %v1059_v44 = vadd.f32 %v1058_v9, %v4821_v40  ;;  %v4826_v63 = vld [vmem:[#allocation17_spill] sm:$0xff]  ;;  %v4827_v40 = vld [vmem:[#allocation23_spill] sm:$0xff] }
 0x1b2   : > { %2368 = vmatmul.bf16.gmra.mxu3 %v4819_v7 }
 0x1b3   : > { %v1808_v34 = vpop.f32.mrf.mxu0 }
 0x1b5   : > { %v1595_v35 = vpop.f32.mrf.mxu3 }
 0x1b6   : > { %2565 = vmatmul.bf16.gmra.mxu0 %v4820_v6  ;;  %v1639_v59 = vadd.f32 %v1595_v35, %v1448_v51 }
 0x1b8   : > { %v1406_v43 = vpop.f32.mrf.mxu2  ;;  %v4370_v57 = vadd.f32 %v1808_v34, %v1639_v59  ;;  %v1061_v53 = vpop.f32.mrf.mxu1 }
 0x1b9   : > { %v1449_v18 = vadd.f32 %v1406_v43, %v1059_v44  ;;  %v1062_v49 = vadd.f32 %v1061_v53, %v4823_v31  ;;  %v4828_v43 = vld [vmem:[#allocation20_spill] sm:$0xff] }
 0x1bb   : > { %v1810_v2 = vpop.f32.mrf.mxu0  ;;  %1969 = vmatmul.bf16.gmra.mxu1 %v4820_v6 }
 0x1bd   : > { %v1597_v47 = vpop.f32.mrf.mxu3  ;;  %2160 = vmatmul.bf16.gmra.mxu2 %v4822_v62  ;;  %v4829_v62 = vld [vmem:[#allocation2_spill] sm:$0xff] }
 0x1be   : > { %v1640_v56 = vadd.f32 %v1597_v47, %v1449_v18 }
 0x1c0   : > { %v1409_v55 = vpop.f32.mrf.mxu2  ;;  %v4375_v4 = vadd.f32 %v1810_v2, %v1640_v56  ;;  %v1063_v61 = vpop.f32.mrf.mxu1 }
 0x1c1   : > { %v1450_v37 = vadd.f32 %v1409_v55, %v1062_v49  ;;  %v1064_v51 = vadd.f32 %v1063_v61, %v4826_v63  ;;  %v4830_v55 = vld [vmem:[#allocation27_spill] sm:$0xff] }
 0x1c2   : > { %2373 = vmatmul.bf16.gmra.mxu3 %v4824_v50  ;;  %v4831_v50 = vld [vmem:[#allocation22_spill] sm:$0xff] }
 0x1c3   : > { %v1813_v5 = vpop.f32.mrf.mxu0 }
 0x1c5   : > { %v1600_v28 = vpop.f32.mrf.mxu3 }
 0x1c6   : > { %2570 = vmatmul.bf16.gmra.mxu0 %v4825_v8  ;;  %v1641_v19 = vadd.f32 %v1600_v28, %v1450_v37 }
 0x1c8   : > { %v1411_v7 = vpop.f32.mrf.mxu2  ;;  %v4380_v9 = vadd.f32 %v1813_v5, %v1641_v19  ;;  %v1066_v35 = vpop.f32.mrf.mxu1 }
 0x1c9   : > { %v1451_v34 = vadd.f32 %v1411_v7, %v1064_v51  ;;  %v1067_v18 = vadd.f32 %v1066_v35, %v4828_v43 }
 0x1cb   : > { %v1815_v6 = vpop.f32.mrf.mxu0  ;;  %1974 = vmatmul.bf16.gmra.mxu1 %v4825_v8 }
 0x1cd   : > { %v1602_v59 = vpop.f32.mrf.mxu3  ;;  %2165 = vmatmul.bf16.gmra.mxu2 %v4827_v40 }
 0x1ce   : > { %v1642_v44 = vadd.f32 %v1602_v59, %v1451_v34  ;;  %v4832_v34 = vld [vmem:[#allocation25_spill] sm:$0xff] }
 0x1d0   : > { %v1414_v53 = vpop.f32.mrf.mxu2  ;;  %v4385_v2 = vadd.f32 %v1815_v6, %v1642_v44  ;;  %v1068_v56 = vpop.f32.mrf.mxu1 }
 0x1d1   : > { %v1452_v47 = vadd.f32 %v1414_v53, %v1067_v18  ;;  %v1069_v61 = vadd.f32 %v1068_v56, %v4831_v50 }
 0x1d2   : > { %2378 = vmatmul.bf16.gmra.mxu3 %v4829_v62 }
 0x1d3   : > { %v1818_v31 = vpop.f32.mrf.mxu0 }
 0x1d5   : > { %v1605_v49 = vpop.f32.mrf.mxu3 }
 0x1d6   : > { %2575 = vmatmul.bf16.gmra.mxu0 %v4830_v55  ;;  %v1643_v37 = vadd.f32 %v1605_v49, %v1452_v47  ;;  %v4833_v47 = vld [vmem:[#allocation28_spill] sm:$0xff] }
 0x1d8   : > { %v1416_v5 = vpop.f32.mrf.mxu2  ;;  %v4390_v28 = vadd.f32 %v1818_v31, %v1643_v37  ;;  %v1071_v19 = vpop.f32.mrf.mxu1 }
 0x1d9   : > { %v1453_v8 = vadd.f32 %v1416_v5, %v1069_v61  ;;  %v1072_v35 = vadd.f32 %v1071_v19, %v4832_v34 }
 0x1db   : > { %v1820_v63 = vpop.f32.mrf.mxu0  ;;  %1979 = vmatmul.bf16.gmra.mxu1 %v4830_v55 }
 0x1dd   : > { %v1607_v51 = vpop.f32.mrf.mxu3  ;;  %2170 = vmatmul.bf16.gmra.mxu2 %v4106_v14 }
 0x1de   : > { %v1644_v7 = vadd.f32 %v1607_v51, %v1453_v8  ;;  %v4834_v51 = vld [vmem:[#allocation29_spill] sm:$0xff] }
 0x1e0   : > { %v1419_v6 = vpop.f32.mrf.mxu2  ;;  %v4395_v59 = vadd.f32 %v1820_v63, %v1644_v7  ;;  %v1073_v44 = vpop.f32.mrf.mxu1 }
 0x1e1   : > { %v1454_v40 = vadd.f32 %v1419_v6, %v1072_v35  ;;  %v1074_v62 = vadd.f32 %v1073_v44, %v4833_v47 }
 0x1e2   : > { %2383 = vmatmul.bf16.gmra.mxu3 %v3624_v12 }
 0x1e3   : > { %v1823_v43 = vpop.f32.mrf.mxu0 }
 0x1e5   : > { %v1610_v18 = vpop.f32.mrf.mxu3 }
 0x1e6   : > { %2580 = vmatmul.bf16.gmra.mxu0 %v4128_v60  ;;  %v1645_v53 = vadd.f32 %v1610_v18, %v1454_v40 }
 0x1e8   : > { %v1421_v56 = vpop.f32.mrf.mxu2  ;;  %v4400_v31 = vadd.f32 %v1823_v43, %v1645_v53  ;;  %v1945_v49 = vpop.f32.mrf.mxu1 }
 0x1e9   : > { %v1455_v14 = vadd.f32 %v1421_v56, %v1074_v62  ;;  %v2025_v37 = vadd.f32 %v1945_v49, %v4126_v15 }
 0x1eb   : > { %v1825_v55 = vpop.f32.mrf.mxu0  ;;  %1984 = vmatmul.bf16.gmra.mxu1 %v4128_v60 }
 0x1ed   : > { %v1612_v50 = vpop.f32.mrf.mxu3  ;;  %2175 = vmatmul.bf16.gmra.mxu2 %v4138_v29 }
 0x1ee   : > { %v1646_v12 = vadd.f32 %v1612_v50, %v1455_v14 }
 0x1f0   : > { %v2136_v61 = vpop.f32.mrf.mxu2  ;;  %v4405_v5 = vadd.f32 %v1825_v55, %v1646_v12  ;;  %v1947_v19 = vpop.f32.mrf.mxu1 }
 0x1f1   : > { %v2216_v8 = vadd.f32 %v2136_v61, %v2025_v37  ;;  %v2026_v7 = vadd.f32 %v1947_v19, %v4834_v51 }
 0x1f2   : > { %2388 = vmatmul.bf16.gmra.mxu3 %v3733_v26 }
 0x1f3   : > { %v2546_v63 = vpop.f32.mrf.mxu0 }
 0x1f5   : > { %v2349_v34 = vpop.f32.mrf.mxu3 }
 0x1f6   : > { %2585 = vmatmul.bf16.gmra.mxu0 %v4153_v11  ;;  %v2429_v15 = vadd.f32 %v2349_v34, %v2216_v8 }
 0x1f8   : > { %v4410_v35 = vadd.f32 %v2546_v63, %v2429_v15  ;;  %v2138_v60 = vpop.f32.mrf.mxu2  ;;  %v1950_v29 = vpop.f32.mrf.mxu1 }
 0x1f9   : > { %v2217_v6 = vadd.f32 %v2138_v60, %v2026_v7  ;;  %v2027_v44 = vadd.f32 %v1950_v29, %v4151_v54  ;;  %v4835_v7 = vld [vmem:[#allocation30_spill] sm:$0xff]  ;;  %v4836_v60 = vld [vmem:[#allocation32_spill] sm:$0xff] }
 0x1fb   : > { %v2548_v40 = vpop.f32.mrf.mxu0  ;;  %1989 = vmatmul.bf16.gmra.mxu1 %v4153_v11 }
 0x1fd   : > { %v2351_v43 = vpop.f32.mrf.mxu3  ;;  %2180 = vmatmul.bf16.gmra.mxu2 %v4160_v22 }
 0x1fe   : > { %v2430_v26 = vadd.f32 %v2351_v43, %v2217_v6 }
 0x200   : > { %v4415_v18 = vadd.f32 %v2548_v40, %v2430_v26  ;;  %v2141_v53 = vpop.f32.mrf.mxu2  ;;  %v1952_v62 = vpop.f32.mrf.mxu1 }
 0x201   : > { %v2218_v47 = vadd.f32 %v2141_v53, %v2027_v44  ;;  %v2028_v14 = vadd.f32 %v1952_v62, %v4164_v21  ;;  %v4837_v44 = vld [vmem:[#allocation31_spill] sm:$0xff] }
 0x202   : > { %2393 = vmatmul.bf16.gmra.mxu3 %v3837_v58 }
 0x203   : > { %v2551_v56 = vpop.f32.mrf.mxu0 }
 0x205   : > { %v2354_v49 = vpop.f32.mrf.mxu3 }
 0x206   : > { %2590 = vmatmul.bf16.gmra.mxu0 %v4184_v23  ;;  %v2431_v54 = vadd.f32 %v2354_v49, %v2218_v47 }
 0x208   : > { %v4420_v55 = vadd.f32 %v2551_v56, %v2431_v54  ;;  %v2143_v11 = vpop.f32.mrf.mxu2  ;;  %v1955_v22 = vpop.f32.mrf.mxu1 }
 0x209   : > { %v2219_v37 = vadd.f32 %v2143_v11, %v2028_v14  ;;  %v2029_v12 = vadd.f32 %v1955_v22, %v4182_v17  ;;  %v4839_v14 = vld [vmem:[#allocation4_spill] sm:$0xff]  ;;  %v4840_v11 = vld [vmem:[#allocation34_spill] sm:$0xff] }
 0x20b   : > { %v2553_v50 = vpop.f32.mrf.mxu0  ;;  %1994 = vmatmul.bf16.gmra.mxu1 %v4184_v23 }
 0x20d   : > { %v2356_v61 = vpop.f32.mrf.mxu3  ;;  %2185 = vmatmul.bf16.gmra.mxu2 %v4194_v39 }
 0x20e   : > { %v2432_v58 = vadd.f32 %v2356_v61, %v2219_v37 }
 0x210   : > { %v4425_v8 = vadd.f32 %v2553_v50, %v2432_v58  ;;  %v2146_v21 = vpop.f32.mrf.mxu2  ;;  %v1957_v63 = vpop.f32.mrf.mxu1  ;;  %v4841_v50 = vld [vmem:[#allocation36_spill] sm:$0xff] }
 0x211   : > { %v2220_v19 = vadd.f32 %v2146_v21, %v2029_v12  ;;  %v2030_v34 = vadd.f32 %v1957_v63, %v4835_v7 }
 0x212   : > { %2398 = vmatmul.bf16.gmra.mxu3 %v3533_v36  ;;  %v4838_v36 = vld [vmem:[#allocation33_spill] sm:$0xff] }
 0x213   : > { %v2556_v51 = vpop.f32.mrf.mxu0 }
 0x215   : > { %v2359_v15 = vpop.f32.mrf.mxu3 }
 0x216   : > { %2595 = vmatmul.bf16.gmra.mxu0 %v4836_v60  ;;  %v2433_v17 = vadd.f32 %v2359_v15, %v2220_v19  ;;  %v4843_v15 = vld [vmem:[#allocation37_spill] sm:$0xff] }
 0x218   : > { %v4430_v6 = vadd.f32 %v2556_v51, %v2433_v17  ;;  %v2148_v23 = vpop.f32.mrf.mxu2  ;;  %v1960_v39 = vpop.f32.mrf.mxu1  ;;  %v4842_v51 = vld [vmem:[#allocation35_spill] sm:$0xff] }
 0x219   : > { %v2221_v29 = vadd.f32 %v2148_v23, %v2030_v34  ;;  %v2031_v43 = vadd.f32 %v1960_v39, %v4837_v44  ;;  %v4844_v39 = vld [vmem:[#allocation6_spill] sm:$0xff] }
 0x21b   : > { %v2558_v40 = vpop.f32.mrf.mxu0  ;;  %1999 = vmatmul.bf16.gmra.mxu1 %v4836_v60 }
 0x21d   : > { %v2361_v26 = vpop.f32.mrf.mxu3  ;;  %2190 = vmatmul.bf16.gmra.mxu2 %v4838_v36 }
 0x21e   : > { %v2434_v53 = vadd.f32 %v2361_v26, %v2221_v29 }
 0x220   : > { %v4435_v47 = vadd.f32 %v2558_v40, %v2434_v53  ;;  %v2151_v62 = vpop.f32.mrf.mxu2  ;;  %v1962_v49 = vpop.f32.mrf.mxu1  ;;  %v4846_v53 = vld [vmem:[#allocation42_spill] sm:$0xff] }
 0x221   : > { %v2222_v56 = vadd.f32 %v2151_v62, %v2031_v43  ;;  %v2032_v37 = vadd.f32 %v1962_v49, %v4840_v11  ;;  %v4845_v43 = vld [vmem:[#allocation38_spill] sm:$0xff] }
 0x222   : > { %2403 = vmatmul.bf16.gmra.mxu3 %v4839_v14 }
 0x223   : > { %v2561_v54 = vpop.f32.mrf.mxu0 }
 0x225   : > { %v2364_v22 = vpop.f32.mrf.mxu3 }
 0x226   : > { %2600 = vmatmul.bf16.gmra.mxu0 %v4841_v50  ;;  %v2435_v12 = vadd.f32 %v2364_v22, %v2222_v56 }
 0x228   : > { %v4440_v61 = vadd.f32 %v2561_v54, %v2435_v12  ;;  %v2153_v58 = vpop.f32.mrf.mxu2  ;;  %v1965_v19 = vpop.f32.mrf.mxu1 }
 0x229   : > { %v2223_v21 = vadd.f32 %v2153_v58, %v2032_v37  ;;  %v2033_v7 = vadd.f32 %v1965_v19, %v4842_v51  ;;  %v4847_v37 = vld [vmem:[#allocation41_spill] sm:$0xff] }
 0x22b   : > { %v2563_v63 = vpop.f32.mrf.mxu0  ;;  %2004 = vmatmul.bf16.gmra.mxu1 %v4841_v50 }
 0x22d   : > { %v2366_v34 = vpop.f32.mrf.mxu3  ;;  %2195 = vmatmul.bf16.gmra.mxu2 %v4843_v15 }
 0x22e   : > { %v2436_v60 = vadd.f32 %v2366_v34, %v2223_v21  ;;  %v4848_v34 = vld [vmem:[#allocation40_spill] sm:$0xff] }
 0x22f   : > { %v1863_v15 = vrot.slane %v4848_v34, 5 }
 0x230   : > { %v4445_v17 = vadd.f32 %v2563_v63, %v2436_v60  ;;  %v2156_v23 = vpop.f32.mrf.mxu2  ;;  %v1967_v40 = vpop.f32.mrf.mxu1  ;;  %v4461_v60 = vld [vmem:[%s3457_s28 + $0xcc] sm:$0xf] }
 0x231   : > { %v2224_v29 = vadd.f32 %v2156_v23, %v2033_v7  ;;  %v2034_v26 = vadd.f32 %v1967_v40, %v4845_v43  ;;  %v4464_v23 = vld [vmem:[%s3457_s28 + $0xd0] sm:$0xf]  ;;  %v1865_v43 = vrot.slane %v1863_v15, 4 }
 0x232   : > { %2408 = vmatmul.bf16.gmra.mxu3 %v4844_v39  ;;  %v4849_v39 = vld [vmem:[#allocation39_spill] sm:$0xff] }
 0x233   : > { %v2566_v44 = vpop.f32.mrf.mxu0  ;;  %v3119_v40 = vrot.slane %v4849_v39, 9 }
 0x235   : > { %v2369_v36 = vpop.f32.mrf.mxu3 }
 0x236   : > { %2605 = vmatmul.bf16.gmra.mxu0 %v4846_v53  ;;  %v2437_v62 = vadd.f32 %v2369_v36, %v2224_v29  ;;  %v2262_v36 = vshrl.u32 %v4464_v23, 16 }
 0x238   : > { %v4450_v56 = vadd.f32 %v2566_v44, %v2437_v62  ;;  %v2158_v14 = vpop.f32.mrf.mxu2  ;;  %v1970_v54 = vpop.f32.mrf.mxu1  ;;  %v2249_v44 = vshrl.u32 %v4461_v60, 16 }
 0x239   : > { %v2225_v49 = vadd.f32 %v2158_v14, %v2034_v26  ;;  %v2035_v22 = vadd.f32 %v1970_v54, %v4847_v37  ;;  %v1866_v26 = vrot.slane %v4287_v25, 5 }
 0x23a   : > { %v2251_v37 = vrot.slane %v2249_v44, 4 }
 0x23b   : > { %v2568_v11 = vpop.f32.mrf.mxu0  ;;  %2009 = vmatmul.bf16.gmra.mxu1 %v4846_v53  ;;  %v1867_v25 = vsel %vm3845_vm5, %v1865_v43, %v1866_v26 }
 0x23d   : > { %v2371_v50 = vpop.f32.mrf.mxu3  ;;  %2200 = vmatmul.bf16.gmra.mxu2 %v4281_v20 }
 0x23e   : > { %v2438_v12 = vadd.f32 %v2371_v50, %v2225_v49 }
 0x240   : > { %v4455_v58 = vadd.f32 %v2568_v11, %v2438_v12  ;;  %v2161_v21 = vpop.f32.mrf.mxu2  ;;  %v1972_v63 = vpop.f32.mrf.mxu1  ;;  %v1864_v11 = vsel %vm3845_vm5, %v3119_v40, %v1863_v15 }
 0x241   : > { %v2226_v19 = vadd.f32 %v2161_v21, %v2035_v22  ;;  %v2036_v7 = vadd.f32 %v1972_v63, %v4289_v3  ;;  %v2258_v3 = vshll.u32 %v4464_v23, 16  ;;  %v222_v63 = vld [vmem:[%s3457_s28 + $0xd4] sm:$0x1]  ;;  %v1884_v34 = vunpack.c.l.b16 %v1864_v11 }
 0x242   : > { %2413 = vmatmul.bf16.gmra.mxu3 %v3855_v48  ;;  %v2252_v48 = vshll.u32 %v4461_v60, 16  ;;  %v2268_v39 = vshll.u32 %v222_v63, 16 }
 0x243   : > { %v2571_v51 = vpop.f32.mrf.mxu0  ;;  %v2260_v21 = vrot.slane %v2258_v3, 5 }
 0x244   : > { %v2254_v22 = vrot.slane %v2252_v48, 5 }
 0x245   : > { %v2374_v29 = vpop.f32.mrf.mxu3 }
 0x246   : > { %2610 = vmatmul.bf16.gmra.mxu0 %v4301_v1  ;;  %v2439_v20 = vadd.f32 %v2374_v29, %v2226_v19  ;;  %v2264_v19 = vrot.slane %v2262_v36, 4  ;;  %v1885_v29 = vunpack.c.l.b16 %v1867_v25  ;;  %v2255_v15 = vor.u32 %v2254_v22, %v2251_v37 }
 0x247   : > { %v2270_v36 = vrot.slane %v2268_v39, 5  ;;  %v3220_v37 = vrot.slane %v4461_v60, 9 }
 0x248   : > { %v4473_v53 = vadd.f32 %v2571_v51, %v2439_v20  ;;  %v2163_v62 = vpop.f32.mrf.mxu2  ;;  %v1975_v49 = vpop.f32.mrf.mxu1  ;;  %v2265_v20 = vor.u32 %v2264_v19, %v2260_v21  ;;  %v1886_v48 = vpack.c.b16 %v1885_v29, %v1884_v34  ;;  %v2256_v26 = vrot.slane %v2255_v15, 4  ;;  %v3274_v19 = vld [vmem:[%s3457_s28 + $0xcc] sm:$0xff] }
 0x249   : > { %v2227_v14 = vadd.f32 %v2163_v62, %v2036_v7  ;;  %v2037_v12 = vadd.f32 %v1975_v49, %v4299_v0  ;;  %v2464_v62 = vrot.slane %v4464_v23, 5 }
 0x24a   : > { %v2261_v11 = vsel %vm3472_vm2, %v2256_v26, %v2260_v21 }
 0x24b   : > { %v2573_v50 = vpop.f32.mrf.mxu0  ;;  %2014 = vmatmul.bf16.gmra.mxu1 %v4301_v1  ;;  %v2466_v22 = vrot.slane %v2464_v62, 4  ;;  %v2288_v23 = vunpack.c.l.b16 %v2261_v11  ;;  %v2465_v21 = vsel %vm3845_vm5, %v3220_v37, %v2464_v62 }
 0x24d   : > { %v2376_v51 = vpop.f32.mrf.mxu3  ;;  %2205 = vmatmul.bf16.gmra.mxu2 %v4310_v27  ;;  %v2266_v27 = vrot.slane %v2265_v20, 4  ;;  %v2485_v20 = vunpack.c.l.b16 %v2465_v21 }
 0x24e   : > { %v2440_v7 = vadd.f32 %v2376_v51, %v2227_v14 }
 0x250   : > { %v4483_v40 = vadd.f32 %v2573_v50, %v2440_v7  ;;  %v2166_v0 = vpop.f32.mrf.mxu2  ;;  %v1977_v43 = vpop.f32.mrf.mxu1  ;;  %v2467_v50 = vrot.slane %v222_v63, 5 }
 0x251   : > { %v2228_v44 = vadd.f32 %v2166_v0, %v2037_v12  ;;  %v2038_v3 = vadd.f32 %v1977_v43, %v4313_v13 }
 0x252   : > { %2418 = vmatmul.bf16.gmra.mxu3 %v4316_v41  ;;  %v2271_v41 = vsel %vm3472_vm2, %v2266_v27, %v2270_v36  ;;  %v2468_v30 = vsel %vm3845_vm5, %v2466_v22, %v2467_v50 }
 0x253   : > { %v2576_v1 = vpop.f32.mrf.mxu0  ;;  %v2289_v7 = vunpack.c.l.b16 %v2271_v41  ;;  %v2486_v39 = vunpack.c.l.b16 %v2468_v30 }
 0x255   : > { %v2379_v14 = vpop.f32.mrf.mxu3  ;;  %v2290_v15 = vpack.c.b16 %v2289_v7, %v2288_v23  ;;  %v2487_v26 = vpack.c.b16 %v2486_v39, %v2485_v20 }
 0x256   : > { %2615 = vmatmul.bf16.gmra.mxu0 %v1886_v48  ;;  %v2441_v49 = vadd.f32 %v2379_v14, %v2228_v44 }
 0x258   : > { %v4493_v12 = vadd.f32 %v2576_v1, %v2441_v49  ;;  %v2168_v13 = vpop.f32.mrf.mxu2  ;;  %v1980_v51 = vpop.f32.mrf.mxu1 }
 0x259   : > { %v2229_v25 = vadd.f32 %v2168_v13, %v2038_v3  ;;  %v2039_v29 = vadd.f32 %v1980_v51, %v4320_v33 }
 0x25b   : > { %v2578_v34 = vpop.f32.mrf.mxu0  ;;  %2019 = vmatmul.bf16.gmra.mxu1 %v1886_v48 }
 0x25d   : > { %v2381_v60 = vpop.f32.mrf.mxu3  ;;  %2210 = vmatmul.bf16.gmra.mxu2 %v3274_v19 }
 0x25e   : > { %v2442_v63 = vadd.f32 %v2381_v60, %v2229_v25 }
 0x260   : > { %v4501_v0 = vadd.f32 %v2578_v34, %v2442_v63  ;;  %v2171_v44 = vpop.f32.mrf.mxu2  ;;  %v1982_v33 = vpop.f32.mrf.mxu1 }
 0x261   : > { %v2230_v43 = vadd.f32 %v2171_v44, %v2039_v29  ;;  %v2040_v3 = vadd.f32 %v1982_v33, %v4325_v32 }
 0x262   : > { %2423 = vmatmul.bf16.gmra.mxu3 %v2290_v15 }
 0x263   : > { %v2581_v1 = vpop.f32.mrf.mxu0 }
 0x265   : > { %v2384_v27 = vpop.f32.mrf.mxu3 }
 0x266   : > { %2620 = vmatmul.bf16.gmra.mxu0 %v2487_v26  ;;  %v2443_v54 = vadd.f32 %v2384_v27, %v2230_v43 }
 0x268   : > { %v4504_v48 = vadd.f32 %v2581_v1, %v2443_v54  ;;  %v2173_v36 = vpop.f32.mrf.mxu2  ;;  %v1985_v14 = vpop.f32.mrf.mxu1 }
 0x269   : > { %v2231_v62 = vadd.f32 %v2173_v36, %v2040_v3  ;;  %v2041_v11 = vadd.f32 %v1985_v14, %v4330_v24 }
 0x26b   : > { %v2583_v49 = vpop.f32.mrf.mxu0 }
 0x26d   : > { %v2386_v41 = vpop.f32.mrf.mxu3 }
 0x26e   : > { %v2444_v37 = vadd.f32 %v2386_v41, %v2231_v62 }
 0x270   : > { %v4507_v22 = vadd.f32 %v2583_v49, %v2444_v37  ;;  %v2176_v50 = vpop.f32.mrf.mxu2  ;;  %v1987_v25 = vpop.f32.mrf.mxu1 }
 0x271   : > { %v2232_v13 = vadd.f32 %v2176_v50, %v2041_v11  ;;  %v2042_v32 = vadd.f32 %v1987_v25, %v4335_v16 }
 0x273   : > { %v2586_v19 = vpop.f32.mrf.mxu0 }
 0x275   : > { %v2389_v51 = vpop.f32.mrf.mxu3 }
 0x276   : > { %v2445_v23 = vadd.f32 %v2389_v51, %v2232_v13 }
 0x278   : > { %v4510_v7 = vadd.f32 %v2586_v19, %v2445_v23  ;;  %v2178_v34 = vpop.f32.mrf.mxu2  ;;  %v1990_v21 = vpop.f32.mrf.mxu1 }
 0x279   : > { %v2233_v29 = vadd.f32 %v2178_v34, %v2042_v32  ;;  %v2043_v24 = vadd.f32 %v1990_v21, %v4340_v38 }
 0x27b   : > { %v2588_v30 = vpop.f32.mrf.mxu0 }
 0x27d   : > { %v2391_v60 = vpop.f32.mrf.mxu3 }
 0x27e   : > { %v2446_v63 = vadd.f32 %v2391_v60, %v2233_v29 }
 0x280   : > { %v4513_v15 = vadd.f32 %v2588_v30, %v2446_v63  ;;  %v2181_v20 = vpop.f32.mrf.mxu2  ;;  %v1992_v44 = vpop.f32.mrf.mxu1 }
 0x281   : > { %v2234_v39 = vadd.f32 %v2181_v20, %v2043_v24  ;;  %v2044_v16 = vadd.f32 %v1992_v44, %v4345_v45 }
 0x283   : > { %v2591_v43 = vpop.f32.mrf.mxu0 }
 0x285   : > { %v2394_v26 = vpop.f32.mrf.mxu3 }
 0x286   : > { %v2447_v33 = vadd.f32 %v2394_v26, %v2234_v39 }
 0x288   : > { %v4516_v1 = vadd.f32 %v2591_v43, %v2447_v33  ;;  %v2183_v3 = vpop.f32.mrf.mxu2  ;;  %v1995_v54 = vpop.f32.mrf.mxu1 }
 0x289   : > { %v2235_v27 = vadd.f32 %v2183_v3, %v2044_v16  ;;  %v2045_v38 = vadd.f32 %v1995_v54, %v4350_v10 }
 0x28b   : > { %v2593_v36 = vpop.f32.mrf.mxu0 }
 0x28d   : > { %v2396_v62 = vpop.f32.mrf.mxu3 }
 0x28e   : > { %v2448_v14 = vadd.f32 %v2396_v62, %v2235_v27 }
 0x290   : > { %v4519_v49 = vadd.f32 %v2593_v36, %v2448_v14  ;;  %v2186_v11 = vpop.f32.mrf.mxu2  ;;  %v1997_v37 = vpop.f32.mrf.mxu1 }
 0x291   : > { %v2236_v41 = vadd.f32 %v2186_v11, %v2045_v38  ;;  %v2046_v45 = vadd.f32 %v1997_v37, %v4355_v42 }
 0x293   : > { %v2596_v50 = vpop.f32.mrf.mxu0 }
 0x295   : > { %v2399_v13 = vpop.f32.mrf.mxu3 }
 0x296   : > { %v2449_v25 = vadd.f32 %v2399_v13, %v2236_v41 }
 0x298   : > { %v4522_v19 = vadd.f32 %v2596_v50, %v2449_v25  ;;  %v2188_v32 = vpop.f32.mrf.mxu2  ;;  %v2000_v23 = vpop.f32.mrf.mxu1 }
 0x299   : > { %v2237_v51 = vadd.f32 %v2188_v32, %v2046_v45  ;;  %v2047_v10 = vadd.f32 %v2000_v23, %v4360_v52 }
 0x29b   : > { %v2598_v34 = vpop.f32.mrf.mxu0 }
 0x29d   : > { %v2401_v29 = vpop.f32.mrf.mxu3 }
 0x29e   : > { %v2450_v21 = vadd.f32 %v2401_v29, %v2237_v51 }
 0x2a0   : > { %v4525_v30 = vadd.f32 %v2598_v34, %v2450_v21  ;;  %v2191_v24 = vpop.f32.mrf.mxu2  ;;  %v2002_v63 = vpop.f32.mrf.mxu1 }
 0x2a1   : > { %v2238_v60 = vadd.f32 %v2191_v24, %v2047_v10  ;;  %v2048_v42 = vadd.f32 %v2002_v63, %v4365_v46 }
 0x2a3   : > { %v2601_v20 = vpop.f32.mrf.mxu0 }
 0x2a5   : > { %v2404_v39 = vpop.f32.mrf.mxu3 }
 0x2a6   : > { %v2451_v44 = vadd.f32 %v2404_v39, %v2238_v60 }
 0x2a8   : > { %v4528_v43 = vadd.f32 %v2601_v20, %v2451_v44  ;;  %v2193_v16 = vpop.f32.mrf.mxu2  ;;  %v2005_v33 = vpop.f32.mrf.mxu1 }
 0x2a9   : > { %v2239_v26 = vadd.f32 %v2193_v16, %v2048_v42  ;;  %v2049_v36 = vadd.f32 %v2005_v33, %v4370_v57 }
 0x2ab   : > { %v2603_v3 = vpop.f32.mrf.mxu0 }
 0x2ad   : > { %v2406_v27 = vpop.f32.mrf.mxu3 }
 0x2ae   : > { %v2452_v52 = vadd.f32 %v2406_v27, %v2239_v26 }
 0x2b0   : > { %v4530_v54 = vadd.f32 %v2603_v3, %v2452_v52  ;;  %v2196_v38 = vpop.f32.mrf.mxu2  ;;  %v2007_v14 = vpop.f32.mrf.mxu1 }
 0x2b1   : > { %v2240_v62 = vadd.f32 %v2196_v38, %v2049_v36  ;;  %v2050_v50 = vadd.f32 %v2007_v14, %v4375_v4 }
 0x2b3   : > { %v2606_v11 = vpop.f32.mrf.mxu0 }
 0x2b5   : > { %v2409_v41 = vpop.f32.mrf.mxu3 }
 0x2b6   : > { %v2453_v46 = vadd.f32 %v2409_v41, %v2240_v62 }
 0x2b8   : > { %v4533_v37 = vadd.f32 %v2606_v11, %v2453_v46  ;;  %v2198_v45 = vpop.f32.mrf.mxu2  ;;  %v2010_v25 = vpop.f32.mrf.mxu1 }
 0x2b9   : > { %v2241_v13 = vadd.f32 %v2198_v45, %v2050_v50  ;;  %v2051_v57 = vadd.f32 %v2010_v25, %v4380_v9 }
 0x2bb   : > { %v2608_v32 = vpop.f32.mrf.mxu0 }
 0x2bd   : > { %v2411_v51 = vpop.f32.mrf.mxu3 }
 0x2be   : > { %v2454_v23 = vadd.f32 %v2411_v51, %v2241_v13 }
 0x2c0   : > { %v4536_v34 = vadd.f32 %v2608_v32, %v2454_v23  ;;  %v2201_v10 = vpop.f32.mrf.mxu2  ;;  %v2012_v21 = vpop.f32.mrf.mxu1 }
 0x2c1   : > { %v2242_v29 = vadd.f32 %v2201_v10, %v2051_v57  ;;  %v2052_v4 = vadd.f32 %v2012_v21, %v4385_v2 }
 0x2c3   : > { %v2611_v24 = vpop.f32.mrf.mxu0 }
 0x2c5   : > { %v2414_v60 = vpop.f32.mrf.mxu3 }
 0x2c6   : > { %v2455_v63 = vadd.f32 %v2414_v60, %v2242_v29 }
 0x2c8   : > { %v4539_v20 = vadd.f32 %v2611_v24, %v2455_v63  ;;  %v2203_v42 = vpop.f32.mrf.mxu2  ;;  %v2015_v44 = vpop.f32.mrf.mxu1 }
 0x2c9   : > { %v2243_v39 = vadd.f32 %v2203_v42, %v2052_v4  ;;  %v2053_v9 = vadd.f32 %v2015_v44, %v4390_v28 }
 0x2cb   : > { %v2613_v16 = vpop.f32.mrf.mxu0 }
 0x2cd   : > { %v2416_v26 = vpop.f32.mrf.mxu3 }
 0x2ce   : > { %v2456_v33 = vadd.f32 %v2416_v26, %v2243_v39 }
 0x2d0   : > { %v4542_v3 = vadd.f32 %v2613_v16, %v2456_v33  ;;  %v2206_v27 = vpop.f32.mrf.mxu2  ;;  %v2017_v36 = vpop.f32.mrf.mxu1 }
 0x2d1   : > { %v2244_v52 = vadd.f32 %v2206_v27, %v2053_v9  ;;  %v2054_v2 = vadd.f32 %v2017_v36, %v4395_v59 }
 0x2d3   : > { %v2616_v38 = vpop.f32.mrf.mxu0 }
 0x2d5   : > { %v2419_v62 = vpop.f32.mrf.mxu3 }
 0x2d6   : > { %v2457_v14 = vadd.f32 %v2419_v62, %v2244_v52 }
 0x2d8   : > { %v4545_v11 = vadd.f32 %v2616_v38, %v2457_v14  ;;  %v2208_v41 = vpop.f32.mrf.mxu2  ;;  %v2020_v50 = vpop.f32.mrf.mxu1 }
 0x2d9   : > { %v2245_v46 = vadd.f32 %v2208_v41, %v2054_v2  ;;  %v2055_v28 = vadd.f32 %v2020_v50, %v4400_v31 }
 0x2db   : > { %v2618_v45 = vpop.f32.mrf.mxu0 }
 0x2dd   : > { %v2421_v13 = vpop.f32.mrf.mxu3 }
 0x2de   : > { %v2458_v25 = vadd.f32 %v2421_v13, %v2245_v46 }
 0x2e0   : > { %v4548_v32 = vadd.f32 %v2618_v45, %v2458_v25  ;;  %v2211_v51 = vpop.f32.mrf.mxu2  ;;  %v2022_v57 = vpop.f32.mrf.mxu1 }
 0x2e1   : > { %v2246_v23 = vadd.f32 %v2211_v51, %v2055_v28  ;;  %v2056_v59 = vadd.f32 %v2022_v57, %v4405_v5 }
 0x2e3   : > { %v2621_v10 = vpop.f32.mrf.mxu0 }
 0x2e5   : > { %v2424_v29 = vpop.f32.mrf.mxu3 }
 0x2e6   : > { %v2459_v21 = vadd.f32 %v2424_v29, %v2246_v23 }
 0x2e8   : > { %v4551_v24 = vadd.f32 %v2621_v10, %v2459_v21  ;;  %v2213_v60 = vpop.f32.mrf.mxu2 }
 0x2e9   : > { %v2247_v63 = vadd.f32 %v2213_v60, %v2056_v59 }
 0x2eb   : > { %v2623_v39 = vpop.f32.mrf.mxu0 }
 0x2ec   : > { %2661 = sbr.rel (%p3253_p4) target bundleno = 755 (0x2f3), region = 32 }
 0x2ed   : > { %v2426_v4 = vpop.f32.mrf.mxu3 }
 0x2ee   : > { %v2460_v42 = vadd.f32 %v2426_v4, %v2247_v63 }
 0x2f0   : > { %v4554_v44 = vadd.f32 %v2623_v39, %v2460_v42 }
 0x2f1   : > { %v3407_v31 = vmov 0.0  }
 0x2f2   : > { %2662 = vst [vmem:[%s4732_s3] sm:$0x3] %v3407_v31 }
 0x2f3 PF: > { %v2663_v5 = vadd.f32 %v4415_v18, %v4410_v35  ;;  %2774 = vst [vmem:[%s3449_s23] sm:$0xff] %v4410_v35  ;;  %v2700_v16 = vmul.f32 %v4410_v35, %v4410_v35  ;;  %v2701_v26 = vmul.f32 %v4415_v18, %v4415_v18  ;;  %v2702_v9 = vmul.f32 %v4420_v55, %v4420_v55 }
 0x2f4   : > { %2775 = vst [vmem:[%s3449_s23 + $0x8] sm:$0xff] %v4415_v18  ;;  %v2703_v35 = vmul.f32 %v4425_v8, %v4425_v8  ;;  %vm2770_vm6 = vcmask 1040384  }
 0x2f5   : > { %v2664_v33 = vadd.f32 %v2663_v5, %v4420_v55  ;;  %2776 = vst [vmem:[%s3449_s23 + $0x10] sm:$0xff] %v4420_v55  ;;  %v2732_v18 = vadd.f32 %v2701_v26, %v2700_v16  ;;  %v2704_v55 = vmul.f32 %v4430_v6, %v4430_v6  ;;  %v2717_v16 = vmul.f32 %v4513_v15, %v4513_v15 }
 0x2f6   : > { %2777 = vst [vmem:[%s3449_s23 + $0x18] sm:$0xff] %v4425_v8 }
 0x2f7   : > { %v2665_v27 = vadd.f32 %v2664_v33, %v4425_v8  ;;  %2778 = vst [vmem:[%s3449_s23 + $0x20] sm:$0xff] %v4430_v6  ;;  %v2733_v36 = vadd.f32 %v2732_v18, %v2702_v9  ;;  %v2705_v8 = vmul.f32 %v4435_v47, %v4435_v47  ;;  %v2718_v33 = vmul.f32 %v4516_v1, %v4516_v1 }
 0x2f8   : > { %2779 = vst [vmem:[%s3449_s23 + $0x28] sm:$0xff] %v4435_v47 }
 0x2f9   : > { %v2666_v52 = vadd.f32 %v2665_v27, %v4430_v6  ;;  %2780 = vst [vmem:[%s3449_s23 + $0x30] sm:$0xff] %v4440_v61  ;;  %v2734_v62 = vadd.f32 %v2733_v36, %v2703_v35  ;;  %v2706_v6 = vmul.f32 %v4440_v61, %v4440_v61  ;;  %v2721_v36 = vmul.f32 %v4525_v30, %v4525_v30 }
 0x2fa   : > { %2781 = vst [vmem:[%s3449_s23 + $0x38] sm:$0xff] %v4445_v17 }
 0x2fb   : > { %v2667_v38 = vadd.f32 %v2666_v52, %v4435_v47  ;;  %2782 = vst [vmem:[%s3449_s23 + $0x40] sm:$0xff] %v4450_v56  ;;  %v2735_v2 = vadd.f32 %v2734_v62, %v2704_v55  ;;  %v2707_v47 = vmul.f32 %v4445_v17, %v4445_v17  ;;  %v2720_v52 = vmul.f32 %v4522_v19, %v4522_v19 }
 0x2fc   : > { %2783 = vst [vmem:[%s3449_s23 + $0x48] sm:$0xff] %v4455_v58 }
 0x2fd   : > { %v2668_v14 = vadd.f32 %v2667_v38, %v4440_v61  ;;  %2784 = vst [vmem:[%s3449_s23 + $0x50] sm:$0xff] %v4473_v53  ;;  %v2736_v46 = vadd.f32 %v2735_v2, %v2705_v8  ;;  %v2708_v61 = vmul.f32 %v4450_v56, %v4450_v56  ;;  %v2722_v8 = vmul.f32 %v4528_v43, %v4528_v43 }
 0x2fe   : > { %2785 = vst [vmem:[%s3449_s23 + $0x58] sm:$0xff] %v4483_v40  ;;  %v2724_v2 = vmul.f32 %v4533_v37, %v4533_v37 }
 0x2ff   : > { %v2669_v41 = vadd.f32 %v2668_v14, %v4445_v17  ;;  %2786 = vst [vmem:[%s3449_s23 + $0x60] sm:$0xff] %v4493_v12  ;;  %v2737_v45 = vadd.f32 %v2736_v46, %v2706_v6  ;;  %v2709_v17 = vmul.f32 %v4455_v58, %v4455_v58  ;;  %v2723_v14 = vmul.f32 %v4530_v54, %v4530_v54 }
 0x300   : > { %2787 = vst [vmem:[%s3449_s23 + $0x68] sm:$0xff] %v4501_v0 }
 0x301   : > { %v2670_v50 = vadd.f32 %v2669_v41, %v4450_v56  ;;  %2788 = vst [vmem:[%s3449_s23 + $0x70] sm:$0xff] %v4504_v48  ;;  %v2738_v25 = vadd.f32 %v2737_v45, %v2707_v47  ;;  %v2710_v56 = vmul.f32 %v4473_v53, %v4473_v53  ;;  %v2725_v47 = vmul.f32 %v4536_v34, %v4536_v34 }
 0x302   : > { %2789 = vst [vmem:[%s3449_s23 + $0x78] sm:$0xff] %v4507_v22  ;;  %v2727_v45 = vmul.f32 %v4542_v3, %v4542_v3 }
 0x303   : > { %v2671_v13 = vadd.f32 %v2670_v50, %v4455_v58  ;;  %2790 = vst [vmem:[%s3449_s23 + $0x80] sm:$0xff] %v4510_v7  ;;  %v2739_v51 = vadd.f32 %v2738_v25, %v2708_v61  ;;  %v2711_v58 = vmul.f32 %v4483_v40, %v4483_v40  ;;  %v2726_v50 = vmul.f32 %v4539_v20, %v4539_v20 }
 0x304   : > { %2791 = vst [vmem:[%s3449_s23 + $0x88] sm:$0xff] %v4513_v15 }
 0x305   : > { %v2672_v28 = vadd.f32 %v2671_v13, %v4473_v53  ;;  %2792 = vst [vmem:[%s3449_s23 + $0x90] sm:$0xff] %v4516_v1  ;;  %v2740_v57 = vadd.f32 %v2739_v51, %v2709_v17  ;;  %v2712_v53 = vmul.f32 %v4493_v12, %v4493_v12  ;;  %v2728_v17 = vmul.f32 %v4545_v11, %v4545_v11 }
 0x306   : > { %2793 = vst [vmem:[%s3449_s23 + $0x98] sm:$0xff] %v4519_v49  ;;  %v2730_v51 = vmul.f32 %v4551_v24, %v4551_v24 }
 0x307   : > { %v2673_v23 = vadd.f32 %v2672_v28, %v4483_v40  ;;  %2794 = vst [vmem:[%s3449_s23 + $0xa0] sm:$0xff] %v4522_v19  ;;  %v2741_v29 = vadd.f32 %v2740_v57, %v2710_v56  ;;  %v2713_v40 = vmul.f32 %v4501_v0, %v4501_v0  ;;  %v2729_v28 = vmul.f32 %v4548_v32, %v4548_v32 }
 0x308   : > { %2795 = vst [vmem:[%s3449_s23 + $0xa8] sm:$0xff] %v4525_v30 }
 0x309   : > { %v2674_v10 = vadd.f32 %v2673_v23, %v4493_v12  ;;  %2796 = vst [vmem:[%s3449_s23 + $0xb0] sm:$0xff] %v4528_v43  ;;  %v2742_v59 = vadd.f32 %v2741_v29, %v2711_v58  ;;  %v2714_v12 = vmul.f32 %v4504_v48, %v4504_v48  ;;  %v2731_v58 = vmul.f32 %v4554_v44, %v4554_v44 }
 0x30a   : > { %2797 = vst [vmem:[%s3449_s23 + $0xb8] sm:$0xff] %v4530_v54 }
 0x30b   : > { %v2675_v21 = vadd.f32 %v2674_v10, %v4501_v0  ;;  %2798 = vst [vmem:[%s3449_s23 + $0xc0] sm:$0xff] %v4533_v37  ;;  %v2743_v63 = vadd.f32 %v2742_v59, %v2712_v53  ;;  %v2715_v0 = vmul.f32 %v4507_v22, %v4507_v22 }
 0x30c   : > { %2799 = vst [vmem:[%s3449_s23 + $0xc8] sm:$0xff] %v4536_v34 }
 0x30d   : > { %v2676_v60 = vadd.f32 %v2675_v21, %v4504_v48  ;;  %2800 = vst [vmem:[%s3449_s23 + $0xd0] sm:$0xff] %v4539_v20  ;;  %v2744_v42 = vadd.f32 %v2743_v63, %v2713_v40  ;;  %v2716_v48 = vmul.f32 %v4510_v7, %v4510_v7 }
 0x30e   : > { %2801 = vst [vmem:[%s3449_s23 + $0xd8] sm:$0xff] %v4542_v3 }
 0x30f   : > { %v2677_v4 = vadd.f32 %v2676_v60, %v4507_v22  ;;  %2802 = vst [vmem:[%s3449_s23 + $0xe0] sm:$0xff] %v4545_v11  ;;  %v2745_v31 = vadd.f32 %v2744_v42, %v2714_v12 }
 0x310   : > { %2803 = vst [vmem:[%s3449_s23 + $0xe8] sm:$0xff] %v4548_v32 }
 0x311   : > { %v2678_v39 = vadd.f32 %v2677_v4, %v4510_v7  ;;  %2804 = vst [vmem:[%s3449_s23 + $0xf0] sm:$0xff] %v4551_v24  ;;  %v2746_v26 = vadd.f32 %v2745_v31, %v2715_v0  ;;  %v2719_v7 = vmul.f32 %v4519_v49, %v4519_v49 }
 0x312   : > { %2805 = vst [vmem:[%s3449_s23 + $0xf8] sm:$0xff] %v4554_v44 }
 0x313   : > { %v2679_v5 = vadd.f32 %v2678_v39, %v4513_v15  ;;  %v2747_v9 = vadd.f32 %v2746_v26, %v2716_v48 }
 0x315   : > { %v2680_v22 = vadd.f32 %v2679_v5, %v4516_v1  ;;  %v2748_v35 = vadd.f32 %v2747_v9, %v2717_v16 }
 0x317   : > { %v2681_v27 = vadd.f32 %v2680_v22, %v4519_v49  ;;  %v2749_v55 = vadd.f32 %v2748_v35, %v2718_v33 }
 0x319   : > { %v2682_v18 = vadd.f32 %v2681_v27, %v4522_v19  ;;  %v2750_v38 = vadd.f32 %v2749_v55, %v2719_v7 }
 0x31b   : > { %v2683_v15 = vadd.f32 %v2682_v18, %v4525_v30  ;;  %v2751_v62 = vadd.f32 %v2750_v38, %v2720_v52 }
 0x31d   : > { %v2684_v1 = vadd.f32 %v2683_v15, %v4528_v43  ;;  %v2752_v6 = vadd.f32 %v2751_v62, %v2721_v36 }
 0x31f   : > { %v2685_v49 = vadd.f32 %v2684_v1, %v4530_v54  ;;  %v2753_v41 = vadd.f32 %v2752_v6, %v2722_v8 }
 0x321   : > { %v2686_v19 = vadd.f32 %v2685_v49, %v4533_v37  ;;  %v2754_v46 = vadd.f32 %v2753_v41, %v2723_v14 }
 0x323   : > { %v2687_v30 = vadd.f32 %v2686_v19, %v4536_v34  ;;  %v2755_v61 = vadd.f32 %v2754_v46, %v2724_v2 }
 0x325   : > { %v2688_v43 = vadd.f32 %v2687_v30, %v4539_v20  ;;  %v2756_v13 = vadd.f32 %v2755_v61, %v2725_v47 }
 0x327   : > { %v2689_v54 = vadd.f32 %v2688_v43, %v4542_v3  ;;  %v2757_v25 = vadd.f32 %v2756_v13, %v2726_v50 }
 0x329   : > { %v2690_v37 = vadd.f32 %v2689_v54, %v4545_v11  ;;  %v2758_v56 = vadd.f32 %v2757_v25, %v2727_v45 }
 0x32b   : > { %v2691_v34 = vadd.f32 %v2690_v37, %v4548_v32  ;;  %v2759_v23 = vadd.f32 %v2758_v56, %v2728_v17 }
 0x32d   : > { %v2692_v20 = vadd.f32 %v2691_v34, %v4551_v24  ;;  %v2760_v57 = vadd.f32 %v2759_v23, %v2729_v28 }
 0x32f   : > { %v2693_v3 = vadd.f32 %v2692_v20, %v4554_v44  ;;  %v2761_v10 = vadd.f32 %v2760_v57, %v2730_v51  ;;  %v2769_v44 = vld [vmem:[%s4732_s3] sm:$0x3] }
 0x331   : > { %v2694_v11 = vrot.slane %v2693_v3, 4  ;;  %v2762_v29 = vadd.f32 %v2761_v10, %v2731_v58 }
 0x333   : > { %v2695_v53 = vadd.f32 %v2694_v11, %v2693_v3  ;;  %v2763_v40 = vrot.slane %v2762_v29, 4 }
 0x335   : > { %v2696_v21 = vrot.slane %v2695_v53, 2  ;;  %v2764_v59 = vadd.f32 %v2763_v40, %v2762_v29 }
 0x337   : > { %v2697_v32 = vadd.f32 %v2696_v21, %v2695_v53  ;;  %v2765_v12 = vrot.slane %v2764_v59, 2 }
 0x339   : > { %v2698_v60 = vrot.slane %v2697_v32, 1  ;;  %v2766_v63 = vadd.f32 %v2765_v12, %v2764_v59 }
 0x33b   : > { %v2699_v4 = vadd.f32 %v2698_v60, %v2697_v32  ;;  %v2767_v24 = vrot.slane %v2766_v63, 1 }
 0x33d   : > { %v2768_v0 = vadd.f32 %v2767_v24, %v2766_v63 }
 0x33f   : > { %v2771_v42 = vsel %vm2770_vm6, %v2699_v4, %v2768_v0 }
 0x340   : > { %v2772_v39 = vadd.f32 %v2771_v42, %v2769_v44 }
 0x342   : > { %2773 = vst [vmem:[%s4732_s3] sm:$0x3] %v2772_v39 }
 0x343 PF: > { %s14_s12 = sadd.s32 1, %s3405_s12  }
 0x344   : > { %p11_p5 = scmp.ge.s32.totalorder %s14_s12, 4  }
 0x346   :  { %13 = sbr.rel (!%p11_p5) target bundleno = 1 (0x1), region = 70 }

</bundles_post_ra>
